<compile_context>
chip_gen: v7x
topology: tpu7x:2x2x1
jax: 0.10.0
libtpu: 0.0.40
codegen_flags: <defaults>
</compile_context>

<pallas_src>
import jax
import jax.numpy as jnp
from jax import lax
from jax.experimental import pallas as pl
from jax.experimental.pallas import tpu as pltpu

# --- static problem sizes (small, consistent with the module) ---------------
N, H, W = 2, 16, 16
HW = H * W                      # 256
NHW = N * HW                    # 512 lanes = 4 x 128 (lane-dense)
C_IN, C_MID, C_OUT = 5, 4, 3    # Conv2d(5->4), Conv2d(4->3)
CP = 8                          # channel padding: one full sublane tile
K1, P1 = 7, 3                   # layer1 conv/pool kernel & padding
K2, P2 = 3, 1                   # layer2 conv/pool kernel & padding
MAXOFF = max(P1, P2)            # 3 -> masks cover offsets -3..3
EPS = 1e-5


# ----------------------------- kernel helpers --------------------------------
def _roll_lanes(x, s):
    """x sampled at lane l + s (cyclic over the flat N*H*W lane axis)."""
    return pltpu.roll(x, (-s) % NHW, axis=1)          # XLU lane rotation


def _col_taps(x, p, cmask_ref):
    """List over dx in [-p, p] of x shifted along W, zeroed outside the row.

    Lane index = n*HW + h*W + w, so a lane shift by dx lands on (n, h, w+dx)
    whenever w+dx is in range; the column mask zeroes exactly the lanes whose
    source wrapped across a row / batch boundary."""
    taps = []
    for dx in range(-p, p + 1):
        if dx == 0:
            taps.append(x)
        else:
            m = cmask_ref[pl.ds(MAXOFF + dx, 1), :]    # (1, NHW) 0/1 mask
            taps.append(_roll_lanes(x, dx) * m)
    return taps


def _conv_bn_relu(x, w_ref, g_ref, be_ref, k, p, cmask_ref, rmask_ref):
    """Conv2d(k, stride 1, pad p, bias dropped) + train-mode BN + ReLU.

    x:      (CP, NHW) activation slab (extra channels are exactly zero)
    w_ref:  VMEM (k*k, CP, CP) weights, [ky*k+kx, o, i] = W[o, i, ky, kx]
    g_ref / be_ref: VMEM (CP, 1) BatchNorm affine params (zero in padding)
    returns (CP, NHW); padded channels stay exactly zero through BN/ReLU.
    """
    xcols = _col_taps(x, p, cmask_ref)                 # k slabs of (CP, NHW)

    y = jnp.zeros((CP, NHW), jnp.float32)
    for dy in range(-p, p + 1):                        # row offset
        ky = dy + p
        a = None
        for j in range(k):                             # j = dx + p (column tap)
            wt = w_ref[ky * k + j]                     # (CP, CP) tap weights
            d = jnp.dot(wt, xcols[j],                  # MXU: (8,8)x(8,512)
                        preferred_element_type=jnp.float32,
                        precision=lax.Precision.HIGHEST)
            a = d if a is None else a + d
        if dy != 0:                                    # shift rows, mask h+dy OOB
            a = _roll_lanes(a, dy * W) * rmask_ref[pl.ds(MAXOFF + dy, 1), :]
        y = y + a

    # training-mode BatchNorm over N*H*W, all channels batched in one pass
    inv = 1.0 / float(NHW)
    mean = jnp.sum(y, axis=-1, keepdims=True) * inv    # (CP, 1)
    ex2 = jnp.sum(y * y, axis=-1, keepdims=True) * inv # (CP, 1)
    var = ex2 - mean * mean                            # biased variance
    scale = g_ref[...] * lax.rsqrt(var + EPS)          # EUP rsqrt; gamma=0 pads
    y = (y - mean) * scale + be_ref[...]
    return jnp.maximum(y, 0.0)                         # ReLU


def _maxpool(y, p, cmask_ref, rmask_ref):
    """Stride-1 MaxPool2d(2p+1, padding=p) on a post-ReLU (>= 0) slab.

    Separable: max over dx first, then max over dy of that result. Zeroing
    out-of-range taps is exact because y >= 0 and the centre tap is included.
    """
    r = y
    for dx in range(-p, p + 1):
        if dx == 0:
            continue
        t = _roll_lanes(y, dx) * cmask_ref[pl.ds(MAXOFF + dx, 1), :]
        r = jnp.maximum(r, t)
    o = r
    for dy in range(-p, p + 1):
        if dy == 0:
            continue
        t = _roll_lanes(r, dy * W) * rmask_ref[pl.ds(MAXOFF + dy, 1), :]
        o = jnp.maximum(o, t)
    return o


def preconv_kernel(x_ref, w1_ref, g1_ref, be1_ref, w2_ref, g2_ref, be2_ref,
                   cmask_ref, rmask_ref, o_ref):
    x = x_ref[...]                                              # (CP, NHW)
    y = _conv_bn_relu(x, w1_ref, g1_ref, be1_ref, K1, P1, cmask_ref, rmask_ref)
    y = _maxpool(y, P1, cmask_ref, rmask_ref)
    y = _conv_bn_relu(y, w2_ref, g2_ref, be2_ref, K2, P2, cmask_ref, rmask_ref)
    o_ref[...] = _maxpool(y, P2, cmask_ref, rmask_ref)          # (CP, NHW)


# ------------------------------ JAX wrapper -----------------------------------
def _masks():
    """(7, NHW) column / row validity masks for offsets -MAXOFF..MAXOFF."""
    lane = jnp.arange(NHW, dtype=jnp.int32)
    w_idx = lane % W
    h_idx = (lane // W) % H
    offs = jnp.arange(-MAXOFF, MAXOFF + 1, dtype=jnp.int32)[:, None]
    col = ((w_idx[None, :] + offs >= 0) & (w_idx[None, :] + offs < W))
    row = ((h_idx[None, :] + offs >= 0) & (h_idx[None, :] + offs < H))
    return col.astype(jnp.float32), row.astype(jnp.float32)


def _pack_weights(w, k):
    """(O, I, k, k) -> (k*k, CP, CP) with zero-padded channels."""
    o, i = w.shape[0], w.shape[1]
    wt = jnp.transpose(w, (2, 3, 0, 1)).reshape(k * k, o, i)
    return jnp.pad(wt, ((0, 0), (0, CP - o), (0, CP - i)))


def _pack_vec(v):
    return jnp.pad(v, (0, CP - v.shape[0])).reshape(CP, 1)


@jax.jit
def preconvnet_pallas(x, w1, b1, g1, be1, w2, b2, g2, be2):
    del b1, b2  # conv bias cancels exactly under training-mode BatchNorm
    # lane-dense repack: (N, C, H, W) -> (CP, N*H*W), channels zero-padded to 8
    x_slab = jnp.pad(jnp.transpose(x, (1, 0, 2, 3)).reshape(C_IN, NHW),
                     ((0, CP - C_IN), (0, 0)))
    col, row = _masks()
    vmem = pl.BlockSpec(memory_space=pltpu.MemorySpace.VMEM)
    out = pl.pallas_call(
        preconv_kernel,
        out_shape=jax.ShapeDtypeStruct((CP, NHW), jnp.float32),
        in_specs=[vmem] * 9,
        out_specs=vmem,
    )(x_slab,
      _pack_weights(w1, K1), _pack_vec(g1), _pack_vec(be1),
      _pack_weights(w2, K2), _pack_vec(g2), _pack_vec(be2),
      col, row)
    # back to NCHW, dropping the padded channels
    return jnp.transpose(out[:C_OUT].reshape(C_OUT, N, H, W), (1, 0, 2, 3))


# --------------------- pure-JAX reference (for checking) --------------------
def ref_forward(x, w1, b1, g1, be1, w2, b2, g2, be2):
    def block(x, w, b, g, be, k, p):
        y = lax.conv_general_dilated(
            x, w, window_strides=(1, 1), padding=[(p, p), (p, p)],
            dimension_numbers=("NCHW", "OIHW", "NCHW"))
        y = y + b[None, :, None, None]
        mean = jnp.mean(y, axis=(0, 2, 3), keepdims=True)
        var = jnp.mean((y - mean) ** 2, axis=(0, 2, 3), keepdims=True)
        y = (y - mean) / jnp.sqrt(var + EPS) * g[None, :, None, None] \
            + be[None, :, None, None]
        y = jnp.maximum(y, 0.0)
        y = lax.reduce_window(y, -jnp.inf, lax.max, (1, 1, k, k), (1, 1, 1, 1),
                              [(0, 0), (0, 0), (p, p), (p, p)])
        return y

    y = block(x, w1, b1, g1, be1, K1, P1)
    y = block(y, w2, b2, g2, be2, K2, P2)
    return y


if __name__ == "__main__":
    key = jax.random.PRNGKey(0)
    ks = jax.random.split(key, 9)
    x = jax.random.normal(ks[0], (N, C_IN, H, W), jnp.float32)
    # deterministic synthetic parameters (shapes match the nn.Module __init__)
    w1 = 0.05 * jax.random.normal(ks[1], (C_MID, C_IN, K1, K1), jnp.float32)
    b1 = 0.10 * jax.random.normal(ks[2], (C_MID,), jnp.float32)
    g1 = 1.0 + 0.10 * jax.random.normal(ks[3], (C_MID,), jnp.float32)
    be1 = 0.10 * jax.random.normal(ks[4], (C_MID,), jnp.float32)
    w2 = 0.10 * jax.random.normal(ks[5], (C_OUT, C_MID, K2, K2), jnp.float32)
    b2 = 0.10 * jax.random.normal(ks[6], (C_OUT,), jnp.float32)
    g2 = 1.0 + 0.10 * jax.random.normal(ks[7], (C_OUT,), jnp.float32)
    be2 = 0.10 * jax.random.normal(ks[8], (C_OUT,), jnp.float32)

    out = preconvnet_pallas(x, w1, b1, g1, be1, w2, b2, g2, be2)
    out = jax.block_until_ready(out)

    ref = ref_forward(x, w1, b1, g1, be1, w2, b2, g2, be2)
    assert out.shape == (N, C_OUT, H, W)
    assert bool(jnp.allclose(out, ref, rtol=2e-3, atol=2e-3)), \
        float(jnp.max(jnp.abs(out - ref)))
    print("KERNEL_OK")
</pallas_src>

<mosaic_0001>
module attributes {stable_mosaic.version = 11 : i64} {
  func.func @preconv_kernel(%arg0: memref<8x512xf32, #tpu.memory_space<vmem>>, %arg1: memref<49x8x8xf32, #tpu.memory_space<vmem>>, %arg2: memref<8x1xf32, #tpu.memory_space<vmem>>, %arg3: memref<8x1xf32, #tpu.memory_space<vmem>>, %arg4: memref<9x8x8xf32, #tpu.memory_space<vmem>>, %arg5: memref<8x1xf32, #tpu.memory_space<vmem>>, %arg6: memref<8x1xf32, #tpu.memory_space<vmem>>, %arg7: memref<7x512xf32, #tpu.memory_space<vmem>>, %arg8: memref<7x512xf32, #tpu.memory_space<vmem>>, %arg9: memref<8x512xf32, #tpu.memory_space<vmem>>) attributes {dimension_semantics = [], scalar_prefetch = 0 : i64, scratch_operands = 0 : i64, tpu.core_type = #tpu.core_type<tc>} {
    %c0 = arith.constant 0 : index
    %c0_0 = arith.constant 0 : index
    %0 = vector.load %arg0[%c0, %c0_0] : memref<8x512xf32, #tpu.memory_space<vmem>>, vector<8x512xf32>
    %c0_1 = arith.constant 0 : index
    %c0_2 = arith.constant 0 : index
    %1 = vector.load %arg7[%c0_1, %c0_2] : memref<7x512xf32, #tpu.memory_space<vmem>>, vector<1x512xf32>
    %c3_i32 = arith.constant 3 : i32
    %2 = tpu.dynamic_rotate %0 by %c3_i32 dim 1 : vector<8x512xf32>, i32 -> vector<8x512xf32>
    %3 = vector.broadcast %1 : vector<1x512xf32> to vector<8x512xf32>
    %4 = arith.mulf %2, %3 : vector<8x512xf32>
    %c1 = arith.constant 1 : index
    %c0_3 = arith.constant 0 : index
    %5 = vector.load %arg7[%c1, %c0_3] : memref<7x512xf32, #tpu.memory_space<vmem>>, vector<1x512xf32>
    %c2_i32 = arith.constant 2 : i32
    %6 = tpu.dynamic_rotate %0 by %c2_i32 dim 1 : vector<8x512xf32>, i32 -> vector<8x512xf32>
    %7 = vector.broadcast %5 : vector<1x512xf32> to vector<8x512xf32>
    %8 = arith.mulf %6, %7 : vector<8x512xf32>
    %c2 = arith.constant 2 : index
    %c0_4 = arith.constant 0 : index
    %9 = vector.load %arg7[%c2, %c0_4] : memref<7x512xf32, #tpu.memory_space<vmem>>, vector<1x512xf32>
    %c1_i32 = arith.constant 1 : i32
    %10 = tpu.dynamic_rotate %0 by %c1_i32 dim 1 : vector<8x512xf32>, i32 -> vector<8x512xf32>
    %11 = vector.broadcast %9 : vector<1x512xf32> to vector<8x512xf32>
    %12 = arith.mulf %10, %11 : vector<8x512xf32>
    %c4 = arith.constant 4 : index
    %c0_5 = arith.constant 0 : index
    %13 = vector.load %arg7[%c4, %c0_5] : memref<7x512xf32, #tpu.memory_space<vmem>>, vector<1x512xf32>
    %c511_i32 = arith.constant 511 : i32
    %14 = tpu.dynamic_rotate %0 by %c511_i32 dim 1 : vector<8x512xf32>, i32 -> vector<8x512xf32>
    %15 = vector.broadcast %13 : vector<1x512xf32> to vector<8x512xf32>
    %16 = arith.mulf %14, %15 : vector<8x512xf32>
    %c5 = arith.constant 5 : index
    %c0_6 = arith.constant 0 : index
    %17 = vector.load %arg7[%c5, %c0_6] : memref<7x512xf32, #tpu.memory_space<vmem>>, vector<1x512xf32>
    %c510_i32 = arith.constant 510 : i32
    %18 = tpu.dynamic_rotate %0 by %c510_i32 dim 1 : vector<8x512xf32>, i32 -> vector<8x512xf32>
    %19 = vector.broadcast %17 : vector<1x512xf32> to vector<8x512xf32>
    %20 = arith.mulf %18, %19 : vector<8x512xf32>
    %c6 = arith.constant 6 : index
    %c0_7 = arith.constant 0 : index
    %21 = vector.load %arg7[%c6, %c0_7] : memref<7x512xf32, #tpu.memory_space<vmem>>, vector<1x512xf32>
    %c509_i32 = arith.constant 509 : i32
    %22 = tpu.dynamic_rotate %0 by %c509_i32 dim 1 : vector<8x512xf32>, i32 -> vector<8x512xf32>
    %23 = vector.broadcast %21 : vector<1x512xf32> to vector<8x512xf32>
    %24 = arith.mulf %22, %23 : vector<8x512xf32>
    %cst = arith.constant 0.000000e+00 : f32
    %25 = vector.broadcast %cst : f32 to vector<8x512xf32>
    %c0_8 = arith.constant 0 : index
    %c0_9 = arith.constant 0 : index
    %c0_10 = arith.constant 0 : index
    %26 = vector.load %arg1[%c0_8, %c0_9, %c0_10] : memref<49x8x8xf32, #tpu.memory_space<vmem>>, vector<1x8x8xf32>
    %27 = vector.shape_cast %26 : vector<1x8x8xf32> to vector<8x8xf32>
    %cst_11 = arith.constant dense<0.000000e+00> : vector<8x512xf32>
    %28 = tpu.matmul %27, %4, %cst_11 {dimension_numbers = #tpu.dot_dimension_numbers<[1], [0], [0], [1], [0, 0, 1, 1], [], []>, precision = #tpu.contract_precision<fp32>} : vector<8x8xf32>, vector<8x512xf32>, vector<8x512xf32> -> vector<8x512xf32>
    %c1_12 = arith.constant 1 : index
    %c0_13 = arith.constant 0 : index
    %c0_14 = arith.constant 0 : index
    %29 = vector.load %arg1[%c1_12, %c0_13, %c0_14] : memref<49x8x8xf32, #tpu.memory_space<vmem>>, vector<1x8x8xf32>
    %30 = vector.shape_cast %29 : vector<1x8x8xf32> to vector<8x8xf32>
    %cst_15 = arith.constant dense<0.000000e+00> : vector<8x512xf32>
    %31 = tpu.matmul %30, %8, %cst_15 {dimension_numbers = #tpu.dot_dimension_numbers<[1], [0], [0], [1], [0, 0, 1, 1], [], []>, precision = #tpu.contract_precision<fp32>} : vector<8x8xf32>, vector<8x512xf32>, vector<8x512xf32> -> vector<8x512xf32>
    %32 = arith.addf %28, %31 : vector<8x512xf32>
    %c2_16 = arith.constant 2 : index
    %c0_17 = arith.constant 0 : index
    %c0_18 = arith.constant 0 : index
    %33 = vector.load %arg1[%c2_16, %c0_17, %c0_18] : memref<49x8x8xf32, #tpu.memory_space<vmem>>, vector<1x8x8xf32>
    %34 = vector.shape_cast %33 : vector<1x8x8xf32> to vector<8x8xf32>
    %cst_19 = arith.constant dense<0.000000e+00> : vector<8x512xf32>
    %35 = tpu.matmul %34, %12, %cst_19 {dimension_numbers = #tpu.dot_dimension_numbers<[1], [0], [0], [1], [0, 0, 1, 1], [], []>, precision = #tpu.contract_precision<fp32>} : vector<8x8xf32>, vector<8x512xf32>, vector<8x512xf32> -> vector<8x512xf32>
    %36 = arith.addf %32, %35 : vector<8x512xf32>
    %c3 = arith.constant 3 : index
    %c0_20 = arith.constant 0 : index
    %c0_21 = arith.constant 0 : index
    %37 = vector.load %arg1[%c3, %c0_20, %c0_21] : memref<49x8x8xf32, #tpu.memory_space<vmem>>, vector<1x8x8xf32>
    %38 = vector.shape_cast %37 : vector<1x8x8xf32> to vector<8x8xf32>
    %cst_22 = arith.constant dense<0.000000e+00> : vector<8x512xf32>
    %39 = tpu.matmul %38, %0, %cst_22 {dimension_numbers = #tpu.dot_dimension_numbers<[1], [0], [0], [1], [0, 0, 1, 1], [], []>, precision = #tpu.contract_precision<fp32>} : vector<8x8xf32>, vector<8x512xf32>, vector<8x512xf32> -> vector<8x512xf32>
    %40 = arith.addf %36, %39 : vector<8x512xf32>
    %c4_23 = arith.constant 4 : index
    %c0_24 = arith.constant 0 : index
    %c0_25 = arith.constant 0 : index
    %41 = vector.load %arg1[%c4_23, %c0_24, %c0_25] : memref<49x8x8xf32, #tpu.memory_space<vmem>>, vector<1x8x8xf32>
    %42 = vector.shape_cast %41 : vector<1x8x8xf32> to vector<8x8xf32>
    %cst_26 = arith.constant dense<0.000000e+00> : vector<8x512xf32>
    %43 = tpu.matmul %42, %16, %cst_26 {dimension_numbers = #tpu.dot_dimension_numbers<[1], [0], [0], [1], [0, 0, 1, 1], [], []>, precision = #tpu.contract_precision<fp32>} : vector<8x8xf32>, vector<8x512xf32>, vector<8x512xf32> -> vector<8x512xf32>
    %44 = arith.addf %40, %43 : vector<8x512xf32>
    %c5_27 = arith.constant 5 : index
    %c0_28 = arith.constant 0 : index
    %c0_29 = arith.constant 0 : index
    %45 = vector.load %arg1[%c5_27, %c0_28, %c0_29] : memref<49x8x8xf32, #tpu.memory_space<vmem>>, vector<1x8x8xf32>
    %46 = vector.shape_cast %45 : vector<1x8x8xf32> to vector<8x8xf32>
    %cst_30 = arith.constant dense<0.000000e+00> : vector<8x512xf32>
    %47 = tpu.matmul %46, %20, %cst_30 {dimension_numbers = #tpu.dot_dimension_numbers<[1], [0], [0], [1], [0, 0, 1, 1], [], []>, precision = #tpu.contract_precision<fp32>} : vector<8x8xf32>, vector<8x512xf32>, vector<8x512xf32> -> vector<8x512xf32>
    %48 = arith.addf %44, %47 : vector<8x512xf32>
    %c6_31 = arith.constant 6 : index
    %c0_32 = arith.constant 0 : index
    %c0_33 = arith.constant 0 : index
    %49 = vector.load %arg1[%c6_31, %c0_32, %c0_33] : memref<49x8x8xf32, #tpu.memory_space<vmem>>, vector<1x8x8xf32>
    %50 = vector.shape_cast %49 : vector<1x8x8xf32> to vector<8x8xf32>
    %cst_34 = arith.constant dense<0.000000e+00> : vector<8x512xf32>
    %51 = tpu.matmul %50, %24, %cst_34 {dimension_numbers = #tpu.dot_dimension_numbers<[1], [0], [0], [1], [0, 0, 1, 1], [], []>, precision = #tpu.contract_precision<fp32>} : vector<8x8xf32>, vector<8x512xf32>, vector<8x512xf32> -> vector<8x512xf32>
    %52 = arith.addf %48, %51 : vector<8x512xf32>
    %c48_i32 = arith.constant 48 : i32
    %53 = tpu.dynamic_rotate %52 by %c48_i32 dim 1 : vector<8x512xf32>, i32 -> vector<8x512xf32>
    %c0_35 = arith.constant 0 : index
    %c0_36 = arith.constant 0 : index
    %54 = vector.load %arg8[%c0_35, %c0_36] : memref<7x512xf32, #tpu.memory_space<vmem>>, vector<1x512xf32>
    %55 = vector.broadcast %54 : vector<1x512xf32> to vector<8x512xf32>
    %56 = arith.mulf %53, %55 : vector<8x512xf32>
    %57 = arith.addf %25, %56 : vector<8x512xf32>
    %c7 = arith.constant 7 : index
    %c0_37 = arith.constant 0 : index
    %c0_38 = arith.constant 0 : index
    %58 = vector.load %arg1[%c7, %c0_37, %c0_38] : memref<49x8x8xf32, #tpu.memory_space<vmem>>, vector<1x8x8xf32>
    %59 = vector.shape_cast %58 : vector<1x8x8xf32> to vector<8x8xf32>
    %cst_39 = arith.constant dense<0.000000e+00> : vector<8x512xf32>
    %60 = tpu.matmul %59, %4, %cst_39 {dimension_numbers = #tpu.dot_dimension_numbers<[1], [0], [0], [1], [0, 0, 1, 1], [], []>, precision = #tpu.contract_precision<fp32>} : vector<8x8xf32>, vector<8x512xf32>, vector<8x512xf32> -> vector<8x512xf32>
    %c8 = arith.constant 8 : index
    %c0_40 = arith.constant 0 : index
    %c0_41 = arith.constant 0 : index
    %61 = vector.load %arg1[%c8, %c0_40, %c0_41] : memref<49x8x8xf32, #tpu.memory_space<vmem>>, vector<1x8x8xf32>
    %62 = vector.shape_cast %61 : vector<1x8x8xf32> to vector<8x8xf32>
    %cst_42 = arith.constant dense<0.000000e+00> : vector<8x512xf32>
    %63 = tpu.matmul %62, %8, %cst_42 {dimension_numbers = #tpu.dot_dimension_numbers<[1], [0], [0], [1], [0, 0, 1, 1], [], []>, precision = #tpu.contract_precision<fp32>} : vector<8x8xf32>, vector<8x512xf32>, vector<8x512xf32> -> vector<8x512xf32>
    %64 = arith.addf %60, %63 : vector<8x512xf32>
    %c9 = arith.constant 9 : index
    %c0_43 = arith.constant 0 : index
    %c0_44 = arith.constant 0 : index
    %65 = vector.load %arg1[%c9, %c0_43, %c0_44] : memref<49x8x8xf32, #tpu.memory_space<vmem>>, vector<1x8x8xf32>
    %66 = vector.shape_cast %65 : vector<1x8x8xf32> to vector<8x8xf32>
    %cst_45 = arith.constant dense<0.000000e+00> : vector<8x512xf32>
    %67 = tpu.matmul %66, %12, %cst_45 {dimension_numbers = #tpu.dot_dimension_numbers<[1], [0], [0], [1], [0, 0, 1, 1], [], []>, precision = #tpu.contract_precision<fp32>} : vector<8x8xf32>, vector<8x512xf32>, vector<8x512xf32> -> vector<8x512xf32>
    %68 = arith.addf %64, %67 : vector<8x512xf32>
    %c10 = arith.constant 10 : index
    %c0_46 = arith.constant 0 : index
    %c0_47 = arith.constant 0 : index
    %69 = vector.load %arg1[%c10, %c0_46, %c0_47] : memref<49x8x8xf32, #tpu.memory_space<vmem>>, vector<1x8x8xf32>
    %70 = vector.shape_cast %69 : vector<1x8x8xf32> to vector<8x8xf32>
    %cst_48 = arith.constant dense<0.000000e+00> : vector<8x512xf32>
    %71 = tpu.matmul %70, %0, %cst_48 {dimension_numbers = #tpu.dot_dimension_numbers<[1], [0], [0], [1], [0, 0, 1, 1], [], []>, precision = #tpu.contract_precision<fp32>} : vector<8x8xf32>, vector<8x512xf32>, vector<8x512xf32> -> vector<8x512xf32>
    %72 = arith.addf %68, %71 : vector<8x512xf32>
    %c11 = arith.constant 11 : index
    %c0_49 = arith.constant 0 : index
    %c0_50 = arith.constant 0 : index
    %73 = vector.load %arg1[%c11, %c0_49, %c0_50] : memref<49x8x8xf32, #tpu.memory_space<vmem>>, vector<1x8x8xf32>
    %74 = vector.shape_cast %73 : vector<1x8x8xf32> to vector<8x8xf32>
    %cst_51 = arith.constant dense<0.000000e+00> : vector<8x512xf32>
    %75 = tpu.matmul %74, %16, %cst_51 {dimension_numbers = #tpu.dot_dimension_numbers<[1], [0], [0], [1], [0, 0, 1, 1], [], []>, precision = #tpu.contract_precision<fp32>} : vector<8x8xf32>, vector<8x512xf32>, vector<8x512xf32> -> vector<8x512xf32>
    %76 = arith.addf %72, %75 : vector<8x512xf32>
    %c12 = arith.constant 12 : index
    %c0_52 = arith.constant 0 : index
    %c0_53 = arith.constant 0 : index
    %77 = vector.load %arg1[%c12, %c0_52, %c0_53] : memref<49x8x8xf32, #tpu.memory_space<vmem>>, vector<1x8x8xf32>
    %78 = vector.shape_cast %77 : vector<1x8x8xf32> to vector<8x8xf32>
    %cst_54 = arith.constant dense<0.000000e+00> : vector<8x512xf32>
    %79 = tpu.matmul %78, %20, %cst_54 {dimension_numbers = #tpu.dot_dimension_numbers<[1], [0], [0], [1], [0, 0, 1, 1], [], []>, precision = #tpu.contract_precision<fp32>} : vector<8x8xf32>, vector<8x512xf32>, vector<8x512xf32> -> vector<8x512xf32>
    %80 = arith.addf %76, %79 : vector<8x512xf32>
    %c13 = arith.constant 13 : index
    %c0_55 = arith.constant 0 : index
    %c0_56 = arith.constant 0 : index
    %81 = vector.load %arg1[%c13, %c0_55, %c0_56] : memref<49x8x8xf32, #tpu.memory_space<vmem>>, vector<1x8x8xf32>
    %82 = vector.shape_cast %81 : vector<1x8x8xf32> to vector<8x8xf32>
    %cst_57 = arith.constant dense<0.000000e+00> : vector<8x512xf32>
    %83 = tpu.matmul %82, %24, %cst_57 {dimension_numbers = #tpu.dot_dimension_numbers<[1], [0], [0], [1], [0, 0, 1, 1], [], []>, precision = #tpu.contract_precision<fp32>} : vector<8x8xf32>, vector<8x512xf32>, vector<8x512xf32> -> vector<8x512xf32>
    %84 = arith.addf %80, %83 : vector<8x512xf32>
    %c32_i32 = arith.constant 32 : i32
    %85 = tpu.dynamic_rotate %84 by %c32_i32 dim 1 : vector<8x512xf32>, i32 -> vector<8x512xf32>
    %c1_58 = arith.constant 1 : index
    %c0_59 = arith.constant 0 : index
    %86 = vector.load %arg8[%c1_58, %c0_59] : memref<7x512xf32, #tpu.memory_space<vmem>>, vector<1x512xf32>
    %87 = vector.broadcast %86 : vector<1x512xf32> to vector<8x512xf32>
    %88 = arith.mulf %85, %87 : vector<8x512xf32>
    %89 = arith.addf %57, %88 : vector<8x512xf32>
    %c14 = arith.constant 14 : index
    %c0_60 = arith.constant 0 : index
    %c0_61 = arith.constant 0 : index
    %90 = vector.load %arg1[%c14, %c0_60, %c0_61] : memref<49x8x8xf32, #tpu.memory_space<vmem>>, vector<1x8x8xf32>
    %91 = vector.shape_cast %90 : vector<1x8x8xf32> to vector<8x8xf32>
    %cst_62 = arith.constant dense<0.000000e+00> : vector<8x512xf32>
    %92 = tpu.matmul %91, %4, %cst_62 {dimension_numbers = #tpu.dot_dimension_numbers<[1], [0], [0], [1], [0, 0, 1, 1], [], []>, precision = #tpu.contract_precision<fp32>} : vector<8x8xf32>, vector<8x512xf32>, vector<8x512xf32> -> vector<8x512xf32>
    %c15 = arith.constant 15 : index
    %c0_63 = arith.constant 0 : index
    %c0_64 = arith.constant 0 : index
    %93 = vector.load %arg1[%c15, %c0_63, %c0_64] : memref<49x8x8xf32, #tpu.memory_space<vmem>>, vector<1x8x8xf32>
    %94 = vector.shape_cast %93 : vector<1x8x8xf32> to vector<8x8xf32>
    %cst_65 = arith.constant dense<0.000000e+00> : vector<8x512xf32>
    %95 = tpu.matmul %94, %8, %cst_65 {dimension_numbers = #tpu.dot_dimension_numbers<[1], [0], [0], [1], [0, 0, 1, 1], [], []>, precision = #tpu.contract_precision<fp32>} : vector<8x8xf32>, vector<8x512xf32>, vector<8x512xf32> -> vector<8x512xf32>
    %96 = arith.addf %92, %95 : vector<8x512xf32>
    %c16 = arith.constant 16 : index
    %c0_66 = arith.constant 0 : index
    %c0_67 = arith.constant 0 : index
    %97 = vector.load %arg1[%c16, %c0_66, %c0_67] : memref<49x8x8xf32, #tpu.memory_space<vmem>>, vector<1x8x8xf32>
    %98 = vector.shape_cast %97 : vector<1x8x8xf32> to vector<8x8xf32>
    %cst_68 = arith.constant dense<0.000000e+00> : vector<8x512xf32>
    %99 = tpu.matmul %98, %12, %cst_68 {dimension_numbers = #tpu.dot_dimension_numbers<[1], [0], [0], [1], [0, 0, 1, 1], [], []>, precision = #tpu.contract_precision<fp32>} : vector<8x8xf32>, vector<8x512xf32>, vector<8x512xf32> -> vector<8x512xf32>
    %100 = arith.addf %96, %99 : vector<8x512xf32>
    %c17 = arith.constant 17 : index
    %c0_69 = arith.constant 0 : index
    %c0_70 = arith.constant 0 : index
    %101 = vector.load %arg1[%c17, %c0_69, %c0_70] : memref<49x8x8xf32, #tpu.memory_space<vmem>>, vector<1x8x8xf32>
    %102 = vector.shape_cast %101 : vector<1x8x8xf32> to vector<8x8xf32>
    %cst_71 = arith.constant dense<0.000000e+00> : vector<8x512xf32>
    %103 = tpu.matmul %102, %0, %cst_71 {dimension_numbers = #tpu.dot_dimension_numbers<[1], [0], [0], [1], [0, 0, 1, 1], [], []>, precision = #tpu.contract_precision<fp32>} : vector<8x8xf32>, vector<8x512xf32>, vector<8x512xf32> -> vector<8x512xf32>
    %104 = arith.addf %100, %103 : vector<8x512xf32>
    %c18 = arith.constant 18 : index
    %c0_72 = arith.constant 0 : index
    %c0_73 = arith.constant 0 : index
    %105 = vector.load %arg1[%c18, %c0_72, %c0_73] : memref<49x8x8xf32, #tpu.memory_space<vmem>>, vector<1x8x8xf32>
    %106 = vector.shape_cast %105 : vector<1x8x8xf32> to vector<8x8xf32>
    %cst_74 = arith.constant dense<0.000000e+00> : vector<8x512xf32>
    %107 = tpu.matmul %106, %16, %cst_74 {dimension_numbers = #tpu.dot_dimension_numbers<[1], [0], [0], [1], [0, 0, 1, 1], [], []>, precision = #tpu.contract_precision<fp32>} : vector<8x8xf32>, vector<8x512xf32>, vector<8x512xf32> -> vector<8x512xf32>
    %108 = arith.addf %104, %107 : vector<8x512xf32>
    %c19 = arith.constant 19 : index
    %c0_75 = arith.constant 0 : index
    %c0_76 = arith.constant 0 : index
    %109 = vector.load %arg1[%c19, %c0_75, %c0_76] : memref<49x8x8xf32, #tpu.memory_space<vmem>>, vector<1x8x8xf32>
    %110 = vector.shape_cast %109 : vector<1x8x8xf32> to vector<8x8xf32>
    %cst_77 = arith.constant dense<0.000000e+00> : vector<8x512xf32>
    %111 = tpu.matmul %110, %20, %cst_77 {dimension_numbers = #tpu.dot_dimension_numbers<[1], [0], [0], [1], [0, 0, 1, 1], [], []>, precision = #tpu.contract_precision<fp32>} : vector<8x8xf32>, vector<8x512xf32>, vector<8x512xf32> -> vector<8x512xf32>
    %112 = arith.addf %108, %111 : vector<8x512xf32>
    %c20 = arith.constant 20 : index
    %c0_78 = arith.constant 0 : index
    %c0_79 = arith.constant 0 : index
    %113 = vector.load %arg1[%c20, %c0_78, %c0_79] : memref<49x8x8xf32, #tpu.memory_space<vmem>>, vector<1x8x8xf32>
    %114 = vector.shape_cast %113 : vector<1x8x8xf32> to vector<8x8xf32>
    %cst_80 = arith.constant dense<0.000000e+00> : vector<8x512xf32>
    %115 = tpu.matmul %114, %24, %cst_80 {dimension_numbers = #tpu.dot_dimension_numbers<[1], [0], [0], [1], [0, 0, 1, 1], [], []>, precision = #tpu.contract_precision<fp32>} : vector<8x8xf32>, vector<8x512xf32>, vector<8x512xf32> -> vector<8x512xf32>
    %116 = arith.addf %112, %115 : vector<8x512xf32>
    %c16_i32 = arith.constant 16 : i32
    %117 = tpu.dynamic_rotate %116 by %c16_i32 dim 1 : vector<8x512xf32>, i32 -> vector<8x512xf32>
    %c2_81 = arith.constant 2 : index
    %c0_82 = arith.constant 0 : index
    %118 = vector.load %arg8[%c2_81, %c0_82] : memref<7x512xf32, #tpu.memory_space<vmem>>, vector<1x512xf32>
    %119 = vector.broadcast %118 : vector<1x512xf32> to vector<8x512xf32>
    %120 = arith.mulf %117, %119 : vector<8x512xf32>
    %121 = arith.addf %89, %120 : vector<8x512xf32>
    %c21 = arith.constant 21 : index
    %c0_83 = arith.constant 0 : index
    %c0_84 = arith.constant 0 : index
    %122 = vector.load %arg1[%c21, %c0_83, %c0_84] : memref<49x8x8xf32, #tpu.memory_space<vmem>>, vector<1x8x8xf32>
    %123 = vector.shape_cast %122 : vector<1x8x8xf32> to vector<8x8xf32>
    %cst_85 = arith.constant dense<0.000000e+00> : vector<8x512xf32>
    %124 = tpu.matmul %123, %4, %cst_85 {dimension_numbers = #tpu.dot_dimension_numbers<[1], [0], [0], [1], [0, 0, 1, 1], [], []>, precision = #tpu.contract_precision<fp32>} : vector<8x8xf32>, vector<8x512xf32>, vector<8x512xf32> -> vector<8x512xf32>
    %c22 = arith.constant 22 : index
    %c0_86 = arith.constant 0 : index
    %c0_87 = arith.constant 0 : index
    %125 = vector.load %arg1[%c22, %c0_86, %c0_87] : memref<49x8x8xf32, #tpu.memory_space<vmem>>, vector<1x8x8xf32>
    %126 = vector.shape_cast %125 : vector<1x8x8xf32> to vector<8x8xf32>
    %cst_88 = arith.constant dense<0.000000e+00> : vector<8x512xf32>
    %127 = tpu.matmul %126, %8, %cst_88 {dimension_numbers = #tpu.dot_dimension_numbers<[1], [0], [0], [1], [0, 0, 1, 1], [], []>, precision = #tpu.contract_precision<fp32>} : vector<8x8xf32>, vector<8x512xf32>, vector<8x512xf32> -> vector<8x512xf32>
    %128 = arith.addf %124, %127 : vector<8x512xf32>
    %c23 = arith.constant 23 : index
    %c0_89 = arith.constant 0 : index
    %c0_90 = arith.constant 0 : index
    %129 = vector.load %arg1[%c23, %c0_89, %c0_90] : memref<49x8x8xf32, #tpu.memory_space<vmem>>, vector<1x8x8xf32>
    %130 = vector.shape_cast %129 : vector<1x8x8xf32> to vector<8x8xf32>
    %cst_91 = arith.constant dense<0.000000e+00> : vector<8x512xf32>
    %131 = tpu.matmul %130, %12, %cst_91 {dimension_numbers = #tpu.dot_dimension_numbers<[1], [0], [0], [1], [0, 0, 1, 1], [], []>, precision = #tpu.contract_precision<fp32>} : vector<8x8xf32>, vector<8x512xf32>, vector<8x512xf32> -> vector<8x512xf32>
    %132 = arith.addf %128, %131 : vector<8x512xf32>
    %c24 = arith.constant 24 : index
    %c0_92 = arith.constant 0 : index
    %c0_93 = arith.constant 0 : index
    %133 = vector.load %arg1[%c24, %c0_92, %c0_93] : memref<49x8x8xf32, #tpu.memory_space<vmem>>, vector<1x8x8xf32>
    %134 = vector.shape_cast %133 : vector<1x8x8xf32> to vector<8x8xf32>
    %cst_94 = arith.constant dense<0.000000e+00> : vector<8x512xf32>
    %135 = tpu.matmul %134, %0, %cst_94 {dimension_numbers = #tpu.dot_dimension_numbers<[1], [0], [0], [1], [0, 0, 1, 1], [], []>, precision = #tpu.contract_precision<fp32>} : vector<8x8xf32>, vector<8x512xf32>, vector<8x512xf32> -> vector<8x512xf32>
    %136 = arith.addf %132, %135 : vector<8x512xf32>
    %c25 = arith.constant 25 : index
    %c0_95 = arith.constant 0 : index
    %c0_96 = arith.constant 0 : index
    %137 = vector.load %arg1[%c25, %c0_95, %c0_96] : memref<49x8x8xf32, #tpu.memory_space<vmem>>, vector<1x8x8xf32>
    %138 = vector.shape_cast %137 : vector<1x8x8xf32> to vector<8x8xf32>
    %cst_97 = arith.constant dense<0.000000e+00> : vector<8x512xf32>
    %139 = tpu.matmul %138, %16, %cst_97 {dimension_numbers = #tpu.dot_dimension_numbers<[1], [0], [0], [1], [0, 0, 1, 1], [], []>, precision = #tpu.contract_precision<fp32>} : vector<8x8xf32>, vector<8x512xf32>, vector<8x512xf32> -> vector<8x512xf32>
    %140 = arith.addf %136, %139 : vector<8x512xf32>
    %c26 = arith.constant 26 : index
    %c0_98 = arith.constant 0 : index
    %c0_99 = arith.constant 0 : index
    %141 = vector.load %arg1[%c26, %c0_98, %c0_99] : memref<49x8x8xf32, #tpu.memory_space<vmem>>, vector<1x8x8xf32>
    %142 = vector.shape_cast %141 : vector<1x8x8xf32> to vector<8x8xf32>
    %cst_100 = arith.constant dense<0.000000e+00> : vector<8x512xf32>
    %143 = tpu.matmul %142, %20, %cst_100 {dimension_numbers = #tpu.dot_dimension_numbers<[1], [0], [0], [1], [0, 0, 1, 1], [], []>, precision = #tpu.contract_precision<fp32>} : vector<8x8xf32>, vector<8x512xf32>, vector<8x512xf32> -> vector<8x512xf32>
    %144 = arith.addf %140, %143 : vector<8x512xf32>
    %c27 = arith.constant 27 : index
    %c0_101 = arith.constant 0 : index
    %c0_102 = arith.constant 0 : index
    %145 = vector.load %arg1[%c27, %c0_101, %c0_102] : memref<49x8x8xf32, #tpu.memory_space<vmem>>, vector<1x8x8xf32>
    %146 = vector.shape_cast %145 : vector<1x8x8xf32> to vector<8x8xf32>
    %cst_103 = arith.constant dense<0.000000e+00> : vector<8x512xf32>
    %147 = tpu.matmul %146, %24, %cst_103 {dimension_numbers = #tpu.dot_dimension_numbers<[1], [0], [0], [1], [0, 0, 1, 1], [], []>, precision = #tpu.contract_precision<fp32>} : vector<8x8xf32>, vector<8x512xf32>, vector<8x512xf32> -> vector<8x512xf32>
    %148 = arith.addf %144, %147 : vector<8x512xf32>
    %149 = arith.addf %121, %148 : vector<8x512xf32>
    %c28 = arith.constant 28 : index
    %c0_104 = arith.constant 0 : index
    %c0_105 = arith.constant 0 : index
    %150 = vector.load %arg1[%c28, %c0_104, %c0_105] : memref<49x8x8xf32, #tpu.memory_space<vmem>>, vector<1x8x8xf32>
    %151 = vector.shape_cast %150 : vector<1x8x8xf32> to vector<8x8xf32>
    %cst_106 = arith.constant dense<0.000000e+00> : vector<8x512xf32>
    %152 = tpu.matmul %151, %4, %cst_106 {dimension_numbers = #tpu.dot_dimension_numbers<[1], [0], [0], [1], [0, 0, 1, 1], [], []>, precision = #tpu.contract_precision<fp32>} : vector<8x8xf32>, vector<8x512xf32>, vector<8x512xf32> -> vector<8x512xf32>
    %c29 = arith.constant 29 : index
    %c0_107 = arith.constant 0 : index
    %c0_108 = arith.constant 0 : index
    %153 = vector.load %arg1[%c29, %c0_107, %c0_108] : memref<49x8x8xf32, #tpu.memory_space<vmem>>, vector<1x8x8xf32>
    %154 = vector.shape_cast %153 : vector<1x8x8xf32> to vector<8x8xf32>
    %cst_109 = arith.constant dense<0.000000e+00> : vector<8x512xf32>
    %155 = tpu.matmul %154, %8, %cst_109 {dimension_numbers = #tpu.dot_dimension_numbers<[1], [0], [0], [1], [0, 0, 1, 1], [], []>, precision = #tpu.contract_precision<fp32>} : vector<8x8xf32>, vector<8x512xf32>, vector<8x512xf32> -> vector<8x512xf32>
    %156 = arith.addf %152, %155 : vector<8x512xf32>
    %c30 = arith.constant 30 : index
    %c0_110 = arith.constant 0 : index
    %c0_111 = arith.constant 0 : index
    %157 = vector.load %arg1[%c30, %c0_110, %c0_111] : memref<49x8x8xf32, #tpu.memory_space<vmem>>, vector<1x8x8xf32>
    %158 = vector.shape_cast %157 : vector<1x8x8xf32> to vector<8x8xf32>
    %cst_112 = arith.constant dense<0.000000e+00> : vector<8x512xf32>
    %159 = tpu.matmul %158, %12, %cst_112 {dimension_numbers = #tpu.dot_dimension_numbers<[1], [0], [0], [1], [0, 0, 1, 1], [], []>, precision = #tpu.contract_precision<fp32>} : vector<8x8xf32>, vector<8x512xf32>, vector<8x512xf32> -> vector<8x512xf32>
    %160 = arith.addf %156, %159 : vector<8x512xf32>
    %c31 = arith.constant 31 : index
    %c0_113 = arith.constant 0 : index
    %c0_114 = arith.constant 0 : index
    %161 = vector.load %arg1[%c31, %c0_113, %c0_114] : memref<49x8x8xf32, #tpu.memory_space<vmem>>, vector<1x8x8xf32>
    %162 = vector.shape_cast %161 : vector<1x8x8xf32> to vector<8x8xf32>
    %cst_115 = arith.constant dense<0.000000e+00> : vector<8x512xf32>
    %163 = tpu.matmul %162, %0, %cst_115 {dimension_numbers = #tpu.dot_dimension_numbers<[1], [0], [0], [1], [0, 0, 1, 1], [], []>, precision = #tpu.contract_precision<fp32>} : vector<8x8xf32>, vector<8x512xf32>, vector<8x512xf32> -> vector<8x512xf32>
    %164 = arith.addf %160, %163 : vector<8x512xf32>
    %c32 = arith.constant 32 : index
    %c0_116 = arith.constant 0 : index
    %c0_117 = arith.constant 0 : index
    %165 = vector.load %arg1[%c32, %c0_116, %c0_117] : memref<49x8x8xf32, #tpu.memory_space<vmem>>, vector<1x8x8xf32>
    %166 = vector.shape_cast %165 : vector<1x8x8xf32> to vector<8x8xf32>
    %cst_118 = arith.constant dense<0.000000e+00> : vector<8x512xf32>
    %167 = tpu.matmul %166, %16, %cst_118 {dimension_numbers = #tpu.dot_dimension_numbers<[1], [0], [0], [1], [0, 0, 1, 1], [], []>, precision = #tpu.contract_precision<fp32>} : vector<8x8xf32>, vector<8x512xf32>, vector<8x512xf32> -> vector<8x512xf32>
    %168 = arith.addf %164, %167 : vector<8x512xf32>
    %c33 = arith.constant 33 : index
    %c0_119 = arith.constant 0 : index
    %c0_120 = arith.constant 0 : index
    %169 = vector.load %arg1[%c33, %c0_119, %c0_120] : memref<49x8x8xf32, #tpu.memory_space<vmem>>, vector<1x8x8xf32>
    %170 = vector.shape_cast %169 : vector<1x8x8xf32> to vector<8x8xf32>
    %cst_121 = arith.constant dense<0.000000e+00> : vector<8x512xf32>
    %171 = tpu.matmul %170, %20, %cst_121 {dimension_numbers = #tpu.dot_dimension_numbers<[1], [0], [0], [1], [0, 0, 1, 1], [], []>, precision = #tpu.contract_precision<fp32>} : vector<8x8xf32>, vector<8x512xf32>, vector<8x512xf32> -> vector<8x512xf32>
    %172 = arith.addf %168, %171 : vector<8x512xf32>
    %c34 = arith.constant 34 : index
    %c0_122 = arith.constant 0 : index
    %c0_123 = arith.constant 0 : index
    %173 = vector.load %arg1[%c34, %c0_122, %c0_123] : memref<49x8x8xf32, #tpu.memory_space<vmem>>, vector<1x8x8xf32>
    %174 = vector.shape_cast %173 : vector<1x8x8xf32> to vector<8x8xf32>
    %cst_124 = arith.constant dense<0.000000e+00> : vector<8x512xf32>
    %175 = tpu.matmul %174, %24, %cst_124 {dimension_numbers = #tpu.dot_dimension_numbers<[1], [0], [0], [1], [0, 0, 1, 1], [], []>, precision = #tpu.contract_precision<fp32>} : vector<8x8xf32>, vector<8x512xf32>, vector<8x512xf32> -> vector<8x512xf32>
    %176 = arith.addf %172, %175 : vector<8x512xf32>
    %c496_i32 = arith.constant 496 : i32
    %177 = tpu.dynamic_rotate %176 by %c496_i32 dim 1 : vector<8x512xf32>, i32 -> vector<8x512xf32>
    %c4_125 = arith.constant 4 : index
    %c0_126 = arith.constant 0 : index
    %178 = vector.load %arg8[%c4_125, %c0_126] : memref<7x512xf32, #tpu.memory_space<vmem>>, vector<1x512xf32>
    %179 = vector.broadcast %178 : vector<1x512xf32> to vector<8x512xf32>
    %180 = arith.mulf %177, %179 : vector<8x512xf32>
    %181 = arith.addf %149, %180 : vector<8x512xf32>
    %c35 = arith.constant 35 : index
    %c0_127 = arith.constant 0 : index
    %c0_128 = arith.constant 0 : index
    %182 = vector.load %arg1[%c35, %c0_127, %c0_128] : memref<49x8x8xf32, #tpu.memory_space<vmem>>, vector<1x8x8xf32>
    %183 = vector.shape_cast %182 : vector<1x8x8xf32> to vector<8x8xf32>
    %cst_129 = arith.constant dense<0.000000e+00> : vector<8x512xf32>
    %184 = tpu.matmul %183, %4, %cst_129 {dimension_numbers = #tpu.dot_dimension_numbers<[1], [0], [0], [1], [0, 0, 1, 1], [], []>, precision = #tpu.contract_precision<fp32>} : vector<8x8xf32>, vector<8x512xf32>, vector<8x512xf32> -> vector<8x512xf32>
    %c36 = arith.constant 36 : index
    %c0_130 = arith.constant 0 : index
    %c0_131 = arith.constant 0 : index
    %185 = vector.load %arg1[%c36, %c0_130, %c0_131] : memref<49x8x8xf32, #tpu.memory_space<vmem>>, vector<1x8x8xf32>
    %186 = vector.shape_cast %185 : vector<1x8x8xf32> to vector<8x8xf32>
    %cst_132 = arith.constant dense<0.000000e+00> : vector<8x512xf32>
    %187 = tpu.matmul %186, %8, %cst_132 {dimension_numbers = #tpu.dot_dimension_numbers<[1], [0], [0], [1], [0, 0, 1, 1], [], []>, precision = #tpu.contract_precision<fp32>} : vector<8x8xf32>, vector<8x512xf32>, vector<8x512xf32> -> vector<8x512xf32>
    %188 = arith.addf %184, %187 : vector<8x512xf32>
    %c37 = arith.constant 37 : index
    %c0_133 = arith.constant 0 : index
    %c0_134 = arith.constant 0 : index
    %189 = vector.load %arg1[%c37, %c0_133, %c0_134] : memref<49x8x8xf32, #tpu.memory_space<vmem>>, vector<1x8x8xf32>
    %190 = vector.shape_cast %189 : vector<1x8x8xf32> to vector<8x8xf32>
    %cst_135 = arith.constant dense<0.000000e+00> : vector<8x512xf32>
    %191 = tpu.matmul %190, %12, %cst_135 {dimension_numbers = #tpu.dot_dimension_numbers<[1], [0], [0], [1], [0, 0, 1, 1], [], []>, precision = #tpu.contract_precision<fp32>} : vector<8x8xf32>, vector<8x512xf32>, vector<8x512xf32> -> vector<8x512xf32>
    %192 = arith.addf %188, %191 : vector<8x512xf32>
    %c38 = arith.constant 38 : index
    %c0_136 = arith.constant 0 : index
    %c0_137 = arith.constant 0 : index
    %193 = vector.load %arg1[%c38, %c0_136, %c0_137] : memref<49x8x8xf32, #tpu.memory_space<vmem>>, vector<1x8x8xf32>
    %194 = vector.shape_cast %193 : vector<1x8x8xf32> to vector<8x8xf32>
    %cst_138 = arith.constant dense<0.000000e+00> : vector<8x512xf32>
    %195 = tpu.matmul %194, %0, %cst_138 {dimension_numbers = #tpu.dot_dimension_numbers<[1], [0], [0], [1], [0, 0, 1, 1], [], []>, precision = #tpu.contract_precision<fp32>} : vector<8x8xf32>, vector<8x512xf32>, vector<8x512xf32> -> vector<8x512xf32>
    %196 = arith.addf %192, %195 : vector<8x512xf32>
    %c39 = arith.constant 39 : index
    %c0_139 = arith.constant 0 : index
    %c0_140 = arith.constant 0 : index
    %197 = vector.load %arg1[%c39, %c0_139, %c0_140] : memref<49x8x8xf32, #tpu.memory_space<vmem>>, vector<1x8x8xf32>
    %198 = vector.shape_cast %197 : vector<1x8x8xf32> to vector<8x8xf32>
    %cst_141 = arith.constant dense<0.000000e+00> : vector<8x512xf32>
    %199 = tpu.matmul %198, %16, %cst_141 {dimension_numbers = #tpu.dot_dimension_numbers<[1], [0], [0], [1], [0, 0, 1, 1], [], []>, precision = #tpu.contract_precision<fp32>} : vector<8x8xf32>, vector<8x512xf32>, vector<8x512xf32> -> vector<8x512xf32>
    %200 = arith.addf %196, %199 : vector<8x512xf32>
    %c40 = arith.constant 40 : index
    %c0_142 = arith.constant 0 : index
    %c0_143 = arith.constant 0 : index
    %201 = vector.load %arg1[%c40, %c0_142, %c0_143] : memref<49x8x8xf32, #tpu.memory_space<vmem>>, vector<1x8x8xf32>
    %202 = vector.shape_cast %201 : vector<1x8x8xf32> to vector<8x8xf32>
    %cst_144 = arith.constant dense<0.000000e+00> : vector<8x512xf32>
    %203 = tpu.matmul %202, %20, %cst_144 {dimension_numbers = #tpu.dot_dimension_numbers<[1], [0], [0], [1], [0, 0, 1, 1], [], []>, precision = #tpu.contract_precision<fp32>} : vector<8x8xf32>, vector<8x512xf32>, vector<8x512xf32> -> vector<8x512xf32>
    %204 = arith.addf %200, %203 : vector<8x512xf32>
    %c41 = arith.constant 41 : index
    %c0_145 = arith.constant 0 : index
    %c0_146 = arith.constant 0 : index
    %205 = vector.load %arg1[%c41, %c0_145, %c0_146] : memref<49x8x8xf32, #tpu.memory_space<vmem>>, vector<1x8x8xf32>
    %206 = vector.shape_cast %205 : vector<1x8x8xf32> to vector<8x8xf32>
    %cst_147 = arith.constant dense<0.000000e+00> : vector<8x512xf32>
    %207 = tpu.matmul %206, %24, %cst_147 {dimension_numbers = #tpu.dot_dimension_numbers<[1], [0], [0], [1], [0, 0, 1, 1], [], []>, precision = #tpu.contract_precision<fp32>} : vector<8x8xf32>, vector<8x512xf32>, vector<8x512xf32> -> vector<8x512xf32>
    %208 = arith.addf %204, %207 : vector<8x512xf32>
    %c480_i32 = arith.constant 480 : i32
    %209 = tpu.dynamic_rotate %208 by %c480_i32 dim 1 : vector<8x512xf32>, i32 -> vector<8x512xf32>
    %c5_148 = arith.constant 5 : index
    %c0_149 = arith.constant 0 : index
    %210 = vector.load %arg8[%c5_148, %c0_149] : memref<7x512xf32, #tpu.memory_space<vmem>>, vector<1x512xf32>
    %211 = vector.broadcast %210 : vector<1x512xf32> to vector<8x512xf32>
    %212 = arith.mulf %209, %211 : vector<8x512xf32>
    %213 = arith.addf %181, %212 : vector<8x512xf32>
    %c42 = arith.constant 42 : index
    %c0_150 = arith.constant 0 : index
    %c0_151 = arith.constant 0 : index
    %214 = vector.load %arg1[%c42, %c0_150, %c0_151] : memref<49x8x8xf32, #tpu.memory_space<vmem>>, vector<1x8x8xf32>
    %215 = vector.shape_cast %214 : vector<1x8x8xf32> to vector<8x8xf32>
    %cst_152 = arith.constant dense<0.000000e+00> : vector<8x512xf32>
    %216 = tpu.matmul %215, %4, %cst_152 {dimension_numbers = #tpu.dot_dimension_numbers<[1], [0], [0], [1], [0, 0, 1, 1], [], []>, precision = #tpu.contract_precision<fp32>} : vector<8x8xf32>, vector<8x512xf32>, vector<8x512xf32> -> vector<8x512xf32>
    %c43 = arith.constant 43 : index
    %c0_153 = arith.constant 0 : index
    %c0_154 = arith.constant 0 : index
    %217 = vector.load %arg1[%c43, %c0_153, %c0_154] : memref<49x8x8xf32, #tpu.memory_space<vmem>>, vector<1x8x8xf32>
    %218 = vector.shape_cast %217 : vector<1x8x8xf32> to vector<8x8xf32>
    %cst_155 = arith.constant dense<0.000000e+00> : vector<8x512xf32>
    %219 = tpu.matmul %218, %8, %cst_155 {dimension_numbers = #tpu.dot_dimension_numbers<[1], [0], [0], [1], [0, 0, 1, 1], [], []>, precision = #tpu.contract_precision<fp32>} : vector<8x8xf32>, vector<8x512xf32>, vector<8x512xf32> -> vector<8x512xf32>
    %220 = arith.addf %216, %219 : vector<8x512xf32>
    %c44 = arith.constant 44 : index
    %c0_156 = arith.constant 0 : index
    %c0_157 = arith.constant 0 : index
    %221 = vector.load %arg1[%c44, %c0_156, %c0_157] : memref<49x8x8xf32, #tpu.memory_space<vmem>>, vector<1x8x8xf32>
    %222 = vector.shape_cast %221 : vector<1x8x8xf32> to vector<8x8xf32>
    %cst_158 = arith.constant dense<0.000000e+00> : vector<8x512xf32>
    %223 = tpu.matmul %222, %12, %cst_158 {dimension_numbers = #tpu.dot_dimension_numbers<[1], [0], [0], [1], [0, 0, 1, 1], [], []>, precision = #tpu.contract_precision<fp32>} : vector<8x8xf32>, vector<8x512xf32>, vector<8x512xf32> -> vector<8x512xf32>
    %224 = arith.addf %220, %223 : vector<8x512xf32>
    %c45 = arith.constant 45 : index
    %c0_159 = arith.constant 0 : index
    %c0_160 = arith.constant 0 : index
    %225 = vector.load %arg1[%c45, %c0_159, %c0_160] : memref<49x8x8xf32, #tpu.memory_space<vmem>>, vector<1x8x8xf32>
    %226 = vector.shape_cast %225 : vector<1x8x8xf32> to vector<8x8xf32>
    %cst_161 = arith.constant dense<0.000000e+00> : vector<8x512xf32>
    %227 = tpu.matmul %226, %0, %cst_161 {dimension_numbers = #tpu.dot_dimension_numbers<[1], [0], [0], [1], [0, 0, 1, 1], [], []>, precision = #tpu.contract_precision<fp32>} : vector<8x8xf32>, vector<8x512xf32>, vector<8x512xf32> -> vector<8x512xf32>
    %228 = arith.addf %224, %227 : vector<8x512xf32>
    %c46 = arith.constant 46 : index
    %c0_162 = arith.constant 0 : index
    %c0_163 = arith.constant 0 : index
    %229 = vector.load %arg1[%c46, %c0_162, %c0_163] : memref<49x8x8xf32, #tpu.memory_space<vmem>>, vector<1x8x8xf32>
    %230 = vector.shape_cast %229 : vector<1x8x8xf32> to vector<8x8xf32>
    %cst_164 = arith.constant dense<0.000000e+00> : vector<8x512xf32>
    %231 = tpu.matmul %230, %16, %cst_164 {dimension_numbers = #tpu.dot_dimension_numbers<[1], [0], [0], [1], [0, 0, 1, 1], [], []>, precision = #tpu.contract_precision<fp32>} : vector<8x8xf32>, vector<8x512xf32>, vector<8x512xf32> -> vector<8x512xf32>
    %232 = arith.addf %228, %231 : vector<8x512xf32>
    %c47 = arith.constant 47 : index
    %c0_165 = arith.constant 0 : index
    %c0_166 = arith.constant 0 : index
    %233 = vector.load %arg1[%c47, %c0_165, %c0_166] : memref<49x8x8xf32, #tpu.memory_space<vmem>>, vector<1x8x8xf32>
    %234 = vector.shape_cast %233 : vector<1x8x8xf32> to vector<8x8xf32>
    %cst_167 = arith.constant dense<0.000000e+00> : vector<8x512xf32>
    %235 = tpu.matmul %234, %20, %cst_167 {dimension_numbers = #tpu.dot_dimension_numbers<[1], [0], [0], [1], [0, 0, 1, 1], [], []>, precision = #tpu.contract_precision<fp32>} : vector<8x8xf32>, vector<8x512xf32>, vector<8x512xf32> -> vector<8x512xf32>
    %236 = arith.addf %232, %235 : vector<8x512xf32>
    %c48 = arith.constant 48 : index
    %c0_168 = arith.constant 0 : index
    %c0_169 = arith.constant 0 : index
    %237 = vector.load %arg1[%c48, %c0_168, %c0_169] : memref<49x8x8xf32, #tpu.memory_space<vmem>>, vector<1x8x8xf32>
    %238 = vector.shape_cast %237 : vector<1x8x8xf32> to vector<8x8xf32>
    %cst_170 = arith.constant dense<0.000000e+00> : vector<8x512xf32>
    %239 = tpu.matmul %238, %24, %cst_170 {dimension_numbers = #tpu.dot_dimension_numbers<[1], [0], [0], [1], [0, 0, 1, 1], [], []>, precision = #tpu.contract_precision<fp32>} : vector<8x8xf32>, vector<8x512xf32>, vector<8x512xf32> -> vector<8x512xf32>
    %240 = arith.addf %236, %239 : vector<8x512xf32>
    %c464_i32 = arith.constant 464 : i32
    %241 = tpu.dynamic_rotate %240 by %c464_i32 dim 1 : vector<8x512xf32>, i32 -> vector<8x512xf32>
    %c6_171 = arith.constant 6 : index
    %c0_172 = arith.constant 0 : index
    %242 = vector.load %arg8[%c6_171, %c0_172] : memref<7x512xf32, #tpu.memory_space<vmem>>, vector<1x512xf32>
    %243 = vector.broadcast %242 : vector<1x512xf32> to vector<8x512xf32>
    %244 = arith.mulf %241, %243 : vector<8x512xf32>
    %245 = arith.addf %213, %244 : vector<8x512xf32>
    %cst_173 = arith.constant dense<0.000000e+00> : vector<8xf32>
    %246 = vector.multi_reduction <add>, %245, %cst_173 [1] : vector<8x512xf32> to vector<8xf32>
    %247 = vector.shape_cast %246 : vector<8xf32> to vector<8x1xf32>
    %cst_174 = arith.constant 0.001953125 : f32
    %248 = vector.broadcast %cst_174 : f32 to vector<8x1xf32>
    %249 = arith.mulf %247, %248 : vector<8x1xf32>
    %250 = arith.mulf %245, %245 : vector<8x512xf32>
    %cst_175 = arith.constant dense<0.000000e+00> : vector<8xf32>
    %251 = vector.multi_reduction <add>, %250, %cst_175 [1] : vector<8x512xf32> to vector<8xf32>
    %252 = vector.shape_cast %251 : vector<8xf32> to vector<8x1xf32>
    %cst_176 = arith.constant 0.001953125 : f32
    %253 = vector.broadcast %cst_176 : f32 to vector<8x1xf32>
    %254 = arith.mulf %252, %253 : vector<8x1xf32>
    %255 = arith.mulf %249, %249 : vector<8x1xf32>
    %256 = arith.subf %254, %255 : vector<8x1xf32>
    %c0_177 = arith.constant 0 : index
    %c0_178 = arith.constant 0 : index
    %257 = vector.load %arg2[%c0_177, %c0_178] : memref<8x1xf32, #tpu.memory_space<vmem>>, vector<8x1xf32>
    %cst_179 = arith.constant 9.99999974E-6 : f32
    %258 = vector.broadcast %cst_179 : f32 to vector<8x1xf32>
    %259 = arith.addf %256, %258 : vector<8x1xf32>
    %260 = math.rsqrt %259 : vector<8x1xf32>
    %261 = arith.mulf %257, %260 : vector<8x1xf32>
    %262 = vector.broadcast %249 : vector<8x1xf32> to vector<8x512xf32>
    %263 = arith.subf %245, %262 : vector<8x512xf32>
    %264 = vector.broadcast %261 : vector<8x1xf32> to vector<8x512xf32>
    %265 = arith.mulf %263, %264 : vector<8x512xf32>
    %c0_180 = arith.constant 0 : index
    %c0_181 = arith.constant 0 : index
    %266 = vector.load %arg3[%c0_180, %c0_181] : memref<8x1xf32, #tpu.memory_space<vmem>>, vector<8x1xf32>
    %267 = vector.broadcast %266 : vector<8x1xf32> to vector<8x512xf32>
    %268 = arith.addf %265, %267 : vector<8x512xf32>
    %cst_182 = arith.constant 0.000000e+00 : f32
    %269 = vector.broadcast %cst_182 : f32 to vector<8x512xf32>
    %270 = arith.maximumf %268, %269 : vector<8x512xf32>
    %c3_i32_183 = arith.constant 3 : i32
    %271 = tpu.dynamic_rotate %270 by %c3_i32_183 dim 1 : vector<8x512xf32>, i32 -> vector<8x512xf32>
    %c0_184 = arith.constant 0 : index
    %c0_185 = arith.constant 0 : index
    %272 = vector.load %arg7[%c0_184, %c0_185] : memref<7x512xf32, #tpu.memory_space<vmem>>, vector<1x512xf32>
    %273 = vector.broadcast %272 : vector<1x512xf32> to vector<8x512xf32>
    %274 = arith.mulf %271, %273 : vector<8x512xf32>
    %275 = arith.maximumf %270, %274 : vector<8x512xf32>
    %c2_i32_186 = arith.constant 2 : i32
    %276 = tpu.dynamic_rotate %270 by %c2_i32_186 dim 1 : vector<8x512xf32>, i32 -> vector<8x512xf32>
    %c1_187 = arith.constant 1 : index
    %c0_188 = arith.constant 0 : index
    %277 = vector.load %arg7[%c1_187, %c0_188] : memref<7x512xf32, #tpu.memory_space<vmem>>, vector<1x512xf32>
    %278 = vector.broadcast %277 : vector<1x512xf32> to vector<8x512xf32>
    %279 = arith.mulf %276, %278 : vector<8x512xf32>
    %280 = arith.maximumf %275, %279 : vector<8x512xf32>
    %c1_i32_189 = arith.constant 1 : i32
    %281 = tpu.dynamic_rotate %270 by %c1_i32_189 dim 1 : vector<8x512xf32>, i32 -> vector<8x512xf32>
    %c2_190 = arith.constant 2 : index
    %c0_191 = arith.constant 0 : index
    %282 = vector.load %arg7[%c2_190, %c0_191] : memref<7x512xf32, #tpu.memory_space<vmem>>, vector<1x512xf32>
    %283 = vector.broadcast %282 : vector<1x512xf32> to vector<8x512xf32>
    %284 = arith.mulf %281, %283 : vector<8x512xf32>
    %285 = arith.maximumf %280, %284 : vector<8x512xf32>
    %c511_i32_192 = arith.constant 511 : i32
    %286 = tpu.dynamic_rotate %270 by %c511_i32_192 dim 1 : vector<8x512xf32>, i32 -> vector<8x512xf32>
    %c4_193 = arith.constant 4 : index
    %c0_194 = arith.constant 0 : index
    %287 = vector.load %arg7[%c4_193, %c0_194] : memref<7x512xf32, #tpu.memory_space<vmem>>, vector<1x512xf32>
    %288 = vector.broadcast %287 : vector<1x512xf32> to vector<8x512xf32>
    %289 = arith.mulf %286, %288 : vector<8x512xf32>
    %290 = arith.maximumf %285, %289 : vector<8x512xf32>
    %c510_i32_195 = arith.constant 510 : i32
    %291 = tpu.dynamic_rotate %270 by %c510_i32_195 dim 1 : vector<8x512xf32>, i32 -> vector<8x512xf32>
    %c5_196 = arith.constant 5 : index
    %c0_197 = arith.constant 0 : index
    %292 = vector.load %arg7[%c5_196, %c0_197] : memref<7x512xf32, #tpu.memory_space<vmem>>, vector<1x512xf32>
    %293 = vector.broadcast %292 : vector<1x512xf32> to vector<8x512xf32>
    %294 = arith.mulf %291, %293 : vector<8x512xf32>
    %295 = arith.maximumf %290, %294 : vector<8x512xf32>
    %c509_i32_198 = arith.constant 509 : i32
    %296 = tpu.dynamic_rotate %270 by %c509_i32_198 dim 1 : vector<8x512xf32>, i32 -> vector<8x512xf32>
    %c6_199 = arith.constant 6 : index
    %c0_200 = arith.constant 0 : index
    %297 = vector.load %arg7[%c6_199, %c0_200] : memref<7x512xf32, #tpu.memory_space<vmem>>, vector<1x512xf32>
    %298 = vector.broadcast %297 : vector<1x512xf32> to vector<8x512xf32>
    %299 = arith.mulf %296, %298 : vector<8x512xf32>
    %300 = arith.maximumf %295, %299 : vector<8x512xf32>
    %c48_i32_201 = arith.constant 48 : i32
    %301 = tpu.dynamic_rotate %300 by %c48_i32_201 dim 1 : vector<8x512xf32>, i32 -> vector<8x512xf32>
    %c0_202 = arith.constant 0 : index
    %c0_203 = arith.constant 0 : index
    %302 = vector.load %arg8[%c0_202, %c0_203] : memref<7x512xf32, #tpu.memory_space<vmem>>, vector<1x512xf32>
    %303 = vector.broadcast %302 : vector<1x512xf32> to vector<8x512xf32>
    %304 = arith.mulf %301, %303 : vector<8x512xf32>
    %305 = arith.maximumf %300, %304 : vector<8x512xf32>
    %c32_i32_204 = arith.constant 32 : i32
    %306 = tpu.dynamic_rotate %300 by %c32_i32_204 dim 1 : vector<8x512xf32>, i32 -> vector<8x512xf32>
    %c1_205 = arith.constant 1 : index
    %c0_206 = arith.constant 0 : index
    %307 = vector.load %arg8[%c1_205, %c0_206] : memref<7x512xf32, #tpu.memory_space<vmem>>, vector<1x512xf32>
    %308 = vector.broadcast %307 : vector<1x512xf32> to vector<8x512xf32>
    %309 = arith.mulf %306, %308 : vector<8x512xf32>
    %310 = arith.maximumf %305, %309 : vector<8x512xf32>
    %c16_i32_207 = arith.constant 16 : i32
    %311 = tpu.dynamic_rotate %300 by %c16_i32_207 dim 1 : vector<8x512xf32>, i32 -> vector<8x512xf32>
    %c2_208 = arith.constant 2 : index
    %c0_209 = arith.constant 0 : index
    %312 = vector.load %arg8[%c2_208, %c0_209] : memref<7x512xf32, #tpu.memory_space<vmem>>, vector<1x512xf32>
    %313 = vector.broadcast %312 : vector<1x512xf32> to vector<8x512xf32>
    %314 = arith.mulf %311, %313 : vector<8x512xf32>
    %315 = arith.maximumf %310, %314 : vector<8x512xf32>
    %c496_i32_210 = arith.constant 496 : i32
    %316 = tpu.dynamic_rotate %300 by %c496_i32_210 dim 1 : vector<8x512xf32>, i32 -> vector<8x512xf32>
    %c4_211 = arith.constant 4 : index
    %c0_212 = arith.constant 0 : index
    %317 = vector.load %arg8[%c4_211, %c0_212] : memref<7x512xf32, #tpu.memory_space<vmem>>, vector<1x512xf32>
    %318 = vector.broadcast %317 : vector<1x512xf32> to vector<8x512xf32>
    %319 = arith.mulf %316, %318 : vector<8x512xf32>
    %320 = arith.maximumf %315, %319 : vector<8x512xf32>
    %c480_i32_213 = arith.constant 480 : i32
    %321 = tpu.dynamic_rotate %300 by %c480_i32_213 dim 1 : vector<8x512xf32>, i32 -> vector<8x512xf32>
    %c5_214 = arith.constant 5 : index
    %c0_215 = arith.constant 0 : index
    %322 = vector.load %arg8[%c5_214, %c0_215] : memref<7x512xf32, #tpu.memory_space<vmem>>, vector<1x512xf32>
    %323 = vector.broadcast %322 : vector<1x512xf32> to vector<8x512xf32>
    %324 = arith.mulf %321, %323 : vector<8x512xf32>
    %325 = arith.maximumf %320, %324 : vector<8x512xf32>
    %c464_i32_216 = arith.constant 464 : i32
    %326 = tpu.dynamic_rotate %300 by %c464_i32_216 dim 1 : vector<8x512xf32>, i32 -> vector<8x512xf32>
    %c6_217 = arith.constant 6 : index
    %c0_218 = arith.constant 0 : index
    %327 = vector.load %arg8[%c6_217, %c0_218] : memref<7x512xf32, #tpu.memory_space<vmem>>, vector<1x512xf32>
    %328 = vector.broadcast %327 : vector<1x512xf32> to vector<8x512xf32>
    %329 = arith.mulf %326, %328 : vector<8x512xf32>
    %330 = arith.maximumf %325, %329 : vector<8x512xf32>
    %c2_219 = arith.constant 2 : index
    %c0_220 = arith.constant 0 : index
    %331 = vector.load %arg7[%c2_219, %c0_220] : memref<7x512xf32, #tpu.memory_space<vmem>>, vector<1x512xf32>
    %c1_i32_221 = arith.constant 1 : i32
    %332 = tpu.dynamic_rotate %330 by %c1_i32_221 dim 1 : vector<8x512xf32>, i32 -> vector<8x512xf32>
    %333 = vector.broadcast %331 : vector<1x512xf32> to vector<8x512xf32>
    %334 = arith.mulf %332, %333 : vector<8x512xf32>
    %c4_222 = arith.constant 4 : index
    %c0_223 = arith.constant 0 : index
    %335 = vector.load %arg7[%c4_222, %c0_223] : memref<7x512xf32, #tpu.memory_space<vmem>>, vector<1x512xf32>
    %c511_i32_224 = arith.constant 511 : i32
    %336 = tpu.dynamic_rotate %330 by %c511_i32_224 dim 1 : vector<8x512xf32>, i32 -> vector<8x512xf32>
    %337 = vector.broadcast %335 : vector<1x512xf32> to vector<8x512xf32>
    %338 = arith.mulf %336, %337 : vector<8x512xf32>
    %cst_225 = arith.constant 0.000000e+00 : f32
    %339 = vector.broadcast %cst_225 : f32 to vector<8x512xf32>
    %c0_226 = arith.constant 0 : index
    %c0_227 = arith.constant 0 : index
    %c0_228 = arith.constant 0 : index
    %340 = vector.load %arg4[%c0_226, %c0_227, %c0_228] : memref<9x8x8xf32, #tpu.memory_space<vmem>>, vector<1x8x8xf32>
    %341 = vector.shape_cast %340 : vector<1x8x8xf32> to vector<8x8xf32>
    %cst_229 = arith.constant dense<0.000000e+00> : vector<8x512xf32>
    %342 = tpu.matmul %341, %334, %cst_229 {dimension_numbers = #tpu.dot_dimension_numbers<[1], [0], [0], [1], [0, 0, 1, 1], [], []>, precision = #tpu.contract_precision<fp32>} : vector<8x8xf32>, vector<8x512xf32>, vector<8x512xf32> -> vector<8x512xf32>
    %c1_230 = arith.constant 1 : index
    %c0_231 = arith.constant 0 : index
    %c0_232 = arith.constant 0 : index
    %343 = vector.load %arg4[%c1_230, %c0_231, %c0_232] : memref<9x8x8xf32, #tpu.memory_space<vmem>>, vector<1x8x8xf32>
    %344 = vector.shape_cast %343 : vector<1x8x8xf32> to vector<8x8xf32>
    %cst_233 = arith.constant dense<0.000000e+00> : vector<8x512xf32>
    %345 = tpu.matmul %344, %330, %cst_233 {dimension_numbers = #tpu.dot_dimension_numbers<[1], [0], [0], [1], [0, 0, 1, 1], [], []>, precision = #tpu.contract_precision<fp32>} : vector<8x8xf32>, vector<8x512xf32>, vector<8x512xf32> -> vector<8x512xf32>
    %346 = arith.addf %342, %345 : vector<8x512xf32>
    %c2_234 = arith.constant 2 : index
    %c0_235 = arith.constant 0 : index
    %c0_236 = arith.constant 0 : index
    %347 = vector.load %arg4[%c2_234, %c0_235, %c0_236] : memref<9x8x8xf32, #tpu.memory_space<vmem>>, vector<1x8x8xf32>
    %348 = vector.shape_cast %347 : vector<1x8x8xf32> to vector<8x8xf32>
    %cst_237 = arith.constant dense<0.000000e+00> : vector<8x512xf32>
    %349 = tpu.matmul %348, %338, %cst_237 {dimension_numbers = #tpu.dot_dimension_numbers<[1], [0], [0], [1], [0, 0, 1, 1], [], []>, precision = #tpu.contract_precision<fp32>} : vector<8x8xf32>, vector<8x512xf32>, vector<8x512xf32> -> vector<8x512xf32>
    %350 = arith.addf %346, %349 : vector<8x512xf32>
    %c16_i32_238 = arith.constant 16 : i32
    %351 = tpu.dynamic_rotate %350 by %c16_i32_238 dim 1 : vector<8x512xf32>, i32 -> vector<8x512xf32>
    %c2_239 = arith.constant 2 : index
    %c0_240 = arith.constant 0 : index
    %352 = vector.load %arg8[%c2_239, %c0_240] : memref<7x512xf32, #tpu.memory_space<vmem>>, vector<1x512xf32>
    %353 = vector.broadcast %352 : vector<1x512xf32> to vector<8x512xf32>
    %354 = arith.mulf %351, %353 : vector<8x512xf32>
    %355 = arith.addf %339, %354 : vector<8x512xf32>
    %c3_241 = arith.constant 3 : index
    %c0_242 = arith.constant 0 : index
    %c0_243 = arith.constant 0 : index
    %356 = vector.load %arg4[%c3_241, %c0_242, %c0_243] : memref<9x8x8xf32, #tpu.memory_space<vmem>>, vector<1x8x8xf32>
    %357 = vector.shape_cast %356 : vector<1x8x8xf32> to vector<8x8xf32>
    %cst_244 = arith.constant dense<0.000000e+00> : vector<8x512xf32>
    %358 = tpu.matmul %357, %334, %cst_244 {dimension_numbers = #tpu.dot_dimension_numbers<[1], [0], [0], [1], [0, 0, 1, 1], [], []>, precision = #tpu.contract_precision<fp32>} : vector<8x8xf32>, vector<8x512xf32>, vector<8x512xf32> -> vector<8x512xf32>
    %c4_245 = arith.constant 4 : index
    %c0_246 = arith.constant 0 : index
    %c0_247 = arith.constant 0 : index
    %359 = vector.load %arg4[%c4_245, %c0_246, %c0_247] : memref<9x8x8xf32, #tpu.memory_space<vmem>>, vector<1x8x8xf32>
    %360 = vector.shape_cast %359 : vector<1x8x8xf32> to vector<8x8xf32>
    %cst_248 = arith.constant dense<0.000000e+00> : vector<8x512xf32>
    %361 = tpu.matmul %360, %330, %cst_248 {dimension_numbers = #tpu.dot_dimension_numbers<[1], [0], [0], [1], [0, 0, 1, 1], [], []>, precision = #tpu.contract_precision<fp32>} : vector<8x8xf32>, vector<8x512xf32>, vector<8x512xf32> -> vector<8x512xf32>
    %362 = arith.addf %358, %361 : vector<8x512xf32>
    %c5_249 = arith.constant 5 : index
    %c0_250 = arith.constant 0 : index
    %c0_251 = arith.constant 0 : index
    %363 = vector.load %arg4[%c5_249, %c0_250, %c0_251] : memref<9x8x8xf32, #tpu.memory_space<vmem>>, vector<1x8x8xf32>
    %364 = vector.shape_cast %363 : vector<1x8x8xf32> to vector<8x8xf32>
    %cst_252 = arith.constant dense<0.000000e+00> : vector<8x512xf32>
    %365 = tpu.matmul %364, %338, %cst_252 {dimension_numbers = #tpu.dot_dimension_numbers<[1], [0], [0], [1], [0, 0, 1, 1], [], []>, precision = #tpu.contract_precision<fp32>} : vector<8x8xf32>, vector<8x512xf32>, vector<8x512xf32> -> vector<8x512xf32>
    %366 = arith.addf %362, %365 : vector<8x512xf32>
    %367 = arith.addf %355, %366 : vector<8x512xf32>
    %c6_253 = arith.constant 6 : index
    %c0_254 = arith.constant 0 : index
    %c0_255 = arith.constant 0 : index
    %368 = vector.load %arg4[%c6_253, %c0_254, %c0_255] : memref<9x8x8xf32, #tpu.memory_space<vmem>>, vector<1x8x8xf32>
    %369 = vector.shape_cast %368 : vector<1x8x8xf32> to vector<8x8xf32>
    %cst_256 = arith.constant dense<0.000000e+00> : vector<8x512xf32>
    %370 = tpu.matmul %369, %334, %cst_256 {dimension_numbers = #tpu.dot_dimension_numbers<[1], [0], [0], [1], [0, 0, 1, 1], [], []>, precision = #tpu.contract_precision<fp32>} : vector<8x8xf32>, vector<8x512xf32>, vector<8x512xf32> -> vector<8x512xf32>
    %c7_257 = arith.constant 7 : index
    %c0_258 = arith.constant 0 : index
    %c0_259 = arith.constant 0 : index
    %371 = vector.load %arg4[%c7_257, %c0_258, %c0_259] : memref<9x8x8xf32, #tpu.memory_space<vmem>>, vector<1x8x8xf32>
    %372 = vector.shape_cast %371 : vector<1x8x8xf32> to vector<8x8xf32>
    %cst_260 = arith.constant dense<0.000000e+00> : vector<8x512xf32>
    %373 = tpu.matmul %372, %330, %cst_260 {dimension_numbers = #tpu.dot_dimension_numbers<[1], [0], [0], [1], [0, 0, 1, 1], [], []>, precision = #tpu.contract_precision<fp32>} : vector<8x8xf32>, vector<8x512xf32>, vector<8x512xf32> -> vector<8x512xf32>
    %374 = arith.addf %370, %373 : vector<8x512xf32>
    %c8_261 = arith.constant 8 : index
    %c0_262 = arith.constant 0 : index
    %c0_263 = arith.constant 0 : index
    %375 = vector.load %arg4[%c8_261, %c0_262, %c0_263] : memref<9x8x8xf32, #tpu.memory_space<vmem>>, vector<1x8x8xf32>
    %376 = vector.shape_cast %375 : vector<1x8x8xf32> to vector<8x8xf32>
    %cst_264 = arith.constant dense<0.000000e+00> : vector<8x512xf32>
    %377 = tpu.matmul %376, %338, %cst_264 {dimension_numbers = #tpu.dot_dimension_numbers<[1], [0], [0], [1], [0, 0, 1, 1], [], []>, precision = #tpu.contract_precision<fp32>} : vector<8x8xf32>, vector<8x512xf32>, vector<8x512xf32> -> vector<8x512xf32>
    %378 = arith.addf %374, %377 : vector<8x512xf32>
    %c496_i32_265 = arith.constant 496 : i32
    %379 = tpu.dynamic_rotate %378 by %c496_i32_265 dim 1 : vector<8x512xf32>, i32 -> vector<8x512xf32>
    %c4_266 = arith.constant 4 : index
    %c0_267 = arith.constant 0 : index
    %380 = vector.load %arg8[%c4_266, %c0_267] : memref<7x512xf32, #tpu.memory_space<vmem>>, vector<1x512xf32>
    %381 = vector.broadcast %380 : vector<1x512xf32> to vector<8x512xf32>
    %382 = arith.mulf %379, %381 : vector<8x512xf32>
    %383 = arith.addf %367, %382 : vector<8x512xf32>
    %cst_268 = arith.constant dense<0.000000e+00> : vector<8xf32>
    %384 = vector.multi_reduction <add>, %383, %cst_268 [1] : vector<8x512xf32> to vector<8xf32>
    %385 = vector.shape_cast %384 : vector<8xf32> to vector<8x1xf32>
    %cst_269 = arith.constant 0.001953125 : f32
    %386 = vector.broadcast %cst_269 : f32 to vector<8x1xf32>
    %387 = arith.mulf %385, %386 : vector<8x1xf32>
    %388 = arith.mulf %383, %383 : vector<8x512xf32>
    %cst_270 = arith.constant dense<0.000000e+00> : vector<8xf32>
    %389 = vector.multi_reduction <add>, %388, %cst_270 [1] : vector<8x512xf32> to vector<8xf32>
    %390 = vector.shape_cast %389 : vector<8xf32> to vector<8x1xf32>
    %cst_271 = arith.constant 0.001953125 : f32
    %391 = vector.broadcast %cst_271 : f32 to vector<8x1xf32>
    %392 = arith.mulf %390, %391 : vector<8x1xf32>
    %393 = arith.mulf %387, %387 : vector<8x1xf32>
    %394 = arith.subf %392, %393 : vector<8x1xf32>
    %c0_272 = arith.constant 0 : index
    %c0_273 = arith.constant 0 : index
    %395 = vector.load %arg5[%c0_272, %c0_273] : memref<8x1xf32, #tpu.memory_space<vmem>>, vector<8x1xf32>
    %cst_274 = arith.constant 9.99999974E-6 : f32
    %396 = vector.broadcast %cst_274 : f32 to vector<8x1xf32>
    %397 = arith.addf %394, %396 : vector<8x1xf32>
    %398 = math.rsqrt %397 : vector<8x1xf32>
    %399 = arith.mulf %395, %398 : vector<8x1xf32>
    %400 = vector.broadcast %387 : vector<8x1xf32> to vector<8x512xf32>
    %401 = arith.subf %383, %400 : vector<8x512xf32>
    %402 = vector.broadcast %399 : vector<8x1xf32> to vector<8x512xf32>
    %403 = arith.mulf %401, %402 : vector<8x512xf32>
    %c0_275 = arith.constant 0 : index
    %c0_276 = arith.constant 0 : index
    %404 = vector.load %arg6[%c0_275, %c0_276] : memref<8x1xf32, #tpu.memory_space<vmem>>, vector<8x1xf32>
    %405 = vector.broadcast %404 : vector<8x1xf32> to vector<8x512xf32>
    %406 = arith.addf %403, %405 : vector<8x512xf32>
    %cst_277 = arith.constant 0.000000e+00 : f32
    %407 = vector.broadcast %cst_277 : f32 to vector<8x512xf32>
    %408 = arith.maximumf %406, %407 : vector<8x512xf32>
    %c1_i32_278 = arith.constant 1 : i32
    %409 = tpu.dynamic_rotate %408 by %c1_i32_278 dim 1 : vector<8x512xf32>, i32 -> vector<8x512xf32>
    %c2_279 = arith.constant 2 : index
    %c0_280 = arith.constant 0 : index
    %410 = vector.load %arg7[%c2_279, %c0_280] : memref<7x512xf32, #tpu.memory_space<vmem>>, vector<1x512xf32>
    %411 = vector.broadcast %410 : vector<1x512xf32> to vector<8x512xf32>
    %412 = arith.mulf %409, %411 : vector<8x512xf32>
    %413 = arith.maximumf %408, %412 : vector<8x512xf32>
    %c511_i32_281 = arith.constant 511 : i32
    %414 = tpu.dynamic_rotate %408 by %c511_i32_281 dim 1 : vector<8x512xf32>, i32 -> vector<8x512xf32>
    %c4_282 = arith.constant 4 : index
    %c0_283 = arith.constant 0 : index
    %415 = vector.load %arg7[%c4_282, %c0_283] : memref<7x512xf32, #tpu.memory_space<vmem>>, vector<1x512xf32>
    %416 = vector.broadcast %415 : vector<1x512xf32> to vector<8x512xf32>
    %417 = arith.mulf %414, %416 : vector<8x512xf32>
    %418 = arith.maximumf %413, %417 : vector<8x512xf32>
    %c16_i32_284 = arith.constant 16 : i32
    %419 = tpu.dynamic_rotate %418 by %c16_i32_284 dim 1 : vector<8x512xf32>, i32 -> vector<8x512xf32>
    %c2_285 = arith.constant 2 : index
    %c0_286 = arith.constant 0 : index
    %420 = vector.load %arg8[%c2_285, %c0_286] : memref<7x512xf32, #tpu.memory_space<vmem>>, vector<1x512xf32>
    %421 = vector.broadcast %420 : vector<1x512xf32> to vector<8x512xf32>
    %422 = arith.mulf %419, %421 : vector<8x512xf32>
    %423 = arith.maximumf %418, %422 : vector<8x512xf32>
    %c496_i32_287 = arith.constant 496 : i32
    %424 = tpu.dynamic_rotate %418 by %c496_i32_287 dim 1 : vector<8x512xf32>, i32 -> vector<8x512xf32>
    %c4_288 = arith.constant 4 : index
    %c0_289 = arith.constant 0 : index
    %425 = vector.load %arg8[%c4_288, %c0_289] : memref<7x512xf32, #tpu.memory_space<vmem>>, vector<1x512xf32>
    %426 = vector.broadcast %425 : vector<1x512xf32> to vector<8x512xf32>
    %427 = arith.mulf %424, %426 : vector<8x512xf32>
    %428 = arith.maximumf %423, %427 : vector<8x512xf32>
    %c0_290 = arith.constant 0 : index
    %c0_291 = arith.constant 0 : index
    %429 = vector.load %arg9[%c0_290, %c0_291] : memref<8x512xf32, #tpu.memory_space<vmem>>, vector<8x512xf32>
    tpu.vector_store %arg9[%c0_290, %c0_291], %428 {strides = array<i32>} : memref<8x512xf32, #tpu.memory_space<vmem>>, vector<8x512xf32>,
    return
  }
}

</mosaic_0001>

<bundles_post_ra>
// kernel: preconvnet_pallas.1
= control target key start
LH: loop header
LB: loop body
LE: loop exit
PB: predicated region body
PF: predicated region fallthrough
CT: control target
= control target key end

     0   :  { %v61180_v2 = vmov 0.0   ;;  %s56866_s13 = smov 2   ;;  %s56867_s18 = smov 3   ;;  %vm280_vm0 = vcmask 64512   ;;  %v45_v7 = vlaneseq  ;;  %s61164_s0 = inlined_call_operand.vmem [shape: f32[8,512], index: 0, kind: input, shape index: {}]   ;;  %s61165_s1 = inlined_call_operand.vmem [shape: f32[49,8,8], index: 1, kind: input, shape index: {}]   ;;  %s61166_s7 = inlined_call_operand.vmem [shape: f32[7,512], index: 7, kind: input, shape index: {}]   ;;  %s61167_s8 = inlined_call_operand.vmem [shape: f32[7,512], index: 8, kind: input, shape index: {}]   ;;  %s61168_s3 = inlined_call_operand.vmem [shape: f32[8,1], index: 3, kind: input, shape index: {}]   ;;  %s61169_s2 = inlined_call_operand.vmem [shape: f32[8,1], index: 2, kind: input, shape index: {}]   ;;  %s61170_s4 = inlined_call_operand.vmem [shape: f32[9,8,8], index: 4, kind: input, shape index: {}]   ;;  %s61171_s6 = inlined_call_operand.vmem [shape: f32[8,1], index: 6, kind: input, shape index: {}]   ;;  %s61172_s5 = inlined_call_operand.vmem [shape: f32[8,1], index: 5, kind: input, shape index: {}]   ;;  %s61173_s9 = inlined_call_operand.vmem [shape: f32[8,512], index: 9, kind: output, shape index: {}]  }
   0x1   :  { %v56932_v0 = vld [vmem:[%s61164_s0 + $0x10] sm:$0xff]  ;;  %v56937_v1 = vld [vmem:[%s61164_s0] sm:$0xff]  ;;  %350 = vmatprep.mubr.f32.mxu0 %v61180_v2  ;;  %815 = vmatprep.mubr.f32.mxu1 %v61180_v2  ;;  %v56948_v3 = vld [vmem:[%s61164_s0 + $0x18] sm:$0xff]  ;;  %s56869_s19 = smov 127   ;;  %s56870_s22 = smov 126  }
   0x2   :  { %83 = vrot.lane.b32.xlu1 %v56932_v0, %s56866_s13  ;;  %79 = vrot.lane.b32.xlu0 %v56937_v1, %s56866_s13  ;;  %v56953_v4 = vld [vmem:[%s61164_s0 + $0x8] sm:$0xff]  ;;  %s56868_s0 = smov 1   ;;  %v54_v9 = vshrl.u32 %v45_v7, 7  ;;  %v57000_v11 = vand.u32 127, %v45_v7  ;;  %s56871_s29 = smov 125  }
   0x3   :  { %v55432_v5 = vld [vmem:[%s61165_s1 + $0x8] sm:$0xff]  ;;  %s56872_s24 = smov 48   ;;  %s56873_s21 = smov 32  }
   0x4   :  { %v282_v6 = vsel %vm280_vm0, %v55432_v5, 0  ;;  %61432 = vst [vmem:[#allocation2_spill] sm:$0xff] %v57000_v11  ;;  %v57002_v12 = vsub.s32 0, %v54_v9  ;;  %v57004_v13 = vsub.s32 3, %v54_v9  ;;  %v57006_v14 = vsub.s32 1, %v54_v9  ;;  %s56874_s20 = smov 16  }
   0x5   :  { %v56987_v8 = vand.u32 4294901760, %v282_v6  ;;  %v57008_v15 = vsub.s32 2, %v54_v9  ;;  %v55427_v16 = vld [vmem:[%s61166_s7 + $0x1] ss:$8 sm:$0xf]  ;;  %vm87_vm1 = vcmp.lt.s32.totalorder %v57000_v11, 2 }
   0x6   :  { %85 = vrot.lane.b32.xlu1 %v56948_v3, %s56866_s13  ;;  %81 = vrot.lane.b32.xlu0 %v56953_v4, %s56866_s13  ;;  %61433 = vst [vmem:[#allocation3_spill] sm:$0xff] %v57002_v12  ;;  %61434 = vst [vmem:[#allocation4_spill] sm:$0xff] %v57004_v13  ;;  %v57018_v20 = vrot.slane %v55427_v16, %v57002_v12  ;;  %v57021_v21 = vrot.slane %v55427_v16, %v57004_v13  ;;  %v36_v58 = vld [vmem:[%s61166_s7] ss:$8 sm:$0xf]  ;;  %vm47_vm2 = vcmp.lt.s32.totalorder %v57000_v11, 3 }
   0x7   :  { %v56994_v10 = vsub.f32 %v282_v6, %v56987_v8  ;;  %61435 = vst [vmem:[#allocation5_spill] sm:$0xff] %v57006_v14  ;;  %61436 = vst [vmem:[#allocation6_spill] sm:$0xff] %v57008_v15  ;;  %v57024_v22 = vrot.slane %v55427_v16, %v57006_v14  ;;  %v57027_v23 = vrot.slane %v55427_v16, %v57008_v15  ;;  %vm127_vm3 = vcmp.lt.s32.totalorder %v57000_v11, 1  ;;  %s56875_s23 = smov 112   ;;  %s56876_s26 = smov 96  }
   0x8   :  { %61437 = vst [vmem:[#allocation7_spill] sm:$0xff] %v57018_v20  ;;  %61438 = vst [vmem:[#allocation8_spill] sm:$0xff] %v57021_v21  ;;  %v57116_v61 = vrot.slane %v36_v58, %v57006_v14  ;;  %v57122_v63 = vrot.slane %v36_v58, %v57004_v13  ;;  %v57136_v9 = vrot.slane %v36_v58, %v57002_v12  ;;  %vm167_vm4 = vcmp.lt.s32.totalorder %v57000_v11, 127 }
   0x9   :  { %v57014_v17 = vand.u32 4294901760, %v56994_v10  ;;  %61439 = vst [vmem:[#allocation9_spill] sm:$0xff] %v57024_v22  ;;  %61440 = vst [vmem:[#allocation10_spill] sm:$0xff] %v57027_v23  ;;  %v57141_v16 = vrot.slane %v36_v58, %v57008_v15  ;;  %vm207_vm5 = vcmp.lt.s32.totalorder %v57000_v11, 126  ;;  %vm247_vm6 = vcmp.lt.s32.totalorder %v57000_v11, 125 }
   0xa   :  { %39 = vrot.lane.b32.xlu1 %v56953_v4, %s56867_s18  ;;  %37 = vrot.lane.b32.xlu0 %v56937_v1, %s56867_s18  ;;  %61457 = vst [vmem:[#allocation27_spill] sm:$0xff] %v57116_v61  ;;  %61458 = vst [vmem:[#allocation28_spill] sm:$0xff] %v57122_v63 }
   0xb   :  { %v354_v24 = vsub.f32 %v56994_v10, %v57014_v17  ;;  %61459 = vst [vmem:[#allocation29_spill] sm:$0xff] %v57136_v9  ;;  %61460 = vst [vmem:[#allocation30_spill] sm:$0xff] %v57141_v16 }
   0xd   :  { %v355_v35 = vand.u32 4294901760, %v354_v24 }
   0xe   :  { %43 = vrot.lane.b32.xlu1 %v56948_v3, %s56867_s18  ;;  %41 = vrot.lane.b32.xlu0 %v56932_v0, %s56867_s18 }
  0x12   :  { %121 = vrot.lane.b32.xlu1 %v56953_v4, %s56868_s0  ;;  %119 = vrot.lane.b32.xlu0 %v56937_v1, %s56868_s0 }
  0x16   :  { %125 = vrot.lane.b32.xlu1 %v56948_v3, %s56868_s0  ;;  %123 = vrot.lane.b32.xlu0 %v56932_v0, %s56868_s0 }
  0x1a   :  { %163 = vrot.lane.b32.xlu1 %v56932_v0, %s56869_s19  ;;  %161 = vrot.lane.b32.xlu0 %v56953_v4, %s56869_s19 }
  0x1e   :  { %165 = vrot.lane.b32.xlu1 %v56948_v3, %s56869_s19  ;;  %159 = vrot.lane.b32.xlu0 %v56937_v1, %s56869_s19 }
  0x22   :  { %203 = vrot.lane.b32.xlu1 %v56932_v0, %s56870_s22  ;;  %201 = vrot.lane.b32.xlu0 %v56953_v4, %s56870_s22 }
  0x26   :  { %205 = vrot.lane.b32.xlu1 %v56948_v3, %s56870_s22  ;;  %199 = vrot.lane.b32.xlu0 %v56937_v1, %s56870_s22 }
  0x2a   :  { %243 = vrot.lane.b32.xlu1 %v56932_v0, %s56871_s29  ;;  %241 = vrot.lane.b32.xlu0 %v56953_v4, %s56871_s29 }
  0x2e   :  { %245 = vrot.lane.b32.xlu1 %v56948_v3, %s56871_s29  ;;  %239 = vrot.lane.b32.xlu0 %v56937_v1, %s56871_s29 }
  0x74   :  { %v84_v18 = vpop.permute.xlu1 %83  ;;  %v80_v19 = vpop.permute.xlu0 %79 }
  0x78   :  { %v86_v25 = vpop.permute.xlu1 %85  ;;  %v82_v26 = vpop.permute.xlu0 %81 }
  0x79   :  { %v88_v27 = vsel %vm87_vm1, %v84_v18, %v86_v25  ;;  %v91_v28 = vsel %vm87_vm1, %v86_v25, %v80_v19  ;;  %v89_v29 = vsel %vm87_vm1, %v82_v26, %v84_v18  ;;  %v90_v30 = vsel %vm87_vm1, %v80_v19, %v82_v26  ;;  %v277_v18 = vld [vmem:[%s61165_s1] sm:$0xff] }
  0x7a   :  { %v113_v31 = vmul.f32 %v57018_v20, %v91_v28  ;;  %v116_v32 = vmul.f32 %v57021_v21, %v88_v27  ;;  %v114_v33 = vmul.f32 %v57024_v22, %v90_v30  ;;  %v115_v34 = vmul.f32 %v57027_v23, %v89_v29  ;;  %v55433_v20 = vld [vmem:[%s61165_s1 + $0x10] sm:$0xff] }
  0x7b   :  { %v1215_v27 = vsel %vm280_vm0, %v277_v18, 0 }
  0x7c   :  { %v57043_v36 = vand.u32 4294901760, %v113_v31  ;;  %v57045_v37 = vand.u32 4294901760, %v116_v32  ;;  %v57047_v38 = vand.u32 4294901760, %v114_v33  ;;  %v57049_v39 = vand.u32 4294901760, %v115_v34  ;;  %v40_v56 = vpop.permute.xlu1 %39  ;;  %v38_v57 = vpop.permute.xlu0 %37 }
  0x7d   :  { %v50_v62 = vsel %vm47_vm2, %v38_v57, %v40_v56  ;;  %v57169_v30 = vand.u32 4294901760, %v1215_v27 }
  0x7e   :  { %61441 = vst [vmem:[#allocation11_spill] sm:$0xff] %v57043_v36  ;;  %61442 = vst [vmem:[#allocation12_spill] sm:$0xff] %v57045_v37  ;;  %v57052_v40 = vsub.f32 %v113_v31, %v57043_v36  ;;  %v57055_v41 = vsub.f32 %v116_v32, %v57045_v37  ;;  %v57058_v42 = vsub.f32 %v114_v33, %v57047_v38  ;;  %285 = vmatprep.subr.mxu0 %v57047_v38 }
  0x7f   :  { %61443 = vst [vmem:[#allocation13_spill] sm:$0xff] %v57047_v38  ;;  %61444 = vst [vmem:[#allocation14_spill] sm:$0xff] %v57049_v39  ;;  %v57061_v43 = vsub.f32 %v115_v34, %v57049_v39  ;;  %750 = vmatprep.subr.mxu1 %v57045_v37  ;;  %287 = vmatpush1.msra.mxu0 %v57043_v36  ;;  %v74_v6 = vmul.f32 %v57116_v61, %v50_v62 }
  0x80   :  { %61445 = vst [vmem:[#allocation15_spill] sm:$0xff] %v57052_v40  ;;  %61446 = vst [vmem:[#allocation16_spill] sm:$0xff] %v57055_v41  ;;  %v57067_v44 = vand.u32 4294901760, %v57052_v40  ;;  %v57070_v45 = vand.u32 4294901760, %v57055_v41  ;;  %v57073_v46 = vand.u32 4294901760, %v57058_v42  ;;  %752 = vmatpush1.msra.mxu1 %v57049_v39  ;;  %356 = vmatmul.mubr.f32.vlgmr.msra.gmra.mrb[0].mxu0 %v355_v35  ;;  %v44_v59 = vpop.permute.xlu1 %43  ;;  %v42_v60 = vpop.permute.xlu0 %41 }
  0x81   :  { %61447 = vst [vmem:[#allocation17_spill] sm:$0xff] %v57058_v42  ;;  %61448 = vst [vmem:[#allocation18_spill] sm:$0xff] %v57061_v43  ;;  %v57076_v47 = vand.u32 4294901760, %v57061_v43  ;;  %821 = vmatmul.mubr.f32.vlgmr.msra.gmra.mrb[0].mxu1 %v355_v35  ;;  %436 = vmatprep.mubr.f32.mxu0 %v61180_v2  ;;  %v48_v5 = vsel %vm47_vm2, %v42_v60, %v44_v59  ;;  %v57146_v19 = vand.u32 4294901760, %v74_v6 }
  0x82   :  { %61449 = vst [vmem:[#allocation19_spill] sm:$0xff] %v57067_v44  ;;  %61450 = vst [vmem:[#allocation20_spill] sm:$0xff] %v57070_v45  ;;  %v365_v48 = vsub.f32 %v57058_v42, %v57073_v46  ;;  %v830_v49 = vsub.f32 %v57055_v41, %v57070_v45  ;;  %v371_v50 = vsub.f32 %v57052_v40, %v57067_v44  ;;  %901 = vmatprep.mubr.f32.mxu1 %v61180_v2 }
  0x83   :  { %61451 = vst [vmem:[#allocation21_spill] sm:$0xff] %v57073_v46  ;;  %61452 = vst [vmem:[#allocation22_spill] sm:$0xff] %v57076_v47  ;;  %v836_v51 = vsub.f32 %v57061_v43, %v57076_v47  ;;  %v76_v7 = vmul.f32 %v57122_v63, %v48_v5  ;;  %v49_v24 = vsel %vm47_vm2, %v40_v56, %v42_v60 }
  0x84   :  { %v57089_v52 = vand.u32 4294901760, %v365_v48  ;;  %v57091_v53 = vand.u32 4294901760, %v830_v49  ;;  %v57093_v54 = vand.u32 4294901760, %v371_v50  ;;  %v75_v28 = vmul.f32 %v57141_v16, %v49_v24  ;;  %v122_v18 = vpop.permute.xlu1 %121  ;;  %v120_v24 = vpop.permute.xlu0 %119 }
  0x85   :  { %v57095_v55 = vand.u32 4294901760, %v836_v51  ;;  %v57151_v25 = vand.u32 4294901760, %v76_v7  ;;  %v57162_v29 = vsub.f32 %v74_v6, %v57146_v19  ;;  %v1285_v35 = vsub.f32 %v1215_v27, %v57169_v30 }
  0x86   :  { %61453 = vst [vmem:[#allocation23_spill] sm:$0xff] %v57089_v52  ;;  %61454 = vst [vmem:[#allocation24_spill] sm:$0xff] %v57091_v53  ;;  %367 = vmatprep.subr.mxu0 %v57089_v52  ;;  %832 = vmatprep.subr.mxu1 %v57091_v53  ;;  %v57177_v32 = vand.u32 4294901760, %v75_v28 }
  0x87   :  { %61455 = vst [vmem:[#allocation25_spill] sm:$0xff] %v57093_v54  ;;  %61456 = vst [vmem:[#allocation26_spill] sm:$0xff] %v57095_v55  ;;  %373 = vmatpush1.msra.mxu0 %v57093_v54  ;;  %838 = vmatpush1.msra.mxu1 %v57095_v55  ;;  %v57180_v33 = vand.u32 4294901760, %v57162_v29  ;;  %v57206_v56 = vand.u32 4294901760, %v1285_v35 }
  0x88   :  { %438 = vmatmul.mubr.f32.vlgmr.msra.gmra.mrb[0].mxu0 %v56987_v8  ;;  %446 = vmatprep.subr.mxu0 %v57058_v42  ;;  %61461 = vst [vmem:[#allocation31_spill] sm:$0xff] %v57151_v25  ;;  %61462 = vst [vmem:[#allocation32_spill] sm:$0xff] %v57162_v29  ;;  %v57196_v49 = vsub.f32 %v75_v28, %v57177_v32  ;;  %v126_v27 = vpop.permute.xlu1 %125  ;;  %v124_v28 = vpop.permute.xlu0 %123 }
  0x89   :  { %903 = vmatmul.mubr.f32.vlgmr.msra.gmra.mrb[0].mxu1 %v56987_v8  ;;  %911 = vmatprep.subr.mxu1 %v57055_v41  ;;  %61465 = vst [vmem:[#allocation35_spill] sm:$0xff] %v57177_v32  ;;  %61466 = vst [vmem:[#allocation36_spill] sm:$0xff] %v57180_v33  ;;  %v1298_v50 = vsub.f32 %v57162_v29, %v57180_v33  ;;  %v1287_v62 = vsub.f32 %v1285_v35, %v57206_v56 }
  0x8a   :  { %449 = vmatpush1.msra.mxu0 %v57052_v40  ;;  %914 = vmatpush1.msra.mxu1 %v57061_v43  ;;  %61469 = vst [vmem:[#allocation39_spill] sm:$0xff] %v57196_v49  ;;  %v57214_v58 = vand.u32 4294901760, %v57196_v49 }
  0x8b   :  { %522 = vmatprep.subr.mxu0 %v57047_v38  ;;  %987 = vmatprep.subr.mxu1 %v57045_v37 }
  0x8c   :  { %512 = vmatprep.mubr.f32.mxu0 %v61180_v2  ;;  %977 = vmatprep.mubr.f32.mxu1 %v61180_v2  ;;  %61471 = vst [vmem:[#allocation41_spill] sm:$0xff] %v57214_v58  ;;  %v1769_v6 = vsub.f32 %v57196_v49, %v57214_v58 }
  0x90   :  { %515 = vmatmul.mubr.f32.vlgmr.msra.gmra.mrb[0].mxu0 %v56994_v10 }
  0x91   :  { %524 = vmatpush1.msra.mxu0 %v57043_v36  ;;  %980 = vmatmul.mubr.f32.vlgmr.msra.gmra.mrb[0].mxu1 %v56994_v10  ;;  %v51_v10 = vsel %vm47_vm2, %v44_v59, %v38_v57  ;;  %v57216_v59 = vand.u32 4294901760, %v1298_v50 }
  0x92   :  { %989 = vmatpush1.msra.mxu1 %v57049_v39  ;;  %600 = vmatprep.subr.mxu0 %v57073_v46  ;;  %v73_v26 = vmul.f32 %v57136_v9, %v51_v10  ;;  %v57235_v10 = vand.u32 4294901760, %v1769_v6 }
  0x93   :  { %1065 = vmatprep.subr.mxu1 %v57070_v45  ;;  %587 = vmatprep.mubr.f32.mxu0 %v61180_v2  ;;  %61472 = vst [vmem:[#allocation42_spill] sm:$0xff] %v57216_v59 }
  0x94   :  { %1052 = vmatprep.mubr.f32.mxu1 %v61180_v2  ;;  %v57173_v31 = vand.u32 4294901760, %v73_v26  ;;  %61475 = vst [vmem:[#allocation45_spill] sm:$0xff] %v57235_v10 }
  0x96   :  { %61464 = vst [vmem:[#allocation34_spill] sm:$0xff] %v57173_v31  ;;  %v57192_v48 = vsub.f32 %v73_v26, %v57173_v31  ;;  %v55428_v26 = vld [vmem:[%s61166_s7 + $0x2] ss:$8 sm:$0xf] }
  0x97   :  { %v57256_v50 = vrot.slane %v55428_v26, %v57006_v14  ;;  %v57274_v21 = vrot.slane %v55428_v26, %v57002_v12  ;;  %v57279_v23 = vrot.slane %v55428_v26, %v57008_v15 }
  0x98   :  { %591 = vmatmul.mubr.f32.vlgmr.msra.gmra.mrb[0].mxu0 %v57014_v17  ;;  %61468 = vst [vmem:[#allocation38_spill] sm:$0xff] %v57192_v48  ;;  %v57211_v57 = vand.u32 4294901760, %v57192_v48 }
  0x99   :  { %604 = vmatpush1.msra.mxu0 %v57067_v44  ;;  %1056 = vmatmul.mubr.f32.vlgmr.msra.gmra.mrb[0].mxu1 %v57014_v17  ;;  %v57167_v17 = vsub.f32 %v76_v7, %v57151_v25  ;;  %v1288_v7 = vand.u32 4294901760, %v1287_v62  ;;  %61476 = vst [vmem:[#allocation46_spill] sm:$0xff] %v57256_v50  ;;  %v57261_v62 = vrot.slane %v55428_v26, %v57004_v13  ;;  %61478 = vst [vmem:[#allocation48_spill] sm:$0xff] %v57274_v21 }
  0x9a   :  { %1069 = vmatpush1.msra.mxu1 %v57076_v47  ;;  %676 = vmatprep.subr.mxu0 %v57047_v38  ;;  %61470 = vst [vmem:[#allocation40_spill] sm:$0xff] %v57211_v57  ;;  %v1304_v5 = vsub.f32 %v57192_v48, %v57211_v57  ;;  %61479 = vst [vmem:[#allocation49_spill] sm:$0xff] %v57279_v23  ;;  %v2150_v26 = vsel %vm280_vm0, %v55433_v20, 0 }
  0x9b   :  { %1141 = vmatprep.subr.mxu1 %v57045_v37  ;;  %667 = vmatprep.mubr.f32.mxu0 %v61180_v2  ;;  %61463 = vst [vmem:[#allocation33_spill] sm:$0xff] %v57167_v17  ;;  %v57184_v34 = vand.u32 4294901760, %v57167_v17  ;;  %61477 = vst [vmem:[#allocation47_spill] sm:$0xff] %v57261_v62 }
  0x9c   :  { %1132 = vmatprep.mubr.f32.mxu1 %v61180_v2 }
  0x9d   :  { %61467 = vst [vmem:[#allocation37_spill] sm:$0xff] %v57184_v34  ;;  %v1763_v51 = vsub.f32 %v57167_v17, %v57184_v34 }
  0x9f   :  { %v57219_v60 = vand.u32 4294901760, %v1763_v51  ;;  %v130_v51 = vsel %vm127_vm3, %v120_v24, %v122_v18 }
  0xa0   :  { %669 = vmatmul.mubr.f32.vlgmr.msra.gmra.mrb[0].mxu0 %v56987_v8  ;;  %v154_v6 = vmul.f32 %v57256_v50, %v130_v51  ;;  %v129_v51 = vsel %vm127_vm3, %v122_v18, %v124_v28 }
  0xa1   :  { %678 = vmatpush1.msra.mxu0 %v57043_v36  ;;  %1134 = vmatmul.mubr.f32.vlgmr.msra.gmra.mrb[0].mxu1 %v56987_v8  ;;  %61473 = vst [vmem:[#allocation43_spill] sm:$0xff] %v57219_v60 }
  0xa2   :  { %1143 = vmatpush1.msra.mxu1 %v57049_v39  ;;  %741 = vmatprep.mubr.f32.mxu0 %v61180_v2  ;;  %v57284_v22 = vand.u32 4294901760, %v154_v6 }
  0xa3   :  { %1206 = vmatprep.mubr.f32.mxu1 %v61180_v2  ;;  %1683 = vmatprep.subr.mxu1 %v57151_v25 }
  0xa4   :  { %1218 = vmatprep.subr.mxu0 %v57146_v19  ;;  %v57300_v18 = vsub.f32 %v154_v6, %v57284_v22 }
  0xa6   :  { %61481 = vst [vmem:[#allocation51_spill] sm:$0xff] %v57300_v18 }
  0xa8   :  { %743 = vmatmul.mubr.f32.vlgmr.msra.gmra.mrb[0].mxu0 %v56987_v8 }
  0xa9   :  { %1208 = vmatmul.mubr.f32.vlgmr.msra.gmra.mrb[0].mxu1 %v56987_v8  ;;  %1220 = vmatpush1.msra.mxu0 %v57173_v31  ;;  %v57233_v8 = vand.u32 4294901760, %v1304_v5  ;;  %v128_v5 = vsel %vm127_vm3, %v124_v28, %v126_v27  ;;  %v57307_v28 = vand.u32 4294901760, %v2150_v26 }
  0xaa   :  { %1685 = vmatpush1.msra.mxu1 %v57177_v32  ;;  %1283 = vmatprep.mubr.f32.mxu0 %v61180_v2 }
  0xab   :  { %1300 = vmatprep.subr.mxu0 %v57216_v59  ;;  %1748 = vmatprep.mubr.f32.mxu1 %v61180_v2  ;;  %61474 = vst [vmem:[#allocation44_spill] sm:$0xff] %v57233_v8 }
  0xac   :  { %1765 = vmatprep.subr.mxu1 %v57219_v60 }
  0xb0   :  { %1289 = vmatmul.mubr.f32.vlgmr.msra.gmra.mrb[0].mxu0 %v1288_v7 }
  0xb1   :  { %1306 = vmatpush1.msra.mxu0 %v57233_v8  ;;  %1754 = vmatmul.mubr.f32.vlgmr.msra.gmra.mrb[0].mxu1 %v1288_v7  ;;  %v156_v7 = vmul.f32 %v57261_v62, %v128_v5  ;;  %v2220_v62 = vsub.f32 %v2150_v26, %v57307_v28 }
  0xb2   :  { %1771 = vmatpush1.msra.mxu1 %v57235_v10  ;;  %1379 = vmatprep.subr.mxu0 %v57162_v29 }
  0xb3   :  { %1844 = vmatprep.subr.mxu1 %v57167_v17  ;;  %1369 = vmatprep.mubr.f32.mxu0 %v61180_v2  ;;  %v57289_v5 = vand.u32 4294901760, %v156_v7  ;;  %v2221_v50 = vand.u32 4294901760, %v2220_v62 }
  0xb4   :  { %1834 = vmatprep.mubr.f32.mxu1 %v61180_v2 }
  0xb5   :  { %61480 = vst [vmem:[#allocation50_spill] sm:$0xff] %v57289_v5  ;;  %v2222_v16 = vsub.f32 %v2220_v62, %v2221_v50 }
  0xb8   :  { %1371 = vmatmul.mubr.f32.vlgmr.msra.gmra.mrb[0].mxu0 %v57169_v30 }
  0xb9   :  { %1382 = vmatpush1.msra.mxu0 %v57192_v48  ;;  %1836 = vmatmul.mubr.f32.vlgmr.msra.gmra.mrb[0].mxu1 %v57169_v30 }
  0xba   :  { %1847 = vmatpush1.msra.mxu1 %v57196_v49  ;;  %1455 = vmatprep.subr.mxu0 %v57146_v19 }
  0xbb   :  { %1920 = vmatprep.subr.mxu1 %v57151_v25  ;;  %1445 = vmatprep.mubr.f32.mxu0 %v61180_v2 }
  0xbc   :  { %1910 = vmatprep.mubr.f32.mxu1 %v61180_v2 }
  0xc0   :  { %1448 = vmatmul.mubr.f32.vlgmr.msra.gmra.mrb[0].mxu0 %v1285_v35 }
  0xc1   :  { %1457 = vmatpush1.msra.mxu0 %v57173_v31  ;;  %1913 = vmatmul.mubr.f32.vlgmr.msra.gmra.mrb[0].mxu1 %v1285_v35  ;;  %v131_v35 = vsel %vm127_vm3, %v126_v27, %v120_v24  ;;  %v155_v27 = vmul.f32 %v57279_v23, %v129_v51  ;;  %v57314_v51 = vand.u32 4294901760, %v57300_v18  ;;  %v61489_v23 = vmov 0.0  }
  0xc2   :  { %1922 = vmatpush1.msra.mxu1 %v57177_v32  ;;  %1533 = vmatprep.subr.mxu0 %v57180_v33  ;;  %v153_v24 = vmul.f32 %v57274_v21, %v131_v35 }
  0xc3   :  { %1998 = vmatprep.subr.mxu1 %v57184_v34  ;;  %1520 = vmatprep.mubr.f32.mxu0 %v61180_v2  ;;  %v57311_v35 = vand.u32 4294901760, %v155_v27  ;;  %61485 = vst [vmem:[#allocation55_spill] sm:$0xff] %v57314_v51  ;;  %v2233_v26 = vsub.f32 %v57300_v18, %v57314_v51 }
  0xc4   :  { %1985 = vmatprep.mubr.f32.mxu1 %v61180_v2  ;;  %v57309_v20 = vand.u32 4294901760, %v153_v24 }
  0xc5   :  { %61484 = vst [vmem:[#allocation54_spill] sm:$0xff] %v57311_v35  ;;  %v57344_v63 = vand.u32 4294901760, %v2233_v26 }
  0xc6   :  { %61483 = vst [vmem:[#allocation53_spill] sm:$0xff] %v57309_v20 }
  0xc7   :  { %61492 = vst [vmem:[#allocation61_spill] sm:$0xff] %v57344_v63 }
  0xc8   :  { %1524 = vmatmul.mubr.f32.vlgmr.msra.gmra.mrb[0].mxu0 %v57206_v56 }
  0xc9   :  { %1537 = vmatpush1.msra.mxu0 %v57211_v57  ;;  %1989 = vmatmul.mubr.f32.vlgmr.msra.gmra.mrb[0].mxu1 %v57206_v56  ;;  %v57305_v56 = vsub.f32 %v156_v7, %v57289_v5  ;;  %v57324_v7 = vsub.f32 %v153_v24, %v57309_v20 }
  0xca   :  { %2002 = vmatpush1.msra.mxu1 %v57214_v58  ;;  %1609 = vmatprep.subr.mxu0 %v57146_v19 }
  0xcb   :  { %2074 = vmatprep.subr.mxu1 %v57151_v25  ;;  %1600 = vmatprep.mubr.f32.mxu0 %v61180_v2  ;;  %61482 = vst [vmem:[#allocation52_spill] sm:$0xff] %v57305_v56  ;;  %v57318_v6 = vand.u32 4294901760, %v57305_v56  ;;  %61487 = vst [vmem:[#allocation57_spill] sm:$0xff] %v57324_v7  ;;  %v57339_v21 = vand.u32 4294901760, %v57324_v7 }
  0xcc   :  { %2065 = vmatprep.mubr.f32.mxu1 %v61180_v2  ;;  %v57328_v2 = vsub.f32 %v155_v27, %v57311_v35 }
  0xcd   :  { %61486 = vst [vmem:[#allocation56_spill] sm:$0xff] %v57318_v6  ;;  %v2698_v24 = vsub.f32 %v57305_v56, %v57318_v6  ;;  %61490 = vst [vmem:[#allocation59_spill] sm:$0xff] %v57339_v21  ;;  %v2239_v61 = vsub.f32 %v57324_v7, %v57339_v21 }
  0xce   :  { %61488 = vst [vmem:[#allocation58_spill] sm:$0xff] %v57328_v2  ;;  %v57342_v27 = vand.u32 4294901760, %v57328_v2 }
  0xcf   :  { %v57347_v9 = vand.u32 4294901760, %v2698_v24  ;;  %v2223_v24 = vand.u32 4294901760, %v2222_v16  ;;  %v57388_v16 = vand.u32 4294901760, %v56953_v4 }
  0xd0   :  { %1602 = vmatmul.mubr.f32.vlgmr.msra.gmra.mrb[0].mxu0 %v57169_v30  ;;  %61491 = vst [vmem:[#allocation60_spill] sm:$0xff] %v57342_v27  ;;  %v2704_v26 = vsub.f32 %v57328_v2, %v57342_v27 }
  0xd1   :  { %1611 = vmatpush1.msra.mxu0 %v57173_v31  ;;  %2067 = vmatmul.mubr.f32.vlgmr.msra.gmra.mrb[0].mxu1 %v57169_v30  ;;  %61493 = vst [vmem:[#allocation62_spill] sm:$0xff] %v57347_v9 }
  0xd2   :  { %2076 = vmatpush1.msra.mxu1 %v57177_v32  ;;  %1674 = vmatprep.mubr.f32.mxu0 %v61489_v23  ;;  %v57362_v58 = vand.u32 4294901760, %v2704_v26  ;;  %v57391_v26 = vand.u32 4294901760, %v56948_v3 }
  0xd3   :  { %2139 = vmatprep.mubr.f32.mxu1 %v61489_v23  ;;  %2618 = vmatprep.subr.mxu1 %v57289_v5 }
  0xd4   :  { %2153 = vmatprep.subr.mxu0 %v57284_v22  ;;  %61495 = vst [vmem:[#allocation64_spill] sm:$0xff] %v57362_v58  ;;  %61496 = vst [vmem:[#allocation65_spill] sm:$0xff] %v57391_v26 }
  0xd8   :  { %1676 = vmatmul.mubr.f32.vlgmr.msra.gmra.mrb[0].mxu0 %v57169_v30 }
  0xd9   :  { %2141 = vmatmul.mubr.f32.vlgmr.msra.gmra.mrb[0].mxu1 %v57169_v30  ;;  %2155 = vmatpush1.msra.mxu0 %v57309_v20  ;;  %v57360_v30 = vand.u32 4294901760, %v2239_v61  ;;  %v55434_v61 = vld [vmem:[%s61165_s1 + $0x18] sm:$0xff] }
  0xda   :  { %2620 = vmatpush1.msra.mxu1 %v57311_v35  ;;  %2218 = vmatprep.mubr.f32.mxu0 %v61489_v23 }
  0xdb   :  { %2235 = vmatprep.subr.mxu0 %v57344_v63  ;;  %2683 = vmatprep.mubr.f32.mxu1 %v61489_v23  ;;  %61494 = vst [vmem:[#allocation63_spill] sm:$0xff] %v57360_v30 }
  0xdc   :  { %2700 = vmatprep.subr.mxu1 %v57347_v9 }
  0xe0   :  { %2224 = vmatmul.mubr.f32.vlgmr.msra.gmra.mrb[0].mxu0 %v2223_v24 }
  0xe1   :  { %2241 = vmatpush1.msra.mxu0 %v57360_v30  ;;  %2689 = vmatmul.mubr.f32.vlgmr.msra.gmra.mrb[0].mxu1 %v2223_v24  ;;  %v57399_v24 = vsub.f32 %v56953_v4, %v57388_v16 }
  0xe2   :  { %2706 = vmatpush1.msra.mxu1 %v57362_v58  ;;  %2314 = vmatprep.subr.mxu0 %v57300_v18 }
  0xe3   :  { %2779 = vmatprep.subr.mxu1 %v57305_v56  ;;  %2304 = vmatprep.mubr.f32.mxu0 %v61489_v23  ;;  %61497 = vst [vmem:[#allocation66_spill] sm:$0xff] %v57399_v24  ;;  %v57417_v4 = vand.u32 4294901760, %v57399_v24 }
  0xe4   :  { %2769 = vmatprep.mubr.f32.mxu1 %v61489_v23 }
  0xe5   :  { %61501 = vst [vmem:[#allocation70_spill] sm:$0xff] %v57417_v4 }
  0xe8   :  { %2306 = vmatmul.mubr.f32.vlgmr.msra.gmra.mrb[0].mxu0 %v57307_v28 }
  0xe9   :  { %2317 = vmatpush1.msra.mxu0 %v57324_v7  ;;  %2771 = vmatmul.mubr.f32.vlgmr.msra.gmra.mrb[0].mxu1 %v57307_v28 }
  0xea   :  { %2782 = vmatpush1.msra.mxu1 %v57328_v2  ;;  %2390 = vmatprep.subr.mxu0 %v57284_v22 }
  0xeb   :  { %2855 = vmatprep.subr.mxu1 %v57289_v5  ;;  %2380 = vmatprep.mubr.f32.mxu0 %v61489_v23 }
  0xec   :  { %2845 = vmatprep.mubr.f32.mxu1 %v61489_v23 }
  0xf0   :  { %2383 = vmatmul.mubr.f32.vlgmr.msra.gmra.mrb[0].mxu0 %v2220_v62 }
  0xf1   :  { %2392 = vmatpush1.msra.mxu0 %v57309_v20  ;;  %2848 = vmatmul.mubr.f32.vlgmr.msra.gmra.mrb[0].mxu1 %v2220_v62  ;;  %v3089_v62 = vsel %vm280_vm0, %v55434_v61, 0  ;;  %v57411_v61 = vand.u32 4294901760, %v56937_v1 }
  0xf2   :  { %2857 = vmatpush1.msra.mxu1 %v57311_v35  ;;  %2468 = vmatprep.subr.mxu0 %v57314_v51 }
  0xf3   :  { %2933 = vmatprep.subr.mxu1 %v57318_v6  ;;  %2455 = vmatprep.mubr.f32.mxu0 %v61489_v23  ;;  %v57405_v6 = vsub.f32 %v56948_v3, %v57391_v26  ;;  %61499 = vst [vmem:[#allocation68_spill] sm:$0xff] %v57411_v61  ;;  %v57426_v51 = vsub.f32 %v56937_v1, %v57411_v61 }
  0xf4   :  { %2920 = vmatprep.mubr.f32.mxu1 %v61489_v23  ;;  %v3172_v1 = vsub.f32 %v57399_v24, %v57417_v4 }
  0xf5   :  { %61498 = vst [vmem:[#allocation67_spill] sm:$0xff] %v57405_v6  ;;  %v57422_v3 = vand.u32 4294901760, %v57405_v6  ;;  %61503 = vst [vmem:[#allocation72_spill] sm:$0xff] %v57426_v51 }
  0xf6   :  { %v57451_v18 = vand.u32 4294901760, %v3172_v1 }
  0xf7   :  { %61502 = vst [vmem:[#allocation71_spill] sm:$0xff] %v57422_v3  ;;  %v3637_v7 = vsub.f32 %v57405_v6, %v57422_v3 }
  0xf8   :  { %2459 = vmatmul.mubr.f32.vlgmr.msra.gmra.mrb[0].mxu0 %v2221_v50  ;;  %61507 = vst [vmem:[#allocation76_spill] sm:$0xff] %v57451_v18 }
  0xf9   :  { %2472 = vmatpush1.msra.mxu0 %v57339_v21  ;;  %2924 = vmatmul.mubr.f32.vlgmr.msra.gmra.mrb[0].mxu1 %v2221_v50  ;;  %v57408_v50 = vand.u32 4294901760, %v3089_v62  ;;  %v57455_v30 = vand.u32 4294901760, %v3637_v7 }
  0xfa   :  { %2937 = vmatpush1.msra.mxu1 %v57342_v27  ;;  %2544 = vmatprep.subr.mxu0 %v57284_v22  ;;  %v57414_v27 = vand.u32 4294901760, %v56932_v0 }
  0xfb   :  { %3009 = vmatprep.subr.mxu1 %v57289_v5  ;;  %2535 = vmatprep.mubr.f32.mxu0 %v61489_v23  ;;  %v3159_v21 = vsub.f32 %v3089_v62, %v57408_v50  ;;  %61508 = vst [vmem:[#allocation77_spill] sm:$0xff] %v57455_v30 }
  0xfc   :  { %3000 = vmatprep.mubr.f32.mxu1 %v61489_v23  ;;  %61500 = vst [vmem:[#allocation69_spill] sm:$0xff] %v57414_v27  ;;  %v57432_v2 = vsub.f32 %v56932_v0, %v57414_v27  ;;  %v57446_v0 = vand.u32 4294901760, %v57426_v51 }
  0xfd   :  { %v57441_v62 = vand.u32 4294901760, %v3159_v21 }
  0xfe   :  { %61504 = vst [vmem:[#allocation73_spill] sm:$0xff] %v57432_v2  ;;  %61505 = vst [vmem:[#allocation74_spill] sm:$0xff] %v57446_v0  ;;  %v57449_v56 = vand.u32 4294901760, %v57432_v2  ;;  %v3178_v9 = vsub.f32 %v57426_v51, %v57446_v0 }
  0xff   :  { %v3161_v58 = vsub.f32 %v3159_v21, %v57441_v62 }
 0x100   :  { %2537 = vmatmul.mubr.f32.vlgmr.msra.gmra.mrb[0].mxu0 %v57307_v28  ;;  %61506 = vst [vmem:[#allocation75_spill] sm:$0xff] %v57449_v56  ;;  %v3643_v1 = vsub.f32 %v57432_v2, %v57449_v56 }
 0x101   :  { %2546 = vmatpush1.msra.mxu0 %v57309_v20  ;;  %3002 = vmatmul.mubr.f32.vlgmr.msra.gmra.mrb[0].mxu1 %v57307_v28  ;;  %v3162_v7 = vand.u32 4294901760, %v3161_v58  ;;  %v162_v58 = vpop.permute.xlu0 %161  ;;  %v55435_v20 = vld [vmem:[%s61165_s1 + $0x20] sm:$0xff] }
 0x102   :  { %3011 = vmatpush1.msra.mxu1 %v57311_v35  ;;  %2609 = vmatprep.mubr.f32.mxu0 %v61489_v23  ;;  %v57470_v63 = vand.u32 4294901760, %v3643_v1  ;;  %v55429_v1 = vld [vmem:[%s61166_s7 + $0x4] ss:$8 sm:$0xf] }
 0x103   :  { %3074 = vmatprep.mubr.f32.mxu1 %v61489_v23  ;;  %3092 = vmatprep.subr.mxu0 %v57388_v16 }
 0x104   :  { %3557 = vmatprep.subr.mxu1 %v57391_v26  ;;  %61510 = vst [vmem:[#allocation79_spill] sm:$0xff] %v57470_v63 }
 0x108   :  { %2611 = vmatmul.mubr.f32.vlgmr.msra.gmra.mrb[0].mxu0 %v57307_v28 }
 0x109   :  { %3076 = vmatmul.mubr.f32.vlgmr.msra.gmra.mrb[0].mxu1 %v57307_v28  ;;  %3094 = vmatpush1.msra.mxu0 %v57411_v61  ;;  %v57468_v28 = vand.u32 4294901760, %v3178_v9  ;;  %v164_v9 = vpop.permute.xlu1 %163 }
 0x10a   :  { %3157 = vmatprep.mubr.f32.mxu0 %v61489_v23  ;;  %3559 = vmatpush1.msra.mxu1 %v57414_v27 }
 0x10b   :  { %3622 = vmatprep.mubr.f32.mxu1 %v61489_v23  ;;  %3174 = vmatprep.subr.mxu0 %v57451_v18  ;;  %61509 = vst [vmem:[#allocation78_spill] sm:$0xff] %v57468_v28  ;;  %v57512_v18 = vrot.slane %v55429_v1, %v57008_v15 }
 0x10c   :  { %3639 = vmatprep.subr.mxu1 %v57455_v30 }
 0x10d   :  { %61514 = vst [vmem:[#allocation83_spill] sm:$0xff] %v57512_v18 }
 0x110   :  { %3163 = vmatmul.mubr.f32.vlgmr.msra.gmra.mrb[0].mxu0 %v3162_v7 }
 0x111   :  { %3628 = vmatmul.mubr.f32.vlgmr.msra.gmra.mrb[0].mxu1 %v3162_v7  ;;  %3180 = vmatpush1.msra.mxu0 %v57468_v28  ;;  %v166_v7 = vpop.permute.xlu1 %165 }
 0x112   :  { %3243 = vmatprep.mubr.f32.mxu0 %v61489_v23  ;;  %3645 = vmatpush1.msra.mxu1 %v57470_v63 }
 0x113   :  { %3708 = vmatprep.mubr.f32.mxu1 %v61489_v23  ;;  %3253 = vmatprep.subr.mxu0 %v57399_v24  ;;  %v57496_v24 = vrot.slane %v55429_v1, %v57004_v13 }
 0x114   :  { %3718 = vmatprep.subr.mxu1 %v57405_v6  ;;  %v160_v6 = vpop.permute.xlu0 %159 }
 0x115   :  { %61512 = vst [vmem:[#allocation81_spill] sm:$0xff] %v57496_v24  ;;  %v171_v63 = vsel %vm167_vm4, %v166_v7, %v160_v6  ;;  %v170_v35 = vsel %vm167_vm4, %v160_v6, %v162_v58  ;;  %v4028_v6 = vsel %vm280_vm0, %v55435_v20, 0 }
 0x116   :  { %v196_v30 = vmul.f32 %v57496_v24, %v171_v63 }
 0x118   :  { %3245 = vmatmul.mubr.f32.vlgmr.msra.gmra.mrb[0].mxu0 %v57408_v50  ;;  %v57524_v63 = vand.u32 4294901760, %v196_v30 }
 0x119   :  { %3710 = vmatmul.mubr.f32.vlgmr.msra.gmra.mrb[0].mxu1 %v57408_v50  ;;  %3256 = vmatpush1.msra.mxu0 %v57426_v51  ;;  %v57491_v51 = vrot.slane %v55429_v1, %v57006_v14 }
 0x11a   :  { %3319 = vmatprep.mubr.f32.mxu0 %v61489_v23  ;;  %3721 = vmatpush1.msra.mxu1 %v57432_v2  ;;  %v169_v2 = vsel %vm167_vm4, %v162_v58, %v164_v9  ;;  %61515 = vst [vmem:[#allocation84_spill] sm:$0xff] %v57524_v63 }
 0x11b   :  { %3784 = vmatprep.mubr.f32.mxu1 %v61489_v23  ;;  %3329 = vmatprep.subr.mxu0 %v57388_v16  ;;  %61511 = vst [vmem:[#allocation80_spill] sm:$0xff] %v57491_v51  ;;  %v194_v28 = vmul.f32 %v57491_v51, %v169_v2  ;;  %v168_v51 = vsel %vm167_vm4, %v164_v9, %v166_v7 }
 0x11c   :  { %3794 = vmatprep.subr.mxu1 %v57391_v26  ;;  %v195_v58 = vmul.f32 %v57512_v18, %v168_v51 }
 0x11d   :  { %v57519_v2 = vand.u32 4294901760, %v194_v28 }
 0x11e   :  { %v57546_v7 = vand.u32 4294901760, %v195_v58 }
 0x11f   :  { %v57534_v9 = vsub.f32 %v194_v28, %v57519_v2 }
 0x120   :  { %3322 = vmatmul.mubr.f32.vlgmr.msra.gmra.mrb[0].mxu0 %v3159_v21  ;;  %61519 = vst [vmem:[#allocation88_spill] sm:$0xff] %v57546_v7  ;;  %v57562_v18 = vsub.f32 %v195_v58, %v57546_v7 }
 0x121   :  { %3787 = vmatmul.mubr.f32.vlgmr.msra.gmra.mrb[0].mxu1 %v3159_v21  ;;  %3331 = vmatpush1.msra.mxu0 %v57411_v61  ;;  %v57509_v21 = vrot.slane %v55429_v1, %v57002_v12  ;;  %61516 = vst [vmem:[#allocation85_spill] sm:$0xff] %v57534_v9  ;;  %v57549_v51 = vand.u32 4294901760, %v57534_v9 }
 0x122   :  { %3394 = vmatprep.mubr.f32.mxu0 %v61489_v23  ;;  %3796 = vmatpush1.msra.mxu1 %v57414_v27  ;;  %61523 = vst [vmem:[#allocation92_spill] sm:$0xff] %v57562_v18 }
 0x123   :  { %3859 = vmatprep.mubr.f32.mxu1 %v61489_v23  ;;  %3407 = vmatprep.subr.mxu0 %v57417_v4  ;;  %61513 = vst [vmem:[#allocation82_spill] sm:$0xff] %v57509_v21  ;;  %v193_v1 = vmul.f32 %v57509_v21, %v170_v35  ;;  %v57542_v35 = vand.u32 4294901760, %v4028_v6  ;;  %61520 = vst [vmem:[#allocation89_spill] sm:$0xff] %v57549_v51 }
 0x124   :  { %3872 = vmatprep.subr.mxu1 %v57422_v3 }
 0x125   :  { %v57544_v20 = vand.u32 4294901760, %v193_v1  ;;  %v4098_v24 = vsub.f32 %v4028_v6, %v57542_v35  ;;  %v4111_v6 = vsub.f32 %v57534_v9, %v57549_v51 }
 0x127   :  { %61518 = vst [vmem:[#allocation87_spill] sm:$0xff] %v57544_v20  ;;  %v57573_v21 = vand.u32 4294901760, %v4098_v24 }
 0x128   :  { %3398 = vmatmul.mubr.f32.vlgmr.msra.gmra.mrb[0].mxu0 %v57441_v62 }
 0x129   :  { %3863 = vmatmul.mubr.f32.vlgmr.msra.gmra.mrb[0].mxu1 %v57441_v62  ;;  %3411 = vmatpush1.msra.mxu0 %v57446_v0  ;;  %v57539_v62 = vsub.f32 %v196_v30, %v57524_v63  ;;  %v57558_v30 = vsub.f32 %v193_v1, %v57544_v20  ;;  %v57581_v0 = vand.u32 4294901760, %v4111_v6  ;;  %v4100_v4 = vsub.f32 %v4098_v24, %v57573_v21 }
 0x12a   :  { %3474 = vmatprep.mubr.f32.mxu0 %v61489_v23  ;;  %3876 = vmatpush1.msra.mxu1 %v57449_v56  ;;  %v57579_v56 = vand.u32 4294901760, %v57562_v18 }
 0x12b   :  { %3939 = vmatprep.mubr.f32.mxu1 %v61489_v23  ;;  %3483 = vmatprep.subr.mxu0 %v57388_v16  ;;  %61517 = vst [vmem:[#allocation86_spill] sm:$0xff] %v57539_v62  ;;  %v57553_v28 = vand.u32 4294901760, %v57539_v62  ;;  %61522 = vst [vmem:[#allocation91_spill] sm:$0xff] %v57558_v30  ;;  %v57576_v58 = vand.u32 4294901760, %v57558_v30 }
 0x12c   :  { %3948 = vmatprep.subr.mxu1 %v57391_v26  ;;  %61525 = vst [vmem:[#allocation94_spill] sm:$0xff] %v57579_v56  ;;  %61526 = vst [vmem:[#allocation95_spill] sm:$0xff] %v57581_v0  ;;  %v4582_v6 = vsub.f32 %v57562_v18, %v57579_v56 }
 0x12d   :  { %61521 = vst [vmem:[#allocation90_spill] sm:$0xff] %v57553_v28  ;;  %v4576_v1 = vsub.f32 %v57539_v62, %v57553_v28  ;;  %61524 = vst [vmem:[#allocation93_spill] sm:$0xff] %v57576_v58 }
 0x12f   :  { %v57584_v3 = vand.u32 4294901760, %v4576_v1  ;;  %v4101_v1 = vand.u32 4294901760, %v4100_v4  ;;  %v202_v4 = vpop.permute.xlu0 %201 }
 0x130   :  { %3476 = vmatmul.mubr.f32.vlgmr.msra.gmra.mrb[0].mxu0 %v57408_v50 }
 0x131   :  { %3941 = vmatmul.mubr.f32.vlgmr.msra.gmra.mrb[0].mxu1 %v57408_v50  ;;  %3485 = vmatpush1.msra.mxu0 %v57411_v61  ;;  %61527 = vst [vmem:[#allocation96_spill] sm:$0xff] %v57584_v3  ;;  %v57600_v61 = vand.u32 4294901760, %v4582_v6  ;;  %v55430_v6 = vld [vmem:[%s61166_s7 + $0x5] ss:$8 sm:$0xf] }
 0x132   :  { %3548 = vmatprep.mubr.f32.mxu0 %v61489_v23  ;;  %3950 = vmatpush1.msra.mxu1 %v57414_v27  ;;  %v4117_v27 = vsub.f32 %v57558_v30, %v57576_v58 }
 0x133   :  { %4013 = vmatprep.mubr.f32.mxu1 %v61489_v23  ;;  %4031 = vmatprep.subr.mxu0 %v57519_v2  ;;  %61529 = vst [vmem:[#allocation98_spill] sm:$0xff] %v57600_v61 }
 0x134   :  { %4496 = vmatprep.subr.mxu1 %v57524_v63 }
 0x138   :  { %3550 = vmatmul.mubr.f32.vlgmr.msra.gmra.mrb[0].mxu0 %v57408_v50 }
 0x139   :  { %4015 = vmatmul.mubr.f32.vlgmr.msra.gmra.mrb[0].mxu1 %v57408_v50  ;;  %4033 = vmatpush1.msra.mxu0 %v57544_v20  ;;  %v57598_v50 = vand.u32 4294901760, %v4117_v27  ;;  %v204_v27 = vpop.permute.xlu1 %203 }
 0x13a   :  { %4498 = vmatpush1.msra.mxu1 %v57546_v7  ;;  %4096 = vmatprep.mubr.f32.mxu0 %v61489_v23 }
 0x13b   :  { %4113 = vmatprep.subr.mxu0 %v57581_v0  ;;  %4561 = vmatprep.mubr.f32.mxu1 %v61489_v23  ;;  %61528 = vst [vmem:[#allocation97_spill] sm:$0xff] %v57598_v50  ;;  %v57639_v0 = vrot.slane %v55430_v6, %v57002_v12 }
 0x13c   :  { %4578 = vmatprep.subr.mxu1 %v57584_v3 }
 0x13d   :  { %61532 = vst [vmem:[#allocation101_spill] sm:$0xff] %v57639_v0 }
 0x140   :  { %4102 = vmatmul.mubr.f32.vlgmr.msra.gmra.mrb[0].mxu0 %v4101_v1 }
 0x141   :  { %4119 = vmatpush1.msra.mxu0 %v57598_v50  ;;  %4567 = vmatmul.mubr.f32.vlgmr.msra.gmra.mrb[0].mxu1 %v4101_v1  ;;  %v206_v1 = vpop.permute.xlu1 %205 }
 0x142   :  { %4584 = vmatpush1.msra.mxu1 %v57600_v61  ;;  %4192 = vmatprep.subr.mxu0 %v57534_v9  ;;  %v57626_v9 = vrot.slane %v55430_v6, %v57004_v13 }
 0x143   :  { %4657 = vmatprep.subr.mxu1 %v57539_v62  ;;  %4182 = vmatprep.mubr.f32.mxu0 %v61489_v23  ;;  %v57621_v62 = vrot.slane %v55430_v6, %v57006_v14 }
 0x144   :  { %4647 = vmatprep.mubr.f32.mxu1 %v61489_v23  ;;  %61531 = vst [vmem:[#allocation100_spill] sm:$0xff] %v57626_v9 }
 0x145   :  { %61530 = vst [vmem:[#allocation99_spill] sm:$0xff] %v57621_v62 }
 0x148   :  { %4184 = vmatmul.mubr.f32.vlgmr.msra.gmra.mrb[0].mxu0 %v57542_v35 }
 0x149   :  { %4195 = vmatpush1.msra.mxu0 %v57558_v30  ;;  %4649 = vmatmul.mubr.f32.vlgmr.msra.gmra.mrb[0].mxu1 %v57542_v35  ;;  %v200_v30 = vpop.permute.xlu0 %199 }
 0x14a   :  { %4660 = vmatpush1.msra.mxu1 %v57562_v18  ;;  %4268 = vmatprep.subr.mxu0 %v57519_v2  ;;  %v209_v18 = vsel %vm207_vm5, %v202_v4, %v204_v27  ;;  %v211_v61 = vsel %vm207_vm5, %v206_v1, %v200_v30  ;;  %v210_v26 = vsel %vm207_vm5, %v200_v30, %v202_v4 }
 0x14b   :  { %4733 = vmatprep.subr.mxu1 %v57524_v63  ;;  %4258 = vmatprep.mubr.f32.mxu0 %v61489_v23  ;;  %v234_v50 = vmul.f32 %v57621_v62, %v209_v18  ;;  %v236_v3 = vmul.f32 %v57626_v9, %v211_v61  ;;  %v208_v18 = vsel %vm207_vm5, %v204_v27, %v206_v1 }
 0x14c   :  { %4723 = vmatprep.mubr.f32.mxu1 %v61489_v23 }
 0x14d   :  { %v57654_v61 = vand.u32 4294901760, %v236_v3 }
 0x150   :  { %4261 = vmatmul.mubr.f32.vlgmr.msra.gmra.mrb[0].mxu0 %v4098_v24 }
 0x151   :  { %4270 = vmatpush1.msra.mxu0 %v57544_v20  ;;  %4726 = vmatmul.mubr.f32.vlgmr.msra.gmra.mrb[0].mxu1 %v4098_v24  ;;  %v57642_v24 = vrot.slane %v55430_v6, %v57008_v15  ;;  %v233_v6 = vmul.f32 %v57639_v0, %v210_v26 }
 0x152   :  { %4735 = vmatpush1.msra.mxu1 %v57546_v7  ;;  %4346 = vmatprep.subr.mxu0 %v57549_v51  ;;  %v57649_v51 = vand.u32 4294901760, %v234_v50 }
 0x153   :  { %4811 = vmatprep.subr.mxu1 %v57553_v28  ;;  %4333 = vmatprep.mubr.f32.mxu0 %v61489_v23  ;;  %61533 = vst [vmem:[#allocation102_spill] sm:$0xff] %v57642_v24  ;;  %v55436_v28 = vld [vmem:[%s61165_s1 + $0x28] sm:$0xff]  ;;  %v235_v4 = vmul.f32 %v57642_v24, %v208_v18 }
 0x154   :  { %4798 = vmatprep.mubr.f32.mxu1 %v61489_v23  ;;  %v4967_v30 = vsel %vm280_vm0, %v55436_v28, 0  ;;  %v57665_v27 = vsub.f32 %v234_v50, %v57649_v51  ;;  %v57674_v28 = vand.u32 4294901760, %v233_v6 }
 0x155   :  { %v57672_v26 = vand.u32 4294901760, %v4967_v30  ;;  %v57676_v1 = vand.u32 4294901760, %v235_v4 }
 0x156   :  { %61534 = vst [vmem:[#allocation103_spill] sm:$0xff] %v57665_v27  ;;  %v57679_v18 = vand.u32 4294901760, %v57665_v27 }
 0x157   :  { %v5037_v9 = vsub.f32 %v4967_v30, %v57672_v26  ;;  %v57693_v24 = vsub.f32 %v235_v4, %v57676_v1 }
 0x158   :  { %4337 = vmatmul.mubr.f32.vlgmr.msra.gmra.mrb[0].mxu0 %v57573_v21  ;;  %61536 = vst [vmem:[#allocation105_spill] sm:$0xff] %v57679_v18  ;;  %v5050_v30 = vsub.f32 %v57665_v27, %v57679_v18 }
 0x159   :  { %4350 = vmatpush1.msra.mxu0 %v57576_v58  ;;  %4802 = vmatmul.mubr.f32.vlgmr.msra.gmra.mrb[0].mxu1 %v57573_v21  ;;  %v57670_v21 = vsub.f32 %v236_v3, %v57654_v61  ;;  %v57689_v3 = vsub.f32 %v233_v6, %v57674_v28  ;;  %61539 = vst [vmem:[#allocation108_spill] sm:$0xff] %v57693_v24  ;;  %v57703_v62 = vand.u32 4294901760, %v5037_v9  ;;  %v57709_v4 = vand.u32 4294901760, %v57693_v24 }
 0x15a   :  { %4815 = vmatpush1.msra.mxu1 %v57579_v56  ;;  %4422 = vmatprep.subr.mxu0 %v57519_v2  ;;  %v57711_v56 = vand.u32 4294901760, %v5050_v30 }
 0x15b   :  { %4887 = vmatprep.subr.mxu1 %v57524_v63  ;;  %4413 = vmatprep.mubr.f32.mxu0 %v61489_v23  ;;  %61535 = vst [vmem:[#allocation104_spill] sm:$0xff] %v57670_v21  ;;  %v57683_v50 = vand.u32 4294901760, %v57670_v21  ;;  %61538 = vst [vmem:[#allocation107_spill] sm:$0xff] %v57689_v3  ;;  %v57706_v0 = vand.u32 4294901760, %v57689_v3  ;;  %v5521_v30 = vsub.f32 %v57693_v24, %v57709_v4 }
 0x15c   :  { %4878 = vmatprep.mubr.f32.mxu1 %v61489_v23  ;;  %61541 = vst [vmem:[#allocation110_spill] sm:$0xff] %v57709_v4 }
 0x15d   :  { %61537 = vst [vmem:[#allocation106_spill] sm:$0xff] %v57683_v50  ;;  %v5515_v6 = vsub.f32 %v57670_v21, %v57683_v50  ;;  %61540 = vst [vmem:[#allocation109_spill] sm:$0xff] %v57706_v0  ;;  %v57730_v63 = vand.u32 4294901760, %v5521_v30  ;;  %v55431_v30 = vld [vmem:[%s61166_s7 + $0x6] ss:$8 sm:$0xf] }
 0x15f   :  { %v57714_v58 = vand.u32 4294901760, %v5515_v6  ;;  %61544 = vst [vmem:[#allocation113_spill] sm:$0xff] %v57730_v63 }
 0x160   :  { %4415 = vmatmul.mubr.f32.vlgmr.msra.gmra.mrb[0].mxu0 %v57542_v35 }
 0x161   :  { %4424 = vmatpush1.msra.mxu0 %v57544_v20  ;;  %4880 = vmatmul.mubr.f32.vlgmr.msra.gmra.mrb[0].mxu1 %v57542_v35  ;;  %61542 = vst [vmem:[#allocation111_spill] sm:$0xff] %v57714_v58  ;;  %v5056_v20 = vsub.f32 %v57689_v3, %v57706_v0 }
 0x162   :  { %4889 = vmatpush1.msra.mxu1 %v57546_v7  ;;  %4487 = vmatprep.mubr.f32.mxu0 %v61489_v23  ;;  %v5039_v7 = vsub.f32 %v5037_v9, %v57703_v62 }
 0x163   :  { %4952 = vmatprep.mubr.f32.mxu1 %v61489_v23  ;;  %4970 = vmatprep.subr.mxu0 %v57649_v51 }
 0x164   :  { %5435 = vmatprep.subr.mxu1 %v57654_v61  ;;  %v5040_v6 = vand.u32 4294901760, %v5039_v7  ;;  %v242_v7 = vpop.permute.xlu0 %241 }
 0x168   :  { %4489 = vmatmul.mubr.f32.vlgmr.msra.gmra.mrb[0].mxu0 %v57542_v35 }
 0x169   :  { %4954 = vmatmul.mubr.f32.vlgmr.msra.gmra.mrb[0].mxu1 %v57542_v35  ;;  %4972 = vmatpush1.msra.mxu0 %v57674_v28  ;;  %v57728_v35 = vand.u32 4294901760, %v5056_v20  ;;  %v244_v20 = vpop.permute.xlu1 %243 }
 0x16a   :  { %5437 = vmatpush1.msra.mxu1 %v57676_v1  ;;  %5035 = vmatprep.mubr.f32.mxu0 %v61489_v23 }
 0x16b   :  { %5052 = vmatprep.subr.mxu0 %v57711_v56  ;;  %5500 = vmatprep.mubr.f32.mxu1 %v61489_v23  ;;  %61543 = vst [vmem:[#allocation112_spill] sm:$0xff] %v57728_v35 }
 0x16c   :  { %5517 = vmatprep.subr.mxu1 %v57714_v58 }
 0x170   :  { %5041 = vmatmul.mubr.f32.vlgmr.msra.gmra.mrb[0].mxu0 %v5040_v6 }
 0x171   :  { %5058 = vmatpush1.msra.mxu0 %v57728_v35  ;;  %5506 = vmatmul.mubr.f32.vlgmr.msra.gmra.mrb[0].mxu1 %v5040_v6  ;;  %v246_v6 = vpop.permute.xlu1 %245  ;;  %v57769_v35 = vrot.slane %v55431_v30, %v57002_v12 }
 0x172   :  { %5523 = vmatpush1.msra.mxu1 %v57730_v63  ;;  %5131 = vmatprep.subr.mxu0 %v57665_v27  ;;  %v57756_v27 = vrot.slane %v55431_v30, %v57004_v13 }
 0x173   :  { %5596 = vmatprep.subr.mxu1 %v57670_v21  ;;  %5121 = vmatprep.mubr.f32.mxu0 %v61489_v23  ;;  %v57751_v21 = vrot.slane %v55431_v30, %v57006_v14  ;;  %61547 = vst [vmem:[#allocation116_spill] sm:$0xff] %v57769_v35 }
 0x174   :  { %5586 = vmatprep.mubr.f32.mxu1 %v61489_v23  ;;  %61546 = vst [vmem:[#allocation115_spill] sm:$0xff] %v57756_v27 }
 0x175   :  { %61545 = vst [vmem:[#allocation114_spill] sm:$0xff] %v57751_v21 }
 0x178   :  { %5123 = vmatmul.mubr.f32.vlgmr.msra.gmra.mrb[0].mxu0 %v57672_v26 }
 0x179   :  { %5134 = vmatpush1.msra.mxu0 %v57689_v3  ;;  %5588 = vmatmul.mubr.f32.vlgmr.msra.gmra.mrb[0].mxu1 %v57672_v26  ;;  %v240_v3 = vpop.permute.xlu0 %239 }
 0x17a   :  { %5599 = vmatpush1.msra.mxu1 %v57693_v24  ;;  %5207 = vmatprep.subr.mxu0 %v57649_v51  ;;  %v249_v24 = vsel %vm247_vm6, %v242_v7, %v244_v20  ;;  %v251_v63 = vsel %vm247_vm6, %v246_v6, %v240_v3  ;;  %v250_v58 = vsel %vm247_vm6, %v240_v3, %v242_v7 }
 0x17b   :  { %5672 = vmatprep.subr.mxu1 %v57654_v61  ;;  %5197 = vmatprep.mubr.f32.mxu0 %v61489_v23  ;;  %v274_v14 = vmul.f32 %v57751_v21, %v249_v24  ;;  %v276_v13 = vmul.f32 %v57756_v27, %v251_v63  ;;  %v248_v24 = vsel %vm247_vm6, %v244_v20, %v246_v6 }
 0x17c   :  { %5662 = vmatprep.mubr.f32.mxu1 %v61489_v23 }
 0x17d   :  { %v57784_v63 = vand.u32 4294901760, %v276_v13 }
 0x180   :  { %5200 = vmatmul.mubr.f32.vlgmr.msra.gmra.mrb[0].mxu0 %v5037_v9 }
 0x181   :  { %5209 = vmatpush1.msra.mxu0 %v57674_v28  ;;  %5665 = vmatmul.mubr.f32.vlgmr.msra.gmra.mrb[0].mxu1 %v5037_v9  ;;  %v57772_v9 = vrot.slane %v55431_v30, %v57008_v15  ;;  %v273_v30 = vmul.f32 %v57769_v35, %v250_v58 }
 0x182   :  { %5674 = vmatpush1.msra.mxu1 %v57676_v1  ;;  %5285 = vmatprep.subr.mxu0 %v57679_v18  ;;  %v57779_v18 = vand.u32 4294901760, %v274_v14 }
 0x183   :  { %5750 = vmatprep.subr.mxu1 %v57683_v50  ;;  %5272 = vmatprep.mubr.f32.mxu0 %v61489_v23  ;;  %61548 = vst [vmem:[#allocation117_spill] sm:$0xff] %v57772_v9  ;;  %v55437_v50 = vld [vmem:[%s61165_s1 + $0x30] sm:$0xff]  ;;  %v275_v7 = vmul.f32 %v57772_v9, %v248_v24 }
 0x184   :  { %5737 = vmatprep.mubr.f32.mxu1 %v61489_v23  ;;  %v5906_v3 = vsel %vm280_vm0, %v55437_v50, 0  ;;  %v57795_v20 = vsub.f32 %v274_v14, %v57779_v18  ;;  %v57804_v50 = vand.u32 4294901760, %v273_v30 }
 0x185   :  { %v57802_v58 = vand.u32 4294901760, %v5906_v3  ;;  %v57806_v6 = vand.u32 4294901760, %v275_v7 }
 0x186   :  { %61549 = vst [vmem:[#allocation118_spill] sm:$0xff] %v57795_v20  ;;  %v57809_v24 = vand.u32 4294901760, %v57795_v20 }
 0x187   :  { %v5976_v27 = vsub.f32 %v5906_v3, %v57802_v58  ;;  %v57823_v9 = vsub.f32 %v275_v7, %v57806_v6 }
 0x188   :  { %5276 = vmatmul.mubr.f32.vlgmr.msra.gmra.mrb[0].mxu0 %v57703_v62  ;;  %61551 = vst [vmem:[#allocation120_spill] sm:$0xff] %v57809_v24  ;;  %v5989_v3 = vsub.f32 %v57795_v20, %v57809_v24 }
 0x189   :  { %5289 = vmatpush1.msra.mxu0 %v57706_v0  ;;  %5741 = vmatmul.mubr.f32.vlgmr.msra.gmra.mrb[0].mxu1 %v57703_v62  ;;  %v57800_v62 = vsub.f32 %v276_v13, %v57784_v63  ;;  %v57819_v13 = vsub.f32 %v273_v30, %v57804_v50  ;;  %61554 = vst [vmem:[#allocation123_spill] sm:$0xff] %v57823_v9  ;;  %v5977_v21 = vand.u32 4294901760, %v5976_v27  ;;  %v57837_v7 = vand.u32 4294901760, %v57823_v9 }
 0x18a   :  { %5754 = vmatpush1.msra.mxu1 %v57709_v4  ;;  %5361 = vmatprep.subr.mxu0 %v57649_v51  ;;  %v57839_v12 = vand.u32 4294901760, %v5989_v3 }
 0x18b   :  { %5826 = vmatprep.subr.mxu1 %v57654_v61  ;;  %5352 = vmatprep.mubr.f32.mxu0 %v61489_v23  ;;  %61550 = vst [vmem:[#allocation119_spill] sm:$0xff] %v57800_v62  ;;  %v57813_v14 = vand.u32 4294901760, %v57800_v62  ;;  %61553 = vst [vmem:[#allocation122_spill] sm:$0xff] %v57819_v13  ;;  %v57834_v35 = vand.u32 4294901760, %v57819_v13  ;;  %v5978_v11 = vsub.f32 %v5976_v27, %v5977_v21 }
 0x18c   :  { %5817 = vmatprep.mubr.f32.mxu1 %v61489_v23  ;;  %61556 = vst [vmem:[#allocation125_spill] sm:$0xff] %v57837_v7  ;;  %v6460_v3 = vsub.f32 %v57823_v9, %v57837_v7 }
 0x18d   :  { %61552 = vst [vmem:[#allocation121_spill] sm:$0xff] %v57813_v14  ;;  %v6454_v30 = vsub.f32 %v57800_v62, %v57813_v14  ;;  %61555 = vst [vmem:[#allocation124_spill] sm:$0xff] %v57834_v35  ;;  %v5995_v4 = vsub.f32 %v57819_v13, %v57834_v35 }
 0x18e   :  { %v57857_v0 = vand.u32 4294901760, %v6460_v3 }
 0x18f   :  { %v57842_v15 = vand.u32 4294901760, %v6454_v30  ;;  %v5979_v30 = vand.u32 4294901760, %v5978_v11  ;;  %v55439_v11 = vld [vmem:[%s61165_s1 + $0x40] sm:$0xff] }
 0x190   :  { %5354 = vmatmul.mubr.f32.vlgmr.msra.gmra.mrb[0].mxu0 %v57672_v26  ;;  %61559 = vst [vmem:[#allocation128_spill] sm:$0xff] %v57857_v0 }
 0x191   :  { %5363 = vmatpush1.msra.mxu0 %v57674_v28  ;;  %5819 = vmatmul.mubr.f32.vlgmr.msra.gmra.mrb[0].mxu1 %v57672_v26  ;;  %61557 = vst [vmem:[#allocation126_spill] sm:$0xff] %v57842_v15 }
 0x192   :  { %5828 = vmatpush1.msra.mxu1 %v57676_v1  ;;  %5426 = vmatprep.mubr.f32.mxu0 %v61489_v23 }
 0x193   :  { %5891 = vmatprep.mubr.f32.mxu1 %v61489_v23  ;;  %5909 = vmatprep.subr.mxu0 %v57779_v18 }
 0x194   :  { %6374 = vmatprep.subr.mxu1 %v57784_v63 }
 0x198   :  { %5428 = vmatmul.mubr.f32.vlgmr.msra.gmra.mrb[0].mxu0 %v57672_v26 }
 0x199   :  { %5893 = vmatmul.mubr.f32.vlgmr.msra.gmra.mrb[0].mxu1 %v57672_v26  ;;  %5911 = vmatpush1.msra.mxu0 %v57804_v50  ;;  %v57855_v26 = vand.u32 4294901760, %v5995_v4  ;;  %v6890_v4 = vsel %vm280_vm0, %v55439_v11, 0 }
 0x19a   :  { %6376 = vmatpush1.msra.mxu1 %v57806_v6  ;;  %5974 = vmatprep.mubr.f32.mxu0 %v61489_v23  ;;  %v57883_v3 = vand.u32 4294901760, %v6890_v4 }
 0x19b   :  { %5991 = vmatprep.subr.mxu0 %v57839_v12  ;;  %6439 = vmatprep.mubr.f32.mxu1 %v61489_v23  ;;  %61558 = vst [vmem:[#allocation127_spill] sm:$0xff] %v57855_v26 }
 0x19c   :  { %6456 = vmatprep.subr.mxu1 %v57842_v15 }
 0x1a0   :  { %5980 = vmatmul.mubr.f32.vlgmr.msra.gmra.mrb[0].mxu0 %v5979_v30 }
 0x1a1   :  { %5997 = vmatpush1.msra.mxu0 %v57855_v26  ;;  %6445 = vmatmul.mubr.f32.vlgmr.msra.gmra.mrb[0].mxu1 %v5979_v30 }
 0x1a2   :  { %6462 = vmatpush1.msra.mxu1 %v57857_v0  ;;  %6070 = vmatprep.subr.mxu0 %v57795_v20 }
 0x1a3   :  { %6535 = vmatprep.subr.mxu1 %v57800_v62  ;;  %6060 = vmatprep.mubr.f32.mxu0 %v61489_v23 }
 0x1a4   :  { %6525 = vmatprep.mubr.f32.mxu1 %v61489_v23 }
 0x1a8   :  { %6062 = vmatmul.mubr.f32.vlgmr.msra.gmra.mrb[0].mxu0 %v57802_v58 }
 0x1a9   :  { %6073 = vmatpush1.msra.mxu0 %v57819_v13  ;;  %6527 = vmatmul.mubr.f32.vlgmr.msra.gmra.mrb[0].mxu1 %v57802_v58 }
 0x1aa   :  { %6538 = vmatpush1.msra.mxu1 %v57823_v9  ;;  %6146 = vmatprep.subr.mxu0 %v57779_v18 }
 0x1ab   :  { %6611 = vmatprep.subr.mxu1 %v57784_v63  ;;  %6136 = vmatprep.mubr.f32.mxu0 %v61489_v23 }
 0x1ac   :  { %6601 = vmatprep.mubr.f32.mxu1 %v61489_v23 }
 0x1b0   :  { %6139 = vmatmul.mubr.f32.vlgmr.msra.gmra.mrb[0].mxu0 %v5976_v27 }
 0x1b1   :  { %6148 = vmatpush1.msra.mxu0 %v57804_v50  ;;  %6604 = vmatmul.mubr.f32.vlgmr.msra.gmra.mrb[0].mxu1 %v5976_v27  ;;  %v6960_v27 = vsub.f32 %v6890_v4, %v57883_v3 }
 0x1b2   :  { %6613 = vmatpush1.msra.mxu1 %v57806_v6  ;;  %6224 = vmatprep.subr.mxu0 %v57809_v24 }
 0x1b3   :  { %6689 = vmatprep.subr.mxu1 %v57813_v14  ;;  %6211 = vmatprep.mubr.f32.mxu0 %v61489_v23  ;;  %v6961_v30 = vand.u32 4294901760, %v6960_v27 }
 0x1b4   :  { %6676 = vmatprep.mubr.f32.mxu1 %v61489_v23 }
 0x1b8   :  { %6215 = vmatmul.mubr.f32.vlgmr.msra.gmra.mrb[0].mxu0 %v5977_v21 }
 0x1b9   :  { %6228 = vmatpush1.msra.mxu0 %v57834_v35  ;;  %6680 = vmatmul.mubr.f32.vlgmr.msra.gmra.mrb[0].mxu1 %v5977_v21  ;;  %v6962_v21 = vsub.f32 %v6960_v27, %v6961_v30 }
 0x1ba   :  { %6693 = vmatpush1.msra.mxu1 %v57837_v7  ;;  %6300 = vmatprep.subr.mxu0 %v57779_v18 }
 0x1bb   :  { %6765 = vmatprep.subr.mxu1 %v57784_v63  ;;  %6291 = vmatprep.mubr.f32.mxu0 %v61489_v23  ;;  %v6963_v11 = vand.u32 4294901760, %v6962_v21 }
 0x1bc   :  { %6756 = vmatprep.mubr.f32.mxu1 %v61489_v23 }
 0x1c0   :  { %6293 = vmatmul.mubr.f32.vlgmr.msra.gmra.mrb[0].mxu0 %v57802_v58 }
 0x1c1   :  { %6302 = vmatpush1.msra.mxu0 %v57804_v50  ;;  %6758 = vmatmul.mubr.f32.vlgmr.msra.gmra.mrb[0].mxu1 %v57802_v58 }
 0x1c2   :  { %6767 = vmatpush1.msra.mxu1 %v57806_v6  ;;  %6893 = vmatprep.subr.mxu0 %v57047_v38 }
 0x1c3   :  { %7358 = vmatprep.subr.mxu1 %v57045_v37  ;;  %6365 = vmatprep.mubr.f32.mxu0 %v61489_v23 }
 0x1c4   :  { %6830 = vmatprep.mubr.f32.mxu1 %v61489_v23 }
 0x1c8   :  { %6367 = vmatmul.mubr.f32.vlgmr.msra.gmra.mrb[0].mxu0 %v57802_v58 }
 0x1c9   :  { %6832 = vmatmul.mubr.f32.vlgmr.msra.gmra.mrb[0].mxu1 %v57802_v58  ;;  %6895 = vmatpush1.msra.mxu0 %v57043_v36  ;;  %v55438_v58 = vld [vmem:[%s61165_s1 + $0x38] sm:$0xff] }
 0x1ca   :  { %7360 = vmatpush1.msra.mxu1 %v57049_v39  ;;  %6975 = vmatprep.subr.mxu0 %v57089_v52  ;;  %v7823_v4 = vsel %vm280_vm0, %v55438_v58, 0 }
 0x1cb   :  { %7440 = vmatprep.subr.mxu1 %v57091_v53  ;;  %6958 = vmatprep.mubr.f32.mxu0 %v61489_v23 }
 0x1cc   :  { %7423 = vmatprep.mubr.f32.mxu1 %v61489_v23  ;;  %6964 = vmatmul.mubr.f32.vlgmr.msra.gmra.mrb[2].mxu0 %v6963_v11 }
 0x1cd   :  { %6981 = vmatpush1.msra.mxu0 %v57093_v54  ;;  %7429 = vmatmul.mubr.f32.vlgmr.msra.gmra.mrb[2].mxu1 %v6963_v11 }
 0x1ce   :  { %7446 = vmatpush1.msra.mxu1 %v57095_v55  ;;  %7054 = vmatprep.subr.mxu0 %v57058_v42 }
 0x1cf   :  { %7519 = vmatprep.subr.mxu1 %v57055_v41  ;;  %7044 = vmatprep.mubr.f32.mxu0 %v61489_v23 }
 0x1d0   :  { %7509 = vmatprep.mubr.f32.mxu1 %v61489_v23 }
 0x1d4   :  { %7046 = vmatmul.mubr.f32.vlgmr.msra.gmra.mrb[2].mxu0 %v57883_v3 }
 0x1d5   :  { %7057 = vmatpush1.msra.mxu0 %v57052_v40  ;;  %7511 = vmatmul.mubr.f32.vlgmr.msra.gmra.mrb[2].mxu1 %v57883_v3 }
 0x1d6   :  { %7522 = vmatpush1.msra.mxu1 %v57061_v43  ;;  %7130 = vmatprep.subr.mxu0 %v57047_v38 }
 0x1d7   :  { %7595 = vmatprep.subr.mxu1 %v57045_v37  ;;  %7120 = vmatprep.mubr.f32.mxu0 %v61489_v23 }
 0x1d8   :  { %7585 = vmatprep.mubr.f32.mxu1 %v61489_v23 }
 0x1dc   :  { %7123 = vmatmul.mubr.f32.vlgmr.msra.gmra.mrb[2].mxu0 %v6960_v27 }
 0x1dd   :  { %7132 = vmatpush1.msra.mxu0 %v57043_v36  ;;  %7588 = vmatmul.mubr.f32.vlgmr.msra.gmra.mrb[2].mxu1 %v6960_v27  ;;  %v57938_v27 = vand.u32 4294901760, %v7823_v4 }
 0x1de   :  { %7597 = vmatpush1.msra.mxu1 %v57049_v39  ;;  %7208 = vmatprep.subr.mxu0 %v57073_v46 }
 0x1df   :  { %7673 = vmatprep.subr.mxu1 %v57070_v45  ;;  %7195 = vmatprep.mubr.f32.mxu0 %v61489_v23  ;;  %v7893_v21 = vsub.f32 %v7823_v4, %v57938_v27 }
 0x1e0   :  { %7660 = vmatprep.mubr.f32.mxu1 %v61489_v23 }
 0x1e4   :  { %7199 = vmatmul.mubr.f32.vlgmr.msra.gmra.mrb[2].mxu0 %v6961_v30 }
 0x1e5   :  { %7212 = vmatpush1.msra.mxu0 %v57067_v44  ;;  %7664 = vmatmul.mubr.f32.vlgmr.msra.gmra.mrb[2].mxu1 %v6961_v30  ;;  %v7894_v30 = vand.u32 4294901760, %v7893_v21 }
 0x1e6   :  { %7677 = vmatpush1.msra.mxu1 %v57076_v47  ;;  %7284 = vmatprep.subr.mxu0 %v57047_v38 }
 0x1e7   :  { %7749 = vmatprep.subr.mxu1 %v57045_v37  ;;  %7275 = vmatprep.mubr.f32.mxu0 %v61489_v23  ;;  %v7895_v11 = vsub.f32 %v7893_v21, %v7894_v30 }
 0x1e8   :  { %7740 = vmatprep.mubr.f32.mxu1 %v61489_v23 }
 0x1e9   :  { %v7896_v58 = vand.u32 4294901760, %v7895_v11 }
 0x1ec   :  { %7277 = vmatmul.mubr.f32.vlgmr.msra.gmra.mrb[2].mxu0 %v57883_v3 }
 0x1ed   :  { %7286 = vmatpush1.msra.mxu0 %v57043_v36  ;;  %7742 = vmatmul.mubr.f32.vlgmr.msra.gmra.mrb[2].mxu1 %v57883_v3 }
 0x1ee   :  { %7751 = vmatpush1.msra.mxu1 %v57049_v39  ;;  %7826 = vmatprep.subr.mxu0 %v57146_v19 }
 0x1ef   :  { %8291 = vmatprep.subr.mxu1 %v57151_v25  ;;  %7349 = vmatprep.mubr.f32.mxu0 %v61489_v23 }
 0x1f0   :  { %7814 = vmatprep.mubr.f32.mxu1 %v61489_v23 }
 0x1f4   :  { %7351 = vmatmul.mubr.f32.vlgmr.msra.gmra.mrb[2].mxu0 %v57883_v3 }
 0x1f5   :  { %7816 = vmatmul.mubr.f32.vlgmr.msra.gmra.mrb[2].mxu1 %v57883_v3  ;;  %7828 = vmatpush1.msra.mxu0 %v57173_v31  ;;  %v55440_v3 = vld [vmem:[%s61165_s1 + $0x48] sm:$0xff] }
 0x1f6   :  { %8293 = vmatpush1.msra.mxu1 %v57177_v32  ;;  %7908 = vmatprep.subr.mxu0 %v57216_v59  ;;  %v8758_v4 = vsel %vm280_vm0, %v55440_v3, 0 }
 0x1f7   :  { %8373 = vmatprep.subr.mxu1 %v57219_v60  ;;  %7891 = vmatprep.mubr.f32.mxu0 %v61489_v23  ;;  %v57987_v11 = vand.u32 4294901760, %v8758_v4 }
 0x1f8   :  { %8356 = vmatprep.mubr.f32.mxu1 %v61489_v23 }
 0x1fc   :  { %7897 = vmatmul.mubr.f32.vlgmr.msra.gmra.mrb[2].mxu0 %v7896_v58 }
 0x1fd   :  { %7914 = vmatpush1.msra.mxu0 %v57233_v8  ;;  %8362 = vmatmul.mubr.f32.vlgmr.msra.gmra.mrb[2].mxu1 %v7896_v58  ;;  %v8828_v58 = vsub.f32 %v8758_v4, %v57987_v11  ;;  %v61561_v4 = vld [vmem:[#allocation53_spill] sm:$0xff] }
 0x1fe   :  { %8379 = vmatpush1.msra.mxu1 %v57235_v10  ;;  %7987 = vmatprep.subr.mxu0 %v57162_v29 }
 0x1ff   :  { %8452 = vmatprep.subr.mxu1 %v57167_v17  ;;  %7977 = vmatprep.mubr.f32.mxu0 %v61489_v23  ;;  %v61568_v17 = vld [vmem:[#allocation52_spill] sm:$0xff] }
 0x200   :  { %8442 = vmatprep.mubr.f32.mxu1 %v61489_v23 }
 0x204   :  { %7979 = vmatmul.mubr.f32.vlgmr.msra.gmra.mrb[2].mxu0 %v57938_v27 }
 0x205   :  { %7990 = vmatpush1.msra.mxu0 %v57192_v48  ;;  %8444 = vmatmul.mubr.f32.vlgmr.msra.gmra.mrb[2].mxu1 %v57938_v27  ;;  %v61566_v48 = vld [vmem:[#allocation64_spill] sm:$0xff] }
 0x206   :  { %8455 = vmatpush1.msra.mxu1 %v57196_v49  ;;  %8063 = vmatprep.subr.mxu0 %v57146_v19  ;;  %v61565_v49 = vld [vmem:[#allocation63_spill] sm:$0xff] }
 0x207   :  { %8528 = vmatprep.subr.mxu1 %v57151_v25  ;;  %8053 = vmatprep.mubr.f32.mxu0 %v61489_v23 }
 0x208   :  { %8518 = vmatprep.mubr.f32.mxu1 %v61489_v23 }
 0x20c   :  { %8056 = vmatmul.mubr.f32.vlgmr.msra.gmra.mrb[2].mxu0 %v7893_v21 }
 0x20d   :  { %8065 = vmatpush1.msra.mxu0 %v57173_v31  ;;  %8521 = vmatmul.mubr.f32.vlgmr.msra.gmra.mrb[2].mxu1 %v7893_v21  ;;  %v61560_v21 = vld [vmem:[#allocation41_spill] sm:$0xff] }
 0x20e   :  { %8530 = vmatpush1.msra.mxu1 %v57177_v32  ;;  %8141 = vmatprep.subr.mxu0 %v57180_v33 }
 0x20f   :  { %8606 = vmatprep.subr.mxu1 %v57184_v34  ;;  %8128 = vmatprep.mubr.f32.mxu0 %v61489_v23  ;;  %v61564_v34 = vld [vmem:[#allocation62_spill] sm:$0xff] }
 0x210   :  { %8593 = vmatprep.mubr.f32.mxu1 %v61489_v23 }
 0x214   :  { %8132 = vmatmul.mubr.f32.vlgmr.msra.gmra.mrb[2].mxu0 %v7894_v30 }
 0x215   :  { %8145 = vmatpush1.msra.mxu0 %v57211_v57  ;;  %8597 = vmatmul.mubr.f32.vlgmr.msra.gmra.mrb[2].mxu1 %v7894_v30  ;;  %v8829_v30 = vand.u32 4294901760, %v8828_v58  ;;  %v61563_v57 = vld [vmem:[#allocation61_spill] sm:$0xff] }
 0x216   :  { %8610 = vmatpush1.msra.mxu1 %v61560_v21  ;;  %8217 = vmatprep.subr.mxu0 %v57146_v19  ;;  %v61562_v21 = vld [vmem:[#allocation54_spill] sm:$0xff] }
 0x217   :  { %8682 = vmatprep.subr.mxu1 %v57151_v25  ;;  %8208 = vmatprep.mubr.f32.mxu0 %v61489_v23  ;;  %v8830_v3 = vsub.f32 %v8828_v58, %v8829_v30 }
 0x218   :  { %8673 = vmatprep.mubr.f32.mxu1 %v61489_v23 }
 0x219   :  { %v8831_v33 = vand.u32 4294901760, %v8830_v3  ;;  %v61570_v3 = vld [vmem:[#allocation58_spill] sm:$0xff] }
 0x21c   :  { %8210 = vmatmul.mubr.f32.vlgmr.msra.gmra.mrb[2].mxu0 %v57938_v27 }
 0x21d   :  { %8219 = vmatpush1.msra.mxu0 %v57173_v31  ;;  %8675 = vmatmul.mubr.f32.vlgmr.msra.gmra.mrb[2].mxu1 %v57938_v27 }
 0x21e   :  { %8684 = vmatpush1.msra.mxu1 %v57177_v32  ;;  %8761 = vmatprep.subr.mxu0 %v57284_v22 }
 0x21f   :  { %9226 = vmatprep.subr.mxu1 %v57289_v5  ;;  %8282 = vmatprep.mubr.f32.mxu0 %v61489_v23 }
 0x220   :  { %8747 = vmatprep.mubr.f32.mxu1 %v61489_v23 }
 0x224   :  { %8284 = vmatmul.mubr.f32.vlgmr.msra.gmra.mrb[2].mxu0 %v57938_v27 }
 0x225   :  { %8749 = vmatmul.mubr.f32.vlgmr.msra.gmra.mrb[2].mxu1 %v57938_v27  ;;  %8763 = vmatpush1.msra.mxu0 %v61561_v4  ;;  %v61567_v27 = vld [vmem:[#allocation51_spill] sm:$0xff] }
 0x226   :  { %9228 = vmatpush1.msra.mxu1 %v61562_v21  ;;  %8843 = vmatprep.subr.mxu0 %v61563_v57  ;;  %v61579_v57 = vld [vmem:[#allocation77_spill] sm:$0xff] }
 0x227   :  { %9308 = vmatprep.subr.mxu1 %v61564_v34  ;;  %8826 = vmatprep.mubr.f32.mxu0 %v61489_v23  ;;  %v61569_v34 = vld [vmem:[#allocation57_spill] sm:$0xff] }
 0x228   :  { %9291 = vmatprep.mubr.f32.mxu1 %v61489_v23 }
 0x22c   :  { %8832 = vmatmul.mubr.f32.vlgmr.msra.gmra.mrb[2].mxu0 %v8831_v33 }
 0x22d   :  { %8849 = vmatpush1.msra.mxu0 %v61565_v49  ;;  %9297 = vmatmul.mubr.f32.vlgmr.msra.gmra.mrb[2].mxu1 %v8831_v33  ;;  %v61571_v33 = vld [vmem:[#allocation55_spill] sm:$0xff] }
 0x22e   :  { %9314 = vmatpush1.msra.mxu1 %v61566_v48  ;;  %8922 = vmatprep.subr.mxu0 %v61567_v27  ;;  %v61574_v27 = vld [vmem:[#allocation60_spill] sm:$0xff] }
 0x22f   :  { %9387 = vmatprep.subr.mxu1 %v61568_v17  ;;  %8912 = vmatprep.mubr.f32.mxu0 %v61489_v23  ;;  %v61573_v17 = vld [vmem:[#allocation59_spill] sm:$0xff]  ;;  %v61578_v48 = vld [vmem:[#allocation76_spill] sm:$0xff] }
 0x230   :  { %9377 = vmatprep.mubr.f32.mxu1 %v61489_v23 }
 0x234   :  { %8914 = vmatmul.mubr.f32.vlgmr.msra.gmra.mrb[2].mxu0 %v57987_v11 }
 0x235   :  { %8925 = vmatpush1.msra.mxu0 %v61569_v34  ;;  %9379 = vmatmul.mubr.f32.vlgmr.msra.gmra.mrb[2].mxu1 %v57987_v11  ;;  %v61572_v34 = vld [vmem:[#allocation56_spill] sm:$0xff] }
 0x236   :  { %9390 = vmatpush1.msra.mxu1 %v61570_v3  ;;  %8998 = vmatprep.subr.mxu0 %v57284_v22  ;;  %v55441_v3 = vld [vmem:[%s61165_s1 + $0x50] sm:$0xff] }
 0x237   :  { %9463 = vmatprep.subr.mxu1 %v57289_v5  ;;  %8988 = vmatprep.mubr.f32.mxu0 %v61489_v23 }
 0x238   :  { %9453 = vmatprep.mubr.f32.mxu1 %v61489_v23 }
 0x23c   :  { %8991 = vmatmul.mubr.f32.vlgmr.msra.gmra.mrb[2].mxu0 %v8828_v58 }
 0x23d   :  { %9000 = vmatpush1.msra.mxu0 %v61561_v4  ;;  %9456 = vmatmul.mubr.f32.vlgmr.msra.gmra.mrb[2].mxu1 %v8828_v58  ;;  %v9697_v58 = vsel %vm280_vm0, %v55441_v3, 0 }
 0x23e   :  { %9465 = vmatpush1.msra.mxu1 %v61562_v21  ;;  %9076 = vmatprep.subr.mxu0 %v61571_v33 }
 0x23f   :  { %9541 = vmatprep.subr.mxu1 %v61572_v34  ;;  %9063 = vmatprep.mubr.f32.mxu0 %v61489_v23  ;;  %v58036_v34 = vand.u32 4294901760, %v9697_v58 }
 0x240   :  { %9528 = vmatprep.mubr.f32.mxu1 %v61489_v23 }
 0x241   :  { %v9767_v33 = vsub.f32 %v9697_v58, %v58036_v34  ;;  %v61576_v58 = vld [vmem:[#allocation68_spill] sm:$0xff] }
 0x243   :  { %v9768_v3 = vand.u32 4294901760, %v9767_v33 }
 0x244   :  { %9067 = vmatmul.mubr.f32.vlgmr.msra.gmra.mrb[2].mxu0 %v8829_v30 }
 0x245   :  { %9080 = vmatpush1.msra.mxu0 %v61573_v17  ;;  %9532 = vmatmul.mubr.f32.vlgmr.msra.gmra.mrb[2].mxu1 %v8829_v30  ;;  %v61575_v30 = vld [vmem:[#allocation65_spill] sm:$0xff] }
 0x246   :  { %9545 = vmatpush1.msra.mxu1 %v61574_v27  ;;  %9152 = vmatprep.subr.mxu0 %v57284_v22  ;;  %v9769_v27 = vsub.f32 %v9767_v33, %v9768_v3  ;;  %v61577_v17 = vld [vmem:[#allocation69_spill] sm:$0xff] }
 0x247   :  { %9617 = vmatprep.subr.mxu1 %v57289_v5  ;;  %9143 = vmatprep.mubr.f32.mxu0 %v61489_v23  ;;  %v61583_v5 = vld [vmem:[#allocation67_spill] sm:$0xff] }
 0x248   :  { %9608 = vmatprep.mubr.f32.mxu1 %v61489_v23  ;;  %v9770_v49 = vand.u32 4294901760, %v9769_v27  ;;  %v61584_v27 = vld [vmem:[#allocation72_spill] sm:$0xff] }
 0x24c   :  { %9145 = vmatmul.mubr.f32.vlgmr.msra.gmra.mrb[2].mxu0 %v57987_v11 }
 0x24d   :  { %9154 = vmatpush1.msra.mxu0 %v61561_v4  ;;  %9610 = vmatmul.mubr.f32.vlgmr.msra.gmra.mrb[2].mxu1 %v57987_v11  ;;  %v61582_v4 = vld [vmem:[#allocation66_spill] sm:$0xff] }
 0x24e   :  { %9619 = vmatpush1.msra.mxu1 %v61562_v21  ;;  %9217 = vmatprep.mubr.f32.mxu0 %v61489_v23  ;;  %v61580_v21 = vld [vmem:[#allocation78_spill] sm:$0xff] }
 0x24f   :  { %9682 = vmatprep.mubr.f32.mxu1 %v61489_v23  ;;  %9700 = vmatprep.subr.mxu0 %v57388_v16 }
 0x250   :  { %10165 = vmatprep.subr.mxu1 %v61575_v30 }
 0x254   :  { %9219 = vmatmul.mubr.f32.vlgmr.msra.gmra.mrb[2].mxu0 %v57987_v11 }
 0x255   :  { %9684 = vmatmul.mubr.f32.vlgmr.msra.gmra.mrb[2].mxu1 %v57987_v11  ;;  %9702 = vmatpush1.msra.mxu0 %v61576_v58  ;;  %v61581_v11 = vld [vmem:[#allocation79_spill] sm:$0xff] }
 0x256   :  { %9765 = vmatprep.mubr.f32.mxu0 %v61489_v23  ;;  %10167 = vmatpush1.msra.mxu1 %v61577_v17 }
 0x257   :  { %10230 = vmatprep.mubr.f32.mxu1 %v61489_v23  ;;  %9782 = vmatprep.subr.mxu0 %v61578_v48 }
 0x258   :  { %10247 = vmatprep.subr.mxu1 %v61579_v57  ;;  %v61594_v57 = vld [vmem:[#allocation96_spill] sm:$0xff] }
 0x25c   :  { %9771 = vmatmul.mubr.f32.vlgmr.msra.gmra.mrb[2].mxu0 %v9770_v49 }
 0x25d   :  { %10236 = vmatmul.mubr.f32.vlgmr.msra.gmra.mrb[2].mxu1 %v9770_v49  ;;  %9788 = vmatpush1.msra.mxu0 %v61580_v21  ;;  %v61585_v49 = vld [vmem:[#allocation73_spill] sm:$0xff]  ;;  %v61593_v21 = vld [vmem:[#allocation95_spill] sm:$0xff] }
 0x25e   :  { %9851 = vmatprep.mubr.f32.mxu0 %v61489_v23  ;;  %10253 = vmatpush1.msra.mxu1 %v61581_v11  ;;  %v61589_v11 = vld [vmem:[#allocation75_spill] sm:$0xff] }
 0x25f   :  { %10316 = vmatprep.mubr.f32.mxu1 %v61489_v23  ;;  %9861 = vmatprep.subr.mxu0 %v61582_v4  ;;  %v61588_v4 = vld [vmem:[#allocation74_spill] sm:$0xff] }
 0x260   :  { %10326 = vmatprep.subr.mxu1 %v61583_v5  ;;  %v61587_v5 = vld [vmem:[#allocation71_spill] sm:$0xff] }
 0x264   :  { %9853 = vmatmul.mubr.f32.vlgmr.msra.gmra.mrb[2].mxu0 %v58036_v34 }
 0x265   :  { %10318 = vmatmul.mubr.f32.vlgmr.msra.gmra.mrb[2].mxu1 %v58036_v34  ;;  %9864 = vmatpush1.msra.mxu0 %v61584_v27  ;;  %v61586_v27 = vld [vmem:[#allocation70_spill] sm:$0xff] }
 0x266   :  { %9927 = vmatprep.mubr.f32.mxu0 %v61489_v23  ;;  %10329 = vmatpush1.msra.mxu1 %v61585_v49  ;;  %v55442_v49 = vld [vmem:[%s61165_s1 + $0x58] sm:$0xff] }
 0x267   :  { %10392 = vmatprep.mubr.f32.mxu1 %v61489_v23  ;;  %9937 = vmatprep.subr.mxu0 %v57388_v16 }
 0x268   :  { %10402 = vmatprep.subr.mxu1 %v61575_v30 }
 0x26c   :  { %9930 = vmatmul.mubr.f32.vlgmr.msra.gmra.mrb[2].mxu0 %v9767_v33 }
 0x26d   :  { %10395 = vmatmul.mubr.f32.vlgmr.msra.gmra.mrb[2].mxu1 %v9767_v33  ;;  %9939 = vmatpush1.msra.mxu0 %v61576_v58  ;;  %v10636_v33 = vsel %vm280_vm0, %v55442_v49, 0  ;;  %v61590_v49 = vld [vmem:[#allocation84_spill] sm:$0xff] }
 0x26e   :  { %10002 = vmatprep.mubr.f32.mxu0 %v61489_v23  ;;  %10404 = vmatpush1.msra.mxu1 %v61577_v17 }
 0x26f   :  { %10467 = vmatprep.mubr.f32.mxu1 %v61489_v23  ;;  %10015 = vmatprep.subr.mxu0 %v61586_v27  ;;  %v61592_v27 = vld [vmem:[#allocation88_spill] sm:$0xff] }
 0x270   :  { %10480 = vmatprep.subr.mxu1 %v61587_v5  ;;  %v58085_v5 = vand.u32 4294901760, %v10636_v33 }
 0x274   :  { %10006 = vmatmul.mubr.f32.vlgmr.msra.gmra.mrb[2].mxu0 %v9768_v3 }
 0x275   :  { %10471 = vmatmul.mubr.f32.vlgmr.msra.gmra.mrb[2].mxu1 %v9768_v3  ;;  %10019 = vmatpush1.msra.mxu0 %v61588_v4  ;;  %v10706_v3 = vsub.f32 %v10636_v33, %v58085_v5  ;;  %v61591_v33 = vld [vmem:[#allocation87_spill] sm:$0xff] }
 0x276   :  { %10484 = vmatpush1.msra.mxu1 %v61589_v11  ;;  %10082 = vmatprep.mubr.f32.mxu0 %v61489_v23 }
 0x277   :  { %10091 = vmatprep.subr.mxu0 %v57388_v16  ;;  %10547 = vmatprep.mubr.f32.mxu1 %v61489_v23  ;;  %v10707_v11 = vand.u32 4294901760, %v10706_v3 }
 0x278   :  { %10556 = vmatprep.subr.mxu1 %v61575_v30  ;;  %v61598_v30 = vld [vmem:[#allocation86_spill] sm:$0xff] }
 0x279   :  { %v10708_v4 = vsub.f32 %v10706_v3, %v10707_v11 }
 0x27b   :  { %v10709_v48 = vand.u32 4294901760, %v10708_v4  ;;  %v61600_v4 = vld [vmem:[#allocation92_spill] sm:$0xff] }
 0x27c   :  { %10084 = vmatmul.mubr.f32.vlgmr.msra.gmra.mrb[2].mxu0 %v58036_v34 }
 0x27d   :  { %10093 = vmatpush1.msra.mxu0 %v61576_v58  ;;  %10549 = vmatmul.mubr.f32.vlgmr.msra.gmra.mrb[2].mxu1 %v58036_v34  ;;  %v61596_v58 = vld [vmem:[#allocation98_spill] sm:$0xff] }
 0x27e   :  { %10558 = vmatpush1.msra.mxu1 %v61577_v17  ;;  %10639 = vmatprep.subr.mxu0 %v57519_v2  ;;  %v61595_v17 = vld [vmem:[#allocation97_spill] sm:$0xff] }
 0x27f   :  { %11104 = vmatprep.subr.mxu1 %v61590_v49  ;;  %10156 = vmatprep.mubr.f32.mxu0 %v61489_v23 }
 0x280   :  { %10621 = vmatprep.mubr.f32.mxu1 %v61489_v23 }
 0x284   :  { %10158 = vmatmul.mubr.f32.vlgmr.msra.gmra.mrb[2].mxu0 %v58036_v34 }
 0x285   :  { %10623 = vmatmul.mubr.f32.vlgmr.msra.gmra.mrb[2].mxu1 %v58036_v34  ;;  %10641 = vmatpush1.msra.mxu0 %v61591_v33  ;;  %v61597_v34 = vld [vmem:[#allocation85_spill] sm:$0xff] }
 0x286   :  { %11106 = vmatpush1.msra.mxu1 %v61592_v27  ;;  %10721 = vmatprep.subr.mxu0 %v61593_v21 }
 0x287   :  { %11186 = vmatprep.subr.mxu1 %v61594_v57  ;;  %10704 = vmatprep.mubr.f32.mxu0 %v61489_v23  ;;  %v61599_v57 = vld [vmem:[#allocation91_spill] sm:$0xff] }
 0x288   :  { %11169 = vmatprep.mubr.f32.mxu1 %v61489_v23 }
 0x28c   :  { %10710 = vmatmul.mubr.f32.vlgmr.msra.gmra.mrb[2].mxu0 %v10709_v48 }
 0x28d   :  { %10727 = vmatpush1.msra.mxu0 %v61595_v17  ;;  %11175 = vmatmul.mubr.f32.vlgmr.msra.gmra.mrb[2].mxu1 %v10709_v48  ;;  %v61609_v17 = vld [vmem:[#allocation104_spill] sm:$0xff] }
 0x28e   :  { %11192 = vmatpush1.msra.mxu1 %v61596_v58  ;;  %10800 = vmatprep.subr.mxu0 %v61597_v34  ;;  %v61602_v58 = vld [vmem:[#allocation90_spill] sm:$0xff] }
 0x28f   :  { %11265 = vmatprep.subr.mxu1 %v61598_v30  ;;  %10790 = vmatprep.mubr.f32.mxu0 %v61489_v23 }
 0x290   :  { %11255 = vmatprep.mubr.f32.mxu1 %v61489_v23 }
 0x294   :  { %10792 = vmatmul.mubr.f32.vlgmr.msra.gmra.mrb[2].mxu0 %v58085_v5 }
 0x295   :  { %10803 = vmatpush1.msra.mxu0 %v61599_v57  ;;  %11257 = vmatmul.mubr.f32.vlgmr.msra.gmra.mrb[2].mxu1 %v58085_v5 }
 0x296   :  { %11268 = vmatpush1.msra.mxu1 %v61600_v4  ;;  %10876 = vmatprep.subr.mxu0 %v57519_v2  ;;  %v61601_v4 = vld [vmem:[#allocation89_spill] sm:$0xff] }
 0x297   :  { %11341 = vmatprep.subr.mxu1 %v61590_v49  ;;  %10866 = vmatprep.mubr.f32.mxu0 %v61489_v23 }
 0x298   :  { %11331 = vmatprep.mubr.f32.mxu1 %v61489_v23 }
 0x29b   :  { %v6368_v48 = vpop.f32.mrb[0].mxu0 }
 0x29c   :  { %v6833_v30 = vpop.f32.mrb[0].mxu1  ;;  %10869 = vmatmul.mubr.f32.vlgmr.msra.gmra.mrb[2].mxu0 %v10706_v3  ;;  %6842 = vrot.lane.b32.xlu0 %v6368_v48, %s56872_s24  ;;  %v6370_v34 = vpop.f32.mrb[1].mxu0  ;;  %v55443_v48 = vld [vmem:[%s61165_s1 + $0x60] sm:$0xff] }
 0x29d   :  { %v6835_v57 = vpop.f32.mrb[1].mxu1  ;;  %10878 = vmatpush1.msra.mxu0 %v61591_v33  ;;  %11334 = vmatmul.mubr.f32.vlgmr.msra.gmra.mrb[2].mxu1 %v10706_v3  ;;  %v61603_v3 = vld [vmem:[#allocation93_spill] sm:$0xff] }
 0x29e   :  { %11343 = vmatpush1.msra.mxu1 %v61592_v27  ;;  %10954 = vmatprep.subr.mxu0 %v61601_v4  ;;  %v61604_v4 = vld [vmem:[#allocation94_spill] sm:$0xff] }
 0x29f   :  { %11419 = vmatprep.subr.mxu1 %v61602_v58  ;;  %6844 = vrot.lane.b32.xlu1 %v6370_v34, %s56872_s24  ;;  %v11575_v58 = vsel %vm280_vm0, %v55443_v48, 0 }
 0x2a0   :  { %6846 = vrot.lane.b32.xlu0 %v6833_v30, %s56872_s24  ;;  %10941 = vmatprep.mubr.f32.mxu0 %v61489_v23  ;;  %v58138_v30 = vand.u32 4294901760, %v11575_v58 }
 0x2a1   :  { %11406 = vmatprep.mubr.f32.mxu1 %v61489_v23 }
 0x2a4   :  { %10945 = vmatmul.mubr.f32.vlgmr.msra.gmra.mrb[2].mxu0 %v10707_v11  ;;  %6848 = vrot.lane.b32.xlu0 %v6835_v57, %s56872_s24  ;;  %v11645_v57 = vsub.f32 %v11575_v58, %v58138_v30  ;;  %v61605_v58 = vld [vmem:[#allocation111_spill] sm:$0xff] }
 0x2a5   :  { %10958 = vmatpush1.msra.mxu0 %v61603_v3  ;;  %11410 = vmatmul.mubr.f32.vlgmr.msra.gmra.mrb[2].mxu1 %v10707_v11  ;;  %v61607_v3 = vld [vmem:[#allocation113_spill] sm:$0xff] }
 0x2a6   :  { %11423 = vmatpush1.msra.mxu1 %v61604_v4  ;;  %11030 = vmatprep.subr.mxu0 %v57519_v2  ;;  %v11646_v11 = vand.u32 4294901760, %v11645_v57  ;;  %v61606_v4 = vld [vmem:[#allocation112_spill] sm:$0xff] }
 0x2a7   :  { %11495 = vmatprep.subr.mxu1 %v61590_v49  ;;  %11021 = vmatprep.mubr.f32.mxu0 %v61489_v23 }
 0x2a8   :  { %11486 = vmatprep.mubr.f32.mxu1 %v61489_v23  ;;  %v11647_v34 = vsub.f32 %v11645_v57, %v11646_v11 }
 0x2aa   :  { %v11648_v48 = vand.u32 4294901760, %v11647_v34  ;;  %v61611_v34 = vld [vmem:[#allocation108_spill] sm:$0xff] }
 0x2ac   :  { %11023 = vmatmul.mubr.f32.vlgmr.msra.gmra.mrb[2].mxu0 %v58085_v5 }
 0x2ad   :  { %11032 = vmatpush1.msra.mxu0 %v61591_v33  ;;  %11488 = vmatmul.mubr.f32.vlgmr.msra.gmra.mrb[2].mxu1 %v58085_v5 }
 0x2ae   :  { %11497 = vmatpush1.msra.mxu1 %v61592_v27  ;;  %11578 = vmatprep.subr.mxu0 %v57649_v51 }
 0x2af   :  { %12043 = vmatprep.subr.mxu1 %v57654_v61  ;;  %11095 = vmatprep.mubr.f32.mxu0 %v61489_v23 }
 0x2b0   :  { %11560 = vmatprep.mubr.f32.mxu1 %v61489_v23 }
 0x2b4   :  { %11097 = vmatmul.mubr.f32.vlgmr.msra.gmra.mrb[2].mxu0 %v58085_v5 }
 0x2b5   :  { %11562 = vmatmul.mubr.f32.vlgmr.msra.gmra.mrb[2].mxu1 %v58085_v5  ;;  %11580 = vmatpush1.msra.mxu0 %v57674_v28  ;;  %v61608_v5 = vld [vmem:[#allocation103_spill] sm:$0xff] }
 0x2b6   :  { %12045 = vmatpush1.msra.mxu1 %v57676_v1  ;;  %11660 = vmatprep.subr.mxu0 %v57711_v56 }
 0x2b7   :  { %12125 = vmatprep.subr.mxu1 %v61605_v58  ;;  %11643 = vmatprep.mubr.f32.mxu0 %v61489_v23  ;;  %v61610_v58 = vld [vmem:[#allocation107_spill] sm:$0xff] }
 0x2b8   :  { %12108 = vmatprep.mubr.f32.mxu1 %v61489_v23 }
 0x2bc   :  { %11649 = vmatmul.mubr.f32.vlgmr.msra.gmra.mrb[2].mxu0 %v11648_v48 }
 0x2bd   :  { %11666 = vmatpush1.msra.mxu0 %v61606_v4  ;;  %12114 = vmatmul.mubr.f32.vlgmr.msra.gmra.mrb[2].mxu1 %v11648_v48  ;;  %v61612_v48 = vld [vmem:[#allocation105_spill] sm:$0xff] }
 0x2be   :  { %12131 = vmatpush1.msra.mxu1 %v61607_v3  ;;  %11739 = vmatprep.subr.mxu0 %v61608_v5  ;;  %v61615_v5 = vld [vmem:[#allocation110_spill] sm:$0xff] }
 0x2bf   :  { %12204 = vmatprep.subr.mxu1 %v61609_v17  ;;  %11729 = vmatprep.mubr.f32.mxu0 %v61489_v23  ;;  %v61614_v17 = vld [vmem:[#allocation109_spill] sm:$0xff] }
 0x2c0   :  { %12194 = vmatprep.mubr.f32.mxu1 %v61489_v23 }
 0x2c4   :  { %11731 = vmatmul.mubr.f32.vlgmr.msra.gmra.mrb[2].mxu0 %v58138_v30 }
 0x2c5   :  { %11742 = vmatpush1.msra.mxu0 %v61610_v58  ;;  %12196 = vmatmul.mubr.f32.vlgmr.msra.gmra.mrb[2].mxu1 %v58138_v30  ;;  %v61613_v58 = vld [vmem:[#allocation106_spill] sm:$0xff] }
 0x2c6   :  { %12207 = vmatpush1.msra.mxu1 %v61611_v34  ;;  %11815 = vmatprep.subr.mxu0 %v57649_v51  ;;  %v55444_v34 = vld [vmem:[%s61165_s1 + $0x68] sm:$0xff] }
 0x2c7   :  { %12280 = vmatprep.subr.mxu1 %v57654_v61  ;;  %11805 = vmatprep.mubr.f32.mxu0 %v61489_v23 }
 0x2c8   :  { %12270 = vmatprep.mubr.f32.mxu1 %v61489_v23 }
 0x2cc   :  { %11808 = vmatmul.mubr.f32.vlgmr.msra.gmra.mrb[2].mxu0 %v11645_v57 }
 0x2cd   :  { %11817 = vmatpush1.msra.mxu0 %v57674_v28  ;;  %12273 = vmatmul.mubr.f32.vlgmr.msra.gmra.mrb[2].mxu1 %v11645_v57  ;;  %v12514_v57 = vsel %vm280_vm0, %v55444_v34, 0 }
 0x2ce   :  { %12282 = vmatpush1.msra.mxu1 %v57676_v1  ;;  %11893 = vmatprep.subr.mxu0 %v61612_v48 }
 0x2cf   :  { %12358 = vmatprep.subr.mxu1 %v61613_v58  ;;  %11880 = vmatprep.mubr.f32.mxu0 %v61489_v23  ;;  %v58187_v58 = vand.u32 4294901760, %v12514_v57 }
 0x2d0   :  { %12345 = vmatprep.mubr.f32.mxu1 %v61489_v23 }
 0x2d1   :  { %v12584_v48 = vsub.f32 %v12514_v57, %v58187_v58 }
 0x2d4   :  { %11884 = vmatmul.mubr.f32.vlgmr.msra.gmra.mrb[2].mxu0 %v11646_v11 }
 0x2d5   :  { %11897 = vmatpush1.msra.mxu0 %v61614_v17  ;;  %12349 = vmatmul.mubr.f32.vlgmr.msra.gmra.mrb[2].mxu1 %v11646_v11  ;;  %v12585_v11 = vand.u32 4294901760, %v12584_v48 }
 0x2d6   :  { %12362 = vmatpush1.msra.mxu1 %v61615_v5  ;;  %11969 = vmatprep.subr.mxu0 %v57649_v51 }
 0x2d7   :  { %12434 = vmatprep.subr.mxu1 %v57654_v61  ;;  %11960 = vmatprep.mubr.f32.mxu0 %v61489_v23  ;;  %v12586_v34 = vsub.f32 %v12584_v48, %v12585_v11 }
 0x2d8   :  { %12425 = vmatprep.mubr.f32.mxu1 %v61489_v23 }
 0x2d9   :  { %v12587_v57 = vand.u32 4294901760, %v12586_v34 }
 0x2dc   :  { %11962 = vmatmul.mubr.f32.vlgmr.msra.gmra.mrb[2].mxu0 %v58138_v30 }
 0x2dd   :  { %11971 = vmatpush1.msra.mxu0 %v57674_v28  ;;  %12427 = vmatmul.mubr.f32.vlgmr.msra.gmra.mrb[2].mxu1 %v58138_v30 }
 0x2de   :  { %12436 = vmatpush1.msra.mxu1 %v57676_v1  ;;  %12517 = vmatprep.subr.mxu0 %v57779_v18 }
 0x2df   :  { %12982 = vmatprep.subr.mxu1 %v57784_v63  ;;  %12034 = vmatprep.mubr.f32.mxu0 %v61489_v23 }
 0x2e0   :  { %12499 = vmatprep.mubr.f32.mxu1 %v61489_v23 }
 0x2e4   :  { %12036 = vmatmul.mubr.f32.vlgmr.msra.gmra.mrb[2].mxu0 %v58138_v30 }
 0x2e5   :  { %12501 = vmatmul.mubr.f32.vlgmr.msra.gmra.mrb[2].mxu1 %v58138_v30  ;;  %12519 = vmatpush1.msra.mxu0 %v57804_v50  ;;  %v55447_v30 = vld [vmem:[%s61165_s1 + $0x78] sm:$0xff] }
 0x2e6   :  { %12984 = vmatpush1.msra.mxu1 %v57806_v6  ;;  %12599 = vmatprep.subr.mxu0 %v57839_v12  ;;  %v13499_v34 = vsel %vm280_vm0, %v55447_v30, 0 }
 0x2e7   :  { %13064 = vmatprep.subr.mxu1 %v57842_v15  ;;  %12582 = vmatprep.mubr.f32.mxu0 %v61489_v23 }
 0x2e8   :  { %13047 = vmatprep.mubr.f32.mxu1 %v61489_v23 }
 0x2ec   :  { %12588 = vmatmul.mubr.f32.vlgmr.msra.gmra.mrb[2].mxu0 %v12587_v57 }
 0x2ed   :  { %12605 = vmatpush1.msra.mxu0 %v57855_v26  ;;  %13053 = vmatmul.mubr.f32.vlgmr.msra.gmra.mrb[2].mxu1 %v12587_v57  ;;  %v58230_v57 = vand.u32 4294901760, %v13499_v34 }
 0x2ee   :  { %13070 = vmatpush1.msra.mxu1 %v57857_v0  ;;  %12678 = vmatprep.subr.mxu0 %v57795_v20 }
 0x2ef   :  { %13143 = vmatprep.subr.mxu1 %v57800_v62  ;;  %12668 = vmatprep.mubr.f32.mxu0 %v61489_v23 }
 0x2f0   :  { %13133 = vmatprep.mubr.f32.mxu1 %v61489_v23 }
 0x2f4   :  { %12670 = vmatmul.mubr.f32.vlgmr.msra.gmra.mrb[2].mxu0 %v58187_v58 }
 0x2f5   :  { %12681 = vmatpush1.msra.mxu0 %v57819_v13  ;;  %13135 = vmatmul.mubr.f32.vlgmr.msra.gmra.mrb[2].mxu1 %v58187_v58 }
 0x2f6   :  { %13146 = vmatpush1.msra.mxu1 %v57823_v9  ;;  %12754 = vmatprep.subr.mxu0 %v57779_v18 }
 0x2f7   :  { %13219 = vmatprep.subr.mxu1 %v57784_v63  ;;  %12744 = vmatprep.mubr.f32.mxu0 %v61489_v23 }
 0x2f8   :  { %13209 = vmatprep.mubr.f32.mxu1 %v61489_v23 }
 0x2fc   :  { %12747 = vmatmul.mubr.f32.vlgmr.msra.gmra.mrb[2].mxu0 %v12584_v48 }
 0x2fd   :  { %12756 = vmatpush1.msra.mxu0 %v57804_v50  ;;  %13212 = vmatmul.mubr.f32.vlgmr.msra.gmra.mrb[2].mxu1 %v12584_v48  ;;  %v13569_v48 = vsub.f32 %v13499_v34, %v58230_v57 }
 0x2fe   :  { %13221 = vmatpush1.msra.mxu1 %v57806_v6  ;;  %12832 = vmatprep.subr.mxu0 %v57809_v24 }
 0x2ff   :  { %13297 = vmatprep.subr.mxu1 %v57813_v14  ;;  %12819 = vmatprep.mubr.f32.mxu0 %v61489_v23  ;;  %v13570_v30 = vand.u32 4294901760, %v13569_v48 }
 0x300   :  { %13284 = vmatprep.mubr.f32.mxu1 %v61489_v23 }
 0x304   :  { %12823 = vmatmul.mubr.f32.vlgmr.msra.gmra.mrb[2].mxu0 %v12585_v11 }
 0x305   :  { %12836 = vmatpush1.msra.mxu0 %v57834_v35  ;;  %13288 = vmatmul.mubr.f32.vlgmr.msra.gmra.mrb[2].mxu1 %v12585_v11  ;;  %v13571_v11 = vsub.f32 %v13569_v48, %v13570_v30 }
 0x306   :  { %13301 = vmatpush1.msra.mxu1 %v57837_v7  ;;  %12908 = vmatprep.subr.mxu0 %v57779_v18 }
 0x307   :  { %13373 = vmatprep.subr.mxu1 %v57784_v63  ;;  %12899 = vmatprep.mubr.f32.mxu0 %v61489_v23  ;;  %v13572_v34 = vand.u32 4294901760, %v13571_v11 }
 0x308   :  { %13364 = vmatprep.mubr.f32.mxu1 %v61489_v23 }
 0x30c   :  { %12901 = vmatmul.mubr.f32.vlgmr.msra.gmra.mrb[2].mxu0 %v58187_v58 }
 0x30d   :  { %12910 = vmatpush1.msra.mxu0 %v57804_v50  ;;  %13366 = vmatmul.mubr.f32.vlgmr.msra.gmra.mrb[2].mxu1 %v58187_v58 }
 0x30e   :  { %13375 = vmatpush1.msra.mxu1 %v57806_v6  ;;  %13502 = vmatprep.subr.mxu0 %v57047_v38 }
 0x30f   :  { %13967 = vmatprep.subr.mxu1 %v57045_v37  ;;  %12973 = vmatprep.mubr.f32.mxu0 %v61489_v23 }
 0x310   :  { %13438 = vmatprep.mubr.f32.mxu1 %v61489_v23 }
 0x314   :  { %12975 = vmatmul.mubr.f32.vlgmr.msra.gmra.mrb[2].mxu0 %v58187_v58 }
 0x315   :  { %13440 = vmatmul.mubr.f32.vlgmr.msra.gmra.mrb[2].mxu1 %v58187_v58  ;;  %13504 = vmatpush1.msra.mxu0 %v57043_v36  ;;  %v55446_v58 = vld [vmem:[%s61165_s1 + $0x70] sm:$0xff] }
 0x316   :  { %13969 = vmatpush1.msra.mxu1 %v57049_v39  ;;  %13584 = vmatprep.subr.mxu0 %v57089_v52 }
 0x317   :  { %14049 = vmatprep.subr.mxu1 %v57091_v53  ;;  %13567 = vmatprep.mubr.f32.mxu0 %v61489_v23 }
 0x318   :  { %14032 = vmatprep.mubr.f32.mxu1 %v61489_v23  ;;  %13573 = vmatmul.mubr.f32.vlgmr.msra.gmra.mrb[4].mxu0 %v13572_v34 }
 0x319   :  { %13590 = vmatpush1.msra.mxu0 %v57093_v54  ;;  %14038 = vmatmul.mubr.f32.vlgmr.msra.gmra.mrb[4].mxu1 %v13572_v34 }
 0x31a   :  { %14055 = vmatpush1.msra.mxu1 %v57095_v55  ;;  %13663 = vmatprep.subr.mxu0 %v57058_v42 }
 0x31b   :  { %14128 = vmatprep.subr.mxu1 %v57055_v41  ;;  %13653 = vmatprep.mubr.f32.mxu0 %v61489_v23 }
 0x31c   :  { %14118 = vmatprep.mubr.f32.mxu1 %v61489_v23 }
 0x320   :  { %13655 = vmatmul.mubr.f32.vlgmr.msra.gmra.mrb[4].mxu0 %v58230_v57 }
 0x321   :  { %13666 = vmatpush1.msra.mxu0 %v57052_v40  ;;  %14120 = vmatmul.mubr.f32.vlgmr.msra.gmra.mrb[4].mxu1 %v58230_v57 }
 0x322   :  { %14131 = vmatpush1.msra.mxu1 %v57061_v43  ;;  %13739 = vmatprep.subr.mxu0 %v57047_v38 }
 0x323   :  { %14204 = vmatprep.subr.mxu1 %v57045_v37  ;;  %13729 = vmatprep.mubr.f32.mxu0 %v61489_v23 }
 0x324   :  { %14194 = vmatprep.mubr.f32.mxu1 %v61489_v23 }
 0x328   :  { %13732 = vmatmul.mubr.f32.vlgmr.msra.gmra.mrb[4].mxu0 %v13569_v48 }
 0x329   :  { %13741 = vmatpush1.msra.mxu0 %v57043_v36  ;;  %14197 = vmatmul.mubr.f32.vlgmr.msra.gmra.mrb[4].mxu1 %v13569_v48  ;;  %v14432_v48 = vsel %vm280_vm0, %v55446_v58, 0 }
 0x32a   :  { %14206 = vmatpush1.msra.mxu1 %v57049_v39  ;;  %13817 = vmatprep.subr.mxu0 %v57073_v46  ;;  %v58285_v11 = vand.u32 4294901760, %v14432_v48 }
 0x32b   :  { %14282 = vmatprep.subr.mxu1 %v57070_v45  ;;  %13804 = vmatprep.mubr.f32.mxu0 %v61489_v23 }
 0x32c   :  { %14269 = vmatprep.mubr.f32.mxu1 %v61489_v23  ;;  %v14502_v34 = vsub.f32 %v14432_v48, %v58285_v11 }
 0x330   :  { %13808 = vmatmul.mubr.f32.vlgmr.msra.gmra.mrb[4].mxu0 %v13570_v30 }
 0x331   :  { %13821 = vmatpush1.msra.mxu0 %v57067_v44  ;;  %14273 = vmatmul.mubr.f32.vlgmr.msra.gmra.mrb[4].mxu1 %v13570_v30  ;;  %v14503_v30 = vand.u32 4294901760, %v14502_v34 }
 0x332   :  { %14286 = vmatpush1.msra.mxu1 %v57076_v47  ;;  %13893 = vmatprep.subr.mxu0 %v57047_v38 }
 0x333   :  { %14358 = vmatprep.subr.mxu1 %v57045_v37  ;;  %13884 = vmatprep.mubr.f32.mxu0 %v61489_v23  ;;  %v14504_v58 = vsub.f32 %v14502_v34, %v14503_v30 }
 0x334   :  { %14349 = vmatprep.mubr.f32.mxu1 %v61489_v23 }
 0x335   :  { %v14505_v48 = vand.u32 4294901760, %v14504_v58  ;;  %v61618_v58 = vld [vmem:[#allocation39_spill] sm:$0xff] }
 0x338   :  { %13886 = vmatmul.mubr.f32.vlgmr.msra.gmra.mrb[4].mxu0 %v58230_v57 }
 0x339   :  { %13895 = vmatpush1.msra.mxu0 %v57043_v36  ;;  %14351 = vmatmul.mubr.f32.vlgmr.msra.gmra.mrb[4].mxu1 %v58230_v57 }
 0x33a   :  { %14360 = vmatpush1.msra.mxu1 %v57049_v39  ;;  %14435 = vmatprep.subr.mxu0 %v57146_v19 }
 0x33b   :  { %14900 = vmatprep.subr.mxu1 %v57151_v25  ;;  %13958 = vmatprep.mubr.f32.mxu0 %v61489_v23 }
 0x33c   :  { %14423 = vmatprep.mubr.f32.mxu1 %v61489_v23 }
 0x340   :  { %13960 = vmatmul.mubr.f32.vlgmr.msra.gmra.mrb[4].mxu0 %v58230_v57 }
 0x341   :  { %14425 = vmatmul.mubr.f32.vlgmr.msra.gmra.mrb[4].mxu1 %v58230_v57  ;;  %14437 = vmatpush1.msra.mxu0 %v57173_v31  ;;  %v61616_v57 = vld [vmem:[#allocation33_spill] sm:$0xff] }
 0x342   :  { %14902 = vmatpush1.msra.mxu1 %v57177_v32  ;;  %14517 = vmatprep.subr.mxu0 %v57216_v59 }
 0x343   :  { %14982 = vmatprep.subr.mxu1 %v57219_v60  ;;  %14500 = vmatprep.mubr.f32.mxu0 %v61489_v23  ;;  %v61617_v60 = vld [vmem:[#allocation38_spill] sm:$0xff] }
 0x344   :  { %14965 = vmatprep.mubr.f32.mxu1 %v61489_v23 }
 0x348   :  { %14506 = vmatmul.mubr.f32.vlgmr.msra.gmra.mrb[4].mxu0 %v14505_v48 }
 0x349   :  { %14523 = vmatpush1.msra.mxu0 %v57233_v8  ;;  %14971 = vmatmul.mubr.f32.vlgmr.msra.gmra.mrb[4].mxu1 %v14505_v48  ;;  %v61619_v48 = vld [vmem:[#allocation36_spill] sm:$0xff]  ;;  %v61627_v8 = vld [vmem:[#allocation62_spill] sm:$0xff] }
 0x34a   :  { %14988 = vmatpush1.msra.mxu1 %v57235_v10  ;;  %14596 = vmatprep.subr.mxu0 %v57162_v29  ;;  %v61622_v29 = vld [vmem:[#allocation41_spill] sm:$0xff] }
 0x34b   :  { %15061 = vmatprep.subr.mxu1 %v61616_v57  ;;  %14586 = vmatprep.mubr.f32.mxu0 %v61489_v23  ;;  %v61621_v57 = vld [vmem:[#allocation40_spill] sm:$0xff]  ;;  %v61626_v10 = vld [vmem:[#allocation61_spill] sm:$0xff] }
 0x34c   :  { %15051 = vmatprep.mubr.f32.mxu1 %v61489_v23 }
 0x350   :  { %14588 = vmatmul.mubr.f32.vlgmr.msra.gmra.mrb[4].mxu0 %v58285_v11 }
 0x351   :  { %14599 = vmatpush1.msra.mxu0 %v61617_v60  ;;  %15053 = vmatmul.mubr.f32.vlgmr.msra.gmra.mrb[4].mxu1 %v58285_v11  ;;  %v61620_v60 = vld [vmem:[#allocation37_spill] sm:$0xff] }
 0x352   :  { %15064 = vmatpush1.msra.mxu1 %v61618_v58  ;;  %14672 = vmatprep.subr.mxu0 %v57146_v19  ;;  %v55448_v58 = vld [vmem:[%s61165_s1 + $0x80] sm:$0xff] }
 0x353   :  { %15137 = vmatprep.subr.mxu1 %v57151_v25  ;;  %14662 = vmatprep.mubr.f32.mxu0 %v61489_v23 }
 0x354   :  { %15127 = vmatprep.mubr.f32.mxu1 %v61489_v23 }
 0x358   :  { %14665 = vmatmul.mubr.f32.vlgmr.msra.gmra.mrb[4].mxu0 %v14502_v34 }
 0x359   :  { %14674 = vmatpush1.msra.mxu0 %v57173_v31  ;;  %15130 = vmatmul.mubr.f32.vlgmr.msra.gmra.mrb[4].mxu1 %v14502_v34  ;;  %v15367_v34 = vsel %vm280_vm0, %v55448_v58, 0 }
 0x35a   :  { %15139 = vmatpush1.msra.mxu1 %v57177_v32  ;;  %14750 = vmatprep.subr.mxu0 %v61619_v48 }
 0x35b   :  { %15215 = vmatprep.subr.mxu1 %v61620_v60  ;;  %14737 = vmatprep.mubr.f32.mxu0 %v61489_v23  ;;  %v58334_v60 = vand.u32 4294901760, %v15367_v34 }
 0x35c   :  { %15202 = vmatprep.mubr.f32.mxu1 %v61489_v23 }
 0x35d   :  { %v15437_v48 = vsub.f32 %v15367_v34, %v58334_v60  ;;  %v61624_v34 = vld [vmem:[#allocation53_spill] sm:$0xff] }
 0x35f   :  { %v15438_v58 = vand.u32 4294901760, %v15437_v48 }
 0x360   :  { %14741 = vmatmul.mubr.f32.vlgmr.msra.gmra.mrb[4].mxu0 %v14503_v30 }
 0x361   :  { %14754 = vmatpush1.msra.mxu0 %v61621_v57  ;;  %15206 = vmatmul.mubr.f32.vlgmr.msra.gmra.mrb[4].mxu1 %v14503_v30  ;;  %v61623_v30 = vld [vmem:[#allocation50_spill] sm:$0xff] }
 0x362   :  { %15219 = vmatpush1.msra.mxu1 %v61622_v29  ;;  %14826 = vmatprep.subr.mxu0 %v57146_v19  ;;  %v15439_v29 = vsub.f32 %v15437_v48, %v15438_v58  ;;  %v61625_v57 = vld [vmem:[#allocation54_spill] sm:$0xff] }
 0x363   :  { %15291 = vmatprep.subr.mxu1 %v57151_v25  ;;  %14817 = vmatprep.mubr.f32.mxu0 %v61489_v23  ;;  %v61631_v25 = vld [vmem:[#allocation52_spill] sm:$0xff] }
 0x364   :  { %15282 = vmatprep.mubr.f32.mxu1 %v61489_v23  ;;  %v15440_v59 = vand.u32 4294901760, %v15439_v29  ;;  %v61633_v29 = vld [vmem:[#allocation58_spill] sm:$0xff] }
 0x368   :  { %14819 = vmatmul.mubr.f32.vlgmr.msra.gmra.mrb[4].mxu0 %v58285_v11 }
 0x369   :  { %14828 = vmatpush1.msra.mxu0 %v57173_v31  ;;  %15284 = vmatmul.mubr.f32.vlgmr.msra.gmra.mrb[4].mxu1 %v58285_v11  ;;  %v61629_v31 = vld [vmem:[#allocation64_spill] sm:$0xff] }
 0x36a   :  { %15293 = vmatpush1.msra.mxu1 %v57177_v32  ;;  %15370 = vmatprep.subr.mxu0 %v57284_v22  ;;  %v61628_v32 = vld [vmem:[#allocation63_spill] sm:$0xff] }
 0x36b   :  { %15835 = vmatprep.subr.mxu1 %v61623_v30  ;;  %14891 = vmatprep.mubr.f32.mxu0 %v61489_v23 }
 0x36c   :  { %15356 = vmatprep.mubr.f32.mxu1 %v61489_v23 }
 0x370   :  { %14893 = vmatmul.mubr.f32.vlgmr.msra.gmra.mrb[4].mxu0 %v58285_v11 }
 0x371   :  { %15358 = vmatmul.mubr.f32.vlgmr.msra.gmra.mrb[4].mxu1 %v58285_v11  ;;  %15372 = vmatpush1.msra.mxu0 %v61624_v34  ;;  %v61630_v11 = vld [vmem:[#allocation51_spill] sm:$0xff] }
 0x372   :  { %15837 = vmatpush1.msra.mxu1 %v61625_v57  ;;  %15452 = vmatprep.subr.mxu0 %v61626_v10  ;;  %v61642_v10 = vld [vmem:[#allocation77_spill] sm:$0xff] }
 0x373   :  { %15917 = vmatprep.subr.mxu1 %v61627_v8  ;;  %15435 = vmatprep.mubr.f32.mxu0 %v61489_v23  ;;  %v61632_v8 = vld [vmem:[#allocation57_spill] sm:$0xff] }
 0x374   :  { %15900 = vmatprep.mubr.f32.mxu1 %v61489_v23 }
 0x378   :  { %15441 = vmatmul.mubr.f32.vlgmr.msra.gmra.mrb[4].mxu0 %v15440_v59 }
 0x379   :  { %15458 = vmatpush1.msra.mxu0 %v61628_v32  ;;  %15906 = vmatmul.mubr.f32.vlgmr.msra.gmra.mrb[4].mxu1 %v15440_v59  ;;  %v61634_v59 = vld [vmem:[#allocation55_spill] sm:$0xff] }
 0x37a   :  { %15923 = vmatpush1.msra.mxu1 %v61629_v31  ;;  %15531 = vmatprep.subr.mxu0 %v61630_v11  ;;  %v61637_v11 = vld [vmem:[#allocation60_spill] sm:$0xff] }
 0x37b   :  { %15996 = vmatprep.subr.mxu1 %v61631_v25  ;;  %15521 = vmatprep.mubr.f32.mxu0 %v61489_v23  ;;  %v61636_v25 = vld [vmem:[#allocation59_spill] sm:$0xff]  ;;  %v61641_v31 = vld [vmem:[#allocation76_spill] sm:$0xff] }
 0x37c   :  { %15986 = vmatprep.mubr.f32.mxu1 %v61489_v23 }
 0x380   :  { %15523 = vmatmul.mubr.f32.vlgmr.msra.gmra.mrb[4].mxu0 %v58334_v60 }
 0x381   :  { %15534 = vmatpush1.msra.mxu0 %v61632_v8  ;;  %15988 = vmatmul.mubr.f32.vlgmr.msra.gmra.mrb[4].mxu1 %v58334_v60  ;;  %v61635_v8 = vld [vmem:[#allocation56_spill] sm:$0xff] }
 0x382   :  { %15999 = vmatpush1.msra.mxu1 %v61633_v29  ;;  %15607 = vmatprep.subr.mxu0 %v57284_v22  ;;  %v55449_v29 = vld [vmem:[%s61165_s1 + $0x88] sm:$0xff] }
 0x383   :  { %16072 = vmatprep.subr.mxu1 %v61623_v30  ;;  %15597 = vmatprep.mubr.f32.mxu0 %v61489_v23 }
 0x384   :  { %16062 = vmatprep.mubr.f32.mxu1 %v61489_v23 }
 0x388   :  { %15600 = vmatmul.mubr.f32.vlgmr.msra.gmra.mrb[4].mxu0 %v15437_v48 }
 0x389   :  { %15609 = vmatpush1.msra.mxu0 %v61624_v34  ;;  %16065 = vmatmul.mubr.f32.vlgmr.msra.gmra.mrb[4].mxu1 %v15437_v48  ;;  %v16306_v48 = vsel %vm280_vm0, %v55449_v29, 0 }
 0x38a   :  { %16074 = vmatpush1.msra.mxu1 %v61625_v57  ;;  %15685 = vmatprep.subr.mxu0 %v61634_v59 }
 0x38b   :  { %16150 = vmatprep.subr.mxu1 %v61635_v8  ;;  %15672 = vmatprep.mubr.f32.mxu0 %v61489_v23  ;;  %v58383_v8 = vand.u32 4294901760, %v16306_v48 }
 0x38c   :  { %16137 = vmatprep.mubr.f32.mxu1 %v61489_v23 }
 0x38d   :  { %v16376_v59 = vsub.f32 %v16306_v48, %v58383_v8  ;;  %v61639_v48 = vld [vmem:[#allocation68_spill] sm:$0xff] }
 0x38f   :  { %v16377_v29 = vand.u32 4294901760, %v16376_v59 }
 0x390   :  { %15676 = vmatmul.mubr.f32.vlgmr.msra.gmra.mrb[4].mxu0 %v15438_v58 }
 0x391   :  { %15689 = vmatpush1.msra.mxu0 %v61636_v25  ;;  %16141 = vmatmul.mubr.f32.vlgmr.msra.gmra.mrb[4].mxu1 %v15438_v58  ;;  %v61638_v58 = vld [vmem:[#allocation65_spill] sm:$0xff] }
 0x392   :  { %16154 = vmatpush1.msra.mxu1 %v61637_v11  ;;  %15761 = vmatprep.subr.mxu0 %v57284_v22  ;;  %v16378_v11 = vsub.f32 %v16376_v59, %v16377_v29  ;;  %v61640_v25 = vld [vmem:[#allocation69_spill] sm:$0xff] }
 0x393   :  { %16226 = vmatprep.subr.mxu1 %v61623_v30  ;;  %15752 = vmatprep.mubr.f32.mxu0 %v61489_v23  ;;  %v61646_v30 = vld [vmem:[#allocation67_spill] sm:$0xff] }
 0x394   :  { %16217 = vmatprep.mubr.f32.mxu1 %v61489_v23  ;;  %v16379_v32 = vand.u32 4294901760, %v16378_v11  ;;  %v61647_v11 = vld [vmem:[#allocation72_spill] sm:$0xff] }
 0x398   :  { %15754 = vmatmul.mubr.f32.vlgmr.msra.gmra.mrb[4].mxu0 %v58334_v60 }
 0x399   :  { %15763 = vmatpush1.msra.mxu0 %v61624_v34  ;;  %16219 = vmatmul.mubr.f32.vlgmr.msra.gmra.mrb[4].mxu1 %v58334_v60  ;;  %v61645_v34 = vld [vmem:[#allocation66_spill] sm:$0xff] }
 0x39a   :  { %16228 = vmatpush1.msra.mxu1 %v61625_v57  ;;  %15826 = vmatprep.mubr.f32.mxu0 %v61489_v23  ;;  %v61643_v57 = vld [vmem:[#allocation78_spill] sm:$0xff] }
 0x39b   :  { %16291 = vmatprep.mubr.f32.mxu1 %v61489_v23  ;;  %16309 = vmatprep.subr.mxu0 %v57388_v16 }
 0x39c   :  { %16774 = vmatprep.subr.mxu1 %v61638_v58 }
 0x3a0   :  { %15828 = vmatmul.mubr.f32.vlgmr.msra.gmra.mrb[4].mxu0 %v58334_v60 }
 0x3a1   :  { %16293 = vmatmul.mubr.f32.vlgmr.msra.gmra.mrb[4].mxu1 %v58334_v60  ;;  %16311 = vmatpush1.msra.mxu0 %v61639_v48  ;;  %v61644_v60 = vld [vmem:[#allocation79_spill] sm:$0xff] }
 0x3a2   :  { %16374 = vmatprep.mubr.f32.mxu0 %v61489_v23  ;;  %16776 = vmatpush1.msra.mxu1 %v61640_v25 }
 0x3a3   :  { %16839 = vmatprep.mubr.f32.mxu1 %v61489_v23  ;;  %16391 = vmatprep.subr.mxu0 %v61641_v31 }
 0x3a4   :  { %16856 = vmatprep.subr.mxu1 %v61642_v10  ;;  %v61657_v10 = vld [vmem:[#allocation86_spill] sm:$0xff] }
 0x3a8   :  { %16380 = vmatmul.mubr.f32.vlgmr.msra.gmra.mrb[4].mxu0 %v16379_v32 }
 0x3a9   :  { %16845 = vmatmul.mubr.f32.vlgmr.msra.gmra.mrb[4].mxu1 %v16379_v32  ;;  %16397 = vmatpush1.msra.mxu0 %v61643_v57  ;;  %v61648_v32 = vld [vmem:[#allocation73_spill] sm:$0xff]  ;;  %v61655_v57 = vld [vmem:[#allocation98_spill] sm:$0xff] }
 0x3aa   :  { %16460 = vmatprep.mubr.f32.mxu0 %v61489_v23  ;;  %16862 = vmatpush1.msra.mxu1 %v61644_v60  ;;  %v61652_v60 = vld [vmem:[#allocation75_spill] sm:$0xff] }
 0x3ab   :  { %16925 = vmatprep.mubr.f32.mxu1 %v61489_v23  ;;  %16470 = vmatprep.subr.mxu0 %v61645_v34  ;;  %v61651_v34 = vld [vmem:[#allocation74_spill] sm:$0xff] }
 0x3ac   :  { %16935 = vmatprep.subr.mxu1 %v61646_v30  ;;  %v61650_v30 = vld [vmem:[#allocation71_spill] sm:$0xff] }
 0x3b0   :  { %16462 = vmatmul.mubr.f32.vlgmr.msra.gmra.mrb[4].mxu0 %v58383_v8 }
 0x3b1   :  { %16927 = vmatmul.mubr.f32.vlgmr.msra.gmra.mrb[4].mxu1 %v58383_v8  ;;  %16473 = vmatpush1.msra.mxu0 %v61647_v11  ;;  %v61649_v11 = vld [vmem:[#allocation70_spill] sm:$0xff] }
 0x3b2   :  { %16536 = vmatprep.mubr.f32.mxu0 %v61489_v23  ;;  %16938 = vmatpush1.msra.mxu1 %v61648_v32  ;;  %v55450_v32 = vld [vmem:[%s61165_s1 + $0x90] sm:$0xff] }
 0x3b3   :  { %17001 = vmatprep.mubr.f32.mxu1 %v61489_v23  ;;  %16546 = vmatprep.subr.mxu0 %v57388_v16 }
 0x3b4   :  { %17011 = vmatprep.subr.mxu1 %v61638_v58 }
 0x3b8   :  { %16539 = vmatmul.mubr.f32.vlgmr.msra.gmra.mrb[4].mxu0 %v16376_v59 }
 0x3b9   :  { %17004 = vmatmul.mubr.f32.vlgmr.msra.gmra.mrb[4].mxu1 %v16376_v59  ;;  %16548 = vmatpush1.msra.mxu0 %v61639_v48  ;;  %v17245_v59 = vsel %vm280_vm0, %v55450_v32, 0 }
 0x3ba   :  { %16611 = vmatprep.mubr.f32.mxu0 %v61489_v23  ;;  %17013 = vmatpush1.msra.mxu1 %v61640_v25 }
 0x3bb   :  { %17076 = vmatprep.mubr.f32.mxu1 %v61489_v23  ;;  %16624 = vmatprep.subr.mxu0 %v61649_v11  ;;  %v61654_v11 = vld [vmem:[#allocation97_spill] sm:$0xff] }
 0x3bc   :  { %17089 = vmatprep.subr.mxu1 %v61650_v30  ;;  %v58432_v30 = vand.u32 4294901760, %v17245_v59 }
 0x3c0   :  { %16615 = vmatmul.mubr.f32.vlgmr.msra.gmra.mrb[4].mxu0 %v16377_v29 }
 0x3c1   :  { %17080 = vmatmul.mubr.f32.vlgmr.msra.gmra.mrb[4].mxu1 %v16377_v29  ;;  %16628 = vmatpush1.msra.mxu0 %v61651_v34  ;;  %v17315_v29 = vsub.f32 %v17245_v59, %v58432_v30  ;;  %v61653_v59 = vld [vmem:[#allocation96_spill] sm:$0xff] }
 0x3c2   :  { %17093 = vmatpush1.msra.mxu1 %v61652_v60  ;;  %16691 = vmatprep.mubr.f32.mxu0 %v61489_v23 }
 0x3c3   :  { %16700 = vmatprep.subr.mxu0 %v57388_v16  ;;  %17156 = vmatprep.mubr.f32.mxu1 %v61489_v23  ;;  %v17316_v32 = vand.u32 4294901760, %v17315_v29 }
 0x3c4   :  { %17165 = vmatprep.subr.mxu1 %v61638_v58 }
 0x3c5   :  { %v17317_v60 = vsub.f32 %v17315_v29, %v17316_v32 }
 0x3c7   :  { %v17318_v34 = vand.u32 4294901760, %v17317_v60  ;;  %v61659_v60 = vld [vmem:[#allocation92_spill] sm:$0xff] }
 0x3c8   :  { %16693 = vmatmul.mubr.f32.vlgmr.msra.gmra.mrb[4].mxu0 %v58383_v8 }
 0x3c9   :  { %16702 = vmatpush1.msra.mxu0 %v61639_v48  ;;  %17158 = vmatmul.mubr.f32.vlgmr.msra.gmra.mrb[4].mxu1 %v58383_v8 }
 0x3ca   :  { %17167 = vmatpush1.msra.mxu1 %v61640_v25  ;;  %17248 = vmatprep.subr.mxu0 %v57519_v2 }
 0x3cb   :  { %17713 = vmatprep.subr.mxu1 %v61590_v49  ;;  %16765 = vmatprep.mubr.f32.mxu0 %v61489_v23 }
 0x3cc   :  { %17230 = vmatprep.mubr.f32.mxu1 %v61489_v23 }
 0x3d0   :  { %16767 = vmatmul.mubr.f32.vlgmr.msra.gmra.mrb[4].mxu0 %v58383_v8 }
 0x3d1   :  { %17232 = vmatmul.mubr.f32.vlgmr.msra.gmra.mrb[4].mxu1 %v58383_v8  ;;  %17250 = vmatpush1.msra.mxu0 %v61591_v33  ;;  %v61656_v8 = vld [vmem:[#allocation85_spill] sm:$0xff] }
 0x3d2   :  { %17715 = vmatpush1.msra.mxu1 %v61592_v27  ;;  %17330 = vmatprep.subr.mxu0 %v61593_v21 }
 0x3d3   :  { %17795 = vmatprep.subr.mxu1 %v61653_v59  ;;  %17313 = vmatprep.mubr.f32.mxu0 %v61489_v23  ;;  %v61658_v59 = vld [vmem:[#allocation91_spill] sm:$0xff] }
 0x3d4   :  { %17778 = vmatprep.mubr.f32.mxu1 %v61489_v23 }
 0x3d8   :  { %17319 = vmatmul.mubr.f32.vlgmr.msra.gmra.mrb[4].mxu0 %v17318_v34 }
 0x3d9   :  { %17336 = vmatpush1.msra.mxu0 %v61654_v11  ;;  %17784 = vmatmul.mubr.f32.vlgmr.msra.gmra.mrb[4].mxu1 %v17318_v34 }
 0x3da   :  { %17801 = vmatpush1.msra.mxu1 %v61655_v57  ;;  %17409 = vmatprep.subr.mxu0 %v61656_v8  ;;  %v61661_v57 = vld [vmem:[#allocation90_spill] sm:$0xff] }
 0x3db   :  { %17874 = vmatprep.subr.mxu1 %v61657_v10  ;;  %17399 = vmatprep.mubr.f32.mxu0 %v61489_v23 }
 0x3dc   :  { %17864 = vmatprep.mubr.f32.mxu1 %v61489_v23 }
 0x3e0   :  { %17401 = vmatmul.mubr.f32.vlgmr.msra.gmra.mrb[4].mxu0 %v58432_v30 }
 0x3e1   :  { %17412 = vmatpush1.msra.mxu0 %v61658_v59  ;;  %17866 = vmatmul.mubr.f32.vlgmr.msra.gmra.mrb[4].mxu1 %v58432_v30 }
 0x3e2   :  { %17877 = vmatpush1.msra.mxu1 %v61659_v60  ;;  %17485 = vmatprep.subr.mxu0 %v57519_v2  ;;  %v61660_v60 = vld [vmem:[#allocation89_spill] sm:$0xff] }
 0x3e3   :  { %17950 = vmatprep.subr.mxu1 %v61590_v49  ;;  %17475 = vmatprep.mubr.f32.mxu0 %v61489_v23 }
 0x3e4   :  { %17940 = vmatprep.mubr.f32.mxu1 %v61489_v23 }
 0x3e7   :  { %v12976_v34 = vpop.f32.mrb[2].mxu0 }
 0x3e8   :  { %v13441_v10 = vpop.f32.mrb[2].mxu1  ;;  %17478 = vmatmul.mubr.f32.vlgmr.msra.gmra.mrb[4].mxu0 %v17315_v29  ;;  %13450 = vrot.lane.b32.xlu1 %v12976_v34, %s56873_s21  ;;  %v12978_v8 = vpop.f32.mrb[3].mxu0  ;;  %v55451_v34 = vld [vmem:[%s61165_s1 + $0x98] sm:$0xff] }
 0x3e9   :  { %v13443_v59 = vpop.f32.mrb[3].mxu1  ;;  %17487 = vmatpush1.msra.mxu0 %v61591_v33  ;;  %17943 = vmatmul.mubr.f32.vlgmr.msra.gmra.mrb[4].mxu1 %v17315_v29  ;;  %v61662_v29 = vld [vmem:[#allocation93_spill] sm:$0xff] }
 0x3ea   :  { %17952 = vmatpush1.msra.mxu1 %v61592_v27  ;;  %17563 = vmatprep.subr.mxu0 %v61660_v60  ;;  %v61663_v60 = vld [vmem:[#allocation94_spill] sm:$0xff] }
 0x3eb   :  { %18028 = vmatprep.subr.mxu1 %v61661_v57  ;;  %13452 = vrot.lane.b32.xlu0 %v12978_v8, %s56873_s21  ;;  %v18184_v57 = vsel %vm280_vm0, %v55451_v34, 0 }
 0x3ec   :  { %13454 = vrot.lane.b32.xlu1 %v13441_v10, %s56873_s21  ;;  %17550 = vmatprep.mubr.f32.mxu0 %v61489_v23  ;;  %v58485_v10 = vand.u32 4294901760, %v18184_v57 }
 0x3ed   :  { %18015 = vmatprep.mubr.f32.mxu1 %v61489_v23 }
 0x3f0   :  { %17554 = vmatmul.mubr.f32.vlgmr.msra.gmra.mrb[4].mxu0 %v17316_v32  ;;  %13456 = vrot.lane.b32.xlu1 %v13443_v59, %s56873_s21  ;;  %v18254_v59 = vsub.f32 %v18184_v57, %v58485_v10  ;;  %v61664_v57 = vld [vmem:[#allocation111_spill] sm:$0xff] }
 0x3f1   :  { %17567 = vmatpush1.msra.mxu0 %v61662_v29  ;;  %18019 = vmatmul.mubr.f32.vlgmr.msra.gmra.mrb[4].mxu1 %v17316_v32 }
 0x3f2   :  { %18032 = vmatpush1.msra.mxu1 %v61663_v60  ;;  %17639 = vmatprep.subr.mxu0 %v57519_v2  ;;  %v18255_v32 = vand.u32 4294901760, %v18254_v59  ;;  %v61666_v60 = vld [vmem:[#allocation104_spill] sm:$0xff] }
 0x3f3   :  { %18104 = vmatprep.subr.mxu1 %v61590_v49  ;;  %17630 = vmatprep.mubr.f32.mxu0 %v61489_v23 }
 0x3f4   :  { %18095 = vmatprep.mubr.f32.mxu1 %v61489_v23  ;;  %v18256_v8 = vsub.f32 %v18254_v59, %v18255_v32 }
 0x3f6   :  { %v18257_v34 = vand.u32 4294901760, %v18256_v8  ;;  %v61668_v8 = vld [vmem:[#allocation108_spill] sm:$0xff] }
 0x3f8   :  { %17632 = vmatmul.mubr.f32.vlgmr.msra.gmra.mrb[4].mxu0 %v58432_v30 }
 0x3f9   :  { %17641 = vmatpush1.msra.mxu0 %v61591_v33  ;;  %18097 = vmatmul.mubr.f32.vlgmr.msra.gmra.mrb[4].mxu1 %v58432_v30 }
 0x3fa   :  { %18106 = vmatpush1.msra.mxu1 %v61592_v27  ;;  %18187 = vmatprep.subr.mxu0 %v57649_v51 }
 0x3fb   :  { %18652 = vmatprep.subr.mxu1 %v57654_v61  ;;  %17704 = vmatprep.mubr.f32.mxu0 %v61489_v23 }
 0x3fc   :  { %18169 = vmatprep.mubr.f32.mxu1 %v61489_v23 }
 0x400   :  { %17706 = vmatmul.mubr.f32.vlgmr.msra.gmra.mrb[4].mxu0 %v58432_v30 }
 0x401   :  { %18171 = vmatmul.mubr.f32.vlgmr.msra.gmra.mrb[4].mxu1 %v58432_v30  ;;  %18189 = vmatpush1.msra.mxu0 %v57674_v28  ;;  %v61665_v30 = vld [vmem:[#allocation103_spill] sm:$0xff] }
 0x402   :  { %18654 = vmatpush1.msra.mxu1 %v57676_v1  ;;  %18269 = vmatprep.subr.mxu0 %v57711_v56 }
 0x403   :  { %18734 = vmatprep.subr.mxu1 %v61664_v57  ;;  %18252 = vmatprep.mubr.f32.mxu0 %v61489_v23  ;;  %v61667_v57 = vld [vmem:[#allocation107_spill] sm:$0xff] }
 0x404   :  { %18717 = vmatprep.mubr.f32.mxu1 %v61489_v23 }
 0x408   :  { %18258 = vmatmul.mubr.f32.vlgmr.msra.gmra.mrb[4].mxu0 %v18257_v34 }
 0x409   :  { %18275 = vmatpush1.msra.mxu0 %v61606_v4  ;;  %18723 = vmatmul.mubr.f32.vlgmr.msra.gmra.mrb[4].mxu1 %v18257_v34  ;;  %v61669_v34 = vld [vmem:[#allocation105_spill] sm:$0xff] }
 0x40a   :  { %18740 = vmatpush1.msra.mxu1 %v61607_v3  ;;  %18348 = vmatprep.subr.mxu0 %v61665_v30 }
 0x40b   :  { %18813 = vmatprep.subr.mxu1 %v61666_v60  ;;  %18338 = vmatprep.mubr.f32.mxu0 %v61489_v23 }
 0x40c   :  { %18803 = vmatprep.mubr.f32.mxu1 %v61489_v23 }
 0x410   :  { %18340 = vmatmul.mubr.f32.vlgmr.msra.gmra.mrb[4].mxu0 %v58485_v10 }
 0x411   :  { %18351 = vmatpush1.msra.mxu0 %v61667_v57  ;;  %18805 = vmatmul.mubr.f32.vlgmr.msra.gmra.mrb[4].mxu1 %v58485_v10  ;;  %v61670_v57 = vld [vmem:[#allocation106_spill] sm:$0xff] }
 0x412   :  { %18816 = vmatpush1.msra.mxu1 %v61668_v8  ;;  %18424 = vmatprep.subr.mxu0 %v57649_v51  ;;  %v55452_v8 = vld [vmem:[%s61165_s1 + $0xa0] sm:$0xff] }
 0x413   :  { %18889 = vmatprep.subr.mxu1 %v57654_v61  ;;  %18414 = vmatprep.mubr.f32.mxu0 %v61489_v23 }
 0x414   :  { %18879 = vmatprep.mubr.f32.mxu1 %v61489_v23 }
 0x418   :  { %18417 = vmatmul.mubr.f32.vlgmr.msra.gmra.mrb[4].mxu0 %v18254_v59 }
 0x419   :  { %18426 = vmatpush1.msra.mxu0 %v57674_v28  ;;  %18882 = vmatmul.mubr.f32.vlgmr.msra.gmra.mrb[4].mxu1 %v18254_v59  ;;  %v19123_v59 = vsel %vm280_vm0, %v55452_v8, 0 }
 0x41a   :  { %18891 = vmatpush1.msra.mxu1 %v57676_v1  ;;  %18502 = vmatprep.subr.mxu0 %v61669_v34 }
 0x41b   :  { %18967 = vmatprep.subr.mxu1 %v61670_v57  ;;  %18489 = vmatprep.mubr.f32.mxu0 %v61489_v23  ;;  %v58534_v57 = vand.u32 4294901760, %v19123_v59 }
 0x41c   :  { %18954 = vmatprep.mubr.f32.mxu1 %v61489_v23 }
 0x41d   :  { %v19193_v34 = vsub.f32 %v19123_v59, %v58534_v57 }
 0x420   :  { %18493 = vmatmul.mubr.f32.vlgmr.msra.gmra.mrb[4].mxu0 %v18255_v32 }
 0x421   :  { %18506 = vmatpush1.msra.mxu0 %v61614_v17  ;;  %18958 = vmatmul.mubr.f32.vlgmr.msra.gmra.mrb[4].mxu1 %v18255_v32  ;;  %v19194_v32 = vand.u32 4294901760, %v19193_v34 }
 0x422   :  { %18971 = vmatpush1.msra.mxu1 %v61615_v5  ;;  %18578 = vmatprep.subr.mxu0 %v57649_v51 }
 0x423   :  { %19043 = vmatprep.subr.mxu1 %v57654_v61  ;;  %18569 = vmatprep.mubr.f32.mxu0 %v61489_v23  ;;  %v19195_v8 = vsub.f32 %v19193_v34, %v19194_v32 }
 0x424   :  { %19034 = vmatprep.mubr.f32.mxu1 %v61489_v23 }
 0x425   :  { %v19196_v59 = vand.u32 4294901760, %v19195_v8 }
 0x428   :  { %18571 = vmatmul.mubr.f32.vlgmr.msra.gmra.mrb[4].mxu0 %v58485_v10 }
 0x429   :  { %18580 = vmatpush1.msra.mxu0 %v57674_v28  ;;  %19036 = vmatmul.mubr.f32.vlgmr.msra.gmra.mrb[4].mxu1 %v58485_v10 }
 0x42a   :  { %19045 = vmatpush1.msra.mxu1 %v57676_v1  ;;  %19126 = vmatprep.subr.mxu0 %v57779_v18 }
 0x42b   :  { %19591 = vmatprep.subr.mxu1 %v57784_v63  ;;  %18643 = vmatprep.mubr.f32.mxu0 %v61489_v23 }
 0x42c   :  { %19108 = vmatprep.mubr.f32.mxu1 %v61489_v23 }
 0x430   :  { %18645 = vmatmul.mubr.f32.vlgmr.msra.gmra.mrb[4].mxu0 %v58485_v10 }
 0x431   :  { %19110 = vmatmul.mubr.f32.vlgmr.msra.gmra.mrb[4].mxu1 %v58485_v10  ;;  %19128 = vmatpush1.msra.mxu0 %v57804_v50  ;;  %v55455_v10 = vld [vmem:[%s61165_s1 + $0xb0] sm:$0xff] }
 0x432   :  { %19593 = vmatpush1.msra.mxu1 %v57806_v6  ;;  %19208 = vmatprep.subr.mxu0 %v57839_v12  ;;  %v20108_v8 = vsel %vm280_vm0, %v55455_v10, 0 }
 0x433   :  { %19673 = vmatprep.subr.mxu1 %v57842_v15  ;;  %19191 = vmatprep.mubr.f32.mxu0 %v61489_v23 }
 0x434   :  { %19656 = vmatprep.mubr.f32.mxu1 %v61489_v23 }
 0x438   :  { %19197 = vmatmul.mubr.f32.vlgmr.msra.gmra.mrb[4].mxu0 %v19196_v59 }
 0x439   :  { %19214 = vmatpush1.msra.mxu0 %v57855_v26  ;;  %19662 = vmatmul.mubr.f32.vlgmr.msra.gmra.mrb[4].mxu1 %v19196_v59  ;;  %v58577_v59 = vand.u32 4294901760, %v20108_v8 }
 0x43a   :  { %19679 = vmatpush1.msra.mxu1 %v57857_v0  ;;  %19287 = vmatprep.subr.mxu0 %v57795_v20 }
 0x43b   :  { %19752 = vmatprep.subr.mxu1 %v57800_v62  ;;  %19277 = vmatprep.mubr.f32.mxu0 %v61489_v23 }
 0x43c   :  { %19742 = vmatprep.mubr.f32.mxu1 %v61489_v23 }
 0x440   :  { %19279 = vmatmul.mubr.f32.vlgmr.msra.gmra.mrb[4].mxu0 %v58534_v57 }
 0x441   :  { %19290 = vmatpush1.msra.mxu0 %v57819_v13  ;;  %19744 = vmatmul.mubr.f32.vlgmr.msra.gmra.mrb[4].mxu1 %v58534_v57 }
 0x442   :  { %19755 = vmatpush1.msra.mxu1 %v57823_v9  ;;  %19363 = vmatprep.subr.mxu0 %v57779_v18 }
 0x443   :  { %19828 = vmatprep.subr.mxu1 %v57784_v63  ;;  %19353 = vmatprep.mubr.f32.mxu0 %v61489_v23 }
 0x444   :  { %19818 = vmatprep.mubr.f32.mxu1 %v61489_v23 }
 0x448   :  { %19356 = vmatmul.mubr.f32.vlgmr.msra.gmra.mrb[4].mxu0 %v19193_v34 }
 0x449   :  { %19365 = vmatpush1.msra.mxu0 %v57804_v50  ;;  %19821 = vmatmul.mubr.f32.vlgmr.msra.gmra.mrb[4].mxu1 %v19193_v34  ;;  %v20178_v34 = vsub.f32 %v20108_v8, %v58577_v59 }
 0x44a   :  { %19830 = vmatpush1.msra.mxu1 %v57806_v6  ;;  %19441 = vmatprep.subr.mxu0 %v57809_v24 }
 0x44b   :  { %19906 = vmatprep.subr.mxu1 %v57813_v14  ;;  %19428 = vmatprep.mubr.f32.mxu0 %v61489_v23  ;;  %v20179_v10 = vand.u32 4294901760, %v20178_v34 }
 0x44c   :  { %19893 = vmatprep.mubr.f32.mxu1 %v61489_v23 }
 0x450   :  { %19432 = vmatmul.mubr.f32.vlgmr.msra.gmra.mrb[4].mxu0 %v19194_v32 }
 0x451   :  { %19445 = vmatpush1.msra.mxu0 %v57834_v35  ;;  %19897 = vmatmul.mubr.f32.vlgmr.msra.gmra.mrb[4].mxu1 %v19194_v32  ;;  %v20180_v32 = vsub.f32 %v20178_v34, %v20179_v10 }
 0x452   :  { %19910 = vmatpush1.msra.mxu1 %v57837_v7  ;;  %19517 = vmatprep.subr.mxu0 %v57779_v18 }
 0x453   :  { %19982 = vmatprep.subr.mxu1 %v57784_v63  ;;  %19508 = vmatprep.mubr.f32.mxu0 %v61489_v23  ;;  %v20181_v8 = vand.u32 4294901760, %v20180_v32 }
 0x454   :  { %19973 = vmatprep.mubr.f32.mxu1 %v61489_v23 }
 0x458   :  { %19510 = vmatmul.mubr.f32.vlgmr.msra.gmra.mrb[4].mxu0 %v58534_v57 }
 0x459   :  { %19519 = vmatpush1.msra.mxu0 %v57804_v50  ;;  %19975 = vmatmul.mubr.f32.vlgmr.msra.gmra.mrb[4].mxu1 %v58534_v57 }
 0x45a   :  { %19984 = vmatpush1.msra.mxu1 %v57806_v6  ;;  %20111 = vmatprep.subr.mxu0 %v57047_v38 }
 0x45b   :  { %20576 = vmatprep.subr.mxu1 %v57045_v37  ;;  %19582 = vmatprep.mubr.f32.mxu0 %v61489_v23 }
 0x45c   :  { %20047 = vmatprep.mubr.f32.mxu1 %v61489_v23 }
 0x460   :  { %19584 = vmatmul.mubr.f32.vlgmr.msra.gmra.mrb[4].mxu0 %v58534_v57 }
 0x461   :  { %20049 = vmatmul.mubr.f32.vlgmr.msra.gmra.mrb[4].mxu1 %v58534_v57  ;;  %20113 = vmatpush1.msra.mxu0 %v57043_v36  ;;  %v55454_v57 = vld [vmem:[%s61165_s1 + $0xa8] sm:$0xff] }
 0x462   :  { %20578 = vmatpush1.msra.mxu1 %v57049_v39  ;;  %20193 = vmatprep.subr.mxu0 %v57089_v52 }
 0x463   :  { %20658 = vmatprep.subr.mxu1 %v57091_v53  ;;  %20176 = vmatprep.mubr.f32.mxu0 %v61489_v23 }
 0x464   :  { %20641 = vmatprep.mubr.f32.mxu1 %v61489_v23  ;;  %20182 = vmatmul.mubr.f32.vlgmr.msra.gmra.mrb[6].mxu0 %v20181_v8 }
 0x465   :  { %20199 = vmatpush1.msra.mxu0 %v57093_v54  ;;  %20647 = vmatmul.mubr.f32.vlgmr.msra.gmra.mrb[6].mxu1 %v20181_v8 }
 0x466   :  { %20664 = vmatpush1.msra.mxu1 %v57095_v55  ;;  %20272 = vmatprep.subr.mxu0 %v57058_v42  ;;  %v61679_v42 = vld [vmem:[#allocation33_spill] sm:$0xff] }
 0x467   :  { %20737 = vmatprep.subr.mxu1 %v57055_v41  ;;  %20262 = vmatprep.mubr.f32.mxu0 %v61489_v23  ;;  %v61677_v41 = vld [vmem:[#allocation45_spill] sm:$0xff] }
 0x468   :  { %20727 = vmatprep.mubr.f32.mxu1 %v61489_v23 }
 0x46c   :  { %20264 = vmatmul.mubr.f32.vlgmr.msra.gmra.mrb[6].mxu0 %v58577_v59 }
 0x46d   :  { %20275 = vmatpush1.msra.mxu0 %v57052_v40  ;;  %20729 = vmatmul.mubr.f32.vlgmr.msra.gmra.mrb[6].mxu1 %v58577_v59  ;;  %v61676_v40 = vld [vmem:[#allocation44_spill] sm:$0xff] }
 0x46e   :  { %20740 = vmatpush1.msra.mxu1 %v57061_v43  ;;  %20348 = vmatprep.subr.mxu0 %v57047_v38 }
 0x46f   :  { %20813 = vmatprep.subr.mxu1 %v57045_v37  ;;  %20338 = vmatprep.mubr.f32.mxu0 %v61489_v23 }
 0x470   :  { %20803 = vmatprep.mubr.f32.mxu1 %v61489_v23 }
 0x474   :  { %20341 = vmatmul.mubr.f32.vlgmr.msra.gmra.mrb[6].mxu0 %v20178_v34 }
 0x475   :  { %20350 = vmatpush1.msra.mxu0 %v57043_v36  ;;  %20806 = vmatmul.mubr.f32.vlgmr.msra.gmra.mrb[6].mxu1 %v20178_v34  ;;  %v21041_v34 = vsel %vm280_vm0, %v55454_v57, 0 }
 0x476   :  { %20815 = vmatpush1.msra.mxu1 %v57049_v39  ;;  %20426 = vmatprep.subr.mxu0 %v57073_v46  ;;  %v58632_v32 = vand.u32 4294901760, %v21041_v34  ;;  %v61675_v46 = vld [vmem:[#allocation43_spill] sm:$0xff] }
 0x477   :  { %20891 = vmatprep.subr.mxu1 %v57070_v45  ;;  %20413 = vmatprep.mubr.f32.mxu0 %v61489_v23  ;;  %v61674_v45 = vld [vmem:[#allocation42_spill] sm:$0xff] }
 0x478   :  { %20878 = vmatprep.mubr.f32.mxu1 %v61489_v23  ;;  %v21111_v8 = vsub.f32 %v21041_v34, %v58632_v32  ;;  %v61672_v34 = vld [vmem:[#allocation34_spill] sm:$0xff] }
 0x47a   :  { %v21112_v57 = vand.u32 4294901760, %v21111_v8 }
 0x47c   :  { %20417 = vmatmul.mubr.f32.vlgmr.msra.gmra.mrb[6].mxu0 %v20179_v10 }
 0x47d   :  { %20430 = vmatpush1.msra.mxu0 %v57067_v44  ;;  %20882 = vmatmul.mubr.f32.vlgmr.msra.gmra.mrb[6].mxu1 %v20179_v10  ;;  %v61671_v10 = vld [vmem:[#allocation31_spill] sm:$0xff] }
 0x47e   :  { %20895 = vmatpush1.msra.mxu1 %v57076_v47  ;;  %20502 = vmatprep.subr.mxu0 %v57047_v38  ;;  %v21113_v47 = vsub.f32 %v21111_v8, %v21112_v57  ;;  %v61673_v44 = vld [vmem:[#allocation35_spill] sm:$0xff] }
 0x47f   :  { %20967 = vmatprep.subr.mxu1 %v57045_v37  ;;  %20493 = vmatprep.mubr.f32.mxu0 %v61489_v23 }
 0x480   :  { %20958 = vmatprep.mubr.f32.mxu1 %v61489_v23  ;;  %v21114_v43 = vand.u32 4294901760, %v21113_v47  ;;  %v61681_v47 = vld [vmem:[#allocation39_spill] sm:$0xff] }
 0x484   :  { %20495 = vmatmul.mubr.f32.vlgmr.msra.gmra.mrb[6].mxu0 %v58577_v59 }
 0x485   :  { %20504 = vmatpush1.msra.mxu0 %v57043_v36  ;;  %20960 = vmatmul.mubr.f32.vlgmr.msra.gmra.mrb[6].mxu1 %v58577_v59 }
 0x486   :  { %20969 = vmatpush1.msra.mxu1 %v57049_v39  ;;  %21044 = vmatprep.subr.mxu0 %v57146_v19 }
 0x487   :  { %21509 = vmatprep.subr.mxu1 %v61671_v10  ;;  %20567 = vmatprep.mubr.f32.mxu0 %v61489_v23 }
 0x488   :  { %21032 = vmatprep.mubr.f32.mxu1 %v61489_v23 }
 0x48c   :  { %20569 = vmatmul.mubr.f32.vlgmr.msra.gmra.mrb[6].mxu0 %v58577_v59 }
 0x48d   :  { %21034 = vmatmul.mubr.f32.vlgmr.msra.gmra.mrb[6].mxu1 %v58577_v59  ;;  %21046 = vmatpush1.msra.mxu0 %v61672_v34  ;;  %v61678_v59 = vld [vmem:[#allocation32_spill] sm:$0xff] }
 0x48e   :  { %21511 = vmatpush1.msra.mxu1 %v61673_v44  ;;  %21126 = vmatprep.subr.mxu0 %v61674_v45 }
 0x48f   :  { %21591 = vmatprep.subr.mxu1 %v61675_v46  ;;  %21109 = vmatprep.mubr.f32.mxu0 %v61489_v23  ;;  %v61680_v46 = vld [vmem:[#allocation38_spill] sm:$0xff] }
 0x490   :  { %21574 = vmatprep.mubr.f32.mxu1 %v61489_v23 }
 0x494   :  { %21115 = vmatmul.mubr.f32.vlgmr.msra.gmra.mrb[6].mxu0 %v21114_v43 }
 0x495   :  { %21132 = vmatpush1.msra.mxu0 %v61676_v40  ;;  %21580 = vmatmul.mubr.f32.vlgmr.msra.gmra.mrb[6].mxu1 %v21114_v43  ;;  %v61682_v43 = vld [vmem:[#allocation36_spill] sm:$0xff]  ;;  %v61690_v40 = vld [vmem:[#allocation62_spill] sm:$0xff] }
 0x496   :  { %21597 = vmatpush1.msra.mxu1 %v61677_v41  ;;  %21205 = vmatprep.subr.mxu0 %v61678_v59  ;;  %v61685_v59 = vld [vmem:[#allocation41_spill] sm:$0xff] }
 0x497   :  { %21670 = vmatprep.subr.mxu1 %v61679_v42  ;;  %21195 = vmatprep.mubr.f32.mxu0 %v61489_v23  ;;  %v61684_v42 = vld [vmem:[#allocation40_spill] sm:$0xff]  ;;  %v61689_v41 = vld [vmem:[#allocation61_spill] sm:$0xff] }
 0x498   :  { %21660 = vmatprep.mubr.f32.mxu1 %v61489_v23 }
 0x49c   :  { %21197 = vmatmul.mubr.f32.vlgmr.msra.gmra.mrb[6].mxu0 %v58632_v32 }
 0x49d   :  { %21208 = vmatpush1.msra.mxu0 %v61680_v46  ;;  %21662 = vmatmul.mubr.f32.vlgmr.msra.gmra.mrb[6].mxu1 %v58632_v32  ;;  %v61683_v46 = vld [vmem:[#allocation37_spill] sm:$0xff] }
 0x49e   :  { %21673 = vmatpush1.msra.mxu1 %v61681_v47  ;;  %21281 = vmatprep.subr.mxu0 %v57146_v19  ;;  %v55456_v47 = vld [vmem:[%s61165_s1 + $0xb8] sm:$0xff] }
 0x49f   :  { %21746 = vmatprep.subr.mxu1 %v61671_v10  ;;  %21271 = vmatprep.mubr.f32.mxu0 %v61489_v23 }
 0x4a0   :  { %21736 = vmatprep.mubr.f32.mxu1 %v61489_v23 }
 0x4a4   :  { %21274 = vmatmul.mubr.f32.vlgmr.msra.gmra.mrb[6].mxu0 %v21111_v8 }
 0x4a5   :  { %21283 = vmatpush1.msra.mxu0 %v61672_v34  ;;  %21739 = vmatmul.mubr.f32.vlgmr.msra.gmra.mrb[6].mxu1 %v21111_v8  ;;  %v21976_v8 = vsel %vm280_vm0, %v55456_v47, 0 }
 0x4a6   :  { %21748 = vmatpush1.msra.mxu1 %v61673_v44  ;;  %21359 = vmatprep.subr.mxu0 %v61682_v43 }
 0x4a7   :  { %21824 = vmatprep.subr.mxu1 %v61683_v46  ;;  %21346 = vmatprep.mubr.f32.mxu0 %v61489_v23  ;;  %v58681_v46 = vand.u32 4294901760, %v21976_v8 }
 0x4a8   :  { %21811 = vmatprep.mubr.f32.mxu1 %v61489_v23 }
 0x4a9   :  { %v22046_v43 = vsub.f32 %v21976_v8, %v58681_v46  ;;  %v61687_v8 = vld [vmem:[#allocation53_spill] sm:$0xff] }
 0x4ab   :  { %v22047_v47 = vand.u32 4294901760, %v22046_v43 }
 0x4ac   :  { %21350 = vmatmul.mubr.f32.vlgmr.msra.gmra.mrb[6].mxu0 %v21112_v57 }
 0x4ad   :  { %21363 = vmatpush1.msra.mxu0 %v61684_v42  ;;  %21815 = vmatmul.mubr.f32.vlgmr.msra.gmra.mrb[6].mxu1 %v21112_v57  ;;  %v61686_v57 = vld [vmem:[#allocation50_spill] sm:$0xff] }
 0x4ae   :  { %21828 = vmatpush1.msra.mxu1 %v61685_v59  ;;  %21435 = vmatprep.subr.mxu0 %v57146_v19  ;;  %v22048_v59 = vsub.f32 %v22046_v43, %v22047_v47  ;;  %v61688_v42 = vld [vmem:[#allocation54_spill] sm:$0xff] }
 0x4af   :  { %21900 = vmatprep.subr.mxu1 %v61671_v10  ;;  %21426 = vmatprep.mubr.f32.mxu0 %v61489_v23  ;;  %v61694_v10 = vld [vmem:[#allocation52_spill] sm:$0xff] }
 0x4b0   :  { %21891 = vmatprep.mubr.f32.mxu1 %v61489_v23  ;;  %v22049_v45 = vand.u32 4294901760, %v22048_v59  ;;  %v61696_v59 = vld [vmem:[#allocation58_spill] sm:$0xff] }
 0x4b4   :  { %21428 = vmatmul.mubr.f32.vlgmr.msra.gmra.mrb[6].mxu0 %v58632_v32 }
 0x4b5   :  { %21437 = vmatpush1.msra.mxu0 %v61672_v34  ;;  %21893 = vmatmul.mubr.f32.vlgmr.msra.gmra.mrb[6].mxu1 %v58632_v32  ;;  %v61692_v34 = vld [vmem:[#allocation64_spill] sm:$0xff] }
 0x4b6   :  { %21902 = vmatpush1.msra.mxu1 %v61673_v44  ;;  %21979 = vmatprep.subr.mxu0 %v57284_v22  ;;  %v61691_v44 = vld [vmem:[#allocation63_spill] sm:$0xff] }
 0x4b7   :  { %22444 = vmatprep.subr.mxu1 %v61686_v57  ;;  %21500 = vmatprep.mubr.f32.mxu0 %v61489_v23 }
 0x4b8   :  { %21965 = vmatprep.mubr.f32.mxu1 %v61489_v23 }
 0x4bc   :  { %21502 = vmatmul.mubr.f32.vlgmr.msra.gmra.mrb[6].mxu0 %v58632_v32 }
 0x4bd   :  { %21967 = vmatmul.mubr.f32.vlgmr.msra.gmra.mrb[6].mxu1 %v58632_v32  ;;  %21981 = vmatpush1.msra.mxu0 %v61687_v8  ;;  %v61693_v32 = vld [vmem:[#allocation51_spill] sm:$0xff] }
 0x4be   :  { %22446 = vmatpush1.msra.mxu1 %v61688_v42  ;;  %22061 = vmatprep.subr.mxu0 %v61689_v41 }
 0x4bf   :  { %22526 = vmatprep.subr.mxu1 %v61690_v40  ;;  %22044 = vmatprep.mubr.f32.mxu0 %v61489_v23  ;;  %v61695_v40 = vld [vmem:[#allocation57_spill] sm:$0xff] }
 0x4c0   :  { %22509 = vmatprep.mubr.f32.mxu1 %v61489_v23 }
 0x4c4   :  { %22050 = vmatmul.mubr.f32.vlgmr.msra.gmra.mrb[6].mxu0 %v22049_v45 }
 0x4c5   :  { %22067 = vmatpush1.msra.mxu0 %v61691_v44  ;;  %22515 = vmatmul.mubr.f32.vlgmr.msra.gmra.mrb[6].mxu1 %v22049_v45  ;;  %v61697_v45 = vld [vmem:[#allocation55_spill] sm:$0xff] }
 0x4c6   :  { %22532 = vmatpush1.msra.mxu1 %v61692_v34  ;;  %22140 = vmatprep.subr.mxu0 %v61693_v32  ;;  %v61700_v32 = vld [vmem:[#allocation60_spill] sm:$0xff]  ;;  %v61704_v34 = vld [vmem:[#allocation66_spill] sm:$0xff]  ;;  %v61705_v44 = vld [vmem:[#allocation67_spill] sm:$0xff] }
 0x4c7   :  { %22605 = vmatprep.subr.mxu1 %v61694_v10  ;;  %22130 = vmatprep.mubr.f32.mxu0 %v61489_v23  ;;  %v61699_v10 = vld [vmem:[#allocation59_spill] sm:$0xff] }
 0x4c8   :  { %22595 = vmatprep.mubr.f32.mxu1 %v61489_v23 }
 0x4cc   :  { %22132 = vmatmul.mubr.f32.vlgmr.msra.gmra.mrb[6].mxu0 %v58681_v46 }
 0x4cd   :  { %22143 = vmatpush1.msra.mxu0 %v61695_v40  ;;  %22597 = vmatmul.mubr.f32.vlgmr.msra.gmra.mrb[6].mxu1 %v58681_v46  ;;  %v61698_v40 = vld [vmem:[#allocation56_spill] sm:$0xff] }
 0x4ce   :  { %22608 = vmatpush1.msra.mxu1 %v61696_v59  ;;  %22216 = vmatprep.subr.mxu0 %v57284_v22  ;;  %v55457_v59 = vld [vmem:[%s61165_s1 + $0xc0] sm:$0xff] }
 0x4cf   :  { %22681 = vmatprep.subr.mxu1 %v61686_v57  ;;  %22206 = vmatprep.mubr.f32.mxu0 %v61489_v23 }
 0x4d0   :  { %22671 = vmatprep.mubr.f32.mxu1 %v61489_v23 }
 0x4d4   :  { %22209 = vmatmul.mubr.f32.vlgmr.msra.gmra.mrb[6].mxu0 %v22046_v43 }
 0x4d5   :  { %22218 = vmatpush1.msra.mxu0 %v61687_v8  ;;  %22674 = vmatmul.mubr.f32.vlgmr.msra.gmra.mrb[6].mxu1 %v22046_v43  ;;  %v22915_v43 = vsel %vm280_vm0, %v55457_v59, 0 }
 0x4d6   :  { %22683 = vmatpush1.msra.mxu1 %v61688_v42  ;;  %22294 = vmatprep.subr.mxu0 %v61697_v45 }
 0x4d7   :  { %22759 = vmatprep.subr.mxu1 %v61698_v40  ;;  %22281 = vmatprep.mubr.f32.mxu0 %v61489_v23  ;;  %v58730_v40 = vand.u32 4294901760, %v22915_v43 }
 0x4d8   :  { %22746 = vmatprep.mubr.f32.mxu1 %v61489_v23 }
 0x4d9   :  { %v22985_v45 = vsub.f32 %v22915_v43, %v58730_v40 }
 0x4dc   :  { %22285 = vmatmul.mubr.f32.vlgmr.msra.gmra.mrb[6].mxu0 %v22047_v47 }
 0x4dd   :  { %22298 = vmatpush1.msra.mxu0 %v61699_v10  ;;  %22750 = vmatmul.mubr.f32.vlgmr.msra.gmra.mrb[6].mxu1 %v22047_v47  ;;  %v22986_v47 = vand.u32 4294901760, %v22985_v45  ;;  %v61702_v10 = vld [vmem:[#allocation78_spill] sm:$0xff] }
 0x4de   :  { %22763 = vmatpush1.msra.mxu1 %v61700_v32  ;;  %22370 = vmatprep.subr.mxu0 %v57284_v22  ;;  %v61701_v32 = vld [vmem:[#allocation77_spill] sm:$0xff] }
 0x4df   :  { %22835 = vmatprep.subr.mxu1 %v61686_v57  ;;  %22361 = vmatprep.mubr.f32.mxu0 %v61489_v23  ;;  %v22987_v59 = vsub.f32 %v22985_v45, %v22986_v47 }
 0x4e0   :  { %22826 = vmatprep.mubr.f32.mxu1 %v61489_v23 }
 0x4e1   :  { %v22988_v43 = vand.u32 4294901760, %v22987_v59  ;;  %v61706_v59 = vld [vmem:[#allocation72_spill] sm:$0xff] }
 0x4e4   :  { %22363 = vmatmul.mubr.f32.vlgmr.msra.gmra.mrb[6].mxu0 %v58681_v46 }
 0x4e5   :  { %22372 = vmatpush1.msra.mxu0 %v61687_v8  ;;  %22828 = vmatmul.mubr.f32.vlgmr.msra.gmra.mrb[6].mxu1 %v58681_v46 }
 0x4e6   :  { %22837 = vmatpush1.msra.mxu1 %v61688_v42  ;;  %22435 = vmatprep.mubr.f32.mxu0 %v61489_v23 }
 0x4e7   :  { %22900 = vmatprep.mubr.f32.mxu1 %v61489_v23  ;;  %22918 = vmatprep.subr.mxu0 %v57388_v16 }
 0x4e8   :  { %23383 = vmatprep.subr.mxu1 %v61638_v58 }
 0x4ec   :  { %22437 = vmatmul.mubr.f32.vlgmr.msra.gmra.mrb[6].mxu0 %v58681_v46 }
 0x4ed   :  { %22902 = vmatmul.mubr.f32.vlgmr.msra.gmra.mrb[6].mxu1 %v58681_v46  ;;  %22920 = vmatpush1.msra.mxu0 %v61639_v48  ;;  %v61703_v46 = vld [vmem:[#allocation79_spill] sm:$0xff] }
 0x4ee   :  { %22983 = vmatprep.mubr.f32.mxu0 %v61489_v23  ;;  %23385 = vmatpush1.msra.mxu1 %v61640_v25 }
 0x4ef   :  { %23448 = vmatprep.mubr.f32.mxu1 %v61489_v23  ;;  %23000 = vmatprep.subr.mxu0 %v61641_v31 }
 0x4f0   :  { %23465 = vmatprep.subr.mxu1 %v61701_v32 }
 0x4f4   :  { %22989 = vmatmul.mubr.f32.vlgmr.msra.gmra.mrb[6].mxu0 %v22988_v43 }
 0x4f5   :  { %23454 = vmatmul.mubr.f32.vlgmr.msra.gmra.mrb[6].mxu1 %v22988_v43  ;;  %23006 = vmatpush1.msra.mxu0 %v61702_v10  ;;  %v61707_v43 = vld [vmem:[#allocation73_spill] sm:$0xff]  ;;  %v61715_v10 = vld [vmem:[#allocation86_spill] sm:$0xff] }
 0x4f6   :  { %23069 = vmatprep.mubr.f32.mxu0 %v61489_v23  ;;  %23471 = vmatpush1.msra.mxu1 %v61703_v46  ;;  %v61711_v46 = vld [vmem:[#allocation75_spill] sm:$0xff] }
 0x4f7   :  { %23534 = vmatprep.mubr.f32.mxu1 %v61489_v23  ;;  %23079 = vmatprep.subr.mxu0 %v61704_v34  ;;  %v61710_v34 = vld [vmem:[#allocation74_spill] sm:$0xff] }
 0x4f8   :  { %23544 = vmatprep.subr.mxu1 %v61705_v44  ;;  %v61709_v44 = vld [vmem:[#allocation71_spill] sm:$0xff] }
 0x4fc   :  { %23071 = vmatmul.mubr.f32.vlgmr.msra.gmra.mrb[6].mxu0 %v58730_v40 }
 0x4fd   :  { %23536 = vmatmul.mubr.f32.vlgmr.msra.gmra.mrb[6].mxu1 %v58730_v40  ;;  %23082 = vmatpush1.msra.mxu0 %v61706_v59  ;;  %v61708_v59 = vld [vmem:[#allocation70_spill] sm:$0xff] }
 0x4fe   :  { %23145 = vmatprep.mubr.f32.mxu0 %v61489_v23  ;;  %23547 = vmatpush1.msra.mxu1 %v61707_v43  ;;  %v55458_v43 = vld [vmem:[%s61165_s1 + $0xc8] sm:$0xff] }
 0x4ff   :  { %23610 = vmatprep.mubr.f32.mxu1 %v61489_v23  ;;  %23155 = vmatprep.subr.mxu0 %v57388_v16 }
 0x500   :  { %23620 = vmatprep.subr.mxu1 %v61638_v58 }
 0x504   :  { %23148 = vmatmul.mubr.f32.vlgmr.msra.gmra.mrb[6].mxu0 %v22985_v45 }
 0x505   :  { %23613 = vmatmul.mubr.f32.vlgmr.msra.gmra.mrb[6].mxu1 %v22985_v45  ;;  %23157 = vmatpush1.msra.mxu0 %v61639_v48  ;;  %v23854_v45 = vsel %vm280_vm0, %v55458_v43, 0 }
 0x506   :  { %23220 = vmatprep.mubr.f32.mxu0 %v61489_v23  ;;  %23622 = vmatpush1.msra.mxu1 %v61640_v25 }
 0x507   :  { %23685 = vmatprep.mubr.f32.mxu1 %v61489_v23  ;;  %23233 = vmatprep.subr.mxu0 %v61708_v59  ;;  %v61713_v59 = vld [vmem:[#allocation98_spill] sm:$0xff] }
 0x508   :  { %23698 = vmatprep.subr.mxu1 %v61709_v44  ;;  %v58779_v44 = vand.u32 4294901760, %v23854_v45 }
 0x50c   :  { %23224 = vmatmul.mubr.f32.vlgmr.msra.gmra.mrb[6].mxu0 %v22986_v47 }
 0x50d   :  { %23689 = vmatmul.mubr.f32.vlgmr.msra.gmra.mrb[6].mxu1 %v22986_v47  ;;  %23237 = vmatpush1.msra.mxu0 %v61710_v34  ;;  %v23924_v47 = vsub.f32 %v23854_v45, %v58779_v44  ;;  %v61712_v45 = vld [vmem:[#allocation96_spill] sm:$0xff] }
 0x50e   :  { %23702 = vmatpush1.msra.mxu1 %v61711_v46  ;;  %23300 = vmatprep.mubr.f32.mxu0 %v61489_v23 }
 0x50f   :  { %23309 = vmatprep.subr.mxu0 %v57388_v16  ;;  %23765 = vmatprep.mubr.f32.mxu1 %v61489_v23  ;;  %v23925_v43 = vand.u32 4294901760, %v23924_v47 }
 0x510   :  { %23774 = vmatprep.subr.mxu1 %v61638_v58 }
 0x511   :  { %v23926_v46 = vsub.f32 %v23924_v47, %v23925_v43 }
 0x513   :  { %v23927_v34 = vand.u32 4294901760, %v23926_v46  ;;  %v61717_v46 = vld [vmem:[#allocation92_spill] sm:$0xff] }
 0x514   :  { %23302 = vmatmul.mubr.f32.vlgmr.msra.gmra.mrb[6].mxu0 %v58730_v40 }
 0x515   :  { %23311 = vmatpush1.msra.mxu0 %v61639_v48  ;;  %23767 = vmatmul.mubr.f32.vlgmr.msra.gmra.mrb[6].mxu1 %v58730_v40 }
 0x516   :  { %23776 = vmatpush1.msra.mxu1 %v61640_v25  ;;  %23857 = vmatprep.subr.mxu0 %v57519_v2 }
 0x517   :  { %24322 = vmatprep.subr.mxu1 %v61590_v49  ;;  %23374 = vmatprep.mubr.f32.mxu0 %v61489_v23 }
 0x518   :  { %23839 = vmatprep.mubr.f32.mxu1 %v61489_v23 }
 0x51c   :  { %23376 = vmatmul.mubr.f32.vlgmr.msra.gmra.mrb[6].mxu0 %v58730_v40 }
 0x51d   :  { %23841 = vmatmul.mubr.f32.vlgmr.msra.gmra.mrb[6].mxu1 %v58730_v40  ;;  %23859 = vmatpush1.msra.mxu0 %v61591_v33  ;;  %v61714_v40 = vld [vmem:[#allocation85_spill] sm:$0xff] }
 0x51e   :  { %24324 = vmatpush1.msra.mxu1 %v61592_v27  ;;  %23939 = vmatprep.subr.mxu0 %v61593_v21 }
 0x51f   :  { %24404 = vmatprep.subr.mxu1 %v61712_v45  ;;  %23922 = vmatprep.mubr.f32.mxu0 %v61489_v23  ;;  %v61716_v45 = vld [vmem:[#allocation91_spill] sm:$0xff] }
 0x520   :  { %24387 = vmatprep.mubr.f32.mxu1 %v61489_v23 }
 0x524   :  { %23928 = vmatmul.mubr.f32.vlgmr.msra.gmra.mrb[6].mxu0 %v23927_v34 }
 0x525   :  { %23945 = vmatpush1.msra.mxu0 %v61654_v11  ;;  %24393 = vmatmul.mubr.f32.vlgmr.msra.gmra.mrb[6].mxu1 %v23927_v34 }
 0x526   :  { %24410 = vmatpush1.msra.mxu1 %v61713_v59  ;;  %24018 = vmatprep.subr.mxu0 %v61714_v40  ;;  %v61719_v59 = vld [vmem:[#allocation90_spill] sm:$0xff] }
 0x527   :  { %24483 = vmatprep.subr.mxu1 %v61715_v10  ;;  %24008 = vmatprep.mubr.f32.mxu0 %v61489_v23 }
 0x528   :  { %24473 = vmatprep.mubr.f32.mxu1 %v61489_v23 }
 0x52c   :  { %24010 = vmatmul.mubr.f32.vlgmr.msra.gmra.mrb[6].mxu0 %v58779_v44 }
 0x52d   :  { %24021 = vmatpush1.msra.mxu0 %v61716_v45  ;;  %24475 = vmatmul.mubr.f32.vlgmr.msra.gmra.mrb[6].mxu1 %v58779_v44 }
 0x52e   :  { %24486 = vmatpush1.msra.mxu1 %v61717_v46  ;;  %24094 = vmatprep.subr.mxu0 %v57519_v2  ;;  %v61718_v46 = vld [vmem:[#allocation89_spill] sm:$0xff] }
 0x52f   :  { %24559 = vmatprep.subr.mxu1 %v61590_v49  ;;  %24084 = vmatprep.mubr.f32.mxu0 %v61489_v23 }
 0x530   :  { %24549 = vmatprep.mubr.f32.mxu1 %v61489_v23 }
 0x533   :  { %v19585_v34 = vpop.f32.mrb[4].mxu0 }
 0x534   :  { %v20050_v10 = vpop.f32.mrb[4].mxu1  ;;  %24087 = vmatmul.mubr.f32.vlgmr.msra.gmra.mrb[6].mxu0 %v23924_v47  ;;  %20059 = vrot.lane.b32.xlu0 %v19585_v34, %s56874_s20  ;;  %v19587_v40 = vpop.f32.mrb[5].mxu0  ;;  %v61720_v34 = vld [vmem:[#allocation94_spill] sm:$0xff] }
 0x535   :  { %v20052_v45 = vpop.f32.mrb[5].mxu1  ;;  %24096 = vmatpush1.msra.mxu0 %v61591_v33  ;;  %24552 = vmatmul.mubr.f32.vlgmr.msra.gmra.mrb[6].mxu1 %v23924_v47  ;;  %v55459_v47 = vld [vmem:[%s61165_s1 + $0xd0] sm:$0xff] }
 0x536   :  { %24561 = vmatpush1.msra.mxu1 %v61592_v27  ;;  %20063 = vrot.lane.b32.xlu1 %v20050_v10, %s56874_s20  ;;  %v24793_v10 = vsel %vm280_vm0, %v55459_v47, 0 }
 0x537   :  { %24172 = vmatprep.subr.mxu0 %v61718_v46  ;;  %24637 = vmatprep.subr.mxu1 %v61719_v59 }
 0x538   :  { %20065 = vrot.lane.b32.xlu0 %v20052_v45, %s56874_s20  ;;  %24159 = vmatprep.mubr.f32.mxu0 %v61489_v23  ;;  %v58832_v45 = vand.u32 4294901760, %v24793_v10 }
 0x539   :  { %24624 = vmatprep.mubr.f32.mxu1 %v61489_v23 }
 0x53a   :  { %20061 = vrot.lane.b32.xlu1 %v19587_v40, %s56874_s20  ;;  %v24863_v40 = vsub.f32 %v24793_v10, %v58832_v45  ;;  %v61721_v10 = vld [vmem:[#allocation111_spill] sm:$0xff] }
 0x53c   :  { %24163 = vmatmul.mubr.f32.vlgmr.msra.gmra.mrb[6].mxu0 %v23925_v43 }
 0x53d   :  { %24176 = vmatpush1.msra.mxu0 %v61662_v29  ;;  %24628 = vmatmul.mubr.f32.vlgmr.msra.gmra.mrb[6].mxu1 %v23925_v43  ;;  %v24864_v43 = vand.u32 4294901760, %v24863_v40 }
 0x53e   :  { %24641 = vmatpush1.msra.mxu1 %v61720_v34  ;;  %24248 = vmatprep.subr.mxu0 %v57519_v2 }
 0x53f   :  { %24713 = vmatprep.subr.mxu1 %v61590_v49  ;;  %24239 = vmatprep.mubr.f32.mxu0 %v61489_v23  ;;  %v24865_v47 = vsub.f32 %v24863_v40, %v24864_v43 }
 0x540   :  { %24704 = vmatprep.mubr.f32.mxu1 %v61489_v23 }
 0x541   :  { %v24866_v34 = vand.u32 4294901760, %v24865_v47  ;;  %v61723_v47 = vld [vmem:[#allocation108_spill] sm:$0xff] }
 0x544   :  { %24241 = vmatmul.mubr.f32.vlgmr.msra.gmra.mrb[6].mxu0 %v58779_v44 }
 0x545   :  { %24250 = vmatpush1.msra.mxu0 %v61591_v33  ;;  %24706 = vmatmul.mubr.f32.vlgmr.msra.gmra.mrb[6].mxu1 %v58779_v44 }
 0x546   :  { %24715 = vmatpush1.msra.mxu1 %v61592_v27  ;;  %24796 = vmatprep.subr.mxu0 %v57649_v51 }
 0x547   :  { %25261 = vmatprep.subr.mxu1 %v57654_v61  ;;  %24313 = vmatprep.mubr.f32.mxu0 %v61489_v23 }
 0x548   :  { %24778 = vmatprep.mubr.f32.mxu1 %v61489_v23 }
 0x54c   :  { %24315 = vmatmul.mubr.f32.vlgmr.msra.gmra.mrb[6].mxu0 %v58779_v44 }
 0x54d   :  { %24780 = vmatmul.mubr.f32.vlgmr.msra.gmra.mrb[6].mxu1 %v58779_v44  ;;  %24798 = vmatpush1.msra.mxu0 %v57674_v28  ;;  %v61722_v44 = vld [vmem:[#allocation107_spill] sm:$0xff] }
 0x54e   :  { %25263 = vmatpush1.msra.mxu1 %v57676_v1  ;;  %24878 = vmatprep.subr.mxu0 %v57711_v56 }
 0x54f   :  { %25343 = vmatprep.subr.mxu1 %v61721_v10  ;;  %24861 = vmatprep.mubr.f32.mxu0 %v61489_v23 }
 0x550   :  { %25326 = vmatprep.mubr.f32.mxu1 %v61489_v23 }
 0x554   :  { %24867 = vmatmul.mubr.f32.vlgmr.msra.gmra.mrb[6].mxu0 %v24866_v34 }
 0x555   :  { %24884 = vmatpush1.msra.mxu0 %v61606_v4  ;;  %25332 = vmatmul.mubr.f32.vlgmr.msra.gmra.mrb[6].mxu1 %v24866_v34  ;;  %v61724_v34 = vld [vmem:[#allocation105_spill] sm:$0xff] }
 0x556   :  { %25349 = vmatpush1.msra.mxu1 %v61607_v3  ;;  %24957 = vmatprep.subr.mxu0 %v61665_v30 }
 0x557   :  { %25422 = vmatprep.subr.mxu1 %v61666_v60  ;;  %24947 = vmatprep.mubr.f32.mxu0 %v61489_v23 }
 0x558   :  { %25412 = vmatprep.mubr.f32.mxu1 %v61489_v23 }
 0x55c   :  { %24949 = vmatmul.mubr.f32.vlgmr.msra.gmra.mrb[6].mxu0 %v58832_v45 }
 0x55d   :  { %24960 = vmatpush1.msra.mxu0 %v61722_v44  ;;  %25414 = vmatmul.mubr.f32.vlgmr.msra.gmra.mrb[6].mxu1 %v58832_v45  ;;  %v61725_v44 = vld [vmem:[#allocation106_spill] sm:$0xff] }
 0x55e   :  { %25425 = vmatpush1.msra.mxu1 %v61723_v47  ;;  %25033 = vmatprep.subr.mxu0 %v57649_v51  ;;  %v55460_v47 = vld [vmem:[%s61165_s1 + $0xd8] sm:$0xff] }
 0x55f   :  { %25498 = vmatprep.subr.mxu1 %v57654_v61  ;;  %25023 = vmatprep.mubr.f32.mxu0 %v61489_v23 }
 0x560   :  { %25488 = vmatprep.mubr.f32.mxu1 %v61489_v23 }
 0x564   :  { %25026 = vmatmul.mubr.f32.vlgmr.msra.gmra.mrb[6].mxu0 %v24863_v40 }
 0x565   :  { %25035 = vmatpush1.msra.mxu0 %v57674_v28  ;;  %25491 = vmatmul.mubr.f32.vlgmr.msra.gmra.mrb[6].mxu1 %v24863_v40  ;;  %v25732_v40 = vsel %vm280_vm0, %v55460_v47, 0 }
 0x566   :  { %25500 = vmatpush1.msra.mxu1 %v57676_v1  ;;  %25111 = vmatprep.subr.mxu0 %v61724_v34 }
 0x567   :  { %25576 = vmatprep.subr.mxu1 %v61725_v44  ;;  %25098 = vmatprep.mubr.f32.mxu0 %v61489_v23  ;;  %v58881_v44 = vand.u32 4294901760, %v25732_v40 }
 0x568   :  { %25563 = vmatprep.mubr.f32.mxu1 %v61489_v23 }
 0x569   :  { %v25802_v34 = vsub.f32 %v25732_v40, %v58881_v44 }
 0x56c   :  { %25102 = vmatmul.mubr.f32.vlgmr.msra.gmra.mrb[6].mxu0 %v24864_v43 }
 0x56d   :  { %25115 = vmatpush1.msra.mxu0 %v61614_v17  ;;  %25567 = vmatmul.mubr.f32.vlgmr.msra.gmra.mrb[6].mxu1 %v24864_v43  ;;  %v25803_v43 = vand.u32 4294901760, %v25802_v34 }
 0x56e   :  { %25580 = vmatpush1.msra.mxu1 %v61615_v5  ;;  %25187 = vmatprep.subr.mxu0 %v57649_v51 }
 0x56f   :  { %25652 = vmatprep.subr.mxu1 %v57654_v61  ;;  %25178 = vmatprep.mubr.f32.mxu0 %v61489_v23  ;;  %v25804_v47 = vsub.f32 %v25802_v34, %v25803_v43 }
 0x570   :  { %25643 = vmatprep.mubr.f32.mxu1 %v61489_v23 }
 0x571   :  { %v25805_v40 = vand.u32 4294901760, %v25804_v47 }
 0x574   :  { %25180 = vmatmul.mubr.f32.vlgmr.msra.gmra.mrb[6].mxu0 %v58832_v45 }
 0x575   :  { %25189 = vmatpush1.msra.mxu0 %v57674_v28  ;;  %25645 = vmatmul.mubr.f32.vlgmr.msra.gmra.mrb[6].mxu1 %v58832_v45 }
 0x576   :  { %25654 = vmatpush1.msra.mxu1 %v57676_v1  ;;  %25735 = vmatprep.subr.mxu0 %v57779_v18 }
 0x577   :  { %26200 = vmatprep.subr.mxu1 %v57784_v63  ;;  %25252 = vmatprep.mubr.f32.mxu0 %v61489_v23 }
 0x578   :  { %25717 = vmatprep.mubr.f32.mxu1 %v61489_v23 }
 0x57c   :  { %25254 = vmatmul.mubr.f32.vlgmr.msra.gmra.mrb[6].mxu0 %v58832_v45 }
 0x57d   :  { %25719 = vmatmul.mubr.f32.vlgmr.msra.gmra.mrb[6].mxu1 %v58832_v45  ;;  %25737 = vmatpush1.msra.mxu0 %v57804_v50  ;;  %v55462_v45 = vld [vmem:[%s61165_s1 + $0xe8] sm:$0xff] }
 0x57e   :  { %26202 = vmatpush1.msra.mxu1 %v57806_v6  ;;  %25817 = vmatprep.subr.mxu0 %v57839_v12  ;;  %v26677_v47 = vsel %vm280_vm0, %v55462_v45, 0 }
 0x57f   :  { %26282 = vmatprep.subr.mxu1 %v57842_v15  ;;  %25800 = vmatprep.mubr.f32.mxu0 %v61489_v23 }
 0x580   :  { %26265 = vmatprep.mubr.f32.mxu1 %v61489_v23 }
 0x584   :  { %25806 = vmatmul.mubr.f32.vlgmr.msra.gmra.mrb[6].mxu0 %v25805_v40 }
 0x585   :  { %25823 = vmatpush1.msra.mxu0 %v57855_v26  ;;  %26271 = vmatmul.mubr.f32.vlgmr.msra.gmra.mrb[6].mxu1 %v25805_v40  ;;  %v58924_v40 = vand.u32 4294901760, %v26677_v47 }
 0x586   :  { %26288 = vmatpush1.msra.mxu1 %v57857_v0  ;;  %25896 = vmatprep.subr.mxu0 %v57795_v20 }
 0x587   :  { %26361 = vmatprep.subr.mxu1 %v57800_v62  ;;  %25886 = vmatprep.mubr.f32.mxu0 %v61489_v23 }
 0x588   :  { %26351 = vmatprep.mubr.f32.mxu1 %v61489_v23 }
 0x58c   :  { %25888 = vmatmul.mubr.f32.vlgmr.msra.gmra.mrb[6].mxu0 %v58881_v44 }
 0x58d   :  { %25899 = vmatpush1.msra.mxu0 %v57819_v13  ;;  %26353 = vmatmul.mubr.f32.vlgmr.msra.gmra.mrb[6].mxu1 %v58881_v44 }
 0x58e   :  { %26364 = vmatpush1.msra.mxu1 %v57823_v9  ;;  %25972 = vmatprep.subr.mxu0 %v57779_v18 }
 0x58f   :  { %26437 = vmatprep.subr.mxu1 %v57784_v63  ;;  %25962 = vmatprep.mubr.f32.mxu0 %v61489_v23 }
 0x590   :  { %26427 = vmatprep.mubr.f32.mxu1 %v61489_v23 }
 0x594   :  { %25965 = vmatmul.mubr.f32.vlgmr.msra.gmra.mrb[6].mxu0 %v25802_v34 }
 0x595   :  { %25974 = vmatpush1.msra.mxu0 %v57804_v50  ;;  %26430 = vmatmul.mubr.f32.vlgmr.msra.gmra.mrb[6].mxu1 %v25802_v34  ;;  %v26747_v34 = vsub.f32 %v26677_v47, %v58924_v40 }
 0x596   :  { %26439 = vmatpush1.msra.mxu1 %v57806_v6  ;;  %26050 = vmatprep.subr.mxu0 %v57809_v24 }
 0x597   :  { %26515 = vmatprep.subr.mxu1 %v57813_v14  ;;  %26037 = vmatprep.mubr.f32.mxu0 %v61489_v23  ;;  %v26748_v45 = vand.u32 4294901760, %v26747_v34 }
 0x598   :  { %26502 = vmatprep.mubr.f32.mxu1 %v61489_v23 }
 0x59c   :  { %26041 = vmatmul.mubr.f32.vlgmr.msra.gmra.mrb[6].mxu0 %v25803_v43 }
 0x59d   :  { %26054 = vmatpush1.msra.mxu0 %v57834_v35  ;;  %26506 = vmatmul.mubr.f32.vlgmr.msra.gmra.mrb[6].mxu1 %v25803_v43  ;;  %v26749_v43 = vsub.f32 %v26747_v34, %v26748_v45 }
 0x59e   :  { %26519 = vmatpush1.msra.mxu1 %v57837_v7  ;;  %26126 = vmatprep.subr.mxu0 %v57779_v18 }
 0x59f   :  { %26591 = vmatprep.subr.mxu1 %v57784_v63  ;;  %26117 = vmatprep.mubr.f32.mxu0 %v61489_v23  ;;  %v26750_v47 = vand.u32 4294901760, %v26749_v43  ;;  %v61726_v43 = vld [vmem:[#allocation17_spill] sm:$0xff] }
 0x5a0   :  { %26582 = vmatprep.mubr.f32.mxu1 %v61489_v23 }
 0x5a4   :  { %26119 = vmatmul.mubr.f32.vlgmr.msra.gmra.mrb[6].mxu0 %v58881_v44 }
 0x5a5   :  { %26128 = vmatpush1.msra.mxu0 %v57804_v50  ;;  %26584 = vmatmul.mubr.f32.vlgmr.msra.gmra.mrb[6].mxu1 %v58881_v44 }
 0x5a6   :  { %26593 = vmatpush1.msra.mxu1 %v57806_v6  ;;  %26680 = vmatprep.subr.mxu0 %v57047_v38 }
 0x5a7   :  { %27145 = vmatprep.subr.mxu1 %v57045_v37  ;;  %26191 = vmatprep.mubr.f32.mxu0 %v61489_v23 }
 0x5a8   :  { %26656 = vmatprep.mubr.f32.mxu1 %v61489_v23 }
 0x5ac   :  { %26193 = vmatmul.mubr.f32.vlgmr.msra.gmra.mrb[6].mxu0 %v58881_v44 }
 0x5ad   :  { %26658 = vmatmul.mubr.f32.vlgmr.msra.gmra.mrb[6].mxu1 %v58881_v44  ;;  %26682 = vmatpush1.msra.mxu0 %v57043_v36  ;;  %v61727_v44 = vld [vmem:[#allocation16_spill] sm:$0xff] }
 0x5ae   :  { %27147 = vmatpush1.msra.mxu1 %v57049_v39  ;;  %26762 = vmatprep.subr.mxu0 %v57089_v52  ;;  %v61729_v52 = vld [vmem:[#allocation18_spill] sm:$0xff] }
 0x5af   :  { %27227 = vmatprep.subr.mxu1 %v57091_v53  ;;  %26745 = vmatprep.mubr.f32.mxu0 %v61489_v23  ;;  %v61728_v53 = vld [vmem:[#allocation15_spill] sm:$0xff] }
 0x5b0   :  { %27210 = vmatprep.mubr.f32.mxu1 %v61489_v23  ;;  %26751 = vmatmul.mubr.f32.vlgmr.msra.gmra.mrb[8].mxu0 %v26750_v47 }
 0x5b1   :  { %26768 = vmatpush1.msra.mxu0 %v57093_v54  ;;  %27216 = vmatmul.mubr.f32.vlgmr.msra.gmra.mrb[8].mxu1 %v26750_v47  ;;  %v61730_v47 = vld [vmem:[#allocation21_spill] sm:$0xff]  ;;  %v61738_v54 = vld [vmem:[#allocation43_spill] sm:$0xff] }
 0x5b2   :  { %27233 = vmatpush1.msra.mxu1 %v57095_v55  ;;  %26841 = vmatprep.subr.mxu0 %v61726_v43  ;;  %v61733_v43 = vld [vmem:[#allocation22_spill] sm:$0xff] }
 0x5b3   :  { %27306 = vmatprep.subr.mxu1 %v61727_v44  ;;  %26831 = vmatprep.mubr.f32.mxu0 %v61489_v23  ;;  %v61732_v44 = vld [vmem:[#allocation19_spill] sm:$0xff]  ;;  %v61737_v55 = vld [vmem:[#allocation42_spill] sm:$0xff] }
 0x5b4   :  { %27296 = vmatprep.mubr.f32.mxu1 %v61489_v23 }
 0x5b8   :  { %26833 = vmatmul.mubr.f32.vlgmr.msra.gmra.mrb[8].mxu0 %v58924_v40 }
 0x5b9   :  { %26844 = vmatpush1.msra.mxu0 %v61728_v53  ;;  %27298 = vmatmul.mubr.f32.vlgmr.msra.gmra.mrb[8].mxu1 %v58924_v40  ;;  %v61731_v53 = vld [vmem:[#allocation20_spill] sm:$0xff] }
 0x5ba   :  { %27309 = vmatpush1.msra.mxu1 %v61729_v52  ;;  %26917 = vmatprep.subr.mxu0 %v57047_v38  ;;  %v55461_v52 = vld [vmem:[%s61165_s1 + $0xe0] sm:$0xff] }
 0x5bb   :  { %27382 = vmatprep.subr.mxu1 %v57045_v37  ;;  %26907 = vmatprep.mubr.f32.mxu0 %v61489_v23 }
 0x5bc   :  { %27372 = vmatprep.mubr.f32.mxu1 %v61489_v23 }
 0x5c0   :  { %26910 = vmatmul.mubr.f32.vlgmr.msra.gmra.mrb[8].mxu0 %v26747_v34 }
 0x5c1   :  { %26919 = vmatpush1.msra.mxu0 %v57043_v36  ;;  %27375 = vmatmul.mubr.f32.vlgmr.msra.gmra.mrb[8].mxu1 %v26747_v34  ;;  %v27610_v34 = vsel %vm280_vm0, %v55461_v52, 0  ;;  %v61734_v52 = vld [vmem:[#allocation31_spill] sm:$0xff] }
 0x5c2   :  { %27384 = vmatpush1.msra.mxu1 %v57049_v39  ;;  %26995 = vmatprep.subr.mxu0 %v61730_v47 }
 0x5c3   :  { %27460 = vmatprep.subr.mxu1 %v61731_v53  ;;  %26982 = vmatprep.mubr.f32.mxu0 %v61489_v23  ;;  %v58979_v53 = vand.u32 4294901760, %v27610_v34 }
 0x5c4   :  { %27447 = vmatprep.mubr.f32.mxu1 %v61489_v23 }
 0x5c5   :  { %v27680_v47 = vsub.f32 %v27610_v34, %v58979_v53  ;;  %v61735_v34 = vld [vmem:[#allocation34_spill] sm:$0xff] }
 0x5c8   :  { %26986 = vmatmul.mubr.f32.vlgmr.msra.gmra.mrb[8].mxu0 %v26748_v45 }
 0x5c9   :  { %26999 = vmatpush1.msra.mxu0 %v61732_v44  ;;  %27451 = vmatmul.mubr.f32.vlgmr.msra.gmra.mrb[8].mxu1 %v26748_v45  ;;  %v27681_v45 = vand.u32 4294901760, %v27680_v47  ;;  %v61736_v44 = vld [vmem:[#allocation35_spill] sm:$0xff] }
 0x5ca   :  { %27464 = vmatpush1.msra.mxu1 %v61733_v43  ;;  %27071 = vmatprep.subr.mxu0 %v57047_v38  ;;  %v61742_v38 = vld [vmem:[#allocation33_spill] sm:$0xff] }
 0x5cb   :  { %27536 = vmatprep.subr.mxu1 %v57045_v37  ;;  %27062 = vmatprep.mubr.f32.mxu0 %v61489_v23  ;;  %v27682_v43 = vsub.f32 %v27680_v47, %v27681_v45  ;;  %v61740_v37 = vld [vmem:[#allocation45_spill] sm:$0xff] }
 0x5cc   :  { %27527 = vmatprep.mubr.f32.mxu1 %v61489_v23 }
 0x5d0   :  { %27064 = vmatmul.mubr.f32.vlgmr.msra.gmra.mrb[8].mxu0 %v58924_v40 }
 0x5d1   :  { %27073 = vmatpush1.msra.mxu0 %v57043_v36  ;;  %27529 = vmatmul.mubr.f32.vlgmr.msra.gmra.mrb[8].mxu1 %v58924_v40  ;;  %v61739_v36 = vld [vmem:[#allocation44_spill] sm:$0xff] }
 0x5d2   :  { %27538 = vmatpush1.msra.mxu1 %v57049_v39  ;;  %27613 = vmatprep.subr.mxu0 %v57146_v19  ;;  %v27683_v39 = vand.u32 4294901760, %v27682_v43  ;;  %v61744_v43 = vld [vmem:[#allocation39_spill] sm:$0xff] }
 0x5d3   :  { %28078 = vmatprep.subr.mxu1 %v61734_v52  ;;  %27136 = vmatprep.mubr.f32.mxu0 %v61489_v23 }
 0x5d4   :  { %27601 = vmatprep.mubr.f32.mxu1 %v61489_v23 }
 0x5d8   :  { %27138 = vmatmul.mubr.f32.vlgmr.msra.gmra.mrb[8].mxu0 %v58924_v40 }
 0x5d9   :  { %27603 = vmatmul.mubr.f32.vlgmr.msra.gmra.mrb[8].mxu1 %v58924_v40  ;;  %27615 = vmatpush1.msra.mxu0 %v61735_v34  ;;  %v61741_v40 = vld [vmem:[#allocation32_spill] sm:$0xff] }
 0x5da   :  { %28080 = vmatpush1.msra.mxu1 %v61736_v44  ;;  %27695 = vmatprep.subr.mxu0 %v61737_v55 }
 0x5db   :  { %28160 = vmatprep.subr.mxu1 %v61738_v54  ;;  %27678 = vmatprep.mubr.f32.mxu0 %v61489_v23  ;;  %v61743_v54 = vld [vmem:[#allocation38_spill] sm:$0xff] }
 0x5dc   :  { %28143 = vmatprep.mubr.f32.mxu1 %v61489_v23 }
 0x5e0   :  { %27684 = vmatmul.mubr.f32.vlgmr.msra.gmra.mrb[8].mxu0 %v27683_v39 }
 0x5e1   :  { %27701 = vmatpush1.msra.mxu0 %v61739_v36  ;;  %28149 = vmatmul.mubr.f32.vlgmr.msra.gmra.mrb[8].mxu1 %v27683_v39  ;;  %v61745_v39 = vld [vmem:[#allocation36_spill] sm:$0xff] }
 0x5e2   :  { %28166 = vmatpush1.msra.mxu1 %v61740_v37  ;;  %27774 = vmatprep.subr.mxu0 %v61741_v40  ;;  %v61748_v40 = vld [vmem:[#allocation41_spill] sm:$0xff]  ;;  %v61751_v37 = vld [vmem:[#allocation64_spill] sm:$0xff] }
 0x5e3   :  { %28239 = vmatprep.subr.mxu1 %v61742_v38  ;;  %27764 = vmatprep.mubr.f32.mxu0 %v61489_v23  ;;  %v61747_v38 = vld [vmem:[#allocation40_spill] sm:$0xff] }
 0x5e4   :  { %28229 = vmatprep.mubr.f32.mxu1 %v61489_v23  ;;  %v61753_v36 = vld [vmem:[#allocation52_spill] sm:$0xff] }
 0x5e8   :  { %27766 = vmatmul.mubr.f32.vlgmr.msra.gmra.mrb[8].mxu0 %v58979_v53 }
 0x5e9   :  { %27777 = vmatpush1.msra.mxu0 %v61743_v54  ;;  %28231 = vmatmul.mubr.f32.vlgmr.msra.gmra.mrb[8].mxu1 %v58979_v53  ;;  %v61746_v54 = vld [vmem:[#allocation37_spill] sm:$0xff] }
 0x5ea   :  { %28242 = vmatpush1.msra.mxu1 %v61744_v43  ;;  %27850 = vmatprep.subr.mxu0 %v57146_v19  ;;  %v55463_v43 = vld [vmem:[%s61165_s1 + $0xf0] sm:$0xff] }
 0x5eb   :  { %28315 = vmatprep.subr.mxu1 %v61734_v52  ;;  %27840 = vmatprep.mubr.f32.mxu0 %v61489_v23 }
 0x5ec   :  { %28305 = vmatprep.mubr.f32.mxu1 %v61489_v23 }
 0x5f0   :  { %27843 = vmatmul.mubr.f32.vlgmr.msra.gmra.mrb[8].mxu0 %v27680_v47 }
 0x5f1   :  { %27852 = vmatpush1.msra.mxu0 %v61735_v34  ;;  %28308 = vmatmul.mubr.f32.vlgmr.msra.gmra.mrb[8].mxu1 %v27680_v47  ;;  %v28545_v47 = vsel %vm280_vm0, %v55463_v43, 0 }
 0x5f2   :  { %28317 = vmatpush1.msra.mxu1 %v61736_v44  ;;  %27928 = vmatprep.subr.mxu0 %v61745_v39 }
 0x5f3   :  { %28393 = vmatprep.subr.mxu1 %v61746_v54  ;;  %27915 = vmatprep.mubr.f32.mxu0 %v61489_v23  ;;  %v59028_v54 = vand.u32 4294901760, %v28545_v47 }
 0x5f4   :  { %28380 = vmatprep.mubr.f32.mxu1 %v61489_v23 }
 0x5f5   :  { %v28615_v39 = vsub.f32 %v28545_v47, %v59028_v54  ;;  %v61749_v47 = vld [vmem:[#allocation62_spill] sm:$0xff] }
 0x5f8   :  { %27919 = vmatmul.mubr.f32.vlgmr.msra.gmra.mrb[8].mxu0 %v27681_v45 }
 0x5f9   :  { %27932 = vmatpush1.msra.mxu0 %v61747_v38  ;;  %28384 = vmatmul.mubr.f32.vlgmr.msra.gmra.mrb[8].mxu1 %v27681_v45  ;;  %v28616_v45 = vand.u32 4294901760, %v28615_v39  ;;  %v61750_v38 = vld [vmem:[#allocation63_spill] sm:$0xff] }
 0x5fa   :  { %28397 = vmatpush1.msra.mxu1 %v61748_v40  ;;  %28004 = vmatprep.subr.mxu0 %v57146_v19 }
 0x5fb   :  { %28469 = vmatprep.subr.mxu1 %v61734_v52  ;;  %27995 = vmatprep.mubr.f32.mxu0 %v61489_v23  ;;  %v28617_v43 = vsub.f32 %v28615_v39, %v28616_v45 }
 0x5fc   :  { %28460 = vmatprep.mubr.f32.mxu1 %v61489_v23 }
 0x5fd   :  { %v28618_v40 = vand.u32 4294901760, %v28617_v43  ;;  %v61755_v43 = vld [vmem:[#allocation58_spill] sm:$0xff] }
 0x600   :  { %27997 = vmatmul.mubr.f32.vlgmr.msra.gmra.mrb[8].mxu0 %v58979_v53 }
 0x601   :  { %28006 = vmatpush1.msra.mxu0 %v61735_v34  ;;  %28462 = vmatmul.mubr.f32.vlgmr.msra.gmra.mrb[8].mxu1 %v58979_v53 }
 0x602   :  { %28471 = vmatpush1.msra.mxu1 %v61736_v44  ;;  %28548 = vmatprep.subr.mxu0 %v57284_v22 }
 0x603   :  { %29013 = vmatprep.subr.mxu1 %v61686_v57  ;;  %28069 = vmatprep.mubr.f32.mxu0 %v61489_v23 }
 0x604   :  { %28534 = vmatprep.mubr.f32.mxu1 %v61489_v23 }
 0x608   :  { %28071 = vmatmul.mubr.f32.vlgmr.msra.gmra.mrb[8].mxu0 %v58979_v53 }
 0x609   :  { %28536 = vmatmul.mubr.f32.vlgmr.msra.gmra.mrb[8].mxu1 %v58979_v53  ;;  %28550 = vmatpush1.msra.mxu0 %v61687_v8  ;;  %v61752_v53 = vld [vmem:[#allocation51_spill] sm:$0xff] }
 0x60a   :  { %29015 = vmatpush1.msra.mxu1 %v61688_v42  ;;  %28630 = vmatprep.subr.mxu0 %v61689_v41 }
 0x60b   :  { %29095 = vmatprep.subr.mxu1 %v61749_v47  ;;  %28613 = vmatprep.mubr.f32.mxu0 %v61489_v23  ;;  %v61754_v47 = vld [vmem:[#allocation57_spill] sm:$0xff] }
 0x60c   :  { %29078 = vmatprep.mubr.f32.mxu1 %v61489_v23 }
 0x610   :  { %28619 = vmatmul.mubr.f32.vlgmr.msra.gmra.mrb[8].mxu0 %v28618_v40 }
 0x611   :  { %28636 = vmatpush1.msra.mxu0 %v61750_v38  ;;  %29084 = vmatmul.mubr.f32.vlgmr.msra.gmra.mrb[8].mxu1 %v28618_v40  ;;  %v61756_v40 = vld [vmem:[#allocation55_spill] sm:$0xff] }
 0x612   :  { %29101 = vmatpush1.msra.mxu1 %v61751_v37  ;;  %28709 = vmatprep.subr.mxu0 %v61752_v53  ;;  %v61759_v53 = vld [vmem:[#allocation60_spill] sm:$0xff]  ;;  %v61763_v37 = vld [vmem:[#allocation67_spill] sm:$0xff] }
 0x613   :  { %29174 = vmatprep.subr.mxu1 %v61753_v36  ;;  %28699 = vmatprep.mubr.f32.mxu0 %v61489_v23  ;;  %v61758_v36 = vld [vmem:[#allocation59_spill] sm:$0xff] }
 0x614   :  { %29164 = vmatprep.mubr.f32.mxu1 %v61489_v23 }
 0x618   :  { %28701 = vmatmul.mubr.f32.vlgmr.msra.gmra.mrb[8].mxu0 %v59028_v54 }
 0x619   :  { %28712 = vmatpush1.msra.mxu0 %v61754_v47  ;;  %29166 = vmatmul.mubr.f32.vlgmr.msra.gmra.mrb[8].mxu1 %v59028_v54  ;;  %v61757_v47 = vld [vmem:[#allocation56_spill] sm:$0xff] }
 0x61a   :  { %29177 = vmatpush1.msra.mxu1 %v61755_v43  ;;  %28785 = vmatprep.subr.mxu0 %v57284_v22  ;;  %v55464_v43 = vld [vmem:[%s61165_s1 + $0xf8] sm:$0xff] }
 0x61b   :  { %29250 = vmatprep.subr.mxu1 %v61686_v57  ;;  %28775 = vmatprep.mubr.f32.mxu0 %v61489_v23 }
 0x61c   :  { %29240 = vmatprep.mubr.f32.mxu1 %v61489_v23 }
 0x620   :  { %28778 = vmatmul.mubr.f32.vlgmr.msra.gmra.mrb[8].mxu0 %v28615_v39 }
 0x621   :  { %28787 = vmatpush1.msra.mxu0 %v61687_v8  ;;  %29243 = vmatmul.mubr.f32.vlgmr.msra.gmra.mrb[8].mxu1 %v28615_v39  ;;  %v29484_v39 = vsel %vm280_vm0, %v55464_v43, 0 }
 0x622   :  { %29252 = vmatpush1.msra.mxu1 %v61688_v42  ;;  %28863 = vmatprep.subr.mxu0 %v61756_v40 }
 0x623   :  { %29328 = vmatprep.subr.mxu1 %v61757_v47  ;;  %28850 = vmatprep.mubr.f32.mxu0 %v61489_v23  ;;  %v59077_v47 = vand.u32 4294901760, %v29484_v39 }
 0x624   :  { %29315 = vmatprep.mubr.f32.mxu1 %v61489_v23 }
 0x625   :  { %v29554_v40 = vsub.f32 %v29484_v39, %v59077_v47 }
 0x628   :  { %28854 = vmatmul.mubr.f32.vlgmr.msra.gmra.mrb[8].mxu0 %v28616_v45 }
 0x629   :  { %28867 = vmatpush1.msra.mxu0 %v61758_v36  ;;  %29319 = vmatmul.mubr.f32.vlgmr.msra.gmra.mrb[8].mxu1 %v28616_v45  ;;  %v29555_v45 = vand.u32 4294901760, %v29554_v40  ;;  %v61762_v36 = vld [vmem:[#allocation66_spill] sm:$0xff] }
 0x62a   :  { %29332 = vmatpush1.msra.mxu1 %v61759_v53  ;;  %28939 = vmatprep.subr.mxu0 %v57284_v22  ;;  %v61760_v53 = vld [vmem:[#allocation78_spill] sm:$0xff] }
 0x62b   :  { %29404 = vmatprep.subr.mxu1 %v61686_v57  ;;  %28930 = vmatprep.mubr.f32.mxu0 %v61489_v23  ;;  %v29556_v43 = vsub.f32 %v29554_v40, %v29555_v45 }
 0x62c   :  { %29395 = vmatprep.mubr.f32.mxu1 %v61489_v23 }
 0x62d   :  { %v29557_v39 = vand.u32 4294901760, %v29556_v43  ;;  %v61764_v43 = vld [vmem:[#allocation72_spill] sm:$0xff] }
 0x630   :  { %28932 = vmatmul.mubr.f32.vlgmr.msra.gmra.mrb[8].mxu0 %v59028_v54 }
 0x631   :  { %28941 = vmatpush1.msra.mxu0 %v61687_v8  ;;  %29397 = vmatmul.mubr.f32.vlgmr.msra.gmra.mrb[8].mxu1 %v59028_v54 }
 0x632   :  { %29406 = vmatpush1.msra.mxu1 %v61688_v42  ;;  %29004 = vmatprep.mubr.f32.mxu0 %v61489_v23 }
 0x633   :  { %29469 = vmatprep.mubr.f32.mxu1 %v61489_v23  ;;  %29487 = vmatprep.subr.mxu0 %v57388_v16 }
 0x634   :  { %29952 = vmatprep.subr.mxu1 %v61638_v58 }
 0x638   :  { %29006 = vmatmul.mubr.f32.vlgmr.msra.gmra.mrb[8].mxu0 %v59028_v54 }
 0x639   :  { %29471 = vmatmul.mubr.f32.vlgmr.msra.gmra.mrb[8].mxu1 %v59028_v54  ;;  %29489 = vmatpush1.msra.mxu0 %v61639_v48  ;;  %v61761_v54 = vld [vmem:[#allocation79_spill] sm:$0xff] }
 0x63a   :  { %29552 = vmatprep.mubr.f32.mxu0 %v61489_v23  ;;  %29954 = vmatpush1.msra.mxu1 %v61640_v25 }
 0x63b   :  { %30017 = vmatprep.mubr.f32.mxu1 %v61489_v23  ;;  %29569 = vmatprep.subr.mxu0 %v61641_v31 }
 0x63c   :  { %30034 = vmatprep.subr.mxu1 %v61701_v32 }
 0x640   :  { %29558 = vmatmul.mubr.f32.vlgmr.msra.gmra.mrb[8].mxu0 %v29557_v39 }
 0x641   :  { %30023 = vmatmul.mubr.f32.vlgmr.msra.gmra.mrb[8].mxu1 %v29557_v39  ;;  %29575 = vmatpush1.msra.mxu0 %v61760_v53  ;;  %v61765_v39 = vld [vmem:[#allocation73_spill] sm:$0xff]  ;;  %v61773_v53 = vld [vmem:[#allocation86_spill] sm:$0xff] }
 0x642   :  { %29638 = vmatprep.mubr.f32.mxu0 %v61489_v23  ;;  %30040 = vmatpush1.msra.mxu1 %v61761_v54  ;;  %v61769_v54 = vld [vmem:[#allocation75_spill] sm:$0xff] }
 0x643   :  { %30103 = vmatprep.mubr.f32.mxu1 %v61489_v23  ;;  %29648 = vmatprep.subr.mxu0 %v61762_v36  ;;  %v61768_v36 = vld [vmem:[#allocation74_spill] sm:$0xff] }
 0x644   :  { %30113 = vmatprep.subr.mxu1 %v61763_v37  ;;  %v61767_v37 = vld [vmem:[#allocation71_spill] sm:$0xff] }
 0x648   :  { %29640 = vmatmul.mubr.f32.vlgmr.msra.gmra.mrb[8].mxu0 %v59077_v47 }
 0x649   :  { %30105 = vmatmul.mubr.f32.vlgmr.msra.gmra.mrb[8].mxu1 %v59077_v47  ;;  %29651 = vmatpush1.msra.mxu0 %v61764_v43  ;;  %v61766_v43 = vld [vmem:[#allocation70_spill] sm:$0xff] }
 0x64a   :  { %29714 = vmatprep.mubr.f32.mxu0 %v61489_v23  ;;  %30116 = vmatpush1.msra.mxu1 %v61765_v39  ;;  %v55465_v39 = vld [vmem:[%s61165_s1 + $0x100] sm:$0xff] }
 0x64b   :  { %30179 = vmatprep.mubr.f32.mxu1 %v61489_v23  ;;  %29724 = vmatprep.subr.mxu0 %v57388_v16 }
 0x64c   :  { %30189 = vmatprep.subr.mxu1 %v61638_v58 }
 0x650   :  { %29717 = vmatmul.mubr.f32.vlgmr.msra.gmra.mrb[8].mxu0 %v29554_v40 }
 0x651   :  { %30182 = vmatmul.mubr.f32.vlgmr.msra.gmra.mrb[8].mxu1 %v29554_v40  ;;  %29726 = vmatpush1.msra.mxu0 %v61639_v48  ;;  %v30423_v40 = vsel %vm280_vm0, %v55465_v39, 0 }
 0x652   :  { %29789 = vmatprep.mubr.f32.mxu0 %v61489_v23  ;;  %30191 = vmatpush1.msra.mxu1 %v61640_v25 }
 0x653   :  { %30254 = vmatprep.mubr.f32.mxu1 %v61489_v23  ;;  %29802 = vmatprep.subr.mxu0 %v61766_v43  ;;  %v61771_v43 = vld [vmem:[#allocation98_spill] sm:$0xff] }
 0x654   :  { %30267 = vmatprep.subr.mxu1 %v61767_v37  ;;  %v59126_v37 = vand.u32 4294901760, %v30423_v40 }
 0x658   :  { %29793 = vmatmul.mubr.f32.vlgmr.msra.gmra.mrb[8].mxu0 %v29555_v45 }
 0x659   :  { %30258 = vmatmul.mubr.f32.vlgmr.msra.gmra.mrb[8].mxu1 %v29555_v45  ;;  %29806 = vmatpush1.msra.mxu0 %v61768_v36  ;;  %v30493_v45 = vsub.f32 %v30423_v40, %v59126_v37  ;;  %v61770_v40 = vld [vmem:[#allocation96_spill] sm:$0xff] }
 0x65a   :  { %30271 = vmatpush1.msra.mxu1 %v61769_v54  ;;  %29869 = vmatprep.mubr.f32.mxu0 %v61489_v23 }
 0x65b   :  { %29878 = vmatprep.subr.mxu0 %v57388_v16  ;;  %30334 = vmatprep.mubr.f32.mxu1 %v61489_v23  ;;  %v30494_v39 = vand.u32 4294901760, %v30493_v45 }
 0x65c   :  { %30343 = vmatprep.subr.mxu1 %v61638_v58 }
 0x65d   :  { %v30495_v54 = vsub.f32 %v30493_v45, %v30494_v39 }
 0x65f   :  { %v30496_v36 = vand.u32 4294901760, %v30495_v54  ;;  %v61775_v54 = vld [vmem:[#allocation92_spill] sm:$0xff] }
 0x660   :  { %29871 = vmatmul.mubr.f32.vlgmr.msra.gmra.mrb[8].mxu0 %v59077_v47 }
 0x661   :  { %29880 = vmatpush1.msra.mxu0 %v61639_v48  ;;  %30336 = vmatmul.mubr.f32.vlgmr.msra.gmra.mrb[8].mxu1 %v59077_v47 }
 0x662   :  { %30345 = vmatpush1.msra.mxu1 %v61640_v25  ;;  %30426 = vmatprep.subr.mxu0 %v57519_v2 }
 0x663   :  { %30891 = vmatprep.subr.mxu1 %v61590_v49  ;;  %29943 = vmatprep.mubr.f32.mxu0 %v61489_v23 }
 0x664   :  { %30408 = vmatprep.mubr.f32.mxu1 %v61489_v23 }
 0x668   :  { %29945 = vmatmul.mubr.f32.vlgmr.msra.gmra.mrb[8].mxu0 %v59077_v47 }
 0x669   :  { %30410 = vmatmul.mubr.f32.vlgmr.msra.gmra.mrb[8].mxu1 %v59077_v47  ;;  %30428 = vmatpush1.msra.mxu0 %v61591_v33  ;;  %v61772_v47 = vld [vmem:[#allocation85_spill] sm:$0xff] }
 0x66a   :  { %30893 = vmatpush1.msra.mxu1 %v61592_v27  ;;  %30508 = vmatprep.subr.mxu0 %v61593_v21 }
 0x66b   :  { %30973 = vmatprep.subr.mxu1 %v61770_v40  ;;  %30491 = vmatprep.mubr.f32.mxu0 %v61489_v23  ;;  %v61774_v40 = vld [vmem:[#allocation91_spill] sm:$0xff] }
 0x66c   :  { %30956 = vmatprep.mubr.f32.mxu1 %v61489_v23 }
 0x670   :  { %30497 = vmatmul.mubr.f32.vlgmr.msra.gmra.mrb[8].mxu0 %v30496_v36 }
 0x671   :  { %30514 = vmatpush1.msra.mxu0 %v61654_v11  ;;  %30962 = vmatmul.mubr.f32.vlgmr.msra.gmra.mrb[8].mxu1 %v30496_v36 }
 0x672   :  { %30979 = vmatpush1.msra.mxu1 %v61771_v43  ;;  %30587 = vmatprep.subr.mxu0 %v61772_v47 }
 0x673   :  { %31052 = vmatprep.subr.mxu1 %v61773_v53  ;;  %30577 = vmatprep.mubr.f32.mxu0 %v61489_v23 }
 0x674   :  { %31042 = vmatprep.mubr.f32.mxu1 %v61489_v23 }
 0x678   :  { %30579 = vmatmul.mubr.f32.vlgmr.msra.gmra.mrb[8].mxu0 %v59126_v37 }
 0x679   :  { %30590 = vmatpush1.msra.mxu0 %v61774_v40  ;;  %31044 = vmatmul.mubr.f32.vlgmr.msra.gmra.mrb[8].mxu1 %v59126_v37 }
 0x67a   :  { %31055 = vmatpush1.msra.mxu1 %v61775_v54  ;;  %30663 = vmatprep.subr.mxu0 %v57519_v2 }
 0x67b   :  { %31128 = vmatprep.subr.mxu1 %v61590_v49  ;;  %30653 = vmatprep.mubr.f32.mxu0 %v61489_v23 }
 0x67c   :  { %31118 = vmatprep.mubr.f32.mxu1 %v61489_v23 }
 0x67f   :  { %v59159_v36 = vpop.f32.mrb[6].mxu0 }
 0x680   :  { %61776 = vst [vmem:[#allocation84_spill] sm:$0xff] %v59159_v36  ;;  %v59161_v53 = vpop.f32.mrb[6].mxu1  ;;  %v59163_v47 = vpop.f32.mrb[7].mxu0  ;;  %30656 = vmatmul.mubr.f32.vlgmr.msra.gmra.mrb[8].mxu0 %v30493_v45 }
 0x681   :  { %61777 = vst [vmem:[#allocation87_spill] sm:$0xff] %v59161_v53  ;;  %61778 = vst [vmem:[#allocation88_spill] sm:$0xff] %v59163_v47  ;;  %v59165_v40 = vpop.f32.mrb[7].mxu1  ;;  %30665 = vmatpush1.msra.mxu0 %v61591_v33  ;;  %31121 = vmatmul.mubr.f32.vlgmr.msra.gmra.mrb[8].mxu1 %v30493_v45  ;;  %v55466_v47 = vld [vmem:[%s61165_s1 + $0x108] sm:$0xff] }
 0x682   :  { %61779 = vst [vmem:[#allocation95_spill] sm:$0xff] %v59165_v40  ;;  %31130 = vmatpush1.msra.mxu1 %v61592_v27  ;;  %30741 = vmatprep.subr.mxu0 %v61718_v46  ;;  %v31362_v45 = vsel %vm280_vm0, %v55466_v47, 0  ;;  %v61780_v40 = vld [vmem:[#allocation94_spill] sm:$0xff] }
 0x683   :  { %31206 = vmatprep.subr.mxu1 %v61719_v59  ;;  %30728 = vmatprep.mubr.f32.mxu0 %v61489_v23  ;;  %v59183_v53 = vand.u32 4294901760, %v31362_v45 }
 0x684   :  { %31193 = vmatprep.mubr.f32.mxu1 %v61489_v23 }
 0x685   :  { %v31432_v36 = vsub.f32 %v31362_v45, %v59183_v53 }
 0x688   :  { %30732 = vmatmul.mubr.f32.vlgmr.msra.gmra.mrb[8].mxu0 %v30494_v39 }
 0x689   :  { %30745 = vmatpush1.msra.mxu0 %v61662_v29  ;;  %31197 = vmatmul.mubr.f32.vlgmr.msra.gmra.mrb[8].mxu1 %v30494_v39  ;;  %v31433_v39 = vand.u32 4294901760, %v31432_v36 }
 0x68a   :  { %31210 = vmatpush1.msra.mxu1 %v61780_v40  ;;  %30817 = vmatprep.subr.mxu0 %v57519_v2 }
 0x68b   :  { %31282 = vmatprep.subr.mxu1 %v61590_v49  ;;  %30808 = vmatprep.mubr.f32.mxu0 %v61489_v23  ;;  %v31434_v47 = vsub.f32 %v31432_v36, %v31433_v39 }
 0x68c   :  { %31273 = vmatprep.mubr.f32.mxu1 %v61489_v23 }
 0x68d   :  { %v31435_v45 = vand.u32 4294901760, %v31434_v47  ;;  %v61782_v47 = vld [vmem:[#allocation108_spill] sm:$0xff] }
 0x690   :  { %30810 = vmatmul.mubr.f32.vlgmr.msra.gmra.mrb[8].mxu0 %v59126_v37 }
 0x691   :  { %30819 = vmatpush1.msra.mxu0 %v61591_v33  ;;  %31275 = vmatmul.mubr.f32.vlgmr.msra.gmra.mrb[8].mxu1 %v59126_v37 }
 0x692   :  { %31284 = vmatpush1.msra.mxu1 %v61592_v27  ;;  %31365 = vmatprep.subr.mxu0 %v57649_v51 }
 0x693   :  { %31830 = vmatprep.subr.mxu1 %v57654_v61  ;;  %30882 = vmatprep.mubr.f32.mxu0 %v61489_v23 }
 0x694   :  { %31347 = vmatprep.mubr.f32.mxu1 %v61489_v23 }
 0x698   :  { %30884 = vmatmul.mubr.f32.vlgmr.msra.gmra.mrb[8].mxu0 %v59126_v37 }
 0x699   :  { %31349 = vmatmul.mubr.f32.vlgmr.msra.gmra.mrb[8].mxu1 %v59126_v37  ;;  %31367 = vmatpush1.msra.mxu0 %v57674_v28  ;;  %v61781_v37 = vld [vmem:[#allocation107_spill] sm:$0xff] }
 0x69a   :  { %31832 = vmatpush1.msra.mxu1 %v57676_v1  ;;  %31447 = vmatprep.subr.mxu0 %v57711_v56 }
 0x69b   :  { %31912 = vmatprep.subr.mxu1 %v61721_v10  ;;  %31430 = vmatprep.mubr.f32.mxu0 %v61489_v23 }
 0x69c   :  { %31895 = vmatprep.mubr.f32.mxu1 %v61489_v23 }
 0x6a0   :  { %31436 = vmatmul.mubr.f32.vlgmr.msra.gmra.mrb[8].mxu0 %v31435_v45 }
 0x6a1   :  { %31453 = vmatpush1.msra.mxu0 %v61606_v4  ;;  %31901 = vmatmul.mubr.f32.vlgmr.msra.gmra.mrb[8].mxu1 %v31435_v45  ;;  %v61783_v45 = vld [vmem:[#allocation105_spill] sm:$0xff] }
 0x6a2   :  { %31918 = vmatpush1.msra.mxu1 %v61607_v3  ;;  %31526 = vmatprep.subr.mxu0 %v61665_v30 }
 0x6a3   :  { %31991 = vmatprep.subr.mxu1 %v61666_v60  ;;  %31516 = vmatprep.mubr.f32.mxu0 %v61489_v23 }
 0x6a4   :  { %31981 = vmatprep.mubr.f32.mxu1 %v61489_v23 }
 0x6a8   :  { %31518 = vmatmul.mubr.f32.vlgmr.msra.gmra.mrb[8].mxu0 %v59183_v53 }
 0x6a9   :  { %31529 = vmatpush1.msra.mxu0 %v61781_v37  ;;  %31983 = vmatmul.mubr.f32.vlgmr.msra.gmra.mrb[8].mxu1 %v59183_v53  ;;  %v61784_v37 = vld [vmem:[#allocation106_spill] sm:$0xff] }
 0x6aa   :  { %31994 = vmatpush1.msra.mxu1 %v61782_v47  ;;  %31602 = vmatprep.subr.mxu0 %v57649_v51  ;;  %v55467_v47 = vld [vmem:[%s61165_s1 + $0x110] sm:$0xff] }
 0x6ab   :  { %32067 = vmatprep.subr.mxu1 %v57654_v61  ;;  %31592 = vmatprep.mubr.f32.mxu0 %v61489_v23 }
 0x6ac   :  { %32057 = vmatprep.mubr.f32.mxu1 %v61489_v23 }
 0x6b0   :  { %31595 = vmatmul.mubr.f32.vlgmr.msra.gmra.mrb[8].mxu0 %v31432_v36 }
 0x6b1   :  { %31604 = vmatpush1.msra.mxu0 %v57674_v28  ;;  %32060 = vmatmul.mubr.f32.vlgmr.msra.gmra.mrb[8].mxu1 %v31432_v36  ;;  %v32301_v36 = vsel %vm280_vm0, %v55467_v47, 0 }
 0x6b2   :  { %32069 = vmatpush1.msra.mxu1 %v57676_v1  ;;  %31680 = vmatprep.subr.mxu0 %v61783_v45 }
 0x6b3   :  { %32145 = vmatprep.subr.mxu1 %v61784_v37  ;;  %31667 = vmatprep.mubr.f32.mxu0 %v61489_v23  ;;  %v59232_v37 = vand.u32 4294901760, %v32301_v36 }
 0x6b4   :  { %32132 = vmatprep.mubr.f32.mxu1 %v61489_v23 }
 0x6b5   :  { %v32371_v45 = vsub.f32 %v32301_v36, %v59232_v37 }
 0x6b8   :  { %31671 = vmatmul.mubr.f32.vlgmr.msra.gmra.mrb[8].mxu0 %v31433_v39 }
 0x6b9   :  { %31684 = vmatpush1.msra.mxu0 %v61614_v17  ;;  %32136 = vmatmul.mubr.f32.vlgmr.msra.gmra.mrb[8].mxu1 %v31433_v39  ;;  %v32372_v39 = vand.u32 4294901760, %v32371_v45 }
 0x6ba   :  { %32149 = vmatpush1.msra.mxu1 %v61615_v5  ;;  %31756 = vmatprep.subr.mxu0 %v57649_v51 }
 0x6bb   :  { %32221 = vmatprep.subr.mxu1 %v57654_v61  ;;  %31747 = vmatprep.mubr.f32.mxu0 %v61489_v23  ;;  %v32373_v47 = vsub.f32 %v32371_v45, %v32372_v39 }
 0x6bc   :  { %32212 = vmatprep.mubr.f32.mxu1 %v61489_v23 }
 0x6bd   :  { %v32374_v36 = vand.u32 4294901760, %v32373_v47 }
 0x6c0   :  { %31749 = vmatmul.mubr.f32.vlgmr.msra.gmra.mrb[8].mxu0 %v59183_v53 }
 0x6c1   :  { %31758 = vmatpush1.msra.mxu0 %v57674_v28  ;;  %32214 = vmatmul.mubr.f32.vlgmr.msra.gmra.mrb[8].mxu1 %v59183_v53 }
 0x6c2   :  { %32223 = vmatpush1.msra.mxu1 %v57676_v1  ;;  %32304 = vmatprep.subr.mxu0 %v57779_v18 }
 0x6c3   :  { %32769 = vmatprep.subr.mxu1 %v57784_v63  ;;  %31821 = vmatprep.mubr.f32.mxu0 %v61489_v23 }
 0x6c4   :  { %32286 = vmatprep.mubr.f32.mxu1 %v61489_v23 }
 0x6c8   :  { %31823 = vmatmul.mubr.f32.vlgmr.msra.gmra.mrb[8].mxu0 %v59183_v53 }
 0x6c9   :  { %32288 = vmatmul.mubr.f32.vlgmr.msra.gmra.mrb[8].mxu1 %v59183_v53  ;;  %32306 = vmatpush1.msra.mxu0 %v57804_v50  ;;  %v55470_v53 = vld [vmem:[%s61165_s1 + $0x120] sm:$0xff] }
 0x6ca   :  { %32771 = vmatpush1.msra.mxu1 %v57806_v6  ;;  %32386 = vmatprep.subr.mxu0 %v57839_v12  ;;  %v33286_v47 = vsel %vm280_vm0, %v55470_v53, 0 }
 0x6cb   :  { %32851 = vmatprep.subr.mxu1 %v57842_v15  ;;  %32369 = vmatprep.mubr.f32.mxu0 %v61489_v23 }
 0x6cc   :  { %32834 = vmatprep.mubr.f32.mxu1 %v61489_v23 }
 0x6d0   :  { %32375 = vmatmul.mubr.f32.vlgmr.msra.gmra.mrb[8].mxu0 %v32374_v36 }
 0x6d1   :  { %32392 = vmatpush1.msra.mxu0 %v57855_v26  ;;  %32840 = vmatmul.mubr.f32.vlgmr.msra.gmra.mrb[8].mxu1 %v32374_v36  ;;  %v59275_v36 = vand.u32 4294901760, %v33286_v47 }
 0x6d2   :  { %32857 = vmatpush1.msra.mxu1 %v57857_v0  ;;  %32465 = vmatprep.subr.mxu0 %v57795_v20  ;;  %v61792_v20 = vld [vmem:[#allocation26_spill] sm:$0xff] }
 0x6d3   :  { %32930 = vmatprep.subr.mxu1 %v57800_v62  ;;  %32455 = vmatprep.mubr.f32.mxu0 %v61489_v23  ;;  %v61791_v62 = vld [vmem:[#allocation25_spill] sm:$0xff] }
 0x6d4   :  { %32920 = vmatprep.mubr.f32.mxu1 %v61489_v23 }
 0x6d8   :  { %32457 = vmatmul.mubr.f32.vlgmr.msra.gmra.mrb[8].mxu0 %v59232_v37 }
 0x6d9   :  { %32468 = vmatpush1.msra.mxu0 %v57819_v13  ;;  %32922 = vmatmul.mubr.f32.vlgmr.msra.gmra.mrb[8].mxu1 %v59232_v37  ;;  %v61790_v13 = vld [vmem:[#allocation24_spill] sm:$0xff] }
 0x6da   :  { %32933 = vmatpush1.msra.mxu1 %v57823_v9  ;;  %32541 = vmatprep.subr.mxu0 %v57779_v18  ;;  %v61789_v9 = vld [vmem:[#allocation23_spill] sm:$0xff] }
 0x6db   :  { %33006 = vmatprep.subr.mxu1 %v57784_v63  ;;  %32531 = vmatprep.mubr.f32.mxu0 %v61489_v23 }
 0x6dc   :  { %32996 = vmatprep.mubr.f32.mxu1 %v61489_v23 }
 0x6e0   :  { %32534 = vmatmul.mubr.f32.vlgmr.msra.gmra.mrb[8].mxu0 %v32371_v45 }
 0x6e1   :  { %32543 = vmatpush1.msra.mxu0 %v57804_v50  ;;  %32999 = vmatmul.mubr.f32.vlgmr.msra.gmra.mrb[8].mxu1 %v32371_v45  ;;  %v33356_v45 = vsub.f32 %v33286_v47, %v59275_v36 }
 0x6e2   :  { %33008 = vmatpush1.msra.mxu1 %v57806_v6  ;;  %32619 = vmatprep.subr.mxu0 %v57809_v24  ;;  %v61788_v24 = vld [vmem:[#allocation14_spill] sm:$0xff] }
 0x6e3   :  { %33084 = vmatprep.subr.mxu1 %v57813_v14  ;;  %32606 = vmatprep.mubr.f32.mxu0 %v61489_v23  ;;  %v33357_v53 = vand.u32 4294901760, %v33356_v45  ;;  %v61787_v14 = vld [vmem:[#allocation11_spill] sm:$0xff] }
 0x6e4   :  { %33071 = vmatprep.mubr.f32.mxu1 %v61489_v23 }
 0x6e8   :  { %32610 = vmatmul.mubr.f32.vlgmr.msra.gmra.mrb[8].mxu0 %v32372_v39 }
 0x6e9   :  { %32623 = vmatpush1.msra.mxu0 %v57834_v35  ;;  %33075 = vmatmul.mubr.f32.vlgmr.msra.gmra.mrb[8].mxu1 %v32372_v39  ;;  %v61785_v39 = vld [vmem:[#allocation13_spill] sm:$0xff]  ;;  %v33358_v35 = vsub.f32 %v33356_v45, %v33357_v53 }
 0x6ea   :  { %33088 = vmatpush1.msra.mxu1 %v57837_v7  ;;  %32695 = vmatprep.subr.mxu0 %v57779_v18  ;;  %v61786_v7 = vld [vmem:[#allocation12_spill] sm:$0xff] }
 0x6eb   :  { %33160 = vmatprep.subr.mxu1 %v57784_v63  ;;  %32686 = vmatprep.mubr.f32.mxu0 %v61489_v23  ;;  %v33359_v47 = vand.u32 4294901760, %v33358_v35  ;;  %v61793_v35 = vld [vmem:[#allocation17_spill] sm:$0xff] }
 0x6ec   :  { %33151 = vmatprep.mubr.f32.mxu1 %v61489_v23 }
 0x6f0   :  { %32688 = vmatmul.mubr.f32.vlgmr.msra.gmra.mrb[8].mxu0 %v59232_v37 }
 0x6f1   :  { %32697 = vmatpush1.msra.mxu0 %v57804_v50  ;;  %33153 = vmatmul.mubr.f32.vlgmr.msra.gmra.mrb[8].mxu1 %v59232_v37 }
 0x6f2   :  { %33162 = vmatpush1.msra.mxu1 %v57806_v6  ;;  %33289 = vmatprep.subr.mxu0 %v61785_v39 }
 0x6f3   :  { %33754 = vmatprep.subr.mxu1 %v61786_v7  ;;  %32760 = vmatprep.mubr.f32.mxu0 %v61489_v23 }
 0x6f4   :  { %33225 = vmatprep.mubr.f32.mxu1 %v61489_v23 }
 0x6f8   :  { %32762 = vmatmul.mubr.f32.vlgmr.msra.gmra.mrb[8].mxu0 %v59232_v37 }
 0x6f9   :  { %33227 = vmatmul.mubr.f32.vlgmr.msra.gmra.mrb[8].mxu1 %v59232_v37  ;;  %33291 = vmatpush1.msra.mxu0 %v61787_v14  ;;  %v61794_v37 = vld [vmem:[#allocation16_spill] sm:$0xff] }
 0x6fa   :  { %33756 = vmatpush1.msra.mxu1 %v61788_v24  ;;  %33371 = vmatprep.subr.mxu0 %v61789_v9  ;;  %v61796_v9 = vld [vmem:[#allocation18_spill] sm:$0xff] }
 0x6fb   :  { %33836 = vmatprep.subr.mxu1 %v61790_v13  ;;  %33354 = vmatprep.mubr.f32.mxu0 %v61489_v23  ;;  %v61795_v13 = vld [vmem:[#allocation15_spill] sm:$0xff] }
 0x6fc   :  { %33819 = vmatprep.mubr.f32.mxu1 %v61489_v23  ;;  %33360 = vmatmul.mubr.f32.vlgmr.msra.gmra.mrb[10].mxu0 %v33359_v47 }
 0x6fd   :  { %33377 = vmatpush1.msra.mxu0 %v61791_v62  ;;  %33825 = vmatmul.mubr.f32.vlgmr.msra.gmra.mrb[10].mxu1 %v33359_v47  ;;  %v61797_v47 = vld [vmem:[#allocation21_spill] sm:$0xff] }
 0x6fe   :  { %33842 = vmatpush1.msra.mxu1 %v61792_v20  ;;  %33450 = vmatprep.subr.mxu0 %v61793_v35  ;;  %v61800_v35 = vld [vmem:[#allocation22_spill] sm:$0xff]  ;;  %v61803_v20 = vld [vmem:[#allocation45_spill] sm:$0xff] }
 0x6ff   :  { %33915 = vmatprep.subr.mxu1 %v61794_v37  ;;  %33440 = vmatprep.mubr.f32.mxu0 %v61489_v23  ;;  %v61799_v37 = vld [vmem:[#allocation19_spill] sm:$0xff]  ;;  %v61805_v62 = vld [vmem:[#allocation33_spill] sm:$0xff] }
 0x700   :  { %33905 = vmatprep.mubr.f32.mxu1 %v61489_v23 }
 0x704   :  { %33442 = vmatmul.mubr.f32.vlgmr.msra.gmra.mrb[10].mxu0 %v59275_v36 }
 0x705   :  { %33453 = vmatpush1.msra.mxu0 %v61795_v13  ;;  %33907 = vmatmul.mubr.f32.vlgmr.msra.gmra.mrb[10].mxu1 %v59275_v36  ;;  %v61798_v13 = vld [vmem:[#allocation20_spill] sm:$0xff] }
 0x706   :  { %33918 = vmatpush1.msra.mxu1 %v61796_v9  ;;  %33526 = vmatprep.subr.mxu0 %v61785_v39  ;;  %v55469_v9 = vld [vmem:[%s61165_s1 + $0x118] sm:$0xff] }
 0x707   :  { %33991 = vmatprep.subr.mxu1 %v61786_v7  ;;  %33516 = vmatprep.mubr.f32.mxu0 %v61489_v23 }
 0x708   :  { %33981 = vmatprep.mubr.f32.mxu1 %v61489_v23 }
 0x70c   :  { %33519 = vmatmul.mubr.f32.vlgmr.msra.gmra.mrb[10].mxu0 %v33356_v45 }
 0x70d   :  { %33528 = vmatpush1.msra.mxu0 %v61787_v14  ;;  %33984 = vmatmul.mubr.f32.vlgmr.msra.gmra.mrb[10].mxu1 %v33356_v45  ;;  %v34219_v45 = vsel %vm280_vm0, %v55469_v9, 0 }
 0x70e   :  { %33993 = vmatpush1.msra.mxu1 %v61788_v24  ;;  %33604 = vmatprep.subr.mxu0 %v61797_v47 }
 0x70f   :  { %34069 = vmatprep.subr.mxu1 %v61798_v13  ;;  %33591 = vmatprep.mubr.f32.mxu0 %v61489_v23  ;;  %v59330_v13 = vand.u32 4294901760, %v34219_v45 }
 0x710   :  { %34056 = vmatprep.mubr.f32.mxu1 %v61489_v23 }
 0x711   :  { %v34289_v47 = vsub.f32 %v34219_v45, %v59330_v13  ;;  %v61801_v45 = vld [vmem:[#allocation43_spill] sm:$0xff] }
 0x713   :  { %v34290_v9 = vand.u32 4294901760, %v34289_v47 }
 0x714   :  { %33595 = vmatmul.mubr.f32.vlgmr.msra.gmra.mrb[10].mxu0 %v33357_v53 }
 0x715   :  { %33608 = vmatpush1.msra.mxu0 %v61799_v37  ;;  %34060 = vmatmul.mubr.f32.vlgmr.msra.gmra.mrb[10].mxu1 %v33357_v53  ;;  %v34291_v53 = vsub.f32 %v34289_v47, %v34290_v9  ;;  %v61802_v37 = vld [vmem:[#allocation44_spill] sm:$0xff] }
 0x716   :  { %34073 = vmatpush1.msra.mxu1 %v61800_v35  ;;  %33680 = vmatprep.subr.mxu0 %v61785_v39 }
 0x717   :  { %34145 = vmatprep.subr.mxu1 %v61786_v7  ;;  %33671 = vmatprep.mubr.f32.mxu0 %v61489_v23  ;;  %v34292_v35 = vand.u32 4294901760, %v34291_v53  ;;  %v61807_v53 = vld [vmem:[#allocation39_spill] sm:$0xff] }
 0x718   :  { %34136 = vmatprep.mubr.f32.mxu1 %v61489_v23 }
 0x71c   :  { %33673 = vmatmul.mubr.f32.vlgmr.msra.gmra.mrb[10].mxu0 %v59275_v36 }
 0x71d   :  { %33682 = vmatpush1.msra.mxu0 %v61787_v14  ;;  %34138 = vmatmul.mubr.f32.vlgmr.msra.gmra.mrb[10].mxu1 %v59275_v36 }
 0x71e   :  { %34147 = vmatpush1.msra.mxu1 %v61788_v24  ;;  %34222 = vmatprep.subr.mxu0 %v57146_v19 }
 0x71f   :  { %34687 = vmatprep.subr.mxu1 %v61734_v52  ;;  %33745 = vmatprep.mubr.f32.mxu0 %v61489_v23 }
 0x720   :  { %34210 = vmatprep.mubr.f32.mxu1 %v61489_v23 }
 0x724   :  { %33747 = vmatmul.mubr.f32.vlgmr.msra.gmra.mrb[10].mxu0 %v59275_v36 }
 0x725   :  { %34212 = vmatmul.mubr.f32.vlgmr.msra.gmra.mrb[10].mxu1 %v59275_v36  ;;  %34224 = vmatpush1.msra.mxu0 %v61735_v34  ;;  %v61804_v36 = vld [vmem:[#allocation32_spill] sm:$0xff] }
 0x726   :  { %34689 = vmatpush1.msra.mxu1 %v61736_v44  ;;  %34304 = vmatprep.subr.mxu0 %v61737_v55 }
 0x727   :  { %34769 = vmatprep.subr.mxu1 %v61801_v45  ;;  %34287 = vmatprep.mubr.f32.mxu0 %v61489_v23  ;;  %v61806_v45 = vld [vmem:[#allocation38_spill] sm:$0xff] }
 0x728   :  { %34752 = vmatprep.mubr.f32.mxu1 %v61489_v23 }
 0x72c   :  { %34293 = vmatmul.mubr.f32.vlgmr.msra.gmra.mrb[10].mxu0 %v34292_v35 }
 0x72d   :  { %34310 = vmatpush1.msra.mxu0 %v61802_v37  ;;  %34758 = vmatmul.mubr.f32.vlgmr.msra.gmra.mrb[10].mxu1 %v34292_v35  ;;  %v61808_v35 = vld [vmem:[#allocation36_spill] sm:$0xff] }
 0x72e   :  { %34775 = vmatpush1.msra.mxu1 %v61803_v20  ;;  %34383 = vmatprep.subr.mxu0 %v61804_v36  ;;  %v61811_v36 = vld [vmem:[#allocation41_spill] sm:$0xff]  ;;  %v61815_v20 = vld [vmem:[#allocation52_spill] sm:$0xff] }
 0x72f   :  { %34848 = vmatprep.subr.mxu1 %v61805_v62  ;;  %34373 = vmatprep.mubr.f32.mxu0 %v61489_v23  ;;  %v61810_v62 = vld [vmem:[#allocation40_spill] sm:$0xff] }
 0x730   :  { %34838 = vmatprep.mubr.f32.mxu1 %v61489_v23 }
 0x734   :  { %34375 = vmatmul.mubr.f32.vlgmr.msra.gmra.mrb[10].mxu0 %v59330_v13 }
 0x735   :  { %34386 = vmatpush1.msra.mxu0 %v61806_v45  ;;  %34840 = vmatmul.mubr.f32.vlgmr.msra.gmra.mrb[10].mxu1 %v59330_v13  ;;  %v61809_v45 = vld [vmem:[#allocation37_spill] sm:$0xff] }
 0x736   :  { %34851 = vmatpush1.msra.mxu1 %v61807_v53  ;;  %34459 = vmatprep.subr.mxu0 %v57146_v19  ;;  %v55471_v53 = vld [vmem:[%s61165_s1 + $0x128] sm:$0xff] }
 0x737   :  { %34924 = vmatprep.subr.mxu1 %v61734_v52  ;;  %34449 = vmatprep.mubr.f32.mxu0 %v61489_v23 }
 0x738   :  { %34914 = vmatprep.mubr.f32.mxu1 %v61489_v23 }
 0x73c   :  { %34452 = vmatmul.mubr.f32.vlgmr.msra.gmra.mrb[10].mxu0 %v34289_v47 }
 0x73d   :  { %34461 = vmatpush1.msra.mxu0 %v61735_v34  ;;  %34917 = vmatmul.mubr.f32.vlgmr.msra.gmra.mrb[10].mxu1 %v34289_v47  ;;  %v35154_v47 = vsel %vm280_vm0, %v55471_v53, 0 }
 0x73e   :  { %34926 = vmatpush1.msra.mxu1 %v61736_v44  ;;  %34537 = vmatprep.subr.mxu0 %v61808_v35 }
 0x73f   :  { %35002 = vmatprep.subr.mxu1 %v61809_v45  ;;  %34524 = vmatprep.mubr.f32.mxu0 %v61489_v23  ;;  %v59379_v45 = vand.u32 4294901760, %v35154_v47 }
 0x740   :  { %34989 = vmatprep.mubr.f32.mxu1 %v61489_v23 }
 0x741   :  { %v35224_v35 = vsub.f32 %v35154_v47, %v59379_v45  ;;  %v61812_v47 = vld [vmem:[#allocation62_spill] sm:$0xff] }
 0x744   :  { %34528 = vmatmul.mubr.f32.vlgmr.msra.gmra.mrb[10].mxu0 %v34290_v9 }
 0x745   :  { %34541 = vmatpush1.msra.mxu0 %v61810_v62  ;;  %34993 = vmatmul.mubr.f32.vlgmr.msra.gmra.mrb[10].mxu1 %v34290_v9  ;;  %v35225_v9 = vand.u32 4294901760, %v35224_v35  ;;  %v61813_v62 = vld [vmem:[#allocation64_spill] sm:$0xff] }
 0x746   :  { %35006 = vmatpush1.msra.mxu1 %v61811_v36  ;;  %34613 = vmatprep.subr.mxu0 %v57146_v19 }
 0x747   :  { %35078 = vmatprep.subr.mxu1 %v61734_v52  ;;  %34604 = vmatprep.mubr.f32.mxu0 %v61489_v23  ;;  %v35226_v53 = vsub.f32 %v35224_v35, %v35225_v9 }
 0x748   :  { %35069 = vmatprep.mubr.f32.mxu1 %v61489_v23 }
 0x749   :  { %v35227_v36 = vand.u32 4294901760, %v35226_v53  ;;  %v61817_v53 = vld [vmem:[#allocation58_spill] sm:$0xff] }
 0x74c   :  { %34606 = vmatmul.mubr.f32.vlgmr.msra.gmra.mrb[10].mxu0 %v59330_v13 }
 0x74d   :  { %34615 = vmatpush1.msra.mxu0 %v61735_v34  ;;  %35071 = vmatmul.mubr.f32.vlgmr.msra.gmra.mrb[10].mxu1 %v59330_v13 }
 0x74e   :  { %35080 = vmatpush1.msra.mxu1 %v61736_v44  ;;  %35157 = vmatprep.subr.mxu0 %v57284_v22 }
 0x74f   :  { %35622 = vmatprep.subr.mxu1 %v61686_v57  ;;  %34678 = vmatprep.mubr.f32.mxu0 %v61489_v23 }
 0x750   :  { %35143 = vmatprep.mubr.f32.mxu1 %v61489_v23 }
 0x754   :  { %34680 = vmatmul.mubr.f32.vlgmr.msra.gmra.mrb[10].mxu0 %v59330_v13 }
 0x755   :  { %35145 = vmatmul.mubr.f32.vlgmr.msra.gmra.mrb[10].mxu1 %v59330_v13  ;;  %35159 = vmatpush1.msra.mxu0 %v61687_v8  ;;  %v61814_v13 = vld [vmem:[#allocation51_spill] sm:$0xff] }
 0x756   :  { %35624 = vmatpush1.msra.mxu1 %v61688_v42  ;;  %35239 = vmatprep.subr.mxu0 %v61689_v41 }
 0x757   :  { %35704 = vmatprep.subr.mxu1 %v61812_v47  ;;  %35222 = vmatprep.mubr.f32.mxu0 %v61489_v23  ;;  %v61816_v47 = vld [vmem:[#allocation57_spill] sm:$0xff] }
 0x758   :  { %35687 = vmatprep.mubr.f32.mxu1 %v61489_v23 }
 0x75c   :  { %35228 = vmatmul.mubr.f32.vlgmr.msra.gmra.mrb[10].mxu0 %v35227_v36 }
 0x75d   :  { %35245 = vmatpush1.msra.mxu0 %v61750_v38  ;;  %35693 = vmatmul.mubr.f32.vlgmr.msra.gmra.mrb[10].mxu1 %v35227_v36  ;;  %v61818_v36 = vld [vmem:[#allocation55_spill] sm:$0xff] }
 0x75e   :  { %35710 = vmatpush1.msra.mxu1 %v61813_v62  ;;  %35318 = vmatprep.subr.mxu0 %v61814_v13  ;;  %v61821_v13 = vld [vmem:[#allocation60_spill] sm:$0xff]  ;;  %v61825_v62 = vld [vmem:[#allocation67_spill] sm:$0xff] }
 0x75f   :  { %35783 = vmatprep.subr.mxu1 %v61815_v20  ;;  %35308 = vmatprep.mubr.f32.mxu0 %v61489_v23  ;;  %v61820_v20 = vld [vmem:[#allocation59_spill] sm:$0xff] }
 0x760   :  { %35773 = vmatprep.mubr.f32.mxu1 %v61489_v23 }
 0x764   :  { %35310 = vmatmul.mubr.f32.vlgmr.msra.gmra.mrb[10].mxu0 %v59379_v45 }
 0x765   :  { %35321 = vmatpush1.msra.mxu0 %v61816_v47  ;;  %35775 = vmatmul.mubr.f32.vlgmr.msra.gmra.mrb[10].mxu1 %v59379_v45  ;;  %v61819_v47 = vld [vmem:[#allocation56_spill] sm:$0xff] }
 0x766   :  { %35786 = vmatpush1.msra.mxu1 %v61817_v53  ;;  %35394 = vmatprep.subr.mxu0 %v57284_v22  ;;  %v55472_v53 = vld [vmem:[%s61165_s1 + $0x130] sm:$0xff] }
 0x767   :  { %35859 = vmatprep.subr.mxu1 %v61686_v57  ;;  %35384 = vmatprep.mubr.f32.mxu0 %v61489_v23 }
 0x768   :  { %35849 = vmatprep.mubr.f32.mxu1 %v61489_v23 }
 0x76c   :  { %35387 = vmatmul.mubr.f32.vlgmr.msra.gmra.mrb[10].mxu0 %v35224_v35 }
 0x76d   :  { %35396 = vmatpush1.msra.mxu0 %v61687_v8  ;;  %35852 = vmatmul.mubr.f32.vlgmr.msra.gmra.mrb[10].mxu1 %v35224_v35  ;;  %v36093_v35 = vsel %vm280_vm0, %v55472_v53, 0 }
 0x76e   :  { %35861 = vmatpush1.msra.mxu1 %v61688_v42  ;;  %35472 = vmatprep.subr.mxu0 %v61818_v36 }
 0x76f   :  { %35937 = vmatprep.subr.mxu1 %v61819_v47  ;;  %35459 = vmatprep.mubr.f32.mxu0 %v61489_v23  ;;  %v59428_v47 = vand.u32 4294901760, %v36093_v35 }
 0x770   :  { %35924 = vmatprep.mubr.f32.mxu1 %v61489_v23 }
 0x771   :  { %v36163_v36 = vsub.f32 %v36093_v35, %v59428_v47 }
 0x774   :  { %35463 = vmatmul.mubr.f32.vlgmr.msra.gmra.mrb[10].mxu0 %v35225_v9 }
 0x775   :  { %35476 = vmatpush1.msra.mxu0 %v61820_v20  ;;  %35928 = vmatmul.mubr.f32.vlgmr.msra.gmra.mrb[10].mxu1 %v35225_v9  ;;  %v36164_v9 = vand.u32 4294901760, %v36163_v36  ;;  %v61824_v20 = vld [vmem:[#allocation66_spill] sm:$0xff] }
 0x776   :  { %35941 = vmatpush1.msra.mxu1 %v61821_v13  ;;  %35548 = vmatprep.subr.mxu0 %v57284_v22  ;;  %v61822_v13 = vld [vmem:[#allocation78_spill] sm:$0xff] }
 0x777   :  { %36013 = vmatprep.subr.mxu1 %v61686_v57  ;;  %35539 = vmatprep.mubr.f32.mxu0 %v61489_v23  ;;  %v36165_v53 = vsub.f32 %v36163_v36, %v36164_v9 }
 0x778   :  { %36004 = vmatprep.mubr.f32.mxu1 %v61489_v23 }
 0x779   :  { %v36166_v35 = vand.u32 4294901760, %v36165_v53  ;;  %v61826_v53 = vld [vmem:[#allocation72_spill] sm:$0xff] }
 0x77c   :  { %35541 = vmatmul.mubr.f32.vlgmr.msra.gmra.mrb[10].mxu0 %v59379_v45 }
 0x77d   :  { %35550 = vmatpush1.msra.mxu0 %v61687_v8  ;;  %36006 = vmatmul.mubr.f32.vlgmr.msra.gmra.mrb[10].mxu1 %v59379_v45 }
 0x77e   :  { %36015 = vmatpush1.msra.mxu1 %v61688_v42  ;;  %35613 = vmatprep.mubr.f32.mxu0 %v61489_v23 }
 0x77f   :  { %36078 = vmatprep.mubr.f32.mxu1 %v61489_v23  ;;  %36096 = vmatprep.subr.mxu0 %v57388_v16 }
 0x780   :  { %36561 = vmatprep.subr.mxu1 %v61638_v58 }
 0x784   :  { %35615 = vmatmul.mubr.f32.vlgmr.msra.gmra.mrb[10].mxu0 %v59379_v45 }
 0x785   :  { %36080 = vmatmul.mubr.f32.vlgmr.msra.gmra.mrb[10].mxu1 %v59379_v45  ;;  %36098 = vmatpush1.msra.mxu0 %v61639_v48  ;;  %v61823_v45 = vld [vmem:[#allocation79_spill] sm:$0xff] }
 0x786   :  { %36161 = vmatprep.mubr.f32.mxu0 %v61489_v23  ;;  %36563 = vmatpush1.msra.mxu1 %v61640_v25 }
 0x787   :  { %36626 = vmatprep.mubr.f32.mxu1 %v61489_v23  ;;  %36178 = vmatprep.subr.mxu0 %v61641_v31 }
 0x788   :  { %36643 = vmatprep.subr.mxu1 %v61701_v32 }
 0x78c   :  { %36167 = vmatmul.mubr.f32.vlgmr.msra.gmra.mrb[10].mxu0 %v36166_v35 }
 0x78d   :  { %36632 = vmatmul.mubr.f32.vlgmr.msra.gmra.mrb[10].mxu1 %v36166_v35  ;;  %36184 = vmatpush1.msra.mxu0 %v61822_v13  ;;  %v61827_v35 = vld [vmem:[#allocation73_spill] sm:$0xff] }
 0x78e   :  { %36247 = vmatprep.mubr.f32.mxu0 %v61489_v23  ;;  %36649 = vmatpush1.msra.mxu1 %v61823_v45  ;;  %v61831_v45 = vld [vmem:[#allocation75_spill] sm:$0xff] }
 0x78f   :  { %36712 = vmatprep.mubr.f32.mxu1 %v61489_v23  ;;  %36257 = vmatprep.subr.mxu0 %v61824_v20  ;;  %v61830_v20 = vld [vmem:[#allocation74_spill] sm:$0xff] }
 0x790   :  { %36722 = vmatprep.subr.mxu1 %v61825_v62  ;;  %v61829_v62 = vld [vmem:[#allocation71_spill] sm:$0xff] }
 0x794   :  { %36249 = vmatmul.mubr.f32.vlgmr.msra.gmra.mrb[10].mxu0 %v59428_v47 }
 0x795   :  { %36714 = vmatmul.mubr.f32.vlgmr.msra.gmra.mrb[10].mxu1 %v59428_v47  ;;  %36260 = vmatpush1.msra.mxu0 %v61826_v53  ;;  %v61828_v53 = vld [vmem:[#allocation70_spill] sm:$0xff] }
 0x796   :  { %36323 = vmatprep.mubr.f32.mxu0 %v61489_v23  ;;  %36725 = vmatpush1.msra.mxu1 %v61827_v35  ;;  %v55473_v35 = vld [vmem:[%s61165_s1 + $0x138] sm:$0xff] }
 0x797   :  { %36788 = vmatprep.mubr.f32.mxu1 %v61489_v23  ;;  %36333 = vmatprep.subr.mxu0 %v57388_v16 }
 0x798   :  { %36798 = vmatprep.subr.mxu1 %v61638_v58 }
 0x79c   :  { %36326 = vmatmul.mubr.f32.vlgmr.msra.gmra.mrb[10].mxu0 %v36163_v36 }
 0x79d   :  { %36791 = vmatmul.mubr.f32.vlgmr.msra.gmra.mrb[10].mxu1 %v36163_v36  ;;  %36335 = vmatpush1.msra.mxu0 %v61639_v48  ;;  %v37032_v36 = vsel %vm280_vm0, %v55473_v35, 0 }
 0x79e   :  { %36398 = vmatprep.mubr.f32.mxu0 %v61489_v23  ;;  %36800 = vmatpush1.msra.mxu1 %v61640_v25 }
 0x79f   :  { %36863 = vmatprep.mubr.f32.mxu1 %v61489_v23  ;;  %36411 = vmatprep.subr.mxu0 %v61828_v53  ;;  %v61834_v53 = vld [vmem:[#allocation86_spill] sm:$0xff] }
 0x7a0   :  { %36876 = vmatprep.subr.mxu1 %v61829_v62  ;;  %v59477_v62 = vand.u32 4294901760, %v37032_v36 }
 0x7a4   :  { %36402 = vmatmul.mubr.f32.vlgmr.msra.gmra.mrb[10].mxu0 %v36164_v9 }
 0x7a5   :  { %36867 = vmatmul.mubr.f32.vlgmr.msra.gmra.mrb[10].mxu1 %v36164_v9  ;;  %36415 = vmatpush1.msra.mxu0 %v61830_v20  ;;  %v37102_v9 = vsub.f32 %v37032_v36, %v59477_v62  ;;  %v61832_v36 = vld [vmem:[#allocation96_spill] sm:$0xff] }
 0x7a6   :  { %36880 = vmatpush1.msra.mxu1 %v61831_v45  ;;  %36478 = vmatprep.mubr.f32.mxu0 %v61489_v23 }
 0x7a7   :  { %36487 = vmatprep.subr.mxu0 %v57388_v16  ;;  %36943 = vmatprep.mubr.f32.mxu1 %v61489_v23  ;;  %v37103_v35 = vand.u32 4294901760, %v37102_v9 }
 0x7a8   :  { %36952 = vmatprep.subr.mxu1 %v61638_v58 }
 0x7a9   :  { %v37104_v45 = vsub.f32 %v37102_v9, %v37103_v35 }
 0x7ab   :  { %v37105_v20 = vand.u32 4294901760, %v37104_v45 }
 0x7ac   :  { %36480 = vmatmul.mubr.f32.vlgmr.msra.gmra.mrb[10].mxu0 %v59428_v47 }
 0x7ad   :  { %36489 = vmatpush1.msra.mxu0 %v61639_v48  ;;  %36945 = vmatmul.mubr.f32.vlgmr.msra.gmra.mrb[10].mxu1 %v59428_v47 }
 0x7ae   :  { %36954 = vmatpush1.msra.mxu1 %v61640_v25  ;;  %37035 = vmatprep.subr.mxu0 %v57519_v2 }
 0x7af   :  { %37500 = vmatprep.subr.mxu1 %v61590_v49  ;;  %36552 = vmatprep.mubr.f32.mxu0 %v61489_v23 }
 0x7b0   :  { %37017 = vmatprep.mubr.f32.mxu1 %v61489_v23 }
 0x7b4   :  { %36554 = vmatmul.mubr.f32.vlgmr.msra.gmra.mrb[10].mxu0 %v59428_v47 }
 0x7b5   :  { %37019 = vmatmul.mubr.f32.vlgmr.msra.gmra.mrb[10].mxu1 %v59428_v47  ;;  %37037 = vmatpush1.msra.mxu0 %v61591_v33  ;;  %v61833_v47 = vld [vmem:[#allocation85_spill] sm:$0xff] }
 0x7b6   :  { %37502 = vmatpush1.msra.mxu1 %v61592_v27  ;;  %37117 = vmatprep.subr.mxu0 %v61593_v21 }
 0x7b7   :  { %37582 = vmatprep.subr.mxu1 %v61832_v36  ;;  %37100 = vmatprep.mubr.f32.mxu0 %v61489_v23  ;;  %v61835_v36 = vld [vmem:[#allocation91_spill] sm:$0xff] }
 0x7b8   :  { %37565 = vmatprep.mubr.f32.mxu1 %v61489_v23 }
 0x7bc   :  { %37106 = vmatmul.mubr.f32.vlgmr.msra.gmra.mrb[10].mxu0 %v37105_v20 }
 0x7bd   :  { %37123 = vmatpush1.msra.mxu0 %v61654_v11  ;;  %37571 = vmatmul.mubr.f32.vlgmr.msra.gmra.mrb[10].mxu1 %v37105_v20 }
 0x7be   :  { %37588 = vmatpush1.msra.mxu1 %v61771_v43  ;;  %37196 = vmatprep.subr.mxu0 %v61833_v47 }
 0x7bf   :  { %37661 = vmatprep.subr.mxu1 %v61834_v53  ;;  %37186 = vmatprep.mubr.f32.mxu0 %v61489_v23 }
 0x7c0   :  { %37651 = vmatprep.mubr.f32.mxu1 %v61489_v23 }
 0x7c4   :  { %37188 = vmatmul.mubr.f32.vlgmr.msra.gmra.mrb[10].mxu0 %v59477_v62 }
 0x7c5   :  { %37199 = vmatpush1.msra.mxu0 %v61835_v36  ;;  %37653 = vmatmul.mubr.f32.vlgmr.msra.gmra.mrb[10].mxu1 %v59477_v62 }
 0x7c6   :  { %37664 = vmatpush1.msra.mxu1 %v61775_v54  ;;  %37272 = vmatprep.subr.mxu0 %v57519_v2 }
 0x7c7   :  { %37737 = vmatprep.subr.mxu1 %v61590_v49  ;;  %37262 = vmatprep.mubr.f32.mxu0 %v61489_v23 }
 0x7c8   :  { %37727 = vmatprep.mubr.f32.mxu1 %v61489_v23 }
 0x7cb   :  { %v32763_v20 = vpop.f32.mrb[8].mxu0 }
 0x7cc   :  { %v33228_v45 = vpop.f32.mrb[8].mxu1  ;;  %37265 = vmatmul.mubr.f32.vlgmr.msra.gmra.mrb[10].mxu0 %v37102_v9  ;;  %33237 = vrot.lane.b32.xlu0 %v32763_v20, %s56875_s23  ;;  %v32765_v53 = vpop.f32.mrb[9].mxu0  ;;  %v55474_v20 = vld [vmem:[%s61165_s1 + $0x140] sm:$0xff] }
 0x7cd   :  { %v33230_v36 = vpop.f32.mrb[9].mxu1  ;;  %37274 = vmatpush1.msra.mxu0 %v61591_v33  ;;  %37730 = vmatmul.mubr.f32.vlgmr.msra.gmra.mrb[10].mxu1 %v37102_v9  ;;  %v37971_v9 = vsel %vm280_vm0, %v55474_v20, 0 }
 0x7ce   :  { %37739 = vmatpush1.msra.mxu1 %v61592_v27  ;;  %37350 = vmatprep.subr.mxu0 %v61718_v46 }
 0x7cf   :  { %37815 = vmatprep.subr.mxu1 %v61719_v59  ;;  %33239 = vrot.lane.b32.xlu1 %v32765_v53, %s56875_s23  ;;  %v59530_v53 = vand.u32 4294901760, %v37971_v9 }
 0x7d0   :  { %33241 = vrot.lane.b32.xlu0 %v33228_v45, %s56875_s23  ;;  %37337 = vmatprep.mubr.f32.mxu0 %v61489_v23 }
 0x7d1   :  { %37802 = vmatprep.mubr.f32.mxu1 %v61489_v23 }
 0x7d3   :  { %33243 = vrot.lane.b32.xlu1 %v33230_v36, %s56875_s23  ;;  %v38041_v36 = vsub.f32 %v37971_v9, %v59530_v53  ;;  %v61837_v9 = vld [vmem:[#allocation108_spill] sm:$0xff] }
 0x7d4   :  { %37341 = vmatmul.mubr.f32.vlgmr.msra.gmra.mrb[10].mxu0 %v37103_v35 }
 0x7d5   :  { %37354 = vmatpush1.msra.mxu0 %v61662_v29  ;;  %37806 = vmatmul.mubr.f32.vlgmr.msra.gmra.mrb[10].mxu1 %v37103_v35  ;;  %v38042_v35 = vand.u32 4294901760, %v38041_v36 }
 0x7d6   :  { %37819 = vmatpush1.msra.mxu1 %v61780_v40  ;;  %37426 = vmatprep.subr.mxu0 %v57519_v2 }
 0x7d7   :  { %37891 = vmatprep.subr.mxu1 %v61590_v49  ;;  %37417 = vmatprep.mubr.f32.mxu0 %v61489_v23  ;;  %v38043_v45 = vsub.f32 %v38041_v36, %v38042_v35 }
 0x7d8   :  { %37882 = vmatprep.mubr.f32.mxu1 %v61489_v23 }
 0x7d9   :  { %v38044_v20 = vand.u32 4294901760, %v38043_v45  ;;  %v61838_v45 = vld [vmem:[#allocation105_spill] sm:$0xff] }
 0x7dc   :  { %37419 = vmatmul.mubr.f32.vlgmr.msra.gmra.mrb[10].mxu0 %v59477_v62 }
 0x7dd   :  { %37428 = vmatpush1.msra.mxu0 %v61591_v33  ;;  %37884 = vmatmul.mubr.f32.vlgmr.msra.gmra.mrb[10].mxu1 %v59477_v62 }
 0x7de   :  { %37893 = vmatpush1.msra.mxu1 %v61592_v27  ;;  %37974 = vmatprep.subr.mxu0 %v57649_v51 }
 0x7df   :  { %38439 = vmatprep.subr.mxu1 %v57654_v61  ;;  %37491 = vmatprep.mubr.f32.mxu0 %v61489_v23 }
 0x7e0   :  { %37956 = vmatprep.mubr.f32.mxu1 %v61489_v23 }
 0x7e4   :  { %37493 = vmatmul.mubr.f32.vlgmr.msra.gmra.mrb[10].mxu0 %v59477_v62 }
 0x7e5   :  { %37958 = vmatmul.mubr.f32.vlgmr.msra.gmra.mrb[10].mxu1 %v59477_v62  ;;  %37976 = vmatpush1.msra.mxu0 %v57674_v28  ;;  %v61836_v62 = vld [vmem:[#allocation107_spill] sm:$0xff] }
 0x7e6   :  { %38441 = vmatpush1.msra.mxu1 %v57676_v1  ;;  %38056 = vmatprep.subr.mxu0 %v57711_v56 }
 0x7e7   :  { %38521 = vmatprep.subr.mxu1 %v61721_v10  ;;  %38039 = vmatprep.mubr.f32.mxu0 %v61489_v23 }
 0x7e8   :  { %38504 = vmatprep.mubr.f32.mxu1 %v61489_v23 }
 0x7ec   :  { %38045 = vmatmul.mubr.f32.vlgmr.msra.gmra.mrb[10].mxu0 %v38044_v20 }
 0x7ed   :  { %38062 = vmatpush1.msra.mxu0 %v61606_v4  ;;  %38510 = vmatmul.mubr.f32.vlgmr.msra.gmra.mrb[10].mxu1 %v38044_v20  ;;  %v61839_v20 = vld [vmem:[#allocation106_spill] sm:$0xff] }
 0x7ee   :  { %38527 = vmatpush1.msra.mxu1 %v61607_v3  ;;  %38135 = vmatprep.subr.mxu0 %v61665_v30 }
 0x7ef   :  { %38600 = vmatprep.subr.mxu1 %v61666_v60  ;;  %38125 = vmatprep.mubr.f32.mxu0 %v61489_v23 }
 0x7f0   :  { %38590 = vmatprep.mubr.f32.mxu1 %v61489_v23 }
 0x7f4   :  { %38127 = vmatmul.mubr.f32.vlgmr.msra.gmra.mrb[10].mxu0 %v59530_v53 }
 0x7f5   :  { %38138 = vmatpush1.msra.mxu0 %v61836_v62  ;;  %38592 = vmatmul.mubr.f32.vlgmr.msra.gmra.mrb[10].mxu1 %v59530_v53 }
 0x7f6   :  { %38603 = vmatpush1.msra.mxu1 %v61837_v9  ;;  %38211 = vmatprep.subr.mxu0 %v57649_v51  ;;  %v55475_v9 = vld [vmem:[%s61165_s1 + $0x148] sm:$0xff] }
 0x7f7   :  { %38676 = vmatprep.subr.mxu1 %v57654_v61  ;;  %38201 = vmatprep.mubr.f32.mxu0 %v61489_v23 }
 0x7f8   :  { %38666 = vmatprep.mubr.f32.mxu1 %v61489_v23 }
 0x7fc   :  { %38204 = vmatmul.mubr.f32.vlgmr.msra.gmra.mrb[10].mxu0 %v38041_v36 }
 0x7fd   :  { %38213 = vmatpush1.msra.mxu0 %v57674_v28  ;;  %38669 = vmatmul.mubr.f32.vlgmr.msra.gmra.mrb[10].mxu1 %v38041_v36  ;;  %v38910_v36 = vsel %vm280_vm0, %v55475_v9, 0 }
 0x7fe   :  { %38678 = vmatpush1.msra.mxu1 %v57676_v1  ;;  %38289 = vmatprep.subr.mxu0 %v61838_v45 }
 0x7ff   :  { %38754 = vmatprep.subr.mxu1 %v61839_v20  ;;  %38276 = vmatprep.mubr.f32.mxu0 %v61489_v23  ;;  %v59579_v20 = vand.u32 4294901760, %v38910_v36 }
 0x800   :  { %38741 = vmatprep.mubr.f32.mxu1 %v61489_v23 }
 0x801   :  { %v38980_v45 = vsub.f32 %v38910_v36, %v59579_v20 }
 0x804   :  { %38280 = vmatmul.mubr.f32.vlgmr.msra.gmra.mrb[10].mxu0 %v38042_v35 }
 0x805   :  { %38293 = vmatpush1.msra.mxu0 %v61614_v17  ;;  %38745 = vmatmul.mubr.f32.vlgmr.msra.gmra.mrb[10].mxu1 %v38042_v35  ;;  %v38981_v35 = vand.u32 4294901760, %v38980_v45 }
 0x806   :  { %38758 = vmatpush1.msra.mxu1 %v61615_v5  ;;  %38365 = vmatprep.subr.mxu0 %v57649_v51  ;;  %v61841_v5 = vld [vmem:[#allocation119_spill] sm:$0xff] }
 0x807   :  { %38830 = vmatprep.subr.mxu1 %v57654_v61  ;;  %38356 = vmatprep.mubr.f32.mxu0 %v61489_v23  ;;  %v38982_v9 = vsub.f32 %v38980_v45, %v38981_v35 }
 0x808   :  { %38821 = vmatprep.mubr.f32.mxu1 %v61489_v23 }
 0x809   :  { %v38983_v36 = vand.u32 4294901760, %v38982_v9  ;;  %v61843_v9 = vld [vmem:[#allocation123_spill] sm:$0xff] }
 0x80c   :  { %38358 = vmatmul.mubr.f32.vlgmr.msra.gmra.mrb[10].mxu0 %v59530_v53 }
 0x80d   :  { %38367 = vmatpush1.msra.mxu0 %v57674_v28  ;;  %38823 = vmatmul.mubr.f32.vlgmr.msra.gmra.mrb[10].mxu1 %v59530_v53 }
 0x80e   :  { %38832 = vmatpush1.msra.mxu1 %v57676_v1  ;;  %38913 = vmatprep.subr.mxu0 %v57779_v18 }
 0x80f   :  { %39378 = vmatprep.subr.mxu1 %v57784_v63  ;;  %38430 = vmatprep.mubr.f32.mxu0 %v61489_v23 }
 0x810   :  { %38895 = vmatprep.mubr.f32.mxu1 %v61489_v23 }
 0x814   :  { %38432 = vmatmul.mubr.f32.vlgmr.msra.gmra.mrb[10].mxu0 %v59530_v53 }
 0x815   :  { %38897 = vmatmul.mubr.f32.vlgmr.msra.gmra.mrb[10].mxu1 %v59530_v53  ;;  %38915 = vmatpush1.msra.mxu0 %v57804_v50  ;;  %v61840_v53 = vld [vmem:[#allocation118_spill] sm:$0xff] }
 0x816   :  { %39380 = vmatpush1.msra.mxu1 %v57806_v6  ;;  %38995 = vmatprep.subr.mxu0 %v57839_v12 }
 0x817   :  { %39460 = vmatprep.subr.mxu1 %v57842_v15  ;;  %38978 = vmatprep.mubr.f32.mxu0 %v61489_v23  ;;  %v61842_v15 = vld [vmem:[#allocation122_spill] sm:$0xff] }
 0x818   :  { %39443 = vmatprep.mubr.f32.mxu1 %v61489_v23 }
 0x81c   :  { %38984 = vmatmul.mubr.f32.vlgmr.msra.gmra.mrb[10].mxu0 %v38983_v36 }
 0x81d   :  { %39001 = vmatpush1.msra.mxu0 %v57855_v26  ;;  %39449 = vmatmul.mubr.f32.vlgmr.msra.gmra.mrb[10].mxu1 %v38983_v36  ;;  %v61844_v36 = vld [vmem:[#allocation120_spill] sm:$0xff]  ;;  %v61851_v26 = vld [vmem:[#allocation26_spill] sm:$0xff] }
 0x81e   :  { %39466 = vmatpush1.msra.mxu1 %v57857_v0  ;;  %39074 = vmatprep.subr.mxu0 %v61840_v53  ;;  %v61847_v0 = vld [vmem:[#allocation125_spill] sm:$0xff] }
 0x81f   :  { %39539 = vmatprep.subr.mxu1 %v61841_v5  ;;  %39064 = vmatprep.mubr.f32.mxu0 %v61489_v23 }
 0x820   :  { %39529 = vmatprep.mubr.f32.mxu1 %v61489_v23 }
 0x824   :  { %39066 = vmatmul.mubr.f32.vlgmr.msra.gmra.mrb[10].mxu0 %v59579_v20 }
 0x825   :  { %39077 = vmatpush1.msra.mxu0 %v61842_v15  ;;  %39531 = vmatmul.mubr.f32.vlgmr.msra.gmra.mrb[10].mxu1 %v59579_v20  ;;  %v61845_v15 = vld [vmem:[#allocation121_spill] sm:$0xff] }
 0x826   :  { %39542 = vmatpush1.msra.mxu1 %v61843_v9  ;;  %39150 = vmatprep.subr.mxu0 %v57779_v18  ;;  %v55478_v9 = vld [vmem:[%s61165_s1 + $0x158] sm:$0xff] }
 0x827   :  { %39615 = vmatprep.subr.mxu1 %v57784_v63  ;;  %39140 = vmatprep.mubr.f32.mxu0 %v61489_v23  ;;  %v39895_v5 = vsel %vm280_vm0, %v55478_v9, 0 }
 0x828   :  { %39605 = vmatprep.mubr.f32.mxu1 %v61489_v23  ;;  %v59622_v53 = vand.u32 4294901760, %v39895_v5 }
 0x82c   :  { %39143 = vmatmul.mubr.f32.vlgmr.msra.gmra.mrb[10].mxu0 %v38980_v45 }
 0x82d   :  { %39152 = vmatpush1.msra.mxu0 %v57804_v50  ;;  %39608 = vmatmul.mubr.f32.vlgmr.msra.gmra.mrb[10].mxu1 %v38980_v45  ;;  %v61846_v45 = vld [vmem:[#allocation124_spill] sm:$0xff] }
 0x82e   :  { %39617 = vmatpush1.msra.mxu1 %v57806_v6  ;;  %39228 = vmatprep.subr.mxu0 %v61844_v36  ;;  %v61850_v36 = vld [vmem:[#allocation25_spill] sm:$0xff] }
 0x82f   :  { %39693 = vmatprep.subr.mxu1 %v61845_v15  ;;  %39215 = vmatprep.mubr.f32.mxu0 %v61489_v23  ;;  %v39965_v15 = vsub.f32 %v39895_v5, %v59622_v53 }
 0x830   :  { %39680 = vmatprep.mubr.f32.mxu1 %v61489_v23 }
 0x831   :  { %v39966_v9 = vand.u32 4294901760, %v39965_v15 }
 0x834   :  { %39219 = vmatmul.mubr.f32.vlgmr.msra.gmra.mrb[10].mxu0 %v38981_v35 }
 0x835   :  { %39232 = vmatpush1.msra.mxu0 %v61846_v45  ;;  %39684 = vmatmul.mubr.f32.vlgmr.msra.gmra.mrb[10].mxu1 %v38981_v35  ;;  %v39967_v35 = vsub.f32 %v39965_v15, %v39966_v9  ;;  %v61849_v45 = vld [vmem:[#allocation24_spill] sm:$0xff] }
 0x836   :  { %39697 = vmatpush1.msra.mxu1 %v61847_v0  ;;  %39304 = vmatprep.subr.mxu0 %v57779_v18  ;;  %v61848_v0 = vld [vmem:[#allocation23_spill] sm:$0xff] }
 0x837   :  { %39769 = vmatprep.subr.mxu1 %v57784_v63  ;;  %39295 = vmatprep.mubr.f32.mxu0 %v61489_v23  ;;  %v39968_v5 = vand.u32 4294901760, %v39967_v35  ;;  %v61852_v35 = vld [vmem:[#allocation17_spill] sm:$0xff] }
 0x838   :  { %39760 = vmatprep.mubr.f32.mxu1 %v61489_v23 }
 0x83c   :  { %39297 = vmatmul.mubr.f32.vlgmr.msra.gmra.mrb[10].mxu0 %v59579_v20 }
 0x83d   :  { %39306 = vmatpush1.msra.mxu0 %v57804_v50  ;;  %39762 = vmatmul.mubr.f32.vlgmr.msra.gmra.mrb[10].mxu1 %v59579_v20 }
 0x83e   :  { %39771 = vmatpush1.msra.mxu1 %v57806_v6  ;;  %39898 = vmatprep.subr.mxu0 %v61785_v39 }
 0x83f   :  { %40363 = vmatprep.subr.mxu1 %v61786_v7  ;;  %39369 = vmatprep.mubr.f32.mxu0 %v61489_v23 }
 0x840   :  { %39834 = vmatprep.mubr.f32.mxu1 %v61489_v23 }
 0x844   :  { %39371 = vmatmul.mubr.f32.vlgmr.msra.gmra.mrb[10].mxu0 %v59579_v20 }
 0x845   :  { %39836 = vmatmul.mubr.f32.vlgmr.msra.gmra.mrb[10].mxu1 %v59579_v20  ;;  %39900 = vmatpush1.msra.mxu0 %v61787_v14  ;;  %v61853_v20 = vld [vmem:[#allocation16_spill] sm:$0xff] }
 0x846   :  { %40365 = vmatpush1.msra.mxu1 %v61788_v24  ;;  %39980 = vmatprep.subr.mxu0 %v61848_v0  ;;  %v61854_v0 = vld [vmem:[#allocation15_spill] sm:$0xff] }
 0x847   :  { %40445 = vmatprep.subr.mxu1 %v61849_v45  ;;  %39963 = vmatprep.mubr.f32.mxu0 %v61489_v23  ;;  %v61855_v45 = vld [vmem:[#allocation18_spill] sm:$0xff] }
 0x848   :  { %40428 = vmatprep.mubr.f32.mxu1 %v61489_v23  ;;  %39969 = vmatmul.mubr.f32.vlgmr.msra.gmra.mrb[12].mxu0 %v39968_v5 }
 0x849   :  { %39986 = vmatpush1.msra.mxu0 %v61850_v36  ;;  %40434 = vmatmul.mubr.f32.vlgmr.msra.gmra.mrb[12].mxu1 %v39968_v5  ;;  %v61857_v36 = vld [vmem:[#allocation20_spill] sm:$0xff] }
 0x84a   :  { %40451 = vmatpush1.msra.mxu1 %v61851_v26  ;;  %40059 = vmatprep.subr.mxu0 %v61852_v35  ;;  %v61856_v26 = vld [vmem:[#allocation21_spill] sm:$0xff]  ;;  %v55477_v5 = vld [vmem:[%s61165_s1 + $0x150] sm:$0xff]  ;;  %v61858_v35 = vld [vmem:[#allocation19_spill] sm:$0xff] }
 0x84b   :  { %40524 = vmatprep.subr.mxu1 %v61853_v20  ;;  %40049 = vmatprep.mubr.f32.mxu0 %v61489_v23  ;;  %v61859_v20 = vld [vmem:[#allocation22_spill] sm:$0xff] }
 0x84c   :  { %40514 = vmatprep.mubr.f32.mxu1 %v61489_v23 }
 0x850   :  { %40051 = vmatmul.mubr.f32.vlgmr.msra.gmra.mrb[12].mxu0 %v59622_v53 }
 0x851   :  { %40062 = vmatpush1.msra.mxu0 %v61854_v0  ;;  %40516 = vmatmul.mubr.f32.vlgmr.msra.gmra.mrb[12].mxu1 %v59622_v53 }
 0x852   :  { %40527 = vmatpush1.msra.mxu1 %v61855_v45  ;;  %40135 = vmatprep.subr.mxu0 %v61785_v39 }
 0x853   :  { %40600 = vmatprep.subr.mxu1 %v61786_v7  ;;  %40125 = vmatprep.mubr.f32.mxu0 %v61489_v23 }
 0x854   :  { %40590 = vmatprep.mubr.f32.mxu1 %v61489_v23 }
 0x858   :  { %40128 = vmatmul.mubr.f32.vlgmr.msra.gmra.mrb[12].mxu0 %v39965_v15 }
 0x859   :  { %40137 = vmatpush1.msra.mxu0 %v61787_v14  ;;  %40593 = vmatmul.mubr.f32.vlgmr.msra.gmra.mrb[12].mxu1 %v39965_v15  ;;  %v40828_v15 = vsel %vm280_vm0, %v55477_v5, 0  ;;  %v61867_v5 = vld [vmem:[#allocation37_spill] sm:$0xff] }
 0x85a   :  { %40602 = vmatpush1.msra.mxu1 %v61788_v24  ;;  %40213 = vmatprep.subr.mxu0 %v61856_v26  ;;  %v59677_v0 = vand.u32 4294901760, %v40828_v15  ;;  %v61863_v26 = vld [vmem:[#allocation33_spill] sm:$0xff] }
 0x85b   :  { %40678 = vmatprep.subr.mxu1 %v61857_v36  ;;  %40200 = vmatprep.mubr.f32.mxu0 %v61489_v23  ;;  %v61865_v36 = vld [vmem:[#allocation39_spill] sm:$0xff] }
 0x85c   :  { %40665 = vmatprep.mubr.f32.mxu1 %v61489_v23  ;;  %v40898_v45 = vsub.f32 %v40828_v15, %v59677_v0  ;;  %v61868_v15 = vld [vmem:[#allocation40_spill] sm:$0xff] }
 0x860   :  { %40204 = vmatmul.mubr.f32.vlgmr.msra.gmra.mrb[12].mxu0 %v39966_v9 }
 0x861   :  { %40217 = vmatpush1.msra.mxu0 %v61858_v35  ;;  %40669 = vmatmul.mubr.f32.vlgmr.msra.gmra.mrb[12].mxu1 %v39966_v9  ;;  %v61861_v9 = vld [vmem:[#allocation45_spill] sm:$0xff]  ;;  %v55479_v35 = vld [vmem:[%s61165_s1 + $0x160] sm:$0xff] }
 0x862   :  { %40682 = vmatpush1.msra.mxu1 %v61859_v20  ;;  %40289 = vmatprep.subr.mxu0 %v61785_v39  ;;  %v41763_v20 = vsel %vm280_vm0, %v55479_v35, 0 }
 0x863   :  { %40754 = vmatprep.subr.mxu1 %v61786_v7  ;;  %40280 = vmatprep.mubr.f32.mxu0 %v61489_v23  ;;  %v40899_v7 = vand.u32 4294901760, %v40898_v45 }
 0x864   :  { %40745 = vmatprep.mubr.f32.mxu1 %v61489_v23 }
 0x865   :  { %v40900_v39 = vsub.f32 %v40898_v45, %v40899_v7 }
 0x868   :  { %40282 = vmatmul.mubr.f32.vlgmr.msra.gmra.mrb[12].mxu0 %v59622_v53 }
 0x869   :  { %40291 = vmatpush1.msra.mxu0 %v61787_v14  ;;  %40747 = vmatmul.mubr.f32.vlgmr.msra.gmra.mrb[12].mxu1 %v59622_v53  ;;  %v40901_v14 = vand.u32 4294901760, %v40900_v39  ;;  %v59726_v39 = vand.u32 4294901760, %v41763_v20 }
 0x86a   :  { %40756 = vmatpush1.msra.mxu1 %v61788_v24  ;;  %40831 = vmatprep.subr.mxu0 %v57146_v19  ;;  %v61860_v24 = vld [vmem:[#allocation43_spill] sm:$0xff] }
 0x86b   :  { %41296 = vmatprep.subr.mxu1 %v61734_v52  ;;  %40354 = vmatprep.mubr.f32.mxu0 %v61489_v23 }
 0x86c   :  { %40819 = vmatprep.mubr.f32.mxu1 %v61489_v23 }
 0x870   :  { %40356 = vmatmul.mubr.f32.vlgmr.msra.gmra.mrb[12].mxu0 %v59622_v53 }
 0x871   :  { %40821 = vmatmul.mubr.f32.vlgmr.msra.gmra.mrb[12].mxu1 %v59622_v53  ;;  %40833 = vmatpush1.msra.mxu0 %v61735_v34  ;;  %v61862_v53 = vld [vmem:[#allocation32_spill] sm:$0xff] }
 0x872   :  { %41298 = vmatpush1.msra.mxu1 %v61736_v44  ;;  %40913 = vmatprep.subr.mxu0 %v61737_v55  ;;  %v61864_v55 = vld [vmem:[#allocation38_spill] sm:$0xff] }
 0x873   :  { %41378 = vmatprep.subr.mxu1 %v61860_v24  ;;  %40896 = vmatprep.mubr.f32.mxu0 %v61489_v23  ;;  %v41833_v24 = vsub.f32 %v41763_v20, %v59726_v39  ;;  %v61882_v20 = vld [vmem:[#allocation67_spill] sm:$0xff] }
 0x874   :  { %41361 = vmatprep.mubr.f32.mxu1 %v61489_v23 }
 0x878   :  { %40902 = vmatmul.mubr.f32.vlgmr.msra.gmra.mrb[12].mxu0 %v40901_v14 }
 0x879   :  { %40919 = vmatpush1.msra.mxu0 %v61802_v37  ;;  %41367 = vmatmul.mubr.f32.vlgmr.msra.gmra.mrb[12].mxu1 %v40901_v14  ;;  %v61866_v37 = vld [vmem:[#allocation36_spill] sm:$0xff] }
 0x87a   :  { %41384 = vmatpush1.msra.mxu1 %v61861_v9  ;;  %40992 = vmatprep.subr.mxu0 %v61862_v53  ;;  %v61873_v14 = vld [vmem:[#allocation52_spill] sm:$0xff]  ;;  %v61875_v9 = vld [vmem:[#allocation58_spill] sm:$0xff] }
 0x87b   :  { %41457 = vmatprep.subr.mxu1 %v61863_v26  ;;  %40982 = vmatprep.mubr.f32.mxu0 %v61489_v23  ;;  %v61877_v53 = vld [vmem:[#allocation56_spill] sm:$0xff]  ;;  %v55480_v26 = vld [vmem:[%s61165_s1 + $0x168] sm:$0xff] }
 0x87c   :  { %41447 = vmatprep.mubr.f32.mxu1 %v61489_v23 }
 0x880   :  { %40984 = vmatmul.mubr.f32.vlgmr.msra.gmra.mrb[12].mxu0 %v59677_v0 }
 0x881   :  { %40995 = vmatpush1.msra.mxu0 %v61864_v55  ;;  %41449 = vmatmul.mubr.f32.vlgmr.msra.gmra.mrb[12].mxu1 %v59677_v0  ;;  %v61878_v55 = vld [vmem:[#allocation59_spill] sm:$0xff] }
 0x882   :  { %41460 = vmatpush1.msra.mxu1 %v61865_v36  ;;  %41068 = vmatprep.subr.mxu0 %v57146_v19  ;;  %v42702_v36 = vsel %vm280_vm0, %v55480_v26, 0  ;;  %v61905_v26 = vld [vmem:[#allocation124_spill] sm:$0xff] }
 0x883   :  { %41533 = vmatprep.subr.mxu1 %v61734_v52  ;;  %41058 = vmatprep.mubr.f32.mxu0 %v61489_v23 }
 0x884   :  { %41523 = vmatprep.mubr.f32.mxu1 %v61489_v23 }
 0x888   :  { %41061 = vmatmul.mubr.f32.vlgmr.msra.gmra.mrb[12].mxu0 %v40898_v45 }
 0x889   :  { %41070 = vmatpush1.msra.mxu0 %v61735_v34  ;;  %41526 = vmatmul.mubr.f32.vlgmr.msra.gmra.mrb[12].mxu1 %v40898_v45  ;;  %v61869_v45 = vld [vmem:[#allocation41_spill] sm:$0xff] }
 0x88a   :  { %41535 = vmatpush1.msra.mxu1 %v61736_v44  ;;  %41146 = vmatprep.subr.mxu0 %v61866_v37  ;;  %v61879_v37 = vld [vmem:[#allocation60_spill] sm:$0xff] }
 0x88b   :  { %41611 = vmatprep.subr.mxu1 %v61867_v5  ;;  %41133 = vmatprep.mubr.f32.mxu0 %v61489_v23  ;;  %v59775_v5 = vand.u32 4294901760, %v42702_v36 }
 0x88c   :  { %41598 = vmatprep.mubr.f32.mxu1 %v61489_v23 }
 0x88d   :  { %v42772_v35 = vsub.f32 %v42702_v36, %v59775_v5 }
 0x890   :  { %41137 = vmatmul.mubr.f32.vlgmr.msra.gmra.mrb[12].mxu0 %v40899_v7 }
 0x891   :  { %41150 = vmatpush1.msra.mxu0 %v61868_v15  ;;  %41602 = vmatmul.mubr.f32.vlgmr.msra.gmra.mrb[12].mxu1 %v40899_v7  ;;  %v61871_v7 = vld [vmem:[#allocation64_spill] sm:$0xff]  ;;  %v61881_v15 = vld [vmem:[#allocation66_spill] sm:$0xff] }
 0x892   :  { %41615 = vmatpush1.msra.mxu1 %v61869_v45  ;;  %41222 = vmatprep.subr.mxu0 %v57146_v19  ;;  %v41834_v19 = vand.u32 4294901760, %v41833_v24  ;;  %v61886_v45 = vld [vmem:[#allocation71_spill] sm:$0xff] }
 0x893   :  { %41687 = vmatprep.subr.mxu1 %v61734_v52  ;;  %41213 = vmatprep.mubr.f32.mxu0 %v61489_v23 }
 0x894   :  { %41678 = vmatprep.mubr.f32.mxu1 %v61489_v23  ;;  %v41835_v52 = vsub.f32 %v41833_v24, %v41834_v19 }
 0x898   :  { %41215 = vmatmul.mubr.f32.vlgmr.msra.gmra.mrb[12].mxu0 %v59677_v0 }
 0x899   :  { %41224 = vmatpush1.msra.mxu0 %v61735_v34  ;;  %41680 = vmatmul.mubr.f32.vlgmr.msra.gmra.mrb[12].mxu1 %v59677_v0  ;;  %v41836_v34 = vand.u32 4294901760, %v41835_v52  ;;  %v61888_v52 = vld [vmem:[#allocation75_spill] sm:$0xff] }
 0x89a   :  { %41689 = vmatpush1.msra.mxu1 %v61736_v44  ;;  %41766 = vmatprep.subr.mxu0 %v57284_v22  ;;  %v61870_v44 = vld [vmem:[#allocation62_spill] sm:$0xff] }
 0x89b   :  { %42231 = vmatprep.subr.mxu1 %v61686_v57  ;;  %41287 = vmatprep.mubr.f32.mxu0 %v61489_v23 }
 0x89c   :  { %41752 = vmatprep.mubr.f32.mxu1 %v61489_v23 }
 0x8a0   :  { %41289 = vmatmul.mubr.f32.vlgmr.msra.gmra.mrb[12].mxu0 %v59677_v0 }
 0x8a1   :  { %41754 = vmatmul.mubr.f32.vlgmr.msra.gmra.mrb[12].mxu1 %v59677_v0  ;;  %41768 = vmatpush1.msra.mxu0 %v61687_v8  ;;  %v61872_v0 = vld [vmem:[#allocation51_spill] sm:$0xff] }
 0x8a2   :  { %42233 = vmatpush1.msra.mxu1 %v61688_v42  ;;  %41848 = vmatprep.subr.mxu0 %v61689_v41  ;;  %v61874_v41 = vld [vmem:[#allocation57_spill] sm:$0xff] }
 0x8a3   :  { %42313 = vmatprep.subr.mxu1 %v61870_v44  ;;  %41831 = vmatprep.mubr.f32.mxu0 %v61489_v23 }
 0x8a4   :  { %42296 = vmatprep.mubr.f32.mxu1 %v61489_v23 }
 0x8a8   :  { %41837 = vmatmul.mubr.f32.vlgmr.msra.gmra.mrb[12].mxu0 %v41836_v34 }
 0x8a9   :  { %41854 = vmatpush1.msra.mxu0 %v61750_v38  ;;  %42302 = vmatmul.mubr.f32.vlgmr.msra.gmra.mrb[12].mxu1 %v41836_v34  ;;  %v61876_v38 = vld [vmem:[#allocation55_spill] sm:$0xff] }
 0x8aa   :  { %42319 = vmatpush1.msra.mxu1 %v61871_v7  ;;  %41927 = vmatprep.subr.mxu0 %v61872_v0  ;;  %v61890_v7 = vld [vmem:[#allocation86_spill] sm:$0xff] }
 0x8ab   :  { %42392 = vmatprep.subr.mxu1 %v61873_v14  ;;  %41917 = vmatprep.mubr.f32.mxu0 %v61489_v23 }
 0x8ac   :  { %42382 = vmatprep.mubr.f32.mxu1 %v61489_v23 }
 0x8b0   :  { %41919 = vmatmul.mubr.f32.vlgmr.msra.gmra.mrb[12].mxu0 %v59726_v39 }
 0x8b1   :  { %41930 = vmatpush1.msra.mxu0 %v61874_v41  ;;  %42384 = vmatmul.mubr.f32.vlgmr.msra.gmra.mrb[12].mxu1 %v59726_v39  ;;  %v61900_v41 = vld [vmem:[#allocation119_spill] sm:$0xff] }
 0x8b2   :  { %42395 = vmatpush1.msra.mxu1 %v61875_v9  ;;  %42003 = vmatprep.subr.mxu0 %v57284_v22  ;;  %v61902_v9 = vld [vmem:[#allocation123_spill] sm:$0xff] }
 0x8b3   :  { %42468 = vmatprep.subr.mxu1 %v61686_v57  ;;  %41993 = vmatprep.mubr.f32.mxu0 %v61489_v23 }
 0x8b4   :  { %42458 = vmatprep.mubr.f32.mxu1 %v61489_v23 }
 0x8b8   :  { %41996 = vmatmul.mubr.f32.vlgmr.msra.gmra.mrb[12].mxu0 %v41833_v24 }
 0x8b9   :  { %42005 = vmatpush1.msra.mxu0 %v61687_v8  ;;  %42461 = vmatmul.mubr.f32.vlgmr.msra.gmra.mrb[12].mxu1 %v41833_v24  ;;  %v61887_v24 = vld [vmem:[#allocation74_spill] sm:$0xff] }
 0x8ba   :  { %42470 = vmatpush1.msra.mxu1 %v61688_v42  ;;  %42081 = vmatprep.subr.mxu0 %v61876_v38  ;;  %v61903_v38 = vld [vmem:[#allocation120_spill] sm:$0xff] }
 0x8bb   :  { %42546 = vmatprep.subr.mxu1 %v61877_v53  ;;  %42068 = vmatprep.mubr.f32.mxu0 %v61489_v23  ;;  %v61904_v53 = vld [vmem:[#allocation121_spill] sm:$0xff] }
 0x8bc   :  { %42533 = vmatprep.mubr.f32.mxu1 %v61489_v23 }
 0x8c0   :  { %42072 = vmatmul.mubr.f32.vlgmr.msra.gmra.mrb[12].mxu0 %v41834_v19 }
 0x8c1   :  { %42085 = vmatpush1.msra.mxu0 %v61878_v55  ;;  %42537 = vmatmul.mubr.f32.vlgmr.msra.gmra.mrb[12].mxu1 %v41834_v19  ;;  %v61906_v55 = vld [vmem:[#allocation125_spill] sm:$0xff] }
 0x8c2   :  { %42550 = vmatpush1.msra.mxu1 %v61879_v37  ;;  %42157 = vmatprep.subr.mxu0 %v57284_v22  ;;  %v42773_v22 = vand.u32 4294901760, %v42772_v35  ;;  %v6845_v37 = vpop.permute.xlu1 %6844 }
 0x8c3   :  { %42622 = vmatprep.subr.mxu1 %v61686_v57  ;;  %42148 = vmatprep.mubr.f32.mxu0 %v61489_v23 }
 0x8c4   :  { %42613 = vmatprep.mubr.f32.mxu1 %v61489_v23  ;;  %v42774_v57 = vsub.f32 %v42772_v35, %v42773_v22 }
 0x8c8   :  { %42150 = vmatmul.mubr.f32.vlgmr.msra.gmra.mrb[12].mxu0 %v59726_v39 }
 0x8c9   :  { %42159 = vmatpush1.msra.mxu0 %v61687_v8  ;;  %42615 = vmatmul.mubr.f32.vlgmr.msra.gmra.mrb[12].mxu1 %v59726_v39  ;;  %v61880_v8 = vld [vmem:[#allocation79_spill] sm:$0xff] }
 0x8ca   :  { %42624 = vmatpush1.msra.mxu1 %v61688_v42  ;;  %42222 = vmatprep.mubr.f32.mxu0 %v61489_v23  ;;  %v42775_v42 = vand.u32 4294901760, %v42774_v57 }
 0x8cb   :  { %42687 = vmatprep.mubr.f32.mxu1 %v61489_v23  ;;  %42705 = vmatprep.subr.mxu0 %v57388_v16 }
 0x8cc   :  { %43170 = vmatprep.subr.mxu1 %v61638_v58 }
 0x8d0   :  { %42224 = vmatmul.mubr.f32.vlgmr.msra.gmra.mrb[12].mxu0 %v59726_v39 }
 0x8d1   :  { %42689 = vmatmul.mubr.f32.vlgmr.msra.gmra.mrb[12].mxu1 %v59726_v39  ;;  %42707 = vmatpush1.msra.mxu0 %v61639_v48  ;;  %v55481_v39 = vld [vmem:[%s61165_s1 + $0x170] sm:$0xff] }
 0x8d2   :  { %42770 = vmatprep.mubr.f32.mxu0 %v61489_v23  ;;  %43172 = vmatpush1.msra.mxu1 %v61640_v25  ;;  %v43641_v19 = vsel %vm280_vm0, %v55481_v39, 0 }
 0x8d3   :  { %43235 = vmatprep.mubr.f32.mxu1 %v61489_v23  ;;  %42787 = vmatprep.subr.mxu0 %v61641_v31  ;;  %v61883_v31 = vld [vmem:[#allocation72_spill] sm:$0xff]  ;;  %v59824_v44 = vand.u32 4294901760, %v43641_v19 }
 0x8d4   :  { %43252 = vmatprep.subr.mxu1 %v61701_v32  ;;  %v61884_v32 = vld [vmem:[#allocation73_spill] sm:$0xff] }
 0x8d5   :  { %v43711_v34 = vsub.f32 %v43641_v19, %v59824_v44 }
 0x8d8   :  { %42776 = vmatmul.mubr.f32.vlgmr.msra.gmra.mrb[12].mxu0 %v42775_v42 }
 0x8d9   :  { %43241 = vmatmul.mubr.f32.vlgmr.msra.gmra.mrb[12].mxu1 %v42775_v42  ;;  %42793 = vmatpush1.msra.mxu0 %v61822_v13  ;;  %v61885_v13 = vld [vmem:[#allocation70_spill] sm:$0xff] }
 0x8da   :  { %42856 = vmatprep.mubr.f32.mxu0 %v61489_v23  ;;  %43258 = vmatpush1.msra.mxu1 %v61880_v8 }
 0x8db   :  { %43321 = vmatprep.mubr.f32.mxu1 %v61489_v23  ;;  %42866 = vmatprep.subr.mxu0 %v61881_v15 }
 0x8dc   :  { %43331 = vmatprep.subr.mxu1 %v61882_v20 }
 0x8e0   :  { %42858 = vmatmul.mubr.f32.vlgmr.msra.gmra.mrb[12].mxu0 %v59775_v5 }
 0x8e1   :  { %43323 = vmatmul.mubr.f32.vlgmr.msra.gmra.mrb[12].mxu1 %v59775_v5  ;;  %42869 = vmatpush1.msra.mxu0 %v61883_v31 }
 0x8e2   :  { %42932 = vmatprep.mubr.f32.mxu0 %v61489_v23  ;;  %43334 = vmatpush1.msra.mxu1 %v61884_v32 }
 0x8e3   :  { %43397 = vmatprep.mubr.f32.mxu1 %v61489_v23  ;;  %42942 = vmatprep.subr.mxu0 %v57388_v16 }
 0x8e4   :  { %43407 = vmatprep.subr.mxu1 %v61638_v58 }
 0x8e8   :  { %42935 = vmatmul.mubr.f32.vlgmr.msra.gmra.mrb[12].mxu0 %v42772_v35 }
 0x8e9   :  { %43400 = vmatmul.mubr.f32.vlgmr.msra.gmra.mrb[12].mxu1 %v42772_v35  ;;  %42944 = vmatpush1.msra.mxu0 %v61639_v48  ;;  %v13451_v35 = vpop.permute.xlu1 %13450 }
 0x8ea   :  { %43007 = vmatprep.mubr.f32.mxu0 %v61489_v23  ;;  %43409 = vmatpush1.msra.mxu1 %v61640_v25 }
 0x8eb   :  { %43472 = vmatprep.mubr.f32.mxu1 %v61489_v23  ;;  %43020 = vmatprep.subr.mxu0 %v61885_v13  ;;  %v6855_v13 = vld [vmem:[%s61167_s8] ss:$8 sm:$0xf] }
 0x8ec   :  { %43485 = vmatprep.subr.mxu1 %v61886_v45  ;;  %v61907_v45 = vld [vmem:[#allocation2_spill] sm:$0xff] }
 0x8ed   :  { %v13455_v57 = vpop.permute.xlu1 %13454  ;;  %vm6850_vm7 = vcmp.lt.s32.totalorder %v61907_v45, 48  ;;  %vm13458_vm8 = vcmp.lt.s32.totalorder %v61907_v45, 32  ;;  %vm20067_vm9 = vcmp.lt.s32.totalorder %v61907_v45, 16  ;;  %vm33245_vm10 = vcmp.lt.s32.totalorder %v61907_v45, 112 }
 0x8ee   :  { %vm39854_vm11 = vcmp.lt.s32.totalorder %v61907_v45, 96  ;;  %vm46463_vm12 = vcmp.lt.s32.totalorder %v61907_v45, 80 }
 0x8f0   :  { %43011 = vmatmul.mubr.f32.vlgmr.msra.gmra.mrb[12].mxu0 %v42773_v22 }
 0x8f1   :  { %43476 = vmatmul.mubr.f32.vlgmr.msra.gmra.mrb[12].mxu1 %v42773_v22  ;;  %43024 = vmatpush1.msra.mxu0 %v61887_v24  ;;  %v13457_v8 = vpop.permute.xlu1 %13456  ;;  %v61908_v24 = vld [vmem:[#allocation5_spill] sm:$0xff] }
 0x8f2   :  { %43489 = vmatpush1.msra.mxu1 %v61888_v52  ;;  %43087 = vmatprep.mubr.f32.mxu0 %v61489_v23  ;;  %v59983_v19 = vrot.slane %v6855_v13, %v61908_v24 }
 0x8f3   :  { %43096 = vmatprep.subr.mxu0 %v57388_v16  ;;  %43552 = vmatprep.mubr.f32.mxu1 %v61489_v23  ;;  %v43712_v16 = vand.u32 4294901760, %v43711_v34 }
 0x8f4   :  { %43561 = vmatprep.subr.mxu1 %v61638_v58 }
 0x8f5   :  { %v43713_v58 = vsub.f32 %v43711_v34, %v43712_v16  ;;  %v20064_v20 = vpop.permute.xlu1 %20063 }
 0x8f8   :  { %43089 = vmatmul.mubr.f32.vlgmr.msra.gmra.mrb[12].mxu0 %v59775_v5 }
 0x8f9   :  { %43098 = vmatpush1.msra.mxu0 %v61639_v48  ;;  %43554 = vmatmul.mubr.f32.vlgmr.msra.gmra.mrb[12].mxu1 %v59775_v5  ;;  %v43714_v48 = vand.u32 4294901760, %v43713_v58  ;;  %v20062_v32 = vpop.permute.xlu1 %20061  ;;  %v61910_v58 = vld [vmem:[#allocation3_spill] sm:$0xff] }
 0x8fa   :  { %43563 = vmatpush1.msra.mxu1 %v61640_v25  ;;  %43644 = vmatprep.subr.mxu0 %v57519_v2  ;;  %v61889_v25 = vld [vmem:[#allocation96_spill] sm:$0xff] }
 0x8fb   :  { %44109 = vmatprep.subr.mxu1 %v61590_v49  ;;  %43161 = vmatprep.mubr.f32.mxu0 %v61489_v23 }
 0x8fc   :  { %43626 = vmatprep.mubr.f32.mxu1 %v61489_v23 }
 0x8fd   :  { %v33240_v52 = vpop.permute.xlu1 %33239 }
 0x900   :  { %43163 = vmatmul.mubr.f32.vlgmr.msra.gmra.mrb[12].mxu0 %v59775_v5 }
 0x901   :  { %43628 = vmatmul.mubr.f32.vlgmr.msra.gmra.mrb[12].mxu1 %v59775_v5  ;;  %43646 = vmatpush1.msra.mxu0 %v61591_v33 }
 0x902   :  { %44111 = vmatpush1.msra.mxu1 %v61592_v27  ;;  %43726 = vmatprep.subr.mxu0 %v61593_v21  ;;  %v61891_v21 = vld [vmem:[#allocation91_spill] sm:$0xff] }
 0x903   :  { %44191 = vmatprep.subr.mxu1 %v61889_v25  ;;  %43709 = vmatprep.mubr.f32.mxu0 %v61489_v23  ;;  %v59991_v25 = vrot.slane %v6855_v13, %v61910_v58 }
 0x904   :  { %44174 = vmatprep.mubr.f32.mxu1 %v61489_v23 }
 0x908   :  { %43715 = vmatmul.mubr.f32.vlgmr.msra.gmra.mrb[12].mxu0 %v43714_v48 }
 0x909   :  { %43732 = vmatpush1.msra.mxu0 %v61654_v11  ;;  %44180 = vmatmul.mubr.f32.vlgmr.msra.gmra.mrb[12].mxu1 %v43714_v48  ;;  %v61911_v48 = vld [vmem:[#allocation4_spill] sm:$0xff] }
 0x90a   :  { %44197 = vmatpush1.msra.mxu1 %v61771_v43  ;;  %43805 = vmatprep.subr.mxu0 %v61833_v47 }
 0x90b   :  { %44270 = vmatprep.subr.mxu1 %v61890_v7  ;;  %43795 = vmatprep.mubr.f32.mxu0 %v61489_v23  ;;  %v59994_v7 = vrot.slane %v6855_v13, %v61911_v48 }
 0x90c   :  { %44260 = vmatprep.mubr.f32.mxu1 %v61489_v23 }
 0x910   :  { %43797 = vmatmul.mubr.f32.vlgmr.msra.gmra.mrb[12].mxu0 %v59824_v44 }
 0x911   :  { %43808 = vmatpush1.msra.mxu0 %v61891_v21  ;;  %44262 = vmatmul.mubr.f32.vlgmr.msra.gmra.mrb[12].mxu1 %v59824_v44  ;;  %v55445_v21 = vld [vmem:[%s61167_s8 + $0x1] ss:$8 sm:$0xf] }
 0x912   :  { %44273 = vmatpush1.msra.mxu1 %v61775_v54  ;;  %43881 = vmatprep.subr.mxu0 %v57519_v2  ;;  %v55482_v54 = vld [vmem:[%s61165_s1 + $0x178] sm:$0xff] }
 0x913   :  { %44346 = vmatprep.subr.mxu1 %v61590_v49  ;;  %43871 = vmatprep.mubr.f32.mxu0 %v61489_v23 }
 0x914   :  { %44336 = vmatprep.mubr.f32.mxu1 %v61489_v23 }
 0x917   :  { %v39372_v11 = vpop.f32.mrb[10].mxu0 }
 0x918   :  { %v39837_v43 = vpop.f32.mrb[10].mxu1  ;;  %43874 = vmatmul.mubr.f32.vlgmr.msra.gmra.mrb[12].mxu0 %v43711_v34  ;;  %39846 = vrot.lane.b32.xlu0 %v39372_v11, %s56876_s26  ;;  %v39374_v47 = vpop.f32.mrb[11].mxu0  ;;  %v55453_v11 = vld [vmem:[%s61167_s8 + $0x2] ss:$8 sm:$0xf] }
 0x919   :  { %v39839_v0 = vpop.f32.mrb[11].mxu1  ;;  %43883 = vmatpush1.msra.mxu0 %v61591_v33  ;;  %44339 = vmatmul.mubr.f32.vlgmr.msra.gmra.mrb[12].mxu1 %v43711_v34  ;;  %v61909_v34 = vld [vmem:[#allocation6_spill] sm:$0xff] }
 0x91a   :  { %44348 = vmatpush1.msra.mxu1 %v61592_v27  ;;  %43959 = vmatprep.subr.mxu0 %v61718_v46 }
 0x91b   :  { %44424 = vmatprep.subr.mxu1 %v61719_v59  ;;  %39848 = vrot.lane.b32.xlu1 %v39374_v47, %s56876_s26  ;;  %v44580_v59 = vsel %vm280_vm0, %v55482_v54, 0  ;;  %v60006_v47 = vrot.slane %v55445_v21, %v61910_v58 }
 0x91c   :  { %39850 = vrot.lane.b32.xlu0 %v39837_v43, %s56876_s26  ;;  %43946 = vmatprep.mubr.f32.mxu0 %v61489_v23  ;;  %v59877_v46 = vand.u32 4294901760, %v44580_v59 }
 0x91d   :  { %44411 = vmatprep.mubr.f32.mxu1 %v61489_v23 }
 0x91e   :  { %v44650_v14 = vsub.f32 %v44580_v59, %v59877_v46  ;;  %v60014_v59 = vrot.slane %v55445_v21, %v61909_v34 }
 0x91f   :  { %39852 = vrot.lane.b32.xlu1 %v39839_v0, %s56876_s26 }
 0x920   :  { %43950 = vmatmul.mubr.f32.vlgmr.msra.gmra.mrb[12].mxu0 %v43712_v16 }
 0x921   :  { %43963 = vmatpush1.msra.mxu0 %v61662_v29  ;;  %44415 = vmatmul.mubr.f32.vlgmr.msra.gmra.mrb[12].mxu1 %v43712_v16  ;;  %v61895_v29 = vld [vmem:[#allocation110_spill] sm:$0xff]  ;;  %v59988_v16 = vrot.slane %v6855_v13, %v61909_v34 }
 0x922   :  { %44428 = vmatpush1.msra.mxu1 %v61780_v40  ;;  %44035 = vmatprep.subr.mxu0 %v57519_v2  ;;  %v44651_v2 = vand.u32 4294901760, %v44650_v14  ;;  %v61898_v40 = vld [vmem:[#allocation128_spill] sm:$0xff] }
 0x923   :  { %44500 = vmatprep.subr.mxu1 %v61590_v49  ;;  %44026 = vmatprep.mubr.f32.mxu0 %v61489_v23 }
 0x924   :  { %44491 = vmatprep.mubr.f32.mxu1 %v61489_v23  ;;  %v44652_v49 = vsub.f32 %v44650_v14, %v44651_v2 }
 0x928   :  { %44028 = vmatmul.mubr.f32.vlgmr.msra.gmra.mrb[12].mxu0 %v59824_v44 }
 0x929   :  { %44037 = vmatpush1.msra.mxu0 %v61591_v33  ;;  %44493 = vmatmul.mubr.f32.vlgmr.msra.gmra.mrb[12].mxu1 %v59824_v44  ;;  %v61893_v33 = vld [vmem:[#allocation105_spill] sm:$0xff] }
 0x92a   :  { %44502 = vmatpush1.msra.mxu1 %v61592_v27  ;;  %44583 = vmatprep.subr.mxu0 %v57649_v51  ;;  %v44653_v27 = vand.u32 4294901760, %v44652_v49  ;;  %v60024_v49 = vrot.slane %v55445_v21, %v61911_v48 }
 0x92b   :  { %45048 = vmatprep.subr.mxu1 %v57654_v61  ;;  %44100 = vmatprep.mubr.f32.mxu0 %v61489_v23 }
 0x92c   :  { %44565 = vmatprep.mubr.f32.mxu1 %v61489_v23 }
 0x930   :  { %44102 = vmatmul.mubr.f32.vlgmr.msra.gmra.mrb[12].mxu0 %v59824_v44 }
 0x931   :  { %44567 = vmatmul.mubr.f32.vlgmr.msra.gmra.mrb[12].mxu1 %v59824_v44  ;;  %44585 = vmatpush1.msra.mxu0 %v57674_v28 }
 0x932   :  { %45050 = vmatpush1.msra.mxu1 %v57676_v1  ;;  %44665 = vmatprep.subr.mxu0 %v57711_v56  ;;  %v61892_v56 = vld [vmem:[#allocation108_spill] sm:$0xff] }
 0x933   :  { %45130 = vmatprep.subr.mxu1 %v61721_v10  ;;  %44648 = vmatprep.mubr.f32.mxu0 %v61489_v23 }
 0x934   :  { %45113 = vmatprep.mubr.f32.mxu1 %v61489_v23 }
 0x938   :  { %44654 = vmatmul.mubr.f32.vlgmr.msra.gmra.mrb[12].mxu0 %v44653_v27 }
 0x939   :  { %44671 = vmatpush1.msra.mxu0 %v61606_v4  ;;  %45119 = vmatmul.mubr.f32.vlgmr.msra.gmra.mrb[12].mxu1 %v44653_v27  ;;  %v61894_v4 = vld [vmem:[#allocation106_spill] sm:$0xff]  ;;  %v60027_v27 = vrot.slane %v55453_v11, %v61910_v58 }
 0x93a   :  { %45136 = vmatpush1.msra.mxu1 %v61607_v3  ;;  %44744 = vmatprep.subr.mxu0 %v61665_v30  ;;  %v55483_v3 = vld [vmem:[%s61165_s1 + $0x180] sm:$0xff]  ;;  %s56877_s1 = smov 80  }
 0x93b   :  { %45209 = vmatprep.subr.mxu1 %v61666_v60  ;;  %44734 = vmatprep.mubr.f32.mxu0 %v61489_v23  ;;  %v45519_v60 = vsel %vm280_vm0, %v55483_v3, 0 }
 0x93c   :  { %45199 = vmatprep.mubr.f32.mxu1 %v61489_v23  ;;  %v45588_v30 = vand.u32 4294901760, %v45519_v60 }
 0x93e   :  { %v45589_v10 = vsub.f32 %v45519_v60, %v45588_v30  ;;  %v60036_v60 = vrot.slane %v55453_v11, %v61909_v34 }
 0x940   :  { %44736 = vmatmul.mubr.f32.vlgmr.msra.gmra.mrb[12].mxu0 %v59877_v46 }
 0x941   :  { %44747 = vmatpush1.msra.mxu0 %v61836_v62  ;;  %45201 = vmatmul.mubr.f32.vlgmr.msra.gmra.mrb[12].mxu1 %v59877_v46  ;;  %v61899_v62 = vld [vmem:[#allocation118_spill] sm:$0xff] }
 0x942   :  { %45212 = vmatpush1.msra.mxu1 %v61892_v56  ;;  %44820 = vmatprep.subr.mxu0 %v57649_v51 }
 0x943   :  { %45285 = vmatprep.subr.mxu1 %v57654_v61  ;;  %44810 = vmatprep.mubr.f32.mxu0 %v61489_v23 }
 0x944   :  { %45275 = vmatprep.mubr.f32.mxu1 %v61489_v23 }
 0x948   :  { %44813 = vmatmul.mubr.f32.vlgmr.msra.gmra.mrb[12].mxu0 %v44650_v14 }
 0x949   :  { %44822 = vmatpush1.msra.mxu0 %v57674_v28  ;;  %45278 = vmatmul.mubr.f32.vlgmr.msra.gmra.mrb[12].mxu1 %v44650_v14  ;;  %v60019_v14 = vrot.slane %v55445_v21, %v61908_v24  ;;  %v61912_v21 = vld [vmem:[#allocation84_spill] sm:$0xff] }
 0x94a   :  { %45287 = vmatpush1.msra.mxu1 %v57676_v1  ;;  %44898 = vmatprep.subr.mxu0 %v61893_v33 }
 0x94b   :  { %45363 = vmatprep.subr.mxu1 %v61894_v4  ;;  %44885 = vmatprep.mubr.f32.mxu0 %v61489_v23  ;;  %v13459_v4 = vsel %vm13458_vm8, %v13455_v57, %v13457_v8 }
 0x94c   :  { %45350 = vmatprep.mubr.f32.mxu1 %v61489_v23 }
 0x950   :  { %44889 = vmatmul.mubr.f32.vlgmr.msra.gmra.mrb[12].mxu0 %v44651_v2 }
 0x951   :  { %44902 = vmatpush1.msra.mxu0 %v61614_v17  ;;  %45354 = vmatmul.mubr.f32.vlgmr.msra.gmra.mrb[12].mxu1 %v44651_v2  ;;  %v45590_v17 = vand.u32 4294901760, %v45589_v10 }
 0x952   :  { %45367 = vmatpush1.msra.mxu1 %v61895_v29  ;;  %44974 = vmatprep.subr.mxu0 %v57649_v51 }
 0x953   :  { %45439 = vmatprep.subr.mxu1 %v57654_v61  ;;  %44965 = vmatprep.mubr.f32.mxu0 %v61489_v23  ;;  %v45591_v51 = vsub.f32 %v45589_v10, %v45590_v17  ;;  %v61896_v61 = vld [vmem:[#allocation126_spill] sm:$0xff] }
 0x954   :  { %45430 = vmatprep.mubr.f32.mxu1 %v61489_v23 }
 0x958   :  { %44967 = vmatmul.mubr.f32.vlgmr.msra.gmra.mrb[12].mxu0 %v59877_v46 }
 0x959   :  { %44976 = vmatpush1.msra.mxu0 %v57674_v28  ;;  %45432 = vmatmul.mubr.f32.vlgmr.msra.gmra.mrb[12].mxu1 %v59877_v46  ;;  %v45592_v28 = vand.u32 4294901760, %v45591_v51  ;;  %v33244_v51 = vpop.permute.xlu1 %33243 }
 0x95a   :  { %45441 = vmatpush1.msra.mxu1 %v57676_v1  ;;  %45522 = vmatprep.subr.mxu0 %v57779_v18  ;;  %v61897_v1 = vld [vmem:[#allocation127_spill] sm:$0xff] }
 0x95b   :  { %45987 = vmatprep.subr.mxu1 %v57784_v63  ;;  %45039 = vmatprep.mubr.f32.mxu0 %v61489_v23 }
 0x95c   :  { %45504 = vmatprep.mubr.f32.mxu1 %v61489_v23 }
 0x960   :  { %45041 = vmatmul.mubr.f32.vlgmr.msra.gmra.mrb[12].mxu0 %v59877_v46 }
 0x961   :  { %45506 = vmatmul.mubr.f32.vlgmr.msra.gmra.mrb[12].mxu1 %v59877_v46  ;;  %45524 = vmatpush1.msra.mxu0 %v57804_v50  ;;  %v13462_v46 = vsel %vm13458_vm8, %v13457_v8, %v13451_v35 }
 0x962   :  { %45989 = vmatpush1.msra.mxu1 %v57806_v6  ;;  %45604 = vmatprep.subr.mxu0 %v57839_v12  ;;  %v61901_v12 = vld [vmem:[#allocation122_spill] sm:$0xff]  ;;  %v13486_v29 = vmul.f32 %v60006_v47, %v13462_v46 }
 0x963   :  { %46069 = vmatprep.subr.mxu1 %v61896_v61  ;;  %45587 = vmatprep.mubr.f32.mxu0 %v61489_v23 }
 0x964   :  { %46052 = vmatprep.mubr.f32.mxu1 %v61489_v23 }
 0x968   :  { %45593 = vmatmul.mubr.f32.vlgmr.msra.gmra.mrb[12].mxu0 %v45592_v28 }
 0x969   :  { %45610 = vmatpush1.msra.mxu0 %v61897_v1  ;;  %46058 = vmatmul.mubr.f32.vlgmr.msra.gmra.mrb[12].mxu1 %v45592_v28 }
 0x96a   :  { %46075 = vmatpush1.msra.mxu1 %v61898_v40  ;;  %45683 = vmatprep.subr.mxu0 %v61899_v62 }
 0x96b   :  { %46148 = vmatprep.subr.mxu1 %v61900_v41  ;;  %45673 = vmatprep.mubr.f32.mxu0 %v61489_v23  ;;  %v13489_v41 = vmul.f32 %v60024_v49, %v13459_v4 }
 0x96c   :  { %46138 = vmatprep.mubr.f32.mxu1 %v61489_v23 }
 0x970   :  { %45675 = vmatmul.mubr.f32.vlgmr.msra.gmra.mrb[12].mxu0 %v45588_v30 }
 0x971   :  { %45686 = vmatpush1.msra.mxu0 %v61901_v12  ;;  %46140 = vmatmul.mubr.f32.vlgmr.msra.gmra.mrb[12].mxu1 %v45588_v30 }
 0x972   :  { %46151 = vmatpush1.msra.mxu1 %v61902_v9  ;;  %45759 = vmatprep.subr.mxu0 %v57779_v18 }
 0x973   :  { %46224 = vmatprep.subr.mxu1 %v57784_v63  ;;  %45749 = vmatprep.mubr.f32.mxu0 %v61489_v23 }
 0x974   :  { %46214 = vmatprep.mubr.f32.mxu1 %v61489_v23 }
 0x978   :  { %45752 = vmatmul.mubr.f32.vlgmr.msra.gmra.mrb[12].mxu0 %v45589_v10 }
 0x979   :  { %45761 = vmatpush1.msra.mxu0 %v57804_v50  ;;  %46217 = vmatmul.mubr.f32.vlgmr.msra.gmra.mrb[12].mxu1 %v45589_v10  ;;  %v20069_v10 = vsel %vm20067_vm9, %v20062_v32, %v20064_v20 }
 0x97a   :  { %46226 = vmatpush1.msra.mxu1 %v57806_v6  ;;  %45837 = vmatprep.subr.mxu0 %v61903_v38 }
 0x97b   :  { %46302 = vmatprep.subr.mxu1 %v61904_v53  ;;  %45824 = vmatprep.mubr.f32.mxu0 %v61489_v23 }
 0x97c   :  { %46289 = vmatprep.mubr.f32.mxu1 %v61489_v23 }
 0x980   :  { %45828 = vmatmul.mubr.f32.vlgmr.msra.gmra.mrb[12].mxu0 %v45590_v17 }
 0x981   :  { %45841 = vmatpush1.msra.mxu0 %v61905_v26  ;;  %46293 = vmatmul.mubr.f32.vlgmr.msra.gmra.mrb[12].mxu1 %v45590_v17  ;;  %v60045_v17 = vrot.slane %v55453_v11, %v61908_v24 }
 0x982   :  { %46306 = vmatpush1.msra.mxu1 %v61906_v55  ;;  %45913 = vmatprep.subr.mxu0 %v57779_v18  ;;  %v20097_v55 = vmul.f32 %v60036_v60, %v20069_v10 }
 0x983   :  { %46378 = vmatprep.subr.mxu1 %v57784_v63  ;;  %45904 = vmatprep.mubr.f32.mxu0 %v61489_v23 }
 0x984   :  { %46369 = vmatprep.mubr.f32.mxu1 %v61489_v23 }
 0x988   :  { %45906 = vmatmul.mubr.f32.vlgmr.msra.gmra.mrb[12].mxu0 %v45588_v30 }
 0x989   :  { %45915 = vmatpush1.msra.mxu0 %v57804_v50  ;;  %46371 = vmatmul.mubr.f32.vlgmr.msra.gmra.mrb[12].mxu1 %v45588_v30 }
 0x98a   :  { %46380 = vmatpush1.msra.mxu1 %v57806_v6  ;;  %45978 = vmatprep.mubr.f32.mxu0 %v61489_v23  ;;  %v6843_v6 = vpop.permute.xlu0 %6842 }
 0x98b   :  { %46443 = vmatprep.mubr.f32.mxu1 %v61489_v23  ;;  %v6853_v44 = vsel %vm6850_vm7, %v6843_v6, %v6845_v37 }
 0x98c   :  { %v6878_v38 = vmul.f32 %v59983_v19, %v6853_v44 }
 0x98e   :  { %v6847_v5 = vpop.permute.xlu0 %6846 }
 0x98f   :  { %v6852_v43 = vsel %vm6850_vm7, %v6845_v37, %v6847_v5 }
 0x990   :  { %45980 = vmatmul.mubr.f32.vlgmr.msra.gmra.mrb[12].mxu0 %v45588_v30  ;;  %v6879_v53 = vmul.f32 %v59988_v16, %v6852_v43  ;;  %v61913_v43 = vld [vmem:[#allocation87_spill] sm:$0xff] }
 0x991   :  { %46445 = vmatmul.mubr.f32.vlgmr.msra.gmra.mrb[12].mxu1 %v45588_v30  ;;  %46892 = vmatprep.mubr.f32.mxu0 %v61489_v23  ;;  %v60040_v30 = vrot.slane %v55453_v11, %v61911_v48 }
 0x992   :  { %47357 = vmatprep.mubr.f32.mxu1 %v61489_v23  ;;  %v6849_v22 = vpop.permute.xlu0 %6848 }
 0x993   :  { %v6851_v0 = vsel %vm6850_vm7, %v6847_v5, %v6849_v22  ;;  %v6854_v54 = vsel %vm6850_vm7, %v6849_v22, %v6843_v6  ;;  %v39849_v6 = vpop.permute.xlu1 %39848 }
 0x994   :  { %v6877_v40 = vmul.f32 %v59991_v25, %v6854_v54  ;;  %v6880_v26 = vmul.f32 %v59994_v7, %v6851_v0 }
 0x996   :  { %v13453_v42 = vpop.permute.xlu0 %13452  ;;  %v13493_v22 = vadd.f32 %v13489_v41, %v6880_v26 }
 0x997   :  { %v13460_v2 = vsel %vm13458_vm8, %v13453_v42, %v13455_v57  ;;  %v13461_v33 = vsel %vm13458_vm8, %v13451_v35, %v13453_v42  ;;  %v55476_v42 = vld [vmem:[%s61167_s8 + $0x5] ss:$8 sm:$0xf] }
 0x998   :  { %v13488_v61 = vmul.f32 %v60014_v59, %v13460_v2  ;;  %v13487_v62 = vmul.f32 %v60019_v14, %v13461_v33  ;;  %v60087_v46 = vrot.slane %v55476_v42, %v61910_v58  ;;  %v55484_v2 = vld [vmem:[%s61167_s8 + $0x6] ss:$8 sm:$0xf]  ;;  %v60111_v41 = vrot.slane %v55476_v42, %v61909_v34 }
 0x999   :  { %v60120_v26 = vrot.slane %v55476_v42, %v61911_v48 }
 0x99a   :  { %v20060_v15 = vpop.permute.xlu0 %20059  ;;  %v13492_v37 = vadd.f32 %v13488_v61, %v6879_v53  ;;  %v13491_v35 = vadd.f32 %v13487_v62, %v6878_v38  ;;  %v61917_v38 = vld [vmem:[#allocation95_spill] sm:$0xff] }
 0x99b   :  { %v20070_v1 = vsel %vm20067_vm9, %v20060_v15, %v20062_v32 }
 0x99c   :  { %v20101_v8 = vadd.f32 %v20097_v55, %v13492_v37 }
 0x99e   :  { %v20066_v31 = vpop.permute.xlu0 %20065  ;;  %v26670_v0 = vadd.f32 %v61913_v43, %v20101_v8  ;;  %v60140_v8 = vrot.slane %v55484_v2, %v61911_v48 }
 0x99f   :  { %v20071_v3 = vsel %vm20067_vm9, %v20066_v31, %v20060_v15  ;;  %v20068_v28 = vsel %vm20067_vm9, %v20064_v20, %v20066_v31 }
 0x9a0   :  { %v20095_v12 = vmul.f32 %v60027_v27, %v20071_v3  ;;  %v60099_v3 = vrot.slane %v55476_v42, %v61908_v24  ;;  %v60137_v42 = vrot.slane %v55484_v2, %v61909_v34 }
 0x9a2   :  { %v59980_v39 = vpop.permute.xlu0 %33237 }
 0x9a3   :  { %v33248_v15 = vsel %vm33245_vm10, %v59980_v39, %v33240_v52 }
 0x9a6   :  { %v33242_v56 = vpop.permute.xlu0 %33241 }
 0x9a7   :  { %v33247_v13 = vsel %vm33245_vm10, %v33240_v52, %v33242_v56  ;;  %v33246_v61 = vsel %vm33245_vm10, %v33242_v56, %v33244_v51 }
 0x9aa   :  { %v39847_v9 = vpop.permute.xlu0 %39846 }
 0x9ab   :  { %v39857_v52 = vsel %vm39854_vm11, %v39847_v9, %v39849_v6 }
 0x9ac   :  { %v39882_v56 = vmul.f32 %v60087_v46, %v39857_v52 }
 0x9ae   :  { %v39851_v44 = vpop.permute.xlu0 %39850 }
 0xa63   :  { %v45981_v18 = vpop.f32.mrb[12].mxu0 }
 0xa64   :  { %v46446_v63 = vpop.f32.mrb[12].mxu1  ;;  %46455 = vrot.lane.b32.xlu0 %v45981_v18, %s56877_s1  ;;  %v45983_v36 = vpop.f32.mrb[13].mxu0  ;;  %v55468_v18 = vld [vmem:[%s61167_s8 + $0x4] ss:$8 sm:$0xf] }
 0xa65   :  { %v46448_v50 = vpop.f32.mrb[13].mxu1  ;;  %46457 = vrot.lane.b32.xlu1 %v45983_v36, %s56877_s1  ;;  %v13490_v36 = vadd.f32 %v13486_v29, %v6877_v40  ;;  %v60067_v57 = vrot.slane %v55468_v18, %v61910_v58  ;;  %v60076_v20 = vrot.slane %v55468_v18, %v61908_v24  ;;  %v60084_v54 = vrot.slane %v55468_v18, %v61909_v34  ;;  %v39853_v29 = vpop.permute.xlu1 %39852  ;;  %v61916_v40 = vld [vmem:[#allocation88_spill] sm:$0xff] }
 0xa66   :  { %v60094_v4 = vrot.slane %v55468_v18, %v61911_v48 }
 0xa67   :  { %v20099_v5 = vadd.f32 %v20095_v12, %v13490_v36  ;;  %61914 = vst [vmem:[#allocation112_spill] sm:$0xff] %v60084_v54  ;;  %v33273_v33 = vmul.f32 %v60067_v57, %v33248_v15  ;;  %v33274_v10 = vmul.f32 %v60076_v20, %v33247_v13  ;;  %v60115_v12 = vrot.slane %v55484_v2, %v61910_v58 }
 0xa68   :  { %46459 = vrot.lane.b32.xlu0 %v46446_v63, %s56877_s1  ;;  %v20098_v63 = vmul.f32 %v60040_v30, %v20068_v28  ;;  %61915 = vst [vmem:[#allocation113_spill] sm:$0xff] %v60094_v4  ;;  %v33249_v28 = vsel %vm33245_vm10, %v33244_v51, %v59980_v39  ;;  %v39855_v39 = vsel %vm39854_vm11, %v39851_v44, %v39853_v29 }
 0xa69   :  { %46461 = vrot.lane.b32.xlu1 %v46448_v50, %s56877_s1  ;;  %v20096_v50 = vmul.f32 %v60045_v17, %v20070_v1  ;;  %v26668_v11 = vadd.f32 %v61912_v21, %v20099_v5  ;;  %v39856_v1 = vsel %vm39854_vm11, %v39849_v6, %v39851_v44  ;;  %v33275_v55 = vmul.f32 %v60084_v54, %v33246_v61 }
 0xa6a   :  { %v20102_v32 = vadd.f32 %v20098_v63, %v13493_v22  ;;  %v33276_v18 = vmul.f32 %v60094_v4, %v33249_v28  ;;  %v39883_v63 = vmul.f32 %v60099_v3, %v39856_v1  ;;  %v39858_v58 = vsel %vm39854_vm11, %v39853_v29, %v39847_v9 }
 0xa6b   :  { %v20100_v31 = vadd.f32 %v20096_v50, %v13491_v35  ;;  %v33277_v50 = vadd.f32 %v33273_v33, %v26668_v11  ;;  %v60132_v5 = vrot.slane %v55484_v2, %v61908_v24  ;;  %v39884_v35 = vmul.f32 %v60111_v41, %v39855_v39 }
 0xa6c   :  { %v26671_v53 = vadd.f32 %v61917_v38, %v20102_v32  ;;  %v39885_v15 = vmul.f32 %v60120_v26, %v39858_v58  ;;  %v33279_v32 = vadd.f32 %v33275_v55, %v26670_v0 }
 0xa6d   :  { %v26669_v62 = vadd.f32 %v61916_v40, %v20100_v31  ;;  %v39886_v9 = vadd.f32 %v39882_v56, %v33277_v50 }
 0xa6e   :  { %v33280_v13 = vadd.f32 %v33276_v18, %v26671_v53  ;;  %v39888_v2 = vadd.f32 %v39884_v35, %v33279_v32  ;;  %v56878_v18 = vmov 0  }
 0xa6f   :  { %v33278_v6 = vadd.f32 %v33274_v10, %v26669_v62  ;;  %56859 = vset.pattern.permute.xlu0 %v56878_v18  ;;  %56860 = vset.pattern.permute.xlu1 %v56878_v18 }
 0xa70   :  { %v39889_v52 = vadd.f32 %v39885_v15, %v33280_v13 }
 0xa71   :  { %v39887_v44 = vadd.f32 %v39883_v63, %v33278_v6  ;;  %v46534_v63 = vld [vmem:[%s61168_s3] sm:$0xff] }
 0xad6   :  { %v46456_v51 = vpop.permute.xlu0 %46455 }
 0xad7   :  { %v46458_v36 = vpop.permute.xlu1 %46457 }
 0xad8   :  { %v46466_v37 = vsel %vm46463_vm12, %v46456_v51, %v46458_v36 }
 0xad9   :  { %v46491_v22 = vmul.f32 %v60115_v12, %v46466_v37 }
 0xada   :  { %v46460_v31 = vpop.permute.xlu0 %46459 }
 0xadb   :  { %v46465_v24 = vsel %vm46463_vm12, %v46458_v36, %v46460_v31  ;;  %v46462_v21 = vpop.permute.xlu1 %46461  ;;  %v46495_v11 = vadd.f32 %v46491_v22, %v39886_v9  ;;  %v46517_v9 = vld [vmem:[%s61169_s2] sm:$0xff] }
 0xadc   :  { %v46492_v43 = vmul.f32 %v60132_v5, %v46465_v24  ;;  %v46464_v34 = vsel %vm46463_vm12, %v46460_v31, %v46462_v21  ;;  %v46467_v48 = vsel %vm46463_vm12, %v46462_v21, %v46456_v51 }
 0xadd   :  { %v46493_v33 = vmul.f32 %v60137_v42, %v46464_v34  ;;  %v46494_v0 = vmul.f32 %v60140_v8, %v46467_v48  ;;  %v46505_v1 = vmul.f32 %v46495_v11, %v46495_v11 }
 0xade   :  { %v46496_v29 = vadd.f32 %v46492_v43, %v39887_v44 }
 0xadf   :  { %v46497_v10 = vadd.f32 %v46493_v33, %v39888_v2  ;;  %v46498_v61 = vadd.f32 %v46494_v0, %v39889_v52 }
 0xae0   :  { %v46499_v28 = vadd.f32 %v46496_v29, %v46495_v11  ;;  %v46506_v40 = vmul.f32 %v46496_v29, %v46496_v29 }
 0xae1   :  { %v46507_v62 = vmul.f32 %v46497_v10, %v46497_v10  ;;  %v46508_v39 = vmul.f32 %v46498_v61, %v46498_v61 }
 0xae2   :  { %v46500_v38 = vadd.f32 %v46499_v28, %v46497_v10  ;;  %v46509_v53 = vadd.f32 %v46506_v40, %v46505_v1 }
 0xae4   :  { %v46501_v56 = vadd.f32 %v46500_v38, %v46498_v61  ;;  %v46510_v55 = vadd.f32 %v46509_v53, %v46507_v62 }
 0xae6   :  { %46502 = vadd.xlane.f32.xlu0 %v46501_v56  ;;  %v46511_v51 = vadd.f32 %v46510_v55, %v46508_v39 }
 0xae8   :  { %46512 = vadd.xlane.f32.xlu1 %v46511_v51 }
 0xaf9   :  { %46537 = vperm.xlu1 %56860, %v46534_v63  }
 0xb73   :  { %v46503_v58 = vpop.xlane.xlu0 %46502 }
 0xb74   :  { %v46504_v36 = vmul.f32 0.001953125, %v46503_v58 }
 0xb75   :  { %v46513_v50 = vpop.xlane.xlu1 %46512 }
 0xb76   :  { %v46514_v6 = vmul.f32 0.001953125, %v46513_v50  ;;  %v46515_v37 = vmul.f32 %v46504_v36, %v46504_v36  ;;  %v46521_v32 = vsub.f32 %v46495_v11, %v46504_v36  ;;  %v46522_v13 = vsub.f32 %v46496_v29, %v46504_v36 }
 0xb77   :  { %v46523_v44 = vsub.f32 %v46497_v10, %v46504_v36  ;;  %v46524_v1 = vsub.f32 %v46498_v61, %v46504_v36 }
 0xb78   :  { %v46516_v35 = vsub.f32 %v46514_v6, %v46515_v37 }
 0xb79   :  { %v46538_v21 = vpop.permute.xlu1 %46537 }
 0xb7a   :  { %v46518_v22 = vadd.f32 1e-05, %v46516_v35 }
 0xb7c   :  { %56861 = vrsqrt.f32 %v46518_v22 }
 0xb86   :  { %v56862_v15 = vpop.eup %56861 }
 0xb87   :  { %v46520_v31 = vmul.f32 %v56862_v15, %v46517_v9 }
 0xb89   :  { %46527 = vperm.xlu0 %56859, %v46520_v31   ;;  %v61918_v31 = vld [vmem:[#allocation27_spill] sm:$0xff] }
 0xc08   :  { %v46528_v24 = vpop.permute.xlu0 %46527 }
 0xc09   :  { %v46530_v43 = vmul.f32 %v46528_v24, %v46521_v32  ;;  %v46531_v34 = vmul.f32 %v46528_v24, %v46522_v13  ;;  %v46532_v48 = vmul.f32 %v46528_v24, %v46523_v44  ;;  %v46533_v11 = vmul.f32 %v46528_v24, %v46524_v1  ;;  %v61919_v44 = vld [vmem:[#allocation30_spill] sm:$0xff] }
 0xc0b   :  { %v46540_v2 = vadd.f32 %v46538_v21, %v46530_v43  ;;  %v46542_v33 = vadd.f32 %v46538_v21, %v46532_v48  ;;  %v46541_v0 = vadd.f32 %v46538_v21, %v46531_v34  ;;  %v46543_v10 = vadd.f32 %v46538_v21, %v46533_v11  ;;  %v61920_v21 = vld [vmem:[#allocation29_spill] sm:$0xff]  ;;  %v61921_v11 = vld [vmem:[#allocation28_spill] sm:$0xff] }
 0xc0d   :  { %v60158_v52 = vmax.f32 %v46540_v2, 0.0  ;;  %v60160_v28 = vmax.f32 %v46542_v33, 0.0  ;;  %v60166_v29 = vmax.f32 %v46541_v0, 0.0  ;;  %v60176_v61 = vmax.f32 %v46543_v10, 0.0 }
 0xc0f   :  { %46572 = vrot.lane.b32.xlu0 %v60160_v28, %s56866_s13  ;;  %46548 = vrot.lane.b32.xlu1 %v60158_v52, %s56867_s18 }
 0xc13   :  { %46588 = vrot.lane.b32.xlu0 %v60158_v52, %s56868_s0  ;;  %46550 = vrot.lane.b32.xlu1 %v60166_v29, %s56867_s18 }
 0xc17   :  { %46592 = vrot.lane.b32.xlu0 %v60160_v28, %s56868_s0  ;;  %46552 = vrot.lane.b32.xlu1 %v60160_v28, %s56867_s18 }
 0xc1b   :  { %46608 = vrot.lane.b32.xlu0 %v60158_v52, %s56869_s19  ;;  %46554 = vrot.lane.b32.xlu1 %v60176_v61, %s56867_s18 }
 0xc1f   :  { %46612 = vrot.lane.b32.xlu0 %v60160_v28, %s56869_s19  ;;  %46568 = vrot.lane.b32.xlu1 %v60158_v52, %s56866_s13 }
 0xc23   :  { %46628 = vrot.lane.b32.xlu0 %v60158_v52, %s56870_s22  ;;  %46570 = vrot.lane.b32.xlu1 %v60166_v29, %s56866_s13 }
 0xc27   :  { %46632 = vrot.lane.b32.xlu0 %v60160_v28, %s56870_s22  ;;  %46574 = vrot.lane.b32.xlu1 %v60176_v61, %s56866_s13 }
 0xc2b   :  { %46648 = vrot.lane.b32.xlu0 %v60158_v52, %s56871_s29  ;;  %46590 = vrot.lane.b32.xlu1 %v60166_v29, %s56868_s0 }
 0xc2f   :  { %46652 = vrot.lane.b32.xlu0 %v60160_v28, %s56871_s29  ;;  %46594 = vrot.lane.b32.xlu1 %v60176_v61, %s56868_s0 }
 0xc33   :  { %46610 = vrot.lane.b32.xlu1 %v60166_v29, %s56869_s19 }
 0xc37   :  { %46614 = vrot.lane.b32.xlu1 %v60176_v61, %s56869_s19 }
 0xc3b   :  { %46630 = vrot.lane.b32.xlu1 %v60166_v29, %s56870_s22 }
 0xc3f   :  { %46634 = vrot.lane.b32.xlu1 %v60176_v61, %s56870_s22 }
 0xc43   :  { %46650 = vrot.lane.b32.xlu1 %v60166_v29, %s56871_s29 }
 0xc47   :  { %46654 = vrot.lane.b32.xlu1 %v60176_v61, %s56871_s29 }
 0xc81   :  { %v46549_v40 = vpop.permute.xlu1 %46548  ;;  %v46573_v62 = vpop.permute.xlu0 %46572 }
 0xc85   :  { %v46551_v38 = vpop.permute.xlu1 %46550  ;;  %v46589_v56 = vpop.permute.xlu0 %46588 }
 0xc86   :  { %v46558_v35 = vsel %vm47_vm2, %v46549_v40, %v46551_v38 }
 0xc87   :  { %v46561_v32 = vmul.f32 %v46558_v35, %v61918_v31  ;;  %v61923_v35 = vld [vmem:[#allocation7_spill] sm:$0xff] }
 0xc89   :  { %v46553_v53 = vpop.permute.xlu1 %46552  ;;  %v46593_v55 = vpop.permute.xlu0 %46592  ;;  %v46565_v1 = vmax.f32 %v60166_v29, %v46561_v32  ;;  %v61924_v29 = vld [vmem:[#allocation10_spill] sm:$0xff] }
 0xc8a   :  { %v46557_v9 = vsel %vm47_vm2, %v46551_v38, %v46553_v53  ;;  %v61922_v38 = vld [vmem:[#allocation9_spill] sm:$0xff] }
 0xc8b   :  { %v46562_v24 = vmul.f32 %v46557_v9, %v61919_v44 }
 0xc8d   :  { %v46555_v39 = vpop.permute.xlu1 %46554  ;;  %v46609_v63 = vpop.permute.xlu0 %46608 }
 0xc8e   :  { %v46559_v15 = vsel %vm47_vm2, %v46555_v39, %v46549_v40  ;;  %v46556_v13 = vsel %vm47_vm2, %v46553_v53, %v46555_v39 }
 0xc8f   :  { %v46560_v43 = vmul.f32 %v46559_v15, %v61920_v21  ;;  %v46563_v10 = vmul.f32 %v46556_v13, %v61921_v11  ;;  %v46566_v15 = vmax.f32 %v60160_v28, %v46562_v24 }
 0xc91   :  { %v46569_v51 = vpop.permute.xlu1 %46568  ;;  %v46613_v36 = vpop.permute.xlu0 %46612  ;;  %v46567_v28 = vmax.f32 %v60176_v61, %v46563_v10  ;;  %v61931_v61 = vld [vmem:[#allocation80_spill] sm:$0xff] }
 0xc95   :  { %v46571_v18 = vpop.permute.xlu1 %46570  ;;  %v46629_v37 = vpop.permute.xlu0 %46628 }
 0xc96   :  { %v46578_v34 = vsel %vm87_vm1, %v46569_v51, %v46571_v18  ;;  %v46577_v0 = vsel %vm87_vm1, %v46571_v18, %v46573_v62  ;;  %v46564_v18 = vmax.f32 %v60158_v52, %v46560_v43  ;;  %v61926_v52 = vld [vmem:[#allocation8_spill] sm:$0xff] }
 0xc97   :  { %v46581_v53 = vmul.f32 %v46578_v34, %v61922_v38  ;;  %v46582_v31 = vmul.f32 %v46577_v0, %v61924_v29  ;;  %v61927_v34 = vld [vmem:[#allocation46_spill] sm:$0xff] }
 0xc98   :  { %v61928_v38 = vld [vmem:[#allocation82_spill] sm:$0xff] }
 0xc99   :  { %v46575_v58 = vpop.permute.xlu1 %46574  ;;  %v46633_v48 = vpop.permute.xlu0 %46632  ;;  %v46585_v11 = vmax.f32 %v46565_v1, %v46581_v53  ;;  %v61932_v53 = vld [vmem:[#allocation101_spill] sm:$0xff] }
 0xc9a   :  { %v46579_v2 = vsel %vm87_vm1, %v46575_v58, %v46569_v51  ;;  %v46576_v39 = vsel %vm87_vm1, %v46573_v62, %v46575_v58  ;;  %v61925_v58 = vld [vmem:[#allocation48_spill] sm:$0xff] }
 0xc9b   :  { %v46580_v9 = vmul.f32 %v46579_v2, %v61923_v35  ;;  %v46583_v24 = vmul.f32 %v46576_v39, %v61926_v52  ;;  %v46586_v52 = vmax.f32 %v46566_v15, %v46582_v31 }
 0xc9d   :  { %v46591_v50 = vpop.permute.xlu1 %46590  ;;  %v46649_v43 = vpop.permute.xlu0 %46648 }
 0xc9e   :  { %v46598_v51 = vsel %vm127_vm3, %v46589_v56, %v46591_v50  ;;  %v46597_v44 = vsel %vm127_vm3, %v46591_v50, %v46593_v55  ;;  %v46584_v50 = vmax.f32 %v46564_v18, %v46580_v9  ;;  %v46587_v18 = vmax.f32 %v46567_v28, %v46583_v24  ;;  %v61936_v24 = vld [vmem:[#allocation102_spill] sm:$0xff] }
 0xc9f   :  { %v46601_v2 = vmul.f32 %v46598_v51, %v61927_v34 }
 0xca1   :  { %v46595_v6 = vpop.permute.xlu1 %46594  ;;  %v46653_v31 = vpop.permute.xlu0 %46652 }
 0xca2   :  { %v46599_v40 = vsel %vm127_vm3, %v46595_v6, %v46589_v56  ;;  %v46596_v62 = vsel %vm127_vm3, %v46593_v55, %v46595_v6  ;;  %v61929_v6 = vld [vmem:[#allocation49_spill] sm:$0xff] }
 0xca3   :  { %v46600_v21 = vmul.f32 %v46599_v40, %v61925_v58  ;;  %v46602_v40 = vmul.f32 %v46597_v44, %v61929_v6 }
 0xca5   :  { %v46611_v22 = vpop.permute.xlu1 %46610  ;;  %v46604_v58 = vmax.f32 %v46584_v50, %v46600_v21  ;;  %v46606_v15 = vmax.f32 %v46586_v52, %v46602_v40 }
 0xca6   :  { %v46618_v32 = vsel %vm167_vm4, %v46609_v63, %v46611_v22  ;;  %v46617_v56 = vsel %vm167_vm4, %v46611_v22, %v46613_v36  ;;  %v61930_v22 = vld [vmem:[#allocation47_spill] sm:$0xff] }
 0xca7   :  { %v46620_v35 = vmul.f32 %v46618_v32, %v61928_v38  ;;  %v46603_v29 = vmul.f32 %v46596_v62, %v61930_v22  ;;  %v46621_v10 = vmul.f32 %v46617_v56, %v61931_v61  ;;  %v46605_v32 = vmax.f32 %v46585_v11, %v46601_v2  ;;  %v61934_v56 = vld [vmem:[#allocation83_spill] sm:$0xff] }
 0xca9   :  { %v46615_v33 = vpop.permute.xlu1 %46614  ;;  %v46624_v62 = vmax.f32 %v46604_v58, %v46620_v35  ;;  %v46607_v21 = vmax.f32 %v46587_v18, %v46603_v29  ;;  %v46625_v50 = vmax.f32 %v46605_v32, %v46621_v10  ;;  %v61937_v35 = vld [vmem:[#allocation100_spill] sm:$0xff] }
 0xcaa   :  { %v46616_v39 = vsel %vm167_vm4, %v46613_v36, %v46615_v33  ;;  %v46619_v1 = vsel %vm167_vm4, %v46615_v33, %v46609_v63  ;;  %v61935_v63 = vld [vmem:[#allocation81_spill] sm:$0xff] }
 0xcab   :  { %v46622_v61 = vmul.f32 %v46616_v39, %v61934_v56  ;;  %v46623_v33 = vmul.f32 %v46619_v1, %v61935_v63  ;;  %v61939_v39 = vld [vmem:[#allocation114_spill] sm:$0xff] }
 0xcad   :  { %v46631_v13 = vpop.permute.xlu1 %46630  ;;  %v46626_v10 = vmax.f32 %v46606_v15, %v46622_v61 }
 0xcae   :  { %v46638_v0 = vsel %vm207_vm5, %v46629_v37, %v46631_v13  ;;  %v46637_v55 = vsel %vm207_vm5, %v46631_v13, %v46633_v48  ;;  %v61933_v13 = vld [vmem:[#allocation99_spill] sm:$0xff] }
 0xcaf   :  { %v46640_v9 = vmul.f32 %v46638_v0, %v61932_v53  ;;  %v46641_v38 = vmul.f32 %v46637_v55, %v61933_v13  ;;  %v61940_v13 = vld [vmem:[#allocation117_spill] sm:$0xff] }
 0xcb1   :  { %v46635_v51 = vpop.permute.xlu1 %46634  ;;  %v46644_v28 = vmax.f32 %v46624_v62, %v46640_v9  ;;  %v46645_v58 = vmax.f32 %v46625_v50, %v46641_v38  ;;  %v61941_v62 = vld [vmem:[#allocation115_spill] sm:$0xff] }
 0xcb2   :  { %v46636_v44 = vsel %vm207_vm5, %v46633_v48, %v46635_v51  ;;  %v46639_v36 = vsel %vm207_vm5, %v46635_v51, %v46629_v37  ;;  %v61938_v37 = vld [vmem:[#allocation116_spill] sm:$0xff]  ;;  %v46627_v51 = vmax.f32 %v46607_v21, %v46623_v33 }
 0xcb3   :  { %v46642_v2 = vmul.f32 %v46636_v44, %v61936_v24  ;;  %v46643_v55 = vmul.f32 %v46639_v36, %v61937_v35  ;;  %v55485_v35 = vld [vmem:[%s61170_s4 + $0x8] sm:$0xff] }
 0xcb5   :  { %v46651_v0 = vpop.permute.xlu1 %46650  ;;  %v46646_v9 = vmax.f32 %v46626_v10, %v46642_v2  ;;  %v46647_v32 = vmax.f32 %v46627_v51, %v46643_v55 }
 0xcb6   :  { %v46657_v11 = vsel %vm247_vm6, %v46651_v0, %v46653_v31  ;;  %v46658_v48 = vsel %vm247_vm6, %v46649_v43, %v46651_v0 }
 0xcb7   :  { %v46660_v40 = vmul.f32 %v46658_v48, %v61938_v37  ;;  %v46661_v29 = vmul.f32 %v46657_v11, %v61939_v39  ;;  %v46824_v39 = vsel %vm280_vm0, %v55485_v35, 0 }
 0xcb9   :  { %v60284_v52 = vmax.f32 %v46644_v28, %v46660_v40  ;;  %v60286_v1 = vmax.f32 %v46645_v58, %v46661_v29  ;;  %v46655_v53 = vpop.permute.xlu1 %46654 }
 0xcba   :  { %v46656_v18 = vsel %vm247_vm6, %v46653_v31, %v46655_v53  ;;  %v46659_v38 = vsel %vm247_vm6, %v46655_v53, %v46649_v43 }
 0xcbb   :  { %v46662_v44 = vmul.f32 %v46656_v18, %v61940_v13  ;;  %v46663_v36 = vmul.f32 %v46659_v38, %v61941_v62  ;;  %46668 = vrot.lane.b32.xlu0 %v60284_v52, %s56872_s24  ;;  %46670 = vrot.lane.b32.xlu1 %v60286_v1, %s56872_s24  ;;  %v60363_v38 = vand.u32 4294901760, %v46824_v39 }
 0xcbd   :  { %v60298_v61 = vmax.f32 %v46646_v9, %v46662_v44  ;;  %v60300_v15 = vmax.f32 %v46647_v32, %v46663_v36 }
 0xcbf   :  { %46674 = vrot.lane.b32.xlu0 %v60300_v15, %s56872_s24  ;;  %46672 = vrot.lane.b32.xlu1 %v60298_v61, %s56872_s24 }
 0xcc3   :  { %46688 = vrot.lane.b32.xlu0 %v60284_v52, %s56873_s21  ;;  %46690 = vrot.lane.b32.xlu1 %v60286_v1, %s56873_s21 }
 0xcc7   :  { %46694 = vrot.lane.b32.xlu0 %v60300_v15, %s56873_s21  ;;  %46692 = vrot.lane.b32.xlu1 %v60298_v61, %s56873_s21 }
 0xccb   :  { %46708 = vrot.lane.b32.xlu0 %v60284_v52, %s56874_s20  ;;  %46710 = vrot.lane.b32.xlu1 %v60286_v1, %s56874_s20 }
 0xccf   :  { %46714 = vrot.lane.b32.xlu0 %v60300_v15, %s56874_s20  ;;  %46712 = vrot.lane.b32.xlu1 %v60298_v61, %s56874_s20 }
 0xcd3   :  { %46728 = vrot.lane.b32.xlu0 %v60284_v52, %s56875_s23  ;;  %46730 = vrot.lane.b32.xlu1 %v60286_v1, %s56875_s23 }
 0xcd7   :  { %46732 = vrot.lane.b32.xlu0 %v60298_v61, %s56875_s23  ;;  %46734 = vrot.lane.b32.xlu1 %v60300_v15, %s56875_s23 }
 0xcdb   :  { %46748 = vrot.lane.b32.xlu0 %v60284_v52, %s56876_s26  ;;  %46750 = vrot.lane.b32.xlu1 %v60286_v1, %s56876_s26 }
 0xcdf   :  { %46752 = vrot.lane.b32.xlu0 %v60298_v61, %s56876_s26  ;;  %46754 = vrot.lane.b32.xlu1 %v60300_v15, %s56876_s26 }
 0xce3   :  { %46768 = vrot.lane.b32.xlu0 %v60284_v52, %s56877_s1  ;;  %46770 = vrot.lane.b32.xlu1 %v60286_v1, %s56877_s1 }
 0xce7   :  { %46772 = vrot.lane.b32.xlu0 %v60298_v61, %s56877_s1  ;;  %46774 = vrot.lane.b32.xlu1 %v60300_v15, %s56877_s1 }
 0xd2d   :  { %v46669_v43 = vpop.permute.xlu0 %46668  ;;  %v46671_v31 = vpop.permute.xlu1 %46670 }
 0xd2e   :  { %v46678_v55 = vsel %vm6850_vm7, %v46669_v43, %v46671_v31 }
 0xd2f   :  { %v46681_v53 = vmul.f32 %v46678_v55, %v59983_v19 }
 0xd31   :  { %v46675_v21 = vpop.permute.xlu0 %46674  ;;  %v46673_v50 = vpop.permute.xlu1 %46672 }
 0xd32   :  { %v46679_v29 = vsel %vm6850_vm7, %v46675_v21, %v46669_v43  ;;  %v46677_v10 = vsel %vm6850_vm7, %v46671_v31, %v46673_v50  ;;  %v46676_v51 = vsel %vm6850_vm7, %v46673_v50, %v46675_v21  ;;  %v46685_v50 = vmax.f32 %v60286_v1, %v46681_v53 }
 0xd33   :  { %v46680_v32 = vmul.f32 %v46679_v29, %v59991_v25  ;;  %v46682_v13 = vmul.f32 %v46677_v10, %v59988_v16  ;;  %v46683_v36 = vmul.f32 %v46676_v51, %v59994_v7  ;;  %v60378_v16 = vsub.f32 %v46824_v39, %v60363_v38 }
 0xd35   :  { %v46689_v33 = vpop.permute.xlu0 %46688  ;;  %v46691_v0 = vpop.permute.xlu1 %46690  ;;  %v46684_v7 = vmax.f32 %v60284_v52, %v46680_v32  ;;  %v46687_v55 = vmax.f32 %v60300_v15, %v46683_v36 }
 0xd36   :  { %v46698_v9 = vsel %vm13458_vm8, %v46689_v33, %v46691_v0 }
 0xd37   :  { %v46701_v19 = vmul.f32 %v46698_v9, %v60019_v14 }
 0xd39   :  { %v46695_v28 = vpop.permute.xlu0 %46694  ;;  %v46693_v24 = vpop.permute.xlu1 %46692  ;;  %v46705_v52 = vmax.f32 %v46685_v50, %v46701_v19 }
 0xd3a   :  { %v46699_v18 = vsel %vm13458_vm8, %v46695_v28, %v46689_v33  ;;  %v46697_v43 = vsel %vm13458_vm8, %v46691_v0, %v46693_v24  ;;  %v46696_v25 = vsel %vm13458_vm8, %v46693_v24, %v46695_v28  ;;  %v46686_v33 = vmax.f32 %v60298_v61, %v46682_v13 }
 0xd3b   :  { %v46700_v31 = vmul.f32 %v46699_v18, %v60006_v47  ;;  %v46702_v0 = vmul.f32 %v46697_v43, %v60014_v59  ;;  %v46703_v61 = vmul.f32 %v46696_v25, %v60024_v49 }
 0xd3d   :  { %v46709_v2 = vpop.permute.xlu0 %46708  ;;  %v46711_v11 = vpop.permute.xlu1 %46710  ;;  %v46704_v39 = vmax.f32 %v46684_v7, %v46700_v31  ;;  %v46706_v10 = vmax.f32 %v46686_v33, %v46702_v0  ;;  %v60417_v31 = vand.u32 4294901760, %v60378_v16 }
 0xd3e   :  { %v46718_v47 = vsel %vm20067_vm9, %v46709_v2, %v46711_v11 }
 0xd41   :  { %v46715_v48 = vpop.permute.xlu0 %46714  ;;  %v46713_v58 = vpop.permute.xlu1 %46712 }
 0xd42   :  { %v46719_v21 = vsel %vm20067_vm9, %v46715_v48, %v46709_v2  ;;  %v46717_v28 = vsel %vm20067_vm9, %v46711_v11, %v46713_v58  ;;  %v46716_v59 = vsel %vm20067_vm9, %v46713_v58, %v46715_v48  ;;  %v46721_v2 = vmul.f32 %v46718_v47, %v60045_v17 }
 0xd43   :  { %v46720_v1 = vmul.f32 %v46719_v21, %v60027_v27  ;;  %v46722_v51 = vmul.f32 %v46717_v28, %v60036_v60  ;;  %v46723_v18 = vmul.f32 %v46716_v59, %v60040_v30 }
 0xd44   :  { %v46725_v43 = vmax.f32 %v46705_v52, %v46721_v2 }
 0xd45   :  { %v46729_v37 = vpop.permute.xlu0 %46728  ;;  %v46731_v40 = vpop.permute.xlu1 %46730  ;;  %v46724_v9 = vmax.f32 %v46704_v39, %v46720_v1  ;;  %v46726_v21 = vmax.f32 %v46706_v10, %v46722_v51 }
 0xd46   :  { %v46738_v24 = vsel %vm33245_vm10, %v46729_v37, %v46731_v40 }
 0xd47   :  { %v46740_v53 = vmul.f32 %v46738_v24, %v60067_v57 }
 0xd49   :  { %v46733_v44 = vpop.permute.xlu0 %46732  ;;  %v46735_v62 = vpop.permute.xlu1 %46734  ;;  %v46744_v50 = vmax.f32 %v46724_v9, %v46740_v53 }
 0xd4a   :  { %v46737_v15 = vsel %vm33245_vm10, %v46731_v40, %v46733_v44  ;;  %v46736_v29 = vsel %vm33245_vm10, %v46733_v44, %v46735_v62  ;;  %v46739_v49 = vsel %vm33245_vm10, %v46735_v62, %v46729_v37  ;;  %v46707_v62 = vmax.f32 %v46687_v55, %v46703_v61 }
 0xd4b   :  { %v46741_v13 = vmul.f32 %v46737_v15, %v60076_v20  ;;  %v46742_v44 = vmul.f32 %v46736_v29, %v60084_v54  ;;  %v46743_v19 = vmul.f32 %v46739_v49, %v60094_v4 }
 0xd4c   :  { %v46727_v47 = vmax.f32 %v46707_v62, %v46723_v18 }
 0xd4d   :  { %v46749_v14 = vpop.permute.xlu0 %46748  ;;  %v46751_v35 = vpop.permute.xlu1 %46750  ;;  %v46746_v55 = vmax.f32 %v46726_v21, %v46742_v44 }
 0xd4e   :  { %v46758_v11 = vsel %vm39854_vm11, %v46749_v14, %v46751_v35  ;;  %v46747_v24 = vmax.f32 %v46727_v47, %v46743_v19 }
 0xd4f   :  { %v46760_v36 = vmul.f32 %v46758_v11, %v60087_v46 }
 0xd51   :  { %v46753_v48 = vpop.permute.xlu0 %46752  ;;  %v46755_v58 = vpop.permute.xlu1 %46754  ;;  %v46764_v1 = vmax.f32 %v46744_v50, %v46760_v36 }
 0xd52   :  { %v46757_v40 = vsel %vm39854_vm11, %v46751_v35, %v46753_v48  ;;  %v46756_v32 = vsel %vm39854_vm11, %v46753_v48, %v46755_v58  ;;  %v46759_v37 = vsel %vm39854_vm11, %v46755_v58, %v46749_v14  ;;  %v46745_v35 = vmax.f32 %v46725_v43, %v46741_v13 }
 0xd53   :  { %v46761_v25 = vmul.f32 %v46757_v40, %v60099_v3  ;;  %v46762_v7 = vmul.f32 %v46756_v32, %v60111_v41  ;;  %v46763_v46 = vmul.f32 %v46759_v37, %v60120_v26  ;;  %v46896_v41 = vsub.f32 %v60378_v16, %v60417_v31 }
 0xd55   :  { %v46769_v33 = vpop.permute.xlu0 %46768  ;;  %v46771_v0 = vpop.permute.xlu1 %46770  ;;  %v46765_v52 = vmax.f32 %v46745_v35, %v46761_v25  ;;  %v46766_v39 = vmax.f32 %v46746_v55, %v46762_v7  ;;  %v46767_v2 = vmax.f32 %v46747_v24, %v46763_v46 }
 0xd56   :  { %v46778_v14 = vsel %vm46463_vm12, %v46769_v33, %v46771_v0 }
 0xd57   :  { %v46780_v28 = vmul.f32 %v46778_v14, %v60115_v12 }
 0xd59   :  { %v46784_v61 = vmax.f32 %v46764_v1, %v46780_v28  ;;  %v46773_v3 = vpop.permute.xlu0 %46772  ;;  %v46775_v59 = vpop.permute.xlu1 %46774 }
 0xd5a   :  { %v46777_v26 = vsel %vm46463_vm12, %v46771_v0, %v46773_v3  ;;  %v46776_v15 = vsel %vm46463_vm12, %v46773_v3, %v46775_v59  ;;  %v46779_v29 = vsel %vm46463_vm12, %v46775_v59, %v46769_v33 }
 0xd5b   :  { %v60433_v12 = vand.u32 4294901760, %v46784_v61  ;;  %v46781_v11 = vmul.f32 %v46777_v26, %v60132_v5  ;;  %v46782_v10 = vmul.f32 %v46776_v15, %v60137_v42  ;;  %v46783_v51 = vmul.f32 %v46779_v29, %v60140_v8  ;;  %46788 = vrot.lane.b32.xlu0 %v46784_v61, %s56868_s0  ;;  %v61942_v15 = vld [vmem:[#allocation48_spill] sm:$0xff] }
 0xd5c   :  { %v46897_v5 = vand.u32 4294901760, %v46896_v41 }
 0xd5d   :  { %v60440_v53 = vsub.f32 %v46784_v61, %v60433_v12  ;;  %v46785_v49 = vmax.f32 %v46765_v52, %v46781_v11  ;;  %v46786_v48 = vmax.f32 %v46766_v39, %v46782_v10  ;;  %v46787_v58 = vmax.f32 %v46767_v2, %v46783_v51 }
 0xd5f   :  { %v60442_v9 = vand.u32 4294901760, %v46785_v49  ;;  %v60444_v18 = vand.u32 4294901760, %v46787_v58  ;;  %v60446_v40 = vand.u32 4294901760, %v46786_v48  ;;  %46790 = vrot.lane.b32.xlu1 %v46785_v49, %s56868_s0  ;;  %46792 = vrot.lane.b32.xlu0 %v46786_v48, %s56868_s0  ;;  %v60451_v42 = vand.u32 4294901760, %v60440_v53 }
 0xd61   :  { %v60454_v8 = vsub.f32 %v46785_v49, %v60442_v9  ;;  %v60457_v32 = vsub.f32 %v46787_v58, %v60444_v18  ;;  %v60460_v13 = vsub.f32 %v46786_v48, %v60446_v40  ;;  %46827 = vmatprep.subr.mxu0 %v60442_v9  ;;  %47292 = vmatprep.subr.mxu1 %v60444_v18 }
 0xd62   :  { %46829 = vmatpush1.msra.mxu0 %v60433_v12  ;;  %47294 = vmatpush1.msra.mxu1 %v60446_v40  ;;  %v46913_v62 = vsub.f32 %v60440_v53, %v60451_v42 }
 0xd63   :  { %46898 = vmatmul.mubr.f32.vlgmr.msra.gmra.mrb[14].mxu0 %v46897_v5  ;;  %46794 = vrot.lane.b32.xlu1 %v46787_v58, %s56868_s0  ;;  %v60468_v44 = vand.u32 4294901760, %v60454_v8  ;;  %v60471_v36 = vand.u32 4294901760, %v60457_v32  ;;  %v60474_v37 = vand.u32 4294901760, %v60460_v13 }
 0xd64   :  { %46806 = vrot.lane.b32.xlu0 %v46785_v49, %s56869_s19  ;;  %47363 = vmatmul.mubr.f32.vlgmr.msra.gmra.mrb[14].mxu1 %v46897_v5  ;;  %v60495_v33 = vand.u32 4294901760, %v46913_v62 }
 0xd65   :  { %v46907_v43 = vsub.f32 %v60454_v8, %v60468_v44  ;;  %v47372_v19 = vsub.f32 %v60457_v32, %v60471_v36  ;;  %46978 = vmatprep.mubr.f32.mxu0 %v61489_v23  ;;  %v47378_v21 = vsub.f32 %v60460_v13, %v60474_v37  ;;  %47443 = vmatprep.mubr.f32.mxu1 %v61489_v23 }
 0xd67   :  { %46808 = vrot.lane.b32.xlu1 %v46786_v48, %s56869_s19  ;;  %v60488_v50 = vand.u32 4294901760, %v46907_v43  ;;  %v60490_v25 = vand.u32 4294901760, %v47372_v19  ;;  %v60492_v7 = vand.u32 4294901760, %v47378_v21 }
 0xd68   :  { %46804 = vrot.lane.b32.xlu0 %v46784_v61, %s56869_s19 }
 0xd69   :  { %46909 = vmatprep.subr.mxu0 %v60488_v50  ;;  %47374 = vmatprep.subr.mxu1 %v60490_v25 }
 0xd6a   :  { %46915 = vmatpush1.msra.mxu0 %v60495_v33  ;;  %47380 = vmatpush1.msra.mxu1 %v60492_v7 }
 0xd6b   :  { %46980 = vmatmul.mubr.f32.vlgmr.msra.gmra.mrb[14].mxu0 %v60363_v38  ;;  %46988 = vmatprep.subr.mxu0 %v60454_v8 }
 0xd6c   :  { %46810 = vrot.lane.b32.xlu1 %v46787_v58, %s56869_s19  ;;  %47445 = vmatmul.mubr.f32.vlgmr.msra.gmra.mrb[14].mxu1 %v60363_v38 }
 0xd6d   :  { %47453 = vmatprep.subr.mxu1 %v60457_v32  ;;  %46991 = vmatpush1.msra.mxu0 %v60440_v53 }
 0xd6e   :  { %47456 = vmatpush1.msra.mxu1 %v60460_v13  ;;  %47064 = vmatprep.subr.mxu0 %v60442_v9 }
 0xd6f   :  { %47529 = vmatprep.subr.mxu1 %v60444_v18  ;;  %47054 = vmatprep.mubr.f32.mxu0 %v61489_v23 }
 0xd70   :  { %47519 = vmatprep.mubr.f32.mxu1 %v61489_v23 }
 0xd73   :  { %47057 = vmatmul.mubr.f32.vlgmr.msra.gmra.mrb[14].mxu0 %v60378_v16 }
 0xd74   :  { %47066 = vmatpush1.msra.mxu0 %v60433_v12  ;;  %47522 = vmatmul.mubr.f32.vlgmr.msra.gmra.mrb[14].mxu1 %v60378_v16  ;;  %v46820_v16 = vld [vmem:[%s61170_s4] sm:$0xff] }
 0xd75   :  { %47531 = vmatpush1.msra.mxu1 %v60446_v40  ;;  %47142 = vmatprep.subr.mxu0 %v60468_v44 }
 0xd76   :  { %47607 = vmatprep.subr.mxu1 %v60471_v36  ;;  %47129 = vmatprep.mubr.f32.mxu0 %v61489_v23 }
 0xd77   :  { %47594 = vmatprep.mubr.f32.mxu1 %v61489_v23 }
 0xd7b   :  { %47133 = vmatmul.mubr.f32.vlgmr.msra.gmra.mrb[14].mxu0 %v60417_v31 }
 0xd7c   :  { %47146 = vmatpush1.msra.mxu0 %v60451_v42  ;;  %47598 = vmatmul.mubr.f32.vlgmr.msra.gmra.mrb[14].mxu1 %v60417_v31  ;;  %v47757_v31 = vsel %vm280_vm0, %v46820_v16, 0 }
 0xd7d   :  { %47611 = vmatpush1.msra.mxu1 %v60474_v37  ;;  %47218 = vmatprep.subr.mxu0 %v60442_v9  ;;  %v60542_v0 = vand.u32 4294901760, %v47757_v31 }
 0xd7e   :  { %47683 = vmatprep.subr.mxu1 %v60444_v18  ;;  %47209 = vmatprep.mubr.f32.mxu0 %v61489_v23 }
 0xd7f   :  { %47674 = vmatprep.mubr.f32.mxu1 %v61489_v23  ;;  %v60545_v47 = vsub.f32 %v47757_v31, %v60542_v0 }
 0xd81   :  { %v60548_v14 = vand.u32 4294901760, %v60545_v47 }
 0xd83   :  { %47211 = vmatmul.mubr.f32.vlgmr.msra.gmra.mrb[14].mxu0 %v60363_v38  ;;  %v47829_v52 = vsub.f32 %v60545_v47, %v60548_v14 }
 0xd84   :  { %47220 = vmatpush1.msra.mxu0 %v60433_v12  ;;  %47676 = vmatmul.mubr.f32.vlgmr.msra.gmra.mrb[14].mxu1 %v60363_v38 }
 0xd85   :  { %47685 = vmatpush1.msra.mxu1 %v60446_v40  ;;  %47283 = vmatprep.mubr.f32.mxu0 %v61489_v23  ;;  %v47830_v10 = vand.u32 4294901760, %v47829_v52 }
 0xd86   :  { %47748 = vmatprep.mubr.f32.mxu1 %v61489_v23 }
 0xd8b   :  { %47285 = vmatmul.mubr.f32.vlgmr.msra.gmra.mrb[14].mxu0 %v60363_v38 }
 0xd8c   :  { %47750 = vmatmul.mubr.f32.vlgmr.msra.gmra.mrb[14].mxu1 %v60363_v38  ;;  %47825 = vmatprep.mubr.f32.mxu0 %v61489_v23 }
 0xd8d   :  { %48290 = vmatprep.mubr.f32.mxu1 %v61489_v23 }
 0xdcd   :  { %v46789_v46 = vpop.permute.xlu0 %46788 }
 0xdd1   :  { %v46793_v38 = vpop.permute.xlu0 %46792  ;;  %v46791_v35 = vpop.permute.xlu1 %46790 }
 0xdd2   :  { %v46797_v55 = vsel %vm127_vm3, %v46791_v35, %v46793_v38  ;;  %v46798_v1 = vsel %vm127_vm3, %v46789_v46, %v46791_v35 }
 0xdd3   :  { %v46801_v28 = vmul.f32 %v46798_v1, %v61927_v34  ;;  %v46802_v24 = vmul.f32 %v46797_v55, %v61929_v6 }
 0xdd5   :  { %v60558_v39 = vand.u32 4294901760, %v46801_v28  ;;  %v60560_v61 = vand.u32 4294901760, %v46802_v24  ;;  %v46795_v3 = vpop.permute.xlu1 %46794 }
 0xdd6   :  { %v46796_v59 = vsel %vm127_vm3, %v46793_v38, %v46795_v3  ;;  %v46799_v41 = vsel %vm127_vm3, %v46795_v3, %v46789_v46 }
 0xdd7   :  { %v60567_v2 = vsub.f32 %v46801_v28, %v60558_v39  ;;  %v60570_v26 = vsub.f32 %v46802_v24, %v60560_v61  ;;  %v46800_v29 = vmul.f32 %v46799_v41, %v61942_v15  ;;  %v46803_v11 = vmul.f32 %v46796_v59, %v61930_v22  ;;  %47760 = vmatprep.subr.mxu0 %v60558_v39  ;;  %v46807_v24 = vpop.permute.xlu0 %46806 }
 0xdd9   :  { %v60575_v51 = vand.u32 4294901760, %v46800_v29  ;;  %v60577_v49 = vand.u32 4294901760, %v46803_v11  ;;  %v60580_v48 = vand.u32 4294901760, %v60567_v2  ;;  %v60590_v62 = vand.u32 4294901760, %v60570_v26  ;;  %v46809_v28 = vpop.permute.xlu1 %46808 }
 0xdda   :  { %v46813_v3 = vsel %vm167_vm4, %v46807_v24, %v46809_v28 }
 0xddb   :  { %v60583_v58 = vsub.f32 %v46800_v29, %v60575_v51  ;;  %v60586_v5 = vsub.f32 %v46803_v11, %v60577_v49  ;;  %47762 = vmatpush1.msra.mxu0 %v60575_v51  ;;  %48225 = vmatprep.subr.mxu1 %v60577_v49  ;;  %v47840_v43 = vsub.f32 %v60567_v2, %v60580_v48  ;;  %v46805_v59 = vpop.permute.xlu0 %46804  ;;  %v61943_v29 = vld [vmem:[#allocation80_spill] sm:$0xff] }
 0xddc   :  { %47831 = vmatmul.mubr.f32.vlgmr.msra.gmra.mrb[14].mxu0 %v47830_v10  ;;  %48227 = vmatpush1.msra.mxu1 %v60560_v61  ;;  %v48311_v46 = vsub.f32 %v60570_v26, %v60590_v62  ;;  %v46817_v11 = vmul.f32 %v46813_v3, %v61943_v29 }
 0xddd   :  { %v60597_v19 = vand.u32 4294901760, %v60583_v58  ;;  %47911 = vmatprep.mubr.f32.mxu0 %v61489_v23  ;;  %v60601_v21 = vand.u32 4294901760, %v60586_v5  ;;  %48296 = vmatmul.mubr.f32.vlgmr.msra.gmra.mrb[14].mxu1 %v47830_v10  ;;  %v60603_v16 = vand.u32 4294901760, %v47840_v43  ;;  %v55486_v43 = vld [vmem:[%s61170_s4 + $0x10] sm:$0xff] }
 0xdde   :  { %48376 = vmatprep.mubr.f32.mxu1 %v61489_v23  ;;  %v60618_v1 = vand.u32 4294901760, %v48311_v46  ;;  %v46811_v52 = vpop.permute.xlu1 %46810  ;;  %v48692_v46 = vsel %vm280_vm0, %v55486_v43, 0 }
 0xddf   :  { %v47846_v31 = vsub.f32 %v60583_v58, %v60597_v19  ;;  %47842 = vmatprep.subr.mxu0 %v60603_v16  ;;  %v48305_v38 = vsub.f32 %v60586_v5, %v60601_v21  ;;  %v46815_v41 = vsel %vm167_vm4, %v46811_v52, %v46805_v59  ;;  %v60670_v43 = vand.u32 4294901760, %v48692_v46 }
 0xde0   :  { %v46819_v10 = vmul.f32 %v46815_v41, %v61935_v63 }
 0xde1   :  { %v60613_v35 = vand.u32 4294901760, %v47846_v31  ;;  %v60615_v55 = vand.u32 4294901760, %v48305_v38  ;;  %v60651_v31 = vand.u32 4294901760, %v46817_v11  ;;  %v46812_v38 = vsel %vm167_vm4, %v46809_v28, %v46811_v52 }
 0xde2   :  { %v60659_v3 = vand.u32 4294901760, %v46819_v10  ;;  %v46818_v28 = vmul.f32 %v46812_v38, %v61934_v56 }
 0xde3   :  { %47848 = vmatpush1.msra.mxu0 %v60613_v35  ;;  %48307 = vmatprep.subr.mxu1 %v60615_v55  ;;  %v60667_v41 = vsub.f32 %v46817_v11, %v60651_v31 }
 0xde4   :  { %47913 = vmatmul.mubr.f32.vlgmr.msra.gmra.mrb[14].mxu0 %v60542_v0  ;;  %47921 = vmatprep.subr.mxu0 %v60567_v2  ;;  %v60674_v52 = vsub.f32 %v46819_v10, %v60659_v3  ;;  %v60683_v11 = vand.u32 4294901760, %v46818_v28 }
 0xde5   :  { %48313 = vmatpush1.msra.mxu1 %v60618_v1  ;;  %47924 = vmatpush1.msra.mxu0 %v60583_v58 }
 0xde6   :  { %48378 = vmatmul.mubr.f32.vlgmr.msra.gmra.mrb[14].mxu1 %v60542_v0  ;;  %48386 = vmatprep.subr.mxu1 %v60586_v5  ;;  %v60690_v10 = vand.u32 4294901760, %v60674_v52  ;;  %v60701_v29 = vsub.f32 %v46818_v28, %v60683_v11 }
 0xde7   :  { %47997 = vmatprep.subr.mxu0 %v60558_v39  ;;  %48389 = vmatpush1.msra.mxu1 %v60570_v26 }
 0xde8   :  { %47987 = vmatprep.mubr.f32.mxu0 %v61489_v23  ;;  %48462 = vmatprep.subr.mxu1 %v60577_v49  ;;  %v49240_v22 = vsub.f32 %v60674_v52, %v60690_v10  ;;  %v60714_v34 = vand.u32 4294901760, %v60701_v29 }
 0xde9   :  { %48452 = vmatprep.mubr.f32.mxu1 %v61489_v23 }
 0xdea   :  { %v60718_v28 = vand.u32 4294901760, %v49240_v22  ;;  %v49246_v4 = vsub.f32 %v60701_v29, %v60714_v34 }
 0xdec   :  { %47990 = vmatmul.mubr.f32.vlgmr.msra.gmra.mrb[14].mxu0 %v60545_v47  ;;  %v60730_v22 = vand.u32 4294901760, %v49246_v4  ;;  %v55488_v4 = vld [vmem:[%s61170_s4 + $0x20] sm:$0xff] }
 0xded   :  { %47999 = vmatpush1.msra.mxu0 %v60575_v51  ;;  %48062 = vmatprep.mubr.f32.mxu0 %v61489_v23 }
 0xdee   :  { %48075 = vmatprep.subr.mxu0 %v60580_v48  ;;  %48455 = vmatmul.mubr.f32.vlgmr.msra.gmra.mrb[14].mxu1 %v60545_v47  ;;  %v46814_v47 = vsel %vm167_vm4, %v46805_v59, %v46807_v24  ;;  %v61944_v24 = vld [vmem:[#allocation82_spill] sm:$0xff] }
 0xdef   :  { %48464 = vmatpush1.msra.mxu1 %v60560_v61  ;;  %48527 = vmatprep.mubr.f32.mxu1 %v61489_v23  ;;  %v46816_v59 = vmul.f32 %v46814_v47, %v61944_v24  ;;  %v48762_v47 = vsub.f32 %v48692_v46, %v60670_v43 }
 0xdf0   :  { %48540 = vmatprep.subr.mxu1 %v60601_v21 }
 0xdf1   :  { %v60676_v63 = vand.u32 4294901760, %v46816_v59  ;;  %v48763_v56 = vand.u32 4294901760, %v48762_v47 }
 0xdf3   :  { %v60693_v38 = vsub.f32 %v46816_v59, %v60676_v63  ;;  %v48764_v6 = vsub.f32 %v48762_v47, %v48763_v56 }
 0xdf4   :  { %48066 = vmatmul.mubr.f32.vlgmr.msra.gmra.mrb[14].mxu0 %v60548_v14 }
 0xdf5   :  { %48079 = vmatpush1.msra.mxu0 %v60597_v19  ;;  %48142 = vmatprep.mubr.f32.mxu0 %v61489_v23  ;;  %v60706_v24 = vand.u32 4294901760, %v60693_v38  ;;  %v48765_v15 = vand.u32 4294901760, %v48764_v6  ;;  %v49653_v6 = vsel %vm280_vm0, %v55488_v4, 0 }
 0xdf6   :  { %48151 = vmatprep.subr.mxu0 %v60558_v39  ;;  %48531 = vmatmul.mubr.f32.vlgmr.msra.gmra.mrb[14].mxu1 %v60548_v14  ;;  %v60680_v14 = vand.u32 4294901760, %v60667_v41 }
 0xdf7   :  { %48544 = vmatpush1.msra.mxu1 %v60590_v62  ;;  %48607 = vmatprep.mubr.f32.mxu1 %v61489_v23 }
 0xdf8   :  { %48616 = vmatprep.subr.mxu1 %v60577_v49  ;;  %v48775_v46 = vsub.f32 %v60667_v41, %v60680_v14 }
 0xdfa   :  { %v60709_v59 = vand.u32 4294901760, %v48775_v46  ;;  %v48781_v46 = vsub.f32 %v60693_v38, %v60706_v24 }
 0xdfc   :  { %48144 = vmatmul.mubr.f32.vlgmr.msra.gmra.mrb[14].mxu0 %v60542_v0  ;;  %v60727_v54 = vand.u32 4294901760, %v48781_v46 }
 0xdfd   :  { %48153 = vmatpush1.msra.mxu0 %v60575_v51  ;;  %48216 = vmatprep.mubr.f32.mxu0 %v61489_v23 }
 0xdfe   :  { %48609 = vmatmul.mubr.f32.vlgmr.msra.gmra.mrb[14].mxu1 %v60542_v0  ;;  %48695 = vmatprep.subr.mxu0 %v60651_v31 }
 0xdff   :  { %48618 = vmatpush1.msra.mxu1 %v60560_v61  ;;  %48681 = vmatprep.mubr.f32.mxu1 %v61489_v23 }
 0xe00   :  { %49160 = vmatprep.subr.mxu1 %v60659_v3 }
 0xe04   :  { %48218 = vmatmul.mubr.f32.vlgmr.msra.gmra.mrb[14].mxu0 %v60542_v0 }
 0xe05   :  { %48697 = vmatpush1.msra.mxu0 %v60676_v63  ;;  %48760 = vmatprep.mubr.f32.mxu0 %v61489_v23 }
 0xe06   :  { %48683 = vmatmul.mubr.f32.vlgmr.msra.gmra.mrb[14].mxu1 %v60542_v0  ;;  %48777 = vmatprep.subr.mxu0 %v60709_v59  ;;  %v60755_v0 = vand.u32 4294901760, %v49653_v6 }
 0xe07   :  { %49162 = vmatpush1.msra.mxu1 %v60683_v11  ;;  %49225 = vmatprep.mubr.f32.mxu1 %v61489_v23 }
 0xe08   :  { %49242 = vmatprep.subr.mxu1 %v60718_v28 }
 0xe0c   :  { %48766 = vmatmul.mubr.f32.vlgmr.msra.gmra.mrb[14].mxu0 %v48765_v15 }
 0xe0d   :  { %48783 = vmatpush1.msra.mxu0 %v60727_v54  ;;  %48846 = vmatprep.mubr.f32.mxu0 %v61489_v23 }
 0xe0e   :  { %48856 = vmatprep.subr.mxu0 %v60667_v41  ;;  %49231 = vmatmul.mubr.f32.vlgmr.msra.gmra.mrb[14].mxu1 %v48765_v15  ;;  %v49723_v15 = vsub.f32 %v49653_v6, %v60755_v0 }
 0xe0f   :  { %49248 = vmatpush1.msra.mxu1 %v60730_v22  ;;  %49311 = vmatprep.mubr.f32.mxu1 %v61489_v23 }
 0xe10   :  { %49321 = vmatprep.subr.mxu1 %v60674_v52 }
 0xe14   :  { %48848 = vmatmul.mubr.f32.vlgmr.msra.gmra.mrb[14].mxu0 %v60670_v43 }
 0xe15   :  { %48859 = vmatpush1.msra.mxu0 %v60693_v38  ;;  %48922 = vmatprep.mubr.f32.mxu0 %v61489_v23 }
 0xe16   :  { %48932 = vmatprep.subr.mxu0 %v60651_v31  ;;  %49313 = vmatmul.mubr.f32.vlgmr.msra.gmra.mrb[14].mxu1 %v60670_v43 }
 0xe17   :  { %49324 = vmatpush1.msra.mxu1 %v60701_v29  ;;  %49387 = vmatprep.mubr.f32.mxu1 %v61489_v23 }
 0xe18   :  { %49397 = vmatprep.subr.mxu1 %v60659_v3 }
 0xe1c   :  { %48925 = vmatmul.mubr.f32.vlgmr.msra.gmra.mrb[14].mxu0 %v48762_v47 }
 0xe1d   :  { %48934 = vmatpush1.msra.mxu0 %v60676_v63  ;;  %48997 = vmatprep.mubr.f32.mxu0 %v61489_v23 }
 0xe1e   :  { %49010 = vmatprep.subr.mxu0 %v60680_v14  ;;  %49390 = vmatmul.mubr.f32.vlgmr.msra.gmra.mrb[14].mxu1 %v48762_v47  ;;  %v49724_v47 = vand.u32 4294901760, %v49723_v15 }
 0xe1f   :  { %49399 = vmatpush1.msra.mxu1 %v60683_v11  ;;  %49462 = vmatprep.mubr.f32.mxu1 %v61489_v23 }
 0xe20   :  { %49475 = vmatprep.subr.mxu1 %v60690_v10 }
 0xe24   :  { %49001 = vmatmul.mubr.f32.vlgmr.msra.gmra.mrb[14].mxu0 %v48763_v56 }
 0xe25   :  { %49014 = vmatpush1.msra.mxu0 %v60706_v24  ;;  %49077 = vmatprep.mubr.f32.mxu0 %v61489_v23 }
 0xe26   :  { %49086 = vmatprep.subr.mxu0 %v60651_v31  ;;  %49466 = vmatmul.mubr.f32.vlgmr.msra.gmra.mrb[14].mxu1 %v48763_v56  ;;  %v49725_v56 = vsub.f32 %v49723_v15, %v49724_v47 }
 0xe27   :  { %49479 = vmatpush1.msra.mxu1 %v60714_v34  ;;  %49542 = vmatprep.mubr.f32.mxu1 %v61489_v23 }
 0xe28   :  { %49551 = vmatprep.subr.mxu1 %v60659_v3  ;;  %v49726_v46 = vand.u32 4294901760, %v49725_v56 }
 0xe2c   :  { %49079 = vmatmul.mubr.f32.vlgmr.msra.gmra.mrb[14].mxu0 %v60670_v43 }
 0xe2d   :  { %49088 = vmatpush1.msra.mxu0 %v60676_v63  ;;  %49151 = vmatprep.mubr.f32.mxu0 %v61489_v23 }
 0xe2e   :  { %49544 = vmatmul.mubr.f32.vlgmr.msra.gmra.mrb[14].mxu1 %v60670_v43  ;;  %49656 = vmatprep.subr.mxu0 %v60442_v9 }
 0xe2f   :  { %49553 = vmatpush1.msra.mxu1 %v60683_v11  ;;  %49616 = vmatprep.mubr.f32.mxu1 %v61489_v23 }
 0xe30   :  { %50121 = vmatprep.subr.mxu1 %v60444_v18 }
 0xe34   :  { %49153 = vmatmul.mubr.f32.vlgmr.msra.gmra.mrb[14].mxu0 %v60670_v43 }
 0xe35   :  { %49658 = vmatpush1.msra.mxu0 %v60433_v12  ;;  %49721 = vmatprep.mubr.f32.mxu0 %v61489_v23 }
 0xe36   :  { %49618 = vmatmul.mubr.f32.vlgmr.msra.gmra.mrb[14].mxu1 %v60670_v43  ;;  %49738 = vmatprep.subr.mxu0 %v60488_v50  ;;  %v55487_v43 = vld [vmem:[%s61170_s4 + $0x18] sm:$0xff] }
 0xe37   :  { %50123 = vmatpush1.msra.mxu1 %v60446_v40  ;;  %50186 = vmatprep.mubr.f32.mxu1 %v61489_v23  ;;  %v50586_v4 = vsel %vm280_vm0, %v55487_v43, 0 }
 0xe38   :  { %50203 = vmatprep.subr.mxu1 %v60490_v25  ;;  %49727 = vmatmul.mubr.f32.vlgmr.msra.gmra.mrb[16].mxu0 %v49726_v46  ;;  %v60810_v6 = vand.u32 4294901760, %v50586_v4 }
 0xe39   :  { %49744 = vmatpush1.msra.mxu0 %v60495_v33  ;;  %49807 = vmatprep.mubr.f32.mxu0 %v61489_v23 }
 0xe3a   :  { %49817 = vmatprep.subr.mxu0 %v60454_v8  ;;  %50192 = vmatmul.mubr.f32.vlgmr.msra.gmra.mrb[16].mxu1 %v49726_v46 }
 0xe3b   :  { %50209 = vmatpush1.msra.mxu1 %v60492_v7  ;;  %50272 = vmatprep.mubr.f32.mxu1 %v61489_v23 }
 0xe3c   :  { %50282 = vmatprep.subr.mxu1 %v60457_v32 }
 0xe40   :  { %49809 = vmatmul.mubr.f32.vlgmr.msra.gmra.mrb[16].mxu0 %v60755_v0 }
 0xe41   :  { %49820 = vmatpush1.msra.mxu0 %v60440_v53  ;;  %49883 = vmatprep.mubr.f32.mxu0 %v61489_v23 }
 0xe42   :  { %49893 = vmatprep.subr.mxu0 %v60442_v9  ;;  %50274 = vmatmul.mubr.f32.vlgmr.msra.gmra.mrb[16].mxu1 %v60755_v0 }
 0xe43   :  { %50285 = vmatpush1.msra.mxu1 %v60460_v13  ;;  %50348 = vmatprep.mubr.f32.mxu1 %v61489_v23 }
 0xe44   :  { %50358 = vmatprep.subr.mxu1 %v60444_v18 }
 0xe48   :  { %49886 = vmatmul.mubr.f32.vlgmr.msra.gmra.mrb[16].mxu0 %v49723_v15 }
 0xe49   :  { %49895 = vmatpush1.msra.mxu0 %v60433_v12  ;;  %49958 = vmatprep.mubr.f32.mxu0 %v61489_v23 }
 0xe4a   :  { %49971 = vmatprep.subr.mxu0 %v60468_v44  ;;  %50351 = vmatmul.mubr.f32.vlgmr.msra.gmra.mrb[16].mxu1 %v49723_v15  ;;  %v50656_v15 = vsub.f32 %v50586_v4, %v60810_v6 }
 0xe4b   :  { %50360 = vmatpush1.msra.mxu1 %v60446_v40  ;;  %50423 = vmatprep.mubr.f32.mxu1 %v61489_v23 }
 0xe4c   :  { %50436 = vmatprep.subr.mxu1 %v60471_v36 }
 0xe50   :  { %49962 = vmatmul.mubr.f32.vlgmr.msra.gmra.mrb[16].mxu0 %v49724_v47 }
 0xe51   :  { %49975 = vmatpush1.msra.mxu0 %v60451_v42  ;;  %50038 = vmatprep.mubr.f32.mxu0 %v61489_v23 }
 0xe52   :  { %50047 = vmatprep.subr.mxu0 %v60442_v9  ;;  %50427 = vmatmul.mubr.f32.vlgmr.msra.gmra.mrb[16].mxu1 %v49724_v47  ;;  %v50657_v47 = vand.u32 4294901760, %v50656_v15 }
 0xe53   :  { %50440 = vmatpush1.msra.mxu1 %v60474_v37  ;;  %50503 = vmatprep.mubr.f32.mxu1 %v61489_v23 }
 0xe54   :  { %50512 = vmatprep.subr.mxu1 %v60444_v18  ;;  %v50658_v56 = vsub.f32 %v50656_v15, %v50657_v47 }
 0xe56   :  { %v50659_v46 = vand.u32 4294901760, %v50658_v56 }
 0xe58   :  { %50040 = vmatmul.mubr.f32.vlgmr.msra.gmra.mrb[16].mxu0 %v60755_v0 }
 0xe59   :  { %50049 = vmatpush1.msra.mxu0 %v60433_v12  ;;  %50112 = vmatprep.mubr.f32.mxu0 %v61489_v23 }
 0xe5a   :  { %50505 = vmatmul.mubr.f32.vlgmr.msra.gmra.mrb[16].mxu1 %v60755_v0  ;;  %50589 = vmatprep.subr.mxu0 %v60558_v39 }
 0xe5b   :  { %50514 = vmatpush1.msra.mxu1 %v60446_v40  ;;  %50577 = vmatprep.mubr.f32.mxu1 %v61489_v23 }
 0xe5c   :  { %51054 = vmatprep.subr.mxu1 %v60577_v49 }
 0xe60   :  { %50114 = vmatmul.mubr.f32.vlgmr.msra.gmra.mrb[16].mxu0 %v60755_v0 }
 0xe61   :  { %50591 = vmatpush1.msra.mxu0 %v60575_v51  ;;  %50654 = vmatprep.mubr.f32.mxu0 %v61489_v23 }
 0xe62   :  { %50579 = vmatmul.mubr.f32.vlgmr.msra.gmra.mrb[16].mxu1 %v60755_v0  ;;  %50671 = vmatprep.subr.mxu0 %v60603_v16  ;;  %v55489_v0 = vld [vmem:[%s61170_s4 + $0x28] sm:$0xff] }
 0xe63   :  { %51056 = vmatpush1.msra.mxu1 %v60560_v61  ;;  %51119 = vmatprep.mubr.f32.mxu1 %v61489_v23  ;;  %v51521_v43 = vsel %vm280_vm0, %v55489_v0, 0 }
 0xe64   :  { %51136 = vmatprep.subr.mxu1 %v60615_v55  ;;  %v60859_v4 = vand.u32 4294901760, %v51521_v43 }
 0xe68   :  { %50660 = vmatmul.mubr.f32.vlgmr.msra.gmra.mrb[16].mxu0 %v50659_v46 }
 0xe69   :  { %50677 = vmatpush1.msra.mxu0 %v60613_v35  ;;  %50740 = vmatprep.mubr.f32.mxu0 %v61489_v23 }
 0xe6a   :  { %50750 = vmatprep.subr.mxu0 %v60567_v2  ;;  %51125 = vmatmul.mubr.f32.vlgmr.msra.gmra.mrb[16].mxu1 %v50659_v46 }
 0xe6b   :  { %51142 = vmatpush1.msra.mxu1 %v60618_v1  ;;  %51205 = vmatprep.mubr.f32.mxu1 %v61489_v23 }
 0xe6c   :  { %51215 = vmatprep.subr.mxu1 %v60586_v5 }
 0xe70   :  { %50742 = vmatmul.mubr.f32.vlgmr.msra.gmra.mrb[16].mxu0 %v60810_v6 }
 0xe71   :  { %50753 = vmatpush1.msra.mxu0 %v60583_v58  ;;  %50816 = vmatprep.mubr.f32.mxu0 %v61489_v23 }
 0xe72   :  { %50826 = vmatprep.subr.mxu0 %v60558_v39  ;;  %51207 = vmatmul.mubr.f32.vlgmr.msra.gmra.mrb[16].mxu1 %v60810_v6 }
 0xe73   :  { %51218 = vmatpush1.msra.mxu1 %v60570_v26  ;;  %51281 = vmatprep.mubr.f32.mxu1 %v61489_v23 }
 0xe74   :  { %51291 = vmatprep.subr.mxu1 %v60577_v49 }
 0xe78   :  { %50819 = vmatmul.mubr.f32.vlgmr.msra.gmra.mrb[16].mxu0 %v50656_v15 }
 0xe79   :  { %50828 = vmatpush1.msra.mxu0 %v60575_v51  ;;  %50891 = vmatprep.mubr.f32.mxu0 %v61489_v23 }
 0xe7a   :  { %50904 = vmatprep.subr.mxu0 %v60580_v48  ;;  %51284 = vmatmul.mubr.f32.vlgmr.msra.gmra.mrb[16].mxu1 %v50656_v15  ;;  %v51591_v15 = vsub.f32 %v51521_v43, %v60859_v4 }
 0xe7b   :  { %51293 = vmatpush1.msra.mxu1 %v60560_v61  ;;  %51356 = vmatprep.mubr.f32.mxu1 %v61489_v23 }
 0xe7c   :  { %51369 = vmatprep.subr.mxu1 %v60601_v21 }
 0xe80   :  { %50895 = vmatmul.mubr.f32.vlgmr.msra.gmra.mrb[16].mxu0 %v50657_v47 }
 0xe81   :  { %50908 = vmatpush1.msra.mxu0 %v60597_v19  ;;  %50971 = vmatprep.mubr.f32.mxu0 %v61489_v23 }
 0xe82   :  { %50980 = vmatprep.subr.mxu0 %v60558_v39  ;;  %51360 = vmatmul.mubr.f32.vlgmr.msra.gmra.mrb[16].mxu1 %v50657_v47  ;;  %v51592_v47 = vand.u32 4294901760, %v51591_v15 }
 0xe83   :  { %51373 = vmatpush1.msra.mxu1 %v60590_v62  ;;  %51436 = vmatprep.mubr.f32.mxu1 %v61489_v23 }
 0xe84   :  { %51445 = vmatprep.subr.mxu1 %v60577_v49  ;;  %v51593_v56 = vsub.f32 %v51591_v15, %v51592_v47 }
 0xe86   :  { %v51594_v46 = vand.u32 4294901760, %v51593_v56 }
 0xe88   :  { %50973 = vmatmul.mubr.f32.vlgmr.msra.gmra.mrb[16].mxu0 %v60810_v6 }
 0xe89   :  { %50982 = vmatpush1.msra.mxu0 %v60575_v51  ;;  %51045 = vmatprep.mubr.f32.mxu0 %v61489_v23 }
 0xe8a   :  { %51438 = vmatmul.mubr.f32.vlgmr.msra.gmra.mrb[16].mxu1 %v60810_v6  ;;  %51524 = vmatprep.subr.mxu0 %v60651_v31 }
 0xe8b   :  { %51447 = vmatpush1.msra.mxu1 %v60560_v61  ;;  %51510 = vmatprep.mubr.f32.mxu1 %v61489_v23 }
 0xe8c   :  { %51989 = vmatprep.subr.mxu1 %v60659_v3 }
 0xe90   :  { %51047 = vmatmul.mubr.f32.vlgmr.msra.gmra.mrb[16].mxu0 %v60810_v6 }
 0xe91   :  { %51526 = vmatpush1.msra.mxu0 %v60676_v63  ;;  %51589 = vmatprep.mubr.f32.mxu0 %v61489_v23 }
 0xe92   :  { %51512 = vmatmul.mubr.f32.vlgmr.msra.gmra.mrb[16].mxu1 %v60810_v6  ;;  %51606 = vmatprep.subr.mxu0 %v60709_v59  ;;  %v55491_v6 = vld [vmem:[%s61170_s4 + $0x38] sm:$0xff] }
 0xe93   :  { %51991 = vmatpush1.msra.mxu1 %v60683_v11  ;;  %52054 = vmatprep.mubr.f32.mxu1 %v61489_v23  ;;  %v52466_v0 = vsel %vm280_vm0, %v55491_v6, 0 }
 0xe94   :  { %52071 = vmatprep.subr.mxu1 %v60718_v28  ;;  %v60902_v43 = vand.u32 4294901760, %v52466_v0 }
 0xe98   :  { %51595 = vmatmul.mubr.f32.vlgmr.msra.gmra.mrb[16].mxu0 %v51594_v46 }
 0xe99   :  { %51612 = vmatpush1.msra.mxu0 %v60727_v54  ;;  %51675 = vmatprep.mubr.f32.mxu0 %v61489_v23 }
 0xe9a   :  { %51685 = vmatprep.subr.mxu0 %v60667_v41  ;;  %52060 = vmatmul.mubr.f32.vlgmr.msra.gmra.mrb[16].mxu1 %v51594_v46 }
 0xe9b   :  { %52077 = vmatpush1.msra.mxu1 %v60730_v22  ;;  %52140 = vmatprep.mubr.f32.mxu1 %v61489_v23 }
 0xe9c   :  { %52150 = vmatprep.subr.mxu1 %v60674_v52 }
 0xea0   :  { %51677 = vmatmul.mubr.f32.vlgmr.msra.gmra.mrb[16].mxu0 %v60859_v4 }
 0xea1   :  { %51688 = vmatpush1.msra.mxu0 %v60693_v38  ;;  %51751 = vmatprep.mubr.f32.mxu0 %v61489_v23 }
 0xea2   :  { %51761 = vmatprep.subr.mxu0 %v60651_v31  ;;  %52142 = vmatmul.mubr.f32.vlgmr.msra.gmra.mrb[16].mxu1 %v60859_v4 }
 0xea3   :  { %52153 = vmatpush1.msra.mxu1 %v60701_v29  ;;  %52216 = vmatprep.mubr.f32.mxu1 %v61489_v23 }
 0xea4   :  { %52226 = vmatprep.subr.mxu1 %v60659_v3 }
 0xea8   :  { %51754 = vmatmul.mubr.f32.vlgmr.msra.gmra.mrb[16].mxu0 %v51591_v15 }
 0xea9   :  { %51763 = vmatpush1.msra.mxu0 %v60676_v63  ;;  %51826 = vmatprep.mubr.f32.mxu0 %v61489_v23 }
 0xeaa   :  { %51839 = vmatprep.subr.mxu0 %v60680_v14  ;;  %52219 = vmatmul.mubr.f32.vlgmr.msra.gmra.mrb[16].mxu1 %v51591_v15  ;;  %v52536_v15 = vsub.f32 %v52466_v0, %v60902_v43 }
 0xeab   :  { %52228 = vmatpush1.msra.mxu1 %v60683_v11  ;;  %52291 = vmatprep.mubr.f32.mxu1 %v61489_v23 }
 0xeac   :  { %52304 = vmatprep.subr.mxu1 %v60690_v10  ;;  %v52537_v56 = vand.u32 4294901760, %v52536_v15 }
 0xeb0   :  { %51830 = vmatmul.mubr.f32.vlgmr.msra.gmra.mrb[16].mxu0 %v51592_v47 }
 0xeb1   :  { %51843 = vmatpush1.msra.mxu0 %v60706_v24  ;;  %51906 = vmatprep.mubr.f32.mxu0 %v61489_v23 }
 0xeb2   :  { %51915 = vmatprep.subr.mxu0 %v60651_v31  ;;  %52295 = vmatmul.mubr.f32.vlgmr.msra.gmra.mrb[16].mxu1 %v51592_v47  ;;  %v52538_v47 = vsub.f32 %v52536_v15, %v52537_v56 }
 0xeb3   :  { %52308 = vmatpush1.msra.mxu1 %v60714_v34  ;;  %52371 = vmatprep.mubr.f32.mxu1 %v61489_v23 }
 0xeb4   :  { %52380 = vmatprep.subr.mxu1 %v60659_v3  ;;  %v52539_v46 = vand.u32 4294901760, %v52538_v47 }
 0xeb8   :  { %51908 = vmatmul.mubr.f32.vlgmr.msra.gmra.mrb[16].mxu0 %v60859_v4 }
 0xeb9   :  { %51917 = vmatpush1.msra.mxu0 %v60676_v63  ;;  %51980 = vmatprep.mubr.f32.mxu0 %v61489_v23 }
 0xeba   :  { %52373 = vmatmul.mubr.f32.vlgmr.msra.gmra.mrb[16].mxu1 %v60859_v4  ;;  %52469 = vmatprep.subr.mxu0 %v60442_v9 }
 0xebb   :  { %52382 = vmatpush1.msra.mxu1 %v60683_v11  ;;  %52445 = vmatprep.mubr.f32.mxu1 %v61489_v23 }
 0xebc   :  { %52934 = vmatprep.subr.mxu1 %v60444_v18 }
 0xec0   :  { %51982 = vmatmul.mubr.f32.vlgmr.msra.gmra.mrb[16].mxu0 %v60859_v4 }
 0xec1   :  { %52471 = vmatpush1.msra.mxu0 %v60433_v12  ;;  %52534 = vmatprep.mubr.f32.mxu0 %v61489_v23 }
 0xec2   :  { %52447 = vmatmul.mubr.f32.vlgmr.msra.gmra.mrb[16].mxu1 %v60859_v4  ;;  %52551 = vmatprep.subr.mxu0 %v60488_v50 }
 0xec3   :  { %52936 = vmatpush1.msra.mxu1 %v60446_v40  ;;  %52999 = vmatprep.mubr.f32.mxu1 %v61489_v23 }
 0xec4   :  { %53016 = vmatprep.subr.mxu1 %v60490_v25  ;;  %52540 = vmatmul.mubr.f32.vlgmr.msra.gmra.mrb[18].mxu0 %v52539_v46 }
 0xec5   :  { %52557 = vmatpush1.msra.mxu0 %v60495_v33  ;;  %52620 = vmatprep.mubr.f32.mxu0 %v61489_v23 }
 0xec6   :  { %52630 = vmatprep.subr.mxu0 %v60454_v8  ;;  %53005 = vmatmul.mubr.f32.vlgmr.msra.gmra.mrb[18].mxu1 %v52539_v46 }
 0xec7   :  { %53022 = vmatpush1.msra.mxu1 %v60492_v7  ;;  %53085 = vmatprep.mubr.f32.mxu1 %v61489_v23 }
 0xec8   :  { %53095 = vmatprep.subr.mxu1 %v60457_v32 }
 0xecc   :  { %52622 = vmatmul.mubr.f32.vlgmr.msra.gmra.mrb[18].mxu0 %v60902_v43 }
 0xecd   :  { %52633 = vmatpush1.msra.mxu0 %v60440_v53  ;;  %52696 = vmatprep.mubr.f32.mxu0 %v61489_v23  ;;  %v55490_v53 = vld [vmem:[%s61170_s4 + $0x30] sm:$0xff] }
 0xece   :  { %52706 = vmatprep.subr.mxu0 %v60442_v9  ;;  %53087 = vmatmul.mubr.f32.vlgmr.msra.gmra.mrb[18].mxu1 %v60902_v43  ;;  %v53399_v8 = vsel %vm280_vm0, %v55490_v53, 0 }
 0xecf   :  { %53098 = vmatpush1.msra.mxu1 %v60460_v13  ;;  %53161 = vmatprep.mubr.f32.mxu1 %v61489_v23  ;;  %v60957_v32 = vand.u32 4294901760, %v53399_v8 }
 0xed0   :  { %53171 = vmatprep.subr.mxu1 %v60444_v18 }
 0xed1   :  { %v53469_v13 = vsub.f32 %v53399_v8, %v60957_v32 }
 0xed4   :  { %52699 = vmatmul.mubr.f32.vlgmr.msra.gmra.mrb[18].mxu0 %v52536_v15 }
 0xed5   :  { %52708 = vmatpush1.msra.mxu0 %v60433_v12  ;;  %52771 = vmatprep.mubr.f32.mxu0 %v61489_v23 }
 0xed6   :  { %52784 = vmatprep.subr.mxu0 %v60468_v44  ;;  %53164 = vmatmul.mubr.f32.vlgmr.msra.gmra.mrb[18].mxu1 %v52536_v15 }
 0xed7   :  { %53173 = vmatpush1.msra.mxu1 %v60446_v40  ;;  %53236 = vmatprep.mubr.f32.mxu1 %v61489_v23 }
 0xed8   :  { %53249 = vmatprep.subr.mxu1 %v60471_v36 }
 0xedc   :  { %52775 = vmatmul.mubr.f32.vlgmr.msra.gmra.mrb[18].mxu0 %v52537_v56 }
 0xedd   :  { %52788 = vmatpush1.msra.mxu0 %v60451_v42  ;;  %52851 = vmatprep.mubr.f32.mxu0 %v61489_v23 }
 0xede   :  { %52860 = vmatprep.subr.mxu0 %v60442_v9  ;;  %53240 = vmatmul.mubr.f32.vlgmr.msra.gmra.mrb[18].mxu1 %v52537_v56  ;;  %v53470_v9 = vand.u32 4294901760, %v53469_v13  ;;  %v61946_v56 = vld [vmem:[#allocation113_spill] sm:$0xff] }
 0xedf   :  { %53253 = vmatpush1.msra.mxu1 %v60474_v37  ;;  %53316 = vmatprep.mubr.f32.mxu1 %v61489_v23  ;;  %v55492_v37 = vld [vmem:[%s61170_s4 + $0x40] sm:$0xff] }
 0xee0   :  { %53325 = vmatprep.subr.mxu1 %v60444_v18  ;;  %v53471_v18 = vsub.f32 %v53469_v13, %v53470_v9  ;;  %v54334_v50 = vsel %vm280_vm0, %v55492_v37, 0 }
 0xee1   :  { %v54403_v25 = vand.u32 4294901760, %v54334_v50 }
 0xee3   :  { %v54404_v7 = vsub.f32 %v54334_v50, %v54403_v25 }
 0xee4   :  { %52853 = vmatmul.mubr.f32.vlgmr.msra.gmra.mrb[18].mxu0 %v60902_v43 }
 0xee5   :  { %52862 = vmatpush1.msra.mxu0 %v60433_v12  ;;  %52925 = vmatprep.mubr.f32.mxu0 %v61489_v23  ;;  %v53472_v12 = vand.u32 4294901760, %v53471_v18  ;;  %v54405_v33 = vand.u32 4294901760, %v54404_v7 }
 0xee6   :  { %53318 = vmatmul.mubr.f32.vlgmr.msra.gmra.mrb[18].mxu1 %v60902_v43  ;;  %53402 = vmatprep.subr.mxu0 %v60558_v39 }
 0xee7   :  { %53327 = vmatpush1.msra.mxu1 %v60446_v40  ;;  %53390 = vmatprep.mubr.f32.mxu1 %v61489_v23 }
 0xee8   :  { %53867 = vmatprep.subr.mxu1 %v60577_v49 }
 0xeec   :  { %52927 = vmatmul.mubr.f32.vlgmr.msra.gmra.mrb[18].mxu0 %v60902_v43 }
 0xeed   :  { %53404 = vmatpush1.msra.mxu0 %v60575_v51  ;;  %53467 = vmatprep.mubr.f32.mxu0 %v61489_v23 }
 0xeee   :  { %53392 = vmatmul.mubr.f32.vlgmr.msra.gmra.mrb[18].mxu1 %v60902_v43  ;;  %53484 = vmatprep.subr.mxu0 %v60603_v16  ;;  %v61945_v43 = vld [vmem:[#allocation112_spill] sm:$0xff] }
 0xeef   :  { %53869 = vmatpush1.msra.mxu1 %v60560_v61  ;;  %53932 = vmatprep.mubr.f32.mxu1 %v61489_v23 }
 0xef0   :  { %53949 = vmatprep.subr.mxu1 %v60615_v55 }
 0xef4   :  { %53473 = vmatmul.mubr.f32.vlgmr.msra.gmra.mrb[18].mxu0 %v53472_v12 }
 0xef5   :  { %53490 = vmatpush1.msra.mxu0 %v60613_v35  ;;  %53553 = vmatprep.mubr.f32.mxu0 %v61489_v23 }
 0xef6   :  { %53563 = vmatprep.subr.mxu0 %v60567_v2  ;;  %53938 = vmatmul.mubr.f32.vlgmr.msra.gmra.mrb[18].mxu1 %v53472_v12 }
 0xef7   :  { %53955 = vmatpush1.msra.mxu1 %v60618_v1  ;;  %54018 = vmatprep.mubr.f32.mxu1 %v61489_v23 }
 0xef8   :  { %54028 = vmatprep.subr.mxu1 %v60586_v5 }
 0xefc   :  { %53555 = vmatmul.mubr.f32.vlgmr.msra.gmra.mrb[18].mxu0 %v60957_v32 }
 0xefd   :  { %53566 = vmatpush1.msra.mxu0 %v60583_v58  ;;  %53629 = vmatprep.mubr.f32.mxu0 %v61489_v23 }
 0xefe   :  { %53639 = vmatprep.subr.mxu0 %v60558_v39  ;;  %54020 = vmatmul.mubr.f32.vlgmr.msra.gmra.mrb[18].mxu1 %v60957_v32 }
 0xeff   :  { %54031 = vmatpush1.msra.mxu1 %v60570_v26  ;;  %54094 = vmatprep.mubr.f32.mxu1 %v61489_v23 }
 0xf00   :  { %54104 = vmatprep.subr.mxu1 %v60577_v49 }
 0xf04   :  { %53632 = vmatmul.mubr.f32.vlgmr.msra.gmra.mrb[18].mxu0 %v53469_v13 }
 0xf05   :  { %53641 = vmatpush1.msra.mxu0 %v60575_v51  ;;  %53704 = vmatprep.mubr.f32.mxu0 %v61489_v23 }
 0xf06   :  { %53717 = vmatprep.subr.mxu0 %v60580_v48  ;;  %54097 = vmatmul.mubr.f32.vlgmr.msra.gmra.mrb[18].mxu1 %v53469_v13 }
 0xf07   :  { %54106 = vmatpush1.msra.mxu1 %v60560_v61  ;;  %v49154_v40 = vpop.f32.mrb[14].mxu0  ;;  %54169 = vmatprep.mubr.f32.mxu1 %v61489_v23 }
 0xf08   :  { %54182 = vmatprep.subr.mxu1 %v60601_v21  ;;  %49628 = vrot.lane.b32.xlu0 %v49154_v40, %s56874_s20  ;;  %v49156_v42 = vpop.f32.mrb[15].mxu0 }
 0xf09   :  { %v49619_v44 = vpop.f32.mrb[14].mxu1 }
 0xf0a   :  { %49632 = vrot.lane.b32.xlu1 %v49619_v44, %s56874_s20  ;;  %v49621_v36 = vpop.f32.mrb[15].mxu1 }
 0xf0c   :  { %53708 = vmatmul.mubr.f32.vlgmr.msra.gmra.mrb[18].mxu0 %v53470_v9  ;;  %49634 = vrot.lane.b32.xlu0 %v49621_v36, %s56874_s20 }
 0xf0d   :  { %53721 = vmatpush1.msra.mxu0 %v60597_v19  ;;  %53784 = vmatprep.mubr.f32.mxu0 %v61489_v23 }
 0xf0e   :  { %53793 = vmatprep.subr.mxu0 %v60558_v39  ;;  %54173 = vmatmul.mubr.f32.vlgmr.msra.gmra.mrb[18].mxu1 %v53470_v9  ;;  %v54406_v39 = vsub.f32 %v54404_v7, %v54405_v33 }
 0xf0f   :  { %54186 = vmatpush1.msra.mxu1 %v60590_v62  ;;  %49630 = vrot.lane.b32.xlu1 %v49156_v42, %s56874_s20 }
 0xf10   :  { %54258 = vmatprep.subr.mxu1 %v60577_v49  ;;  %54249 = vmatprep.mubr.f32.mxu1 %v61489_v23 }
 0xf14   :  { %53786 = vmatmul.mubr.f32.vlgmr.msra.gmra.mrb[18].mxu0 %v60957_v32 }
 0xf15   :  { %53795 = vmatpush1.msra.mxu0 %v60575_v51  ;;  %53858 = vmatprep.mubr.f32.mxu0 %v61489_v23 }
 0xf16   :  { %54251 = vmatmul.mubr.f32.vlgmr.msra.gmra.mrb[18].mxu1 %v60957_v32  ;;  %54337 = vmatprep.subr.mxu0 %v60651_v31 }
 0xf17   :  { %54260 = vmatpush1.msra.mxu1 %v60560_v61  ;;  %54323 = vmatprep.mubr.f32.mxu1 %v61489_v23  ;;  %v54407_v61 = vand.u32 4294901760, %v54406_v39 }
 0xf18   :  { %54802 = vmatprep.subr.mxu1 %v60659_v3 }
 0xf1c   :  { %53860 = vmatmul.mubr.f32.vlgmr.msra.gmra.mrb[18].mxu0 %v60957_v32 }
 0xf1d   :  { %54339 = vmatpush1.msra.mxu0 %v60676_v63  ;;  %54402 = vmatprep.mubr.f32.mxu0 %v61489_v23 }
 0xf1e   :  { %54325 = vmatmul.mubr.f32.vlgmr.msra.gmra.mrb[18].mxu1 %v60957_v32  ;;  %54419 = vmatprep.subr.mxu0 %v60709_v59 }
 0xf1f   :  { %54804 = vmatpush1.msra.mxu1 %v60683_v11  ;;  %54867 = vmatprep.mubr.f32.mxu1 %v61489_v23 }
 0xf20   :  { %54884 = vmatprep.subr.mxu1 %v60718_v28 }
 0xf24   :  { %54408 = vmatmul.mubr.f32.vlgmr.msra.gmra.mrb[18].mxu0 %v54407_v61 }
 0xf25   :  { %54425 = vmatpush1.msra.mxu0 %v60727_v54  ;;  %54488 = vmatprep.mubr.f32.mxu0 %v61489_v23 }
 0xf26   :  { %54498 = vmatprep.subr.mxu0 %v60667_v41  ;;  %54873 = vmatmul.mubr.f32.vlgmr.msra.gmra.mrb[18].mxu1 %v54407_v61 }
 0xf27   :  { %54890 = vmatpush1.msra.mxu1 %v60730_v22  ;;  %54953 = vmatprep.mubr.f32.mxu1 %v61489_v23 }
 0xf28   :  { %54963 = vmatprep.subr.mxu1 %v60674_v52 }
 0xf2c   :  { %54490 = vmatmul.mubr.f32.vlgmr.msra.gmra.mrb[18].mxu0 %v54403_v25 }
 0xf2d   :  { %54501 = vmatpush1.msra.mxu0 %v60693_v38  ;;  %54564 = vmatprep.mubr.f32.mxu0 %v61489_v23 }
 0xf2e   :  { %54574 = vmatprep.subr.mxu0 %v60651_v31  ;;  %54955 = vmatmul.mubr.f32.vlgmr.msra.gmra.mrb[18].mxu1 %v54403_v25 }
 0xf2f   :  { %54966 = vmatpush1.msra.mxu1 %v60701_v29  ;;  %55029 = vmatprep.mubr.f32.mxu1 %v61489_v23 }
 0xf30   :  { %55039 = vmatprep.subr.mxu1 %v60659_v3 }
 0xf34   :  { %54567 = vmatmul.mubr.f32.vlgmr.msra.gmra.mrb[18].mxu0 %v54404_v7 }
 0xf35   :  { %54576 = vmatpush1.msra.mxu0 %v60676_v63  ;;  %54639 = vmatprep.mubr.f32.mxu0 %v61489_v23 }
 0xf36   :  { %54652 = vmatprep.subr.mxu0 %v60680_v14  ;;  %55032 = vmatmul.mubr.f32.vlgmr.msra.gmra.mrb[18].mxu1 %v54404_v7 }
 0xf37   :  { %55041 = vmatpush1.msra.mxu1 %v60683_v11  ;;  %55104 = vmatprep.mubr.f32.mxu1 %v61489_v23 }
 0xf38   :  { %55117 = vmatprep.subr.mxu1 %v60690_v10 }
 0xf3c   :  { %54643 = vmatmul.mubr.f32.vlgmr.msra.gmra.mrb[18].mxu0 %v54405_v33 }
 0xf3d   :  { %54656 = vmatpush1.msra.mxu0 %v60706_v24  ;;  %54719 = vmatprep.mubr.f32.mxu0 %v61489_v23 }
 0xf3e   :  { %54728 = vmatprep.subr.mxu0 %v60651_v31  ;;  %55108 = vmatmul.mubr.f32.vlgmr.msra.gmra.mrb[18].mxu1 %v54405_v33 }
 0xf3f   :  { %55121 = vmatpush1.msra.mxu1 %v60714_v34  ;;  %55184 = vmatprep.mubr.f32.mxu1 %v61489_v23 }
 0xf40   :  { %55193 = vmatprep.subr.mxu1 %v60659_v3 }
 0xf44   :  { %54721 = vmatmul.mubr.f32.vlgmr.msra.gmra.mrb[18].mxu0 %v54403_v25 }
 0xf45   :  { %54730 = vmatpush1.msra.mxu0 %v60676_v63  ;;  %54793 = vmatprep.mubr.f32.mxu0 %v61489_v23 }
 0xf46   :  { %55186 = vmatmul.mubr.f32.vlgmr.msra.gmra.mrb[18].mxu1 %v54403_v25 }
 0xf47   :  { %55195 = vmatpush1.msra.mxu1 %v60683_v11  ;;  %55258 = vmatprep.mubr.f32.mxu1 %v61489_v23 }
 0xf4c   :  { %54795 = vmatmul.mubr.f32.vlgmr.msra.gmra.mrb[18].mxu0 %v54403_v25 }
 0xf4e   :  { %55260 = vmatmul.mubr.f32.vlgmr.msra.gmra.mrb[18].mxu1 %v54403_v25  ;;  %v55325_v25 = vld [vmem:[%s61171_s6] sm:$0xff] }
 0xf7a   :  { %v49629_v58 = vpop.permute.xlu0 %49628 }
 0xf7c   :  { %v49633_v23 = vpop.permute.xlu1 %49632 }
 0xf7e   :  { %v49635_v5 = vpop.permute.xlu0 %49634 }
 0xf7f   :  { %v49639_v19 = vsel %vm20067_vm9, %v49635_v5, %v49629_v58  ;;  %v49636_v55 = vsel %vm20067_vm9, %v49633_v23, %v49635_v5 }
 0xf80   :  { %v49640_v29 = vmul.f32 %v49639_v19, %v60027_v27  ;;  %v49643_v10 = vmul.f32 %v49636_v55, %v60040_v30 }
 0xf81   :  { %v49631_v62 = vpop.permute.xlu1 %49630 }
 0xf82   :  { %v49638_v21 = vsel %vm20067_vm9, %v49629_v58, %v49631_v62  ;;  %v49637_v1 = vsel %vm20067_vm9, %v49631_v62, %v49633_v23 }
 0xf83   :  { %v49641_v3 = vmul.f32 %v49638_v21, %v60045_v17  ;;  %v49642_v11 = vmul.f32 %v49637_v1, %v60036_v60 }
 0xf93   :  { %v51983_v54 = vpop.f32.mrb[16].mxu0 }
 0xf94   :  { %v51985_v2 = vpop.f32.mrb[17].mxu0  ;;  %v52457_v41 = vadd.f32 %v51983_v54, %v49640_v29 }
 0xf95   :  { %v52448_v26 = vpop.f32.mrb[16].mxu1  ;;  %v52458_v14 = vadd.f32 %v51985_v2, %v49641_v3 }
 0xf96   :  { %v52450_v34 = vpop.f32.mrb[17].mxu1  ;;  %v52459_v0 = vadd.f32 %v52448_v26, %v49642_v11 }
 0xf97   :  { %v52460_v46 = vadd.f32 %v52450_v34, %v49643_v10  ;;  %v55308_v34 = vld [vmem:[%s61172_s5] sm:$0xff] }
0x101f   :  { %v54796_v51 = vpop.f32.mrb[18].mxu0 }
0x1020   :  { %v54798_v49 = vpop.f32.mrb[19].mxu0  ;;  %55270 = vrot.lane.b32.xlu0 %v54796_v51, %s56875_s23 }
0x1021   :  { %v55261_v48 = vpop.f32.mrb[18].mxu1  ;;  %55272 = vrot.lane.b32.xlu1 %v54798_v49, %s56875_s23 }
0x1022   :  { %v55263_v63 = vpop.f32.mrb[19].mxu1 }
0x1024   :  { %55274 = vrot.lane.b32.xlu0 %v55261_v48, %s56875_s23 }
0x1025   :  { %55276 = vrot.lane.b32.xlu1 %v55263_v63, %s56875_s23 }
0x1092   :  { %v55271_v16 = vpop.permute.xlu0 %55270 }
0x1093   :  { %v55273_v35 = vpop.permute.xlu1 %55272 }
0x1094   :  { %v55280_v31 = vsel %vm33245_vm10, %v55271_v16, %v55273_v35 }
0x1095   :  { %v55282_v24 = vmul.f32 %v55280_v31, %v60067_v57 }
0x1096   :  { %v55275_v52 = vpop.permute.xlu0 %55274 }
0x1097   :  { %v55279_v38 = vsel %vm33245_vm10, %v55273_v35, %v55275_v52  ;;  %v55277_v59 = vpop.permute.xlu1 %55276  ;;  %v55286_v28 = vadd.f32 %v55282_v24, %v52457_v41 }
0x1098   :  { %v55283_v22 = vmul.f32 %v55279_v38, %v60076_v20  ;;  %v55278_v4 = vsel %vm33245_vm10, %v55275_v52, %v55277_v59  ;;  %v55281_v6 = vsel %vm33245_vm10, %v55277_v59, %v55271_v16 }
0x1099   :  { %v55284_v15 = vmul.f32 %v55278_v4, %v61945_v43  ;;  %v55285_v47 = vmul.f32 %v55281_v6, %v61946_v56  ;;  %v55296_v32 = vmul.f32 %v55286_v28, %v55286_v28 }
0x109a   :  { %v55287_v53 = vadd.f32 %v55283_v22, %v52458_v14  ;;  %v61947_v22 = vld [vmem:[#allocation48_spill] sm:$0xff] }
0x109b   :  { %v55288_v8 = vadd.f32 %v55284_v15, %v52459_v0  ;;  %v55289_v9 = vadd.f32 %v55285_v47, %v52460_v46  ;;  %v61948_v47 = vld [vmem:[#allocation46_spill] sm:$0xff] }
0x109c   :  { %v55297_v13 = vmul.f32 %v55287_v53, %v55287_v53  ;;  %v55290_v18 = vadd.f32 %v55287_v53, %v55286_v28 }
0x109d   :  { %v55298_v12 = vmul.f32 %v55288_v8, %v55288_v8  ;;  %v55299_v36 = vmul.f32 %v55289_v9, %v55289_v9 }
0x109e   :  { %v55291_v40 = vadd.f32 %v55290_v18, %v55288_v8  ;;  %v55300_v42 = vadd.f32 %v55297_v13, %v55296_v32  ;;  %v61949_v32 = vld [vmem:[#allocation49_spill] sm:$0xff] }
0x10a0   :  { %v55292_v44 = vadd.f32 %v55291_v40, %v55289_v9  ;;  %v55301_v37 = vadd.f32 %v55300_v42, %v55298_v12 }
0x10a2   :  { %55293 = vadd.xlane.f32.xlu0 %v55292_v44  ;;  %v55302_v50 = vadd.f32 %v55301_v37, %v55299_v36 }
0x10a4   :  { %55303 = vadd.xlane.f32.xlu1 %v55302_v50 }
0x10b5   :  { %55328 = vperm.xlu1 %56860, %v55325_v25  }
0x112f   :  { %v55294_v7 = vpop.xlane.xlu0 %55293 }
0x1130   :  { %v55295_v33 = vmul.f32 0.001953125, %v55294_v7  ;;  %v61951_v7 = vld [vmem:[#allocation47_spill] sm:$0xff] }
0x1131   :  { %v55304_v39 = vpop.xlane.xlu1 %55303 }
0x1132   :  { %v55305_v61 = vmul.f32 0.001953125, %v55304_v39  ;;  %v55306_v54 = vmul.f32 %v55295_v33, %v55295_v33  ;;  %v55312_v48 = vsub.f32 %v55286_v28, %v55295_v33  ;;  %v55313_v63 = vsub.f32 %v55287_v53, %v55295_v33 }
0x1133   :  { %v55314_v58 = vsub.f32 %v55288_v8, %v55295_v33  ;;  %v55315_v23 = vsub.f32 %v55289_v9, %v55295_v33  ;;  %v61950_v9 = vld [vmem:[#allocation82_spill] sm:$0xff] }
0x1134   :  { %v55307_v2 = vsub.f32 %v55305_v61, %v55306_v54  ;;  %v61952_v61 = vld [vmem:[#allocation80_spill] sm:$0xff] }
0x1135   :  { %v55329_v35 = vpop.permute.xlu1 %55328 }
0x1136   :  { %v55309_v26 = vadd.f32 1e-05, %v55307_v2  ;;  %v61953_v2 = vld [vmem:[#allocation83_spill] sm:$0xff] }
0x1138   :  { %56863 = vrsqrt.f32 %v55309_v26 }
0x1142   :  { %v56864_v51 = vpop.eup %56863 }
0x1143   :  { %v55311_v49 = vmul.f32 %v56864_v51, %v55308_v34  ;;  %v61954_v34 = vld [vmem:[#allocation81_spill] sm:$0xff] }
0x1145   :  { %55318 = vperm.xlu0 %56859, %v55311_v49  }
0x11c4   :  { %v55319_v5 = vpop.permute.xlu0 %55318 }
0x11c5   :  { %v55321_v62 = vmul.f32 %v55319_v5, %v55312_v48  ;;  %v55322_v19 = vmul.f32 %v55319_v5, %v55313_v63  ;;  %v55323_v21 = vmul.f32 %v55319_v5, %v55314_v58  ;;  %v55324_v16 = vmul.f32 %v55319_v5, %v55315_v23 }
0x11c7   :  { %v55331_v55 = vadd.f32 %v55329_v35, %v55321_v62  ;;  %v55332_v1 = vadd.f32 %v55329_v35, %v55322_v19  ;;  %v55333_v29 = vadd.f32 %v55329_v35, %v55323_v21  ;;  %v55334_v31 = vadd.f32 %v55329_v35, %v55324_v16 }
0x11c9   :  { %v55336_v3 = vmax.f32 %v55332_v1, 0.0  ;;  %v55335_v24 = vmax.f32 %v55331_v55, 0.0  ;;  %v55338_v41 = vmax.f32 %v55334_v31, 0.0  ;;  %v55337_v52 = vmax.f32 %v55333_v29, 0.0 }
0x11cb   :  { %55341 = vrot.lane.b32.xlu1 %v55336_v3, %s56868_s0  ;;  %55339 = vrot.lane.b32.xlu0 %v55335_v24, %s56868_s0 }
0x11cf   :  { %55345 = vrot.lane.b32.xlu1 %v55338_v41, %s56868_s0  ;;  %55343 = vrot.lane.b32.xlu0 %v55337_v52, %s56868_s0 }
0x11d3   :  { %55361 = vrot.lane.b32.xlu1 %v55336_v3, %s56869_s19  ;;  %55359 = vrot.lane.b32.xlu0 %v55335_v24, %s56869_s19 }
0x11d7   :  { %55365 = vrot.lane.b32.xlu1 %v55338_v41, %s56869_s19  ;;  %55363 = vrot.lane.b32.xlu0 %v55337_v52, %s56869_s19 }
0x123d   :  { %v55342_v14 = vpop.permute.xlu1 %55341  ;;  %v55340_v11 = vpop.permute.xlu0 %55339 }
0x123e   :  { %v55349_v28 = vsel %vm127_vm3, %v55340_v11, %v55342_v14 }
0x123f   :  { %v55352_v46 = vmul.f32 %v55349_v28, %v61948_v47 }
0x1241   :  { %v55346_v10 = vpop.permute.xlu1 %55345  ;;  %v55344_v38 = vpop.permute.xlu0 %55343  ;;  %v55356_v36 = vmax.f32 %v55336_v3, %v55352_v46 }
0x1242   :  { %v55350_v59 = vsel %vm127_vm3, %v55346_v10, %v55340_v11  ;;  %v55348_v6 = vsel %vm127_vm3, %v55342_v14, %v55344_v38  ;;  %v55347_v12 = vsel %vm127_vm3, %v55344_v38, %v55346_v10 }
0x1243   :  { %v55351_v4 = vmul.f32 %v55350_v59, %v61947_v22  ;;  %v55353_v13 = vmul.f32 %v55348_v6, %v61949_v32  ;;  %v55354_v33 = vmul.f32 %v55347_v12, %v61951_v7 }
0x1245   :  { %v55362_v0 = vpop.permute.xlu1 %55361  ;;  %v55360_v15 = vpop.permute.xlu0 %55359  ;;  %v55355_v8 = vmax.f32 %v55335_v24, %v55351_v4  ;;  %v55357_v39 = vmax.f32 %v55337_v52, %v55353_v13  ;;  %v55358_v63 = vmax.f32 %v55338_v41, %v55354_v33 }
0x1246   :  { %v55369_v53 = vsel %vm167_vm4, %v55360_v15, %v55362_v0 }
0x1247   :  { %v55371_v18 = vmul.f32 %v55369_v53, %v61950_v9 }
0x1249   :  { %v55375_v40 = vmax.f32 %v55355_v8, %v55371_v18  ;;  %v55366_v42 = vpop.permute.xlu1 %55365  ;;  %v55364_v44 = vpop.permute.xlu0 %55363 }
0x124a   :  { %v55370_v37 = vsel %vm167_vm4, %v55366_v42, %v55360_v15  ;;  %v55367_v50 = vsel %vm167_vm4, %v55364_v44, %v55366_v42  ;;  %v55368_v25 = vsel %vm167_vm4, %v55362_v0, %v55364_v44 }
0x124b   :  { %v55372_v54 = vmul.f32 %v55368_v25, %v61952_v61  ;;  %v55373_v26 = vmul.f32 %v55367_v50, %v61953_v2  ;;  %55379 = vrot.lane.b32.xlu0 %v55375_v40, %s56874_s20  ;;  %v55374_v51 = vmul.f32 %v55370_v37, %v61954_v34 }
0x124d   :  { %v55376_v49 = vmax.f32 %v55356_v36, %v55372_v54  ;;  %v55377_v48 = vmax.f32 %v55357_v39, %v55373_v26  ;;  %v55378_v58 = vmax.f32 %v55358_v63, %v55374_v51 }
0x124f   :  { %55381 = vrot.lane.b32.xlu1 %v55376_v49, %s56874_s20  ;;  %55383 = vrot.lane.b32.xlu0 %v55377_v48, %s56874_s20 }
0x1253   :  { %55385 = vrot.lane.b32.xlu1 %v55378_v58, %s56874_s20  ;;  %55399 = vrot.lane.b32.xlu0 %v55375_v40, %s56875_s23 }
0x1257   :  { %55401 = vrot.lane.b32.xlu1 %v55376_v49, %s56875_s23  ;;  %55403 = vrot.lane.b32.xlu0 %v55377_v48, %s56875_s23 }
0x125b   :  { %55405 = vrot.lane.b32.xlu1 %v55378_v58, %s56875_s23 }
0x12bd   :  { %v55380_v23 = vpop.permute.xlu0 %55379 }
0x12c1   :  { %v55382_v5 = vpop.permute.xlu1 %55381  ;;  %v55384_v62 = vpop.permute.xlu0 %55383 }
0x12c2   :  { %v55389_v19 = vsel %vm20067_vm9, %v55380_v23, %v55382_v5  ;;  %v55388_v1 = vsel %vm20067_vm9, %v55382_v5, %v55384_v62 }
0x12c3   :  { %v55392_v35 = vmul.f32 %v55389_v19, %v60045_v17  ;;  %v55393_v52 = vmul.f32 %v55388_v1, %v60036_v60 }
0x12c5   :  { %v55386_v21 = vpop.permute.xlu1 %55385  ;;  %v55400_v16 = vpop.permute.xlu0 %55399  ;;  %v55396_v41 = vmax.f32 %v55376_v49, %v55392_v35  ;;  %v55397_v6 = vmax.f32 %v55377_v48, %v55393_v52 }
0x12c6   :  { %v55390_v55 = vsel %vm20067_vm9, %v55386_v21, %v55380_v23  ;;  %v55387_v31 = vsel %vm20067_vm9, %v55384_v62, %v55386_v21 }
0x12c7   :  { %v55391_v29 = vmul.f32 %v55390_v55, %v60027_v27  ;;  %v55394_v11 = vmul.f32 %v55387_v31, %v60040_v30 }
0x12c9   :  { %v55402_v3 = vpop.permute.xlu1 %55401  ;;  %v55404_v24 = vpop.permute.xlu0 %55403  ;;  %v55395_v10 = vmax.f32 %v55375_v40, %v55391_v29  ;;  %v55398_v0 = vmax.f32 %v55378_v58, %v55394_v11 }
0x12ca   :  { %v55409_v14 = vsel %vm33245_vm10, %v55400_v16, %v55402_v3  ;;  %v55408_v17 = vsel %vm33245_vm10, %v55402_v3, %v55404_v24 }
0x12cb   :  { %v55411_v38 = vmul.f32 %v55409_v14, %v60067_v57  ;;  %v55412_v27 = vmul.f32 %v55408_v17, %v60076_v20 }
0x12cd   :  { %v55415_v59 = vmax.f32 %v55395_v10, %v55411_v38  ;;  %v55416_v28 = vmax.f32 %v55396_v41, %v55412_v27  ;;  %v55406_v22 = vpop.permute.xlu1 %55405 }
0x12ce   :  { %v55407_v4 = vsel %vm33245_vm10, %v55404_v24, %v55406_v22  ;;  %v55410_v60 = vsel %vm33245_vm10, %v55406_v22, %v55400_v16 }
0x12cf   :  { %55419 = vst [vmem:[%s61173_s9] sm:$0xff] %v55415_v59  ;;  %55420 = vst [vmem:[%s61173_s9 + $0x8] sm:$0xff] %v55416_v28  ;;  %v55413_v30 = vmul.f32 %v55407_v4, %v61945_v43  ;;  %v55414_v57 = vmul.f32 %v55410_v60, %v61946_v56 }
0x12d1   :  { %v55417_v20 = vmax.f32 %v55397_v6, %v55413_v30  ;;  %v55418_v15 = vmax.f32 %v55398_v0, %v55414_v57 }
0x12d3   :  { %55421 = vst [vmem:[%s61173_s9 + $0x10] sm:$0xff] %v55417_v20  ;;  %55422 = vst [vmem:[%s61173_s9 + $0x18] sm:$0xff] %v55418_v15 }

</bundles_post_ra>
